<compile_context>
chip_gen: v5e
topology: v5e:2x2
jax: 0.10.0
libtpu: 0.0.40
codegen_flags: <defaults>
</compile_context>

<pallas_src>
import math
import numpy as np
import jax
import jax.numpy as jnp
from jax.experimental import pallas as pl
from jax.experimental.pallas import tpu as pltpu

# ----------------------------- config (small) ---------------------------------
B = 2                    # batch
S = 128                  # seq_len (per-grid-step token block -> decent MXU M)
D = 128                  # model dim
NH = 4                   # n_heads
NKV = 2                  # n_kv_heads
HD = D // NH             # head_dim = 32
NREP = NH // NKV         # GQA repeat factor
DQ = NH * HD             # 128
DK = NKV * HD            # 64
QKV_W = DQ + 2 * DK      # fused [Q | K | V] width = 256
MULTIPLE_OF = 64
_h = int(2 * (4 * D) / 3)
HIDDEN = MULTIPLE_OF * ((_h + MULTIPLE_OF - 1) // MULTIPLE_OF)   # 384
FF_W = 2 * HIDDEN        # fused [w1 | w3] width = 768
EPS = 1e-5
ROPE_THETA = 1e6
NEG_INF = -1e30
SCALE = 1.0 / math.sqrt(HD)


# ------------------------------- kernel ---------------------------------------
def minimind_block_kernel(x_ref, cos_ref, sin_ref, anorm_ref, fnorm_ref,
                          wqkv_ref, wo_ref, w13_ref, w2_ref, out_ref):
    f32, bf16 = jnp.float32, jnp.bfloat16
    x = x_ref[...]                                        # (S, D) f32, one sequence

    def rmsnorm(v, w):
        ms = jnp.mean(v * v, axis=-1, keepdims=True)
        return (v * jax.lax.rsqrt(ms + EPS)) * w

    # ---------------- attention branch ----------------
    xn = rmsnorm(x, anorm_ref[...])                       # (S, D) f32
    qkv = jnp.dot(xn.astype(bf16), wqkv_ref[...],
                  preferred_element_type=f32)             # (S, 256) f32

    # Fused interleaved RoPE over the [Q | K | V] slab:
    #   out[2i]   = x[2i]*cos - x[2i+1]*sin
    #   out[2i+1] = x[2i+1]*cos + x[2i]*sin
    # sin table carries the +/- sign per column parity; V columns have
    # cos=1 / sin=0 so they pass through untouched.
    lane = jax.lax.broadcasted_iota(jnp.int32, (S, QKV_W), 1)
    even = (lane % 2) == 0
    nbr_hi = jnp.roll(qkv, -1, axis=1)                    # col j <- qkv[:, j+1]
    nbr_lo = jnp.roll(qkv, 1, axis=1)                     # col j <- qkv[:, j-1]
    swapped = jnp.where(even, nbr_hi, nbr_lo)
    qkv = qkv * cos_ref[...] + swapped * sin_ref[...]

    # per-sequence causal bias (one triangle per grid step, hoisted out of the
    # per-head loop)
    qi = jax.lax.broadcasted_iota(jnp.int32, (S, S), 0)
    ki = jax.lax.broadcasted_iota(jnp.int32, (S, S), 1)
    bias = jnp.where(ki <= qi, jnp.float32(0.0), jnp.float32(NEG_INF))

    # attention score scale folded into q once (cheaper than per-head on (S,S))
    qs = (qkv[:, :DQ] * SCALE).astype(bf16)               # (S, 128)  [Q heads]
    kv = qkv[:, DQ:].astype(bf16)                         # (S, 128)  [K heads | V heads]

    # Per-head attention on static lane slices: no transpose / repeat / concat.
    # ctx_h is pushed through the matching Wo^T row block and accumulated, so
    # the (S, DQ) head concat never materializes.
    trans_b = (((1,), (1,)), ((), ()))                    # contract last dims (q k^T)
    h_attn = jnp.zeros((S, D), dtype=f32)
    for h in range(NH):                                   # NH=4, fully unrolled
        g = h // NREP                                     # GQA: q head h -> kv group g
        qh = qs[:, h * HD:(h + 1) * HD]                   # (S, 32)
        kh = kv[:, g * HD:(g + 1) * HD]                   # (S, 32)
        vh = kv[:, DK + g * HD:DK + (g + 1) * HD]         # (S, 32)

        s = jax.lax.dot_general(qh, kh, trans_b,
                                preferred_element_type=f32) + bias   # (S, S)
        m = jnp.max(s, axis=-1, keepdims=True)
        p = jnp.exp(s - m)
        p = p / jnp.sum(p, axis=-1, keepdims=True)        # exact divide

        ctx = jnp.dot(p.astype(bf16), vh,
                      preferred_element_type=f32)         # (S, 32)
        h_attn = h_attn + jnp.dot(ctx.astype(bf16),
                                  wo_ref[h * HD:(h + 1) * HD, :],
                                  preferred_element_type=f32)        # (S, D)

    h = x + h_attn                                        # residual 1

    # ---------------- SwiGLU feed-forward ----------------
    hn = rmsnorm(h, fnorm_ref[...])
    gu = jnp.dot(hn.astype(bf16), w13_ref[...],
                 preferred_element_type=f32)              # (S, 768) f32
    g_ = gu[:, :HIDDEN]                                   # lane-aligned split (384)
    u = gu[:, HIDDEN:]
    act = (g_ * jax.nn.sigmoid(g_)) * u                   # SiLU(g) * u
    ffn = jnp.dot(act.astype(bf16), w2_ref[...],
                  preferred_element_type=f32)

    out_ref[...] = h + ffn                                # residual 2


# ------------------------------- wrapper ---------------------------------------
@jax.jit
def minimind_block(x, cos_t, sin_t, anorm, fnorm, w_qkv, wo_t, w13, w2_t):
    const2 = lambda b: (0, 0)
    grid_spec = pltpu.PrefetchScalarGridSpec(
        num_scalar_prefetch=0,
        grid=(B,),                                        # one sequence per step
        in_specs=[
            pl.BlockSpec((None, S, D), lambda b: (b, 0, 0)),   # x, batch squeezed
            pl.BlockSpec((S, QKV_W), const2),             # cos table (f32)
            pl.BlockSpec((S, QKV_W), const2),             # sign-folded sin table (f32)
            pl.BlockSpec((1, D), const2),                 # attention_norm weight
            pl.BlockSpec((1, D), const2),                 # ffn_norm weight
            pl.BlockSpec((D, QKV_W), const2),             # fused [Wq|Wk|Wv]^T (bf16)
            pl.BlockSpec((DQ, D), const2),                # Wo^T                (bf16)
            pl.BlockSpec((D, FF_W), const2),              # fused [W1|W3]^T     (bf16)
            pl.BlockSpec((HIDDEN, D), const2),            # W2^T                (bf16)
        ],
        out_specs=pl.BlockSpec((None, S, D), lambda b: (b, 0, 0)),
    )
    return pl.pallas_call(
        minimind_block_kernel,
        out_shape=jax.ShapeDtypeStruct((B, S, D), jnp.float32),
        grid_spec=grid_spec,
        compiler_params=pltpu.CompilerParams(
            dimension_semantics=("parallel",)),           # both TCs on v7x
    )(x, cos_t, sin_t, anorm, fnorm, w_qkv, wo_t, w13, w2_t)


# --------------------------- host-side glue ------------------------------------
def build_rope_tables():
    """f32 (S, QKV_W) cos + sign-folded sin tables for the fused [Q|K|V] slab."""
    freqs = 1.0 / (ROPE_THETA ** (np.arange(0, HD, 2, dtype=np.float64) / HD))  # (HD//2,)
    pos = np.arange(S, dtype=np.float64)
    ang = np.outer(pos, freqs)                            # (S, HD//2)
    cos = np.cos(ang)
    sin = np.sin(ang)

    cos_t = np.ones((S, QKV_W), dtype=np.float32)         # V region stays cos=1
    sin_t = np.zeros((S, QKV_W), dtype=np.float32)        # V region stays sin=0
    for c in range(DQ + DK):                              # Q columns then K columns
        f = (c % HD) // 2                                 # frequency index inside head
        cos_t[:, c] = cos[:, f]
        sin_t[:, c] = (-sin[:, f]) if (c % 2 == 0) else sin[:, f]
    return cos_t, sin_t, cos.astype(np.float32), sin.astype(np.float32)


def reference_forward(x, anorm, fnorm, wq, wk, wv, wo, w1, w2, w3, cos_p, sin_p):
    """Pure-JAX f32 reference mirroring the PyTorch module (eval mode)."""
    def rmsnorm(v, w):
        return w * (v * jax.lax.rsqrt(jnp.mean(v * v, axis=-1, keepdims=True) + EPS))

    xn = rmsnorm(x, anorm)
    xq = (xn @ wq.T).reshape(B, S, NH, HD)
    xk = (xn @ wk.T).reshape(B, S, NKV, HD)
    xv = (xn @ wv.T).reshape(B, S, NKV, HD)

    def rope(v, cos, sin):
        vr = v.reshape(*v.shape[:-1], HD // 2, 2)
        re, im = vr[..., 0], vr[..., 1]
        c = cos[None, :, None, :]
        s = sin[None, :, None, :]
        out_re = re * c - im * s
        out_im = re * s + im * c
        return jnp.stack([out_re, out_im], axis=-1).reshape(*v.shape)

    xq = rope(xq, cos_p, sin_p)
    xk = rope(xk, cos_p, sin_p)
    xk = jnp.repeat(xk, NREP, axis=2)
    xv = jnp.repeat(xv, NREP, axis=2)
    q = xq.transpose(0, 2, 1, 3)
    k = xk.transpose(0, 2, 1, 3)
    v = xv.transpose(0, 2, 1, 3)
    scores = jnp.einsum("bhqd,bhkd->bhqk", q, k) / math.sqrt(HD)
    mask = jnp.triu(jnp.full((S, S), -jnp.inf), k=1)
    scores = scores + mask[None, None]
    p = jax.nn.softmax(scores, axis=-1)
    out = jnp.einsum("bhqk,bhkd->bhqd", p, v)
    out = out.transpose(0, 2, 1, 3).reshape(B, S, DQ)
    h = x + out @ wo.T
    hn = rmsnorm(h, fnorm)
    ffn = (jax.nn.silu(hn @ w1.T) * (hn @ w3.T)) @ w2.T
    return h + ffn


if __name__ == "__main__":
    # eval-mode scope assumptions (see correctness notes in the perf review)
    assert S % 8 == 0 and D % 128 == 0 and DQ % 128 == 0 and FF_W % 128 == 0
    assert NH % NKV == 0

    key = jax.random.PRNGKey(0)
    ks = jax.random.split(key, 8)
    x = jax.random.normal(ks[0], (B, S, D), dtype=jnp.float32)

    # torch-layout weights: (out_features, in_features)
    wq = jax.random.normal(ks[1], (DQ, D), dtype=jnp.float32) * 0.05
    wk = jax.random.normal(ks[2], (DK, D), dtype=jnp.float32) * 0.05
    wv = jax.random.normal(ks[3], (DK, D), dtype=jnp.float32) * 0.05
    wo = jax.random.normal(ks[4], (D, DQ), dtype=jnp.float32) * 0.05
    w1 = jax.random.normal(ks[5], (HIDDEN, D), dtype=jnp.float32) * 0.05
    w2 = jax.random.normal(ks[6], (D, HIDDEN), dtype=jnp.float32) * 0.05
    w3 = jax.random.normal(ks[7], (HIDDEN, D), dtype=jnp.float32) * 0.05
    anorm = jnp.ones((D,), dtype=jnp.float32)
    fnorm = jnp.ones((D,), dtype=jnp.float32)

    # bf16, pre-transposed & fused weights (fed straight into the MXU)
    bf16 = jnp.bfloat16
    w_qkv = jnp.concatenate([wq.T, wk.T, wv.T], axis=1).astype(bf16)   # (128, 256)
    wo_t = wo.T.astype(bf16)                                           # (128, 128)
    w13 = jnp.concatenate([w1.T, w3.T], axis=1).astype(bf16)           # (128, 768)
    w2_t = w2.T.astype(bf16)                                           # (384, 128)

    cos_t_np, sin_t_np, cos_ref_np, sin_ref_np = build_rope_tables()
    cos_t = jnp.asarray(cos_t_np, dtype=jnp.float32)
    sin_t = jnp.asarray(sin_t_np, dtype=jnp.float32)

    out = minimind_block(x, cos_t, sin_t,
                         anorm.reshape(1, D), fnorm.reshape(1, D),
                         w_qkv, wo_t, w13, w2_t)
    out = jax.block_until_ready(out)

    # Reference uses the SAME bf16-quantized weights (de-quantized to f32,
    # full-f32 compute), isolating kernel-implementation error.  Remaining
    # differences come from bf16 MXU activations -> tolerance 5e-2.
    q32 = lambda w: w.astype(bf16).astype(jnp.float32)
    ref = reference_forward(x, anorm, fnorm,
                            q32(wq), q32(wk), q32(wv), q32(wo),
                            q32(w1), q32(w2), q32(w3),
                            jnp.asarray(cos_ref_np), jnp.asarray(sin_ref_np))
    max_diff = float(jnp.max(jnp.abs(out - ref)))
    assert np.isfinite(max_diff) and max_diff < 5e-2, f"mismatch: {max_diff}"
    print("KERNEL_OK")
</pallas_src>

<mosaic_0001>
module attributes {stable_mosaic.version = 11 : i64} {
  func.func @minimind_block_kernel(%arg0: i32, %arg1: memref<1x128x128xf32, #tpu.memory_space<vmem>>, %arg2: memref<128x256xf32, #tpu.memory_space<vmem>>, %arg3: memref<128x256xf32, #tpu.memory_space<vmem>>, %arg4: memref<1x128xf32, #tpu.memory_space<vmem>>, %arg5: memref<1x128xf32, #tpu.memory_space<vmem>>, %arg6: memref<128x256xbf16, #tpu.memory_space<vmem>>, %arg7: memref<128x128xbf16, #tpu.memory_space<vmem>>, %arg8: memref<128x768xbf16, #tpu.memory_space<vmem>>, %arg9: memref<384x128xbf16, #tpu.memory_space<vmem>>, %arg10: memref<1x128x128xf32, #tpu.memory_space<vmem>>) attributes {dimension_semantics = [#tpu.dimension_semantics<parallel>], iteration_bounds = array<i64: 2>, scalar_prefetch = 0 : i64, scratch_operands = 0 : i64, tpu.core_type = #tpu.core_type<tc>, window_params = [{transform_indices = @transform_0, window_bounds = array<i64: 1, 128, 128>}, {pipeline_mode = #tpu.pipeline_mode<synchronous>, transform_indices = @transform_1, window_bounds = array<i64: 128, 256>}, {pipeline_mode = #tpu.pipeline_mode<synchronous>, transform_indices = @transform_2, window_bounds = array<i64: 128, 256>}, {pipeline_mode = #tpu.pipeline_mode<synchronous>, transform_indices = @transform_3, window_bounds = array<i64: 1, 128>}, {pipeline_mode = #tpu.pipeline_mode<synchronous>, transform_indices = @transform_4, window_bounds = array<i64: 1, 128>}, {pipeline_mode = #tpu.pipeline_mode<synchronous>, transform_indices = @transform_5, window_bounds = array<i64: 128, 256>}, {pipeline_mode = #tpu.pipeline_mode<synchronous>, transform_indices = @transform_6, window_bounds = array<i64: 128, 128>}, {pipeline_mode = #tpu.pipeline_mode<synchronous>, transform_indices = @transform_7, window_bounds = array<i64: 128, 768>}, {pipeline_mode = #tpu.pipeline_mode<synchronous>, transform_indices = @transform_8, window_bounds = array<i64: 384, 128>}, {transform_indices = @transform_9, window_bounds = array<i64: 1, 128, 128>}]} {
    %c0 = arith.constant 0 : index
    %c0_0 = arith.constant 0 : index
    %c0_1 = arith.constant 0 : index
    %0 = vector.load %arg1[%c0, %c0_0, %c0_1] : memref<1x128x128xf32, #tpu.memory_space<vmem>>, vector<1x128x128xf32>
    %1 = vector.shape_cast %0 : vector<1x128x128xf32> to vector<128x128xf32>
    %c0_2 = arith.constant 0 : index
    %c0_3 = arith.constant 0 : index
    %2 = vector.load %arg4[%c0_2, %c0_3] : memref<1x128xf32, #tpu.memory_space<vmem>>, vector<1x128xf32>
    %3 = arith.mulf %1, %1 : vector<128x128xf32>
    %cst = arith.constant dense<0.000000e+00> : vector<128xf32>
    %4 = vector.multi_reduction <add>, %3, %cst [1] : vector<128x128xf32> to vector<128xf32>
    %5 = vector.shape_cast %4 : vector<128xf32> to vector<128x1xf32>
    %cst_4 = arith.constant 1.280000e+02 : f32
    %6 = vector.broadcast %cst_4 : f32 to vector<128x1xf32>
    %7 = arith.divf %5, %6 : vector<128x1xf32>
    %cst_5 = arith.constant 9.99999974E-6 : f32
    %8 = vector.broadcast %cst_5 : f32 to vector<128x1xf32>
    %9 = arith.addf %7, %8 : vector<128x1xf32>
    %10 = math.rsqrt %9 : vector<128x1xf32>
    %11 = vector.broadcast %10 : vector<128x1xf32> to vector<128x128xf32>
    %12 = arith.mulf %1, %11 : vector<128x128xf32>
    %13 = vector.broadcast %2 : vector<1x128xf32> to vector<128x128xf32>
    %14 = arith.mulf %12, %13 : vector<128x128xf32>
    %15 = arith.truncf %14 : vector<128x128xf32> to vector<128x128xbf16>
    %c0_6 = arith.constant 0 : index
    %c0_7 = arith.constant 0 : index
    %16 = vector.load %arg6[%c0_6, %c0_7] : memref<128x256xbf16, #tpu.memory_space<vmem>>, vector<128x256xbf16>
    %cst_8 = arith.constant dense<0.000000e+00> : vector<128x256xf32>
    %17 = tpu.matmul %15, %16, %cst_8 {dimension_numbers = #tpu.dot_dimension_numbers<[1], [0], [0], [1], [0, 0, 1, 1], [], []>} : vector<128x128xbf16>, vector<128x256xbf16>, vector<128x256xf32> -> vector<128x256xf32>
    %18 = tpu.iota {dimensions = array<i32: 1>} : vector<128x256xi32>
    %c2_i32 = arith.constant 2 : i32
    %c0_i32 = arith.constant 0 : i32
    %19 = arith.cmpi eq, %c2_i32, %c0_i32 : i32
    %c1_i32 = arith.constant 1 : i32
    %20 = arith.select %19, %c1_i32, %c2_i32 : i32
    %21 = vector.broadcast %20 : i32 to vector<128x256xi32>
    %22 = arith.remsi %18, %21 : vector<128x256xi32>
    %c0_i32_9 = arith.constant 0 : i32
    %23 = vector.broadcast %c0_i32_9 : i32 to vector<128x256xi32>
    %24 = arith.cmpi ne, %22, %23 : vector<128x256xi32>
    %c0_i32_10 = arith.constant 0 : i32
    %25 = vector.broadcast %c0_i32_10 : i32 to vector<128x256xi32>
    %26 = arith.cmpi slt, %22, %25 : vector<128x256xi32>
    %c0_i32_11 = arith.constant 0 : i32
    %27 = arith.cmpi slt, %20, %c0_i32_11 : i32
    %28 = vector.broadcast %27 : i1 to vector<128x256xi1>
    %29 = vector.broadcast %28 : vector<128x256xi1> to vector<128x256xi1>
    %30 = arith.xori %26, %29 : vector<128x256xi1>
    %31 = arith.andi %30, %24 : vector<128x256xi1>
    %32 = vector.broadcast %20 : i32 to vector<128x256xi32>
    %33 = arith.addi %22, %32 : vector<128x256xi32>
    %34 = arith.select %31, %33, %22 : vector<128x256xi1>, vector<128x256xi32>
    %c0_i32_12 = arith.constant 0 : i32
    %35 = vector.broadcast %c0_i32_12 : i32 to vector<128x256xi32>
    %36 = arith.cmpi eq, %34, %35 : vector<128x256xi32>
    %37 = vector.extract_strided_slice %17 {offsets = [0, 1], sizes = [128, 255], strides = [1, 1]} : vector<128x256xf32> to vector<128x255xf32>
    %38 = vector.extract_strided_slice %17 {offsets = [0, 0], sizes = [128, 1], strides = [1, 1]} : vector<128x256xf32> to vector<128x1xf32>
    %39 = tpu.concatenate %37, %38 in 1 : vector<128x255xf32>, vector<128x1xf32> -> vector<128x256xf32>
    %40 = vector.extract_strided_slice %17 {offsets = [0, 255], sizes = [128, 1], strides = [1, 1]} : vector<128x256xf32> to vector<128x1xf32>
    %41 = vector.extract_strided_slice %17 {offsets = [0, 0], sizes = [128, 255], strides = [1, 1]} : vector<128x256xf32> to vector<128x255xf32>
    %42 = tpu.concatenate %40, %41 in 1 : vector<128x1xf32>, vector<128x255xf32> -> vector<128x256xf32>
    %43 = arith.select %36, %39, %42 : vector<128x256xi1>, vector<128x256xf32>
    %c0_13 = arith.constant 0 : index
    %c0_14 = arith.constant 0 : index
    %44 = vector.load %arg2[%c0_13, %c0_14] : memref<128x256xf32, #tpu.memory_space<vmem>>, vector<128x256xf32>
    %45 = arith.mulf %17, %44 : vector<128x256xf32>
    %c0_15 = arith.constant 0 : index
    %c0_16 = arith.constant 0 : index
    %46 = vector.load %arg3[%c0_15, %c0_16] : memref<128x256xf32, #tpu.memory_space<vmem>>, vector<128x256xf32>
    %47 = arith.mulf %43, %46 : vector<128x256xf32>
    %48 = arith.addf %45, %47 : vector<128x256xf32>
    %49 = tpu.iota {dimensions = array<i32: 0>} : vector<128x128xi32>
    %50 = tpu.iota {dimensions = array<i32: 1>} : vector<128x128xi32>
    %51 = arith.cmpi sle, %50, %49 : vector<128x128xi32>
    %cst_17 = arith.constant 0.000000e+00 : f32
    %cst_18 = arith.constant -1.000000e+30 : f32
    %52 = vector.broadcast %cst_17 : f32 to vector<128x128xf32>
    %53 = vector.broadcast %cst_18 : f32 to vector<128x128xf32>
    %54 = arith.select %51, %52, %53 : vector<128x128xi1>, vector<128x128xf32>
    %55 = vector.extract_strided_slice %48 {offsets = [0, 0], sizes = [128, 128], strides = [1, 1]} : vector<128x256xf32> to vector<128x128xf32>
    %cst_19 = arith.constant 0.176776692 : f32
    %56 = vector.broadcast %cst_19 : f32 to vector<128x128xf32>
    %57 = arith.mulf %55, %56 : vector<128x128xf32>
    %58 = arith.truncf %57 : vector<128x128xf32> to vector<128x128xbf16>
    %59 = vector.extract_strided_slice %48 {offsets = [0, 128], sizes = [128, 128], strides = [1, 1]} : vector<128x256xf32> to vector<128x128xf32>
    %60 = arith.truncf %59 : vector<128x128xf32> to vector<128x128xbf16>
    %cst_20 = arith.constant 0.000000e+00 : f32
    %61 = vector.broadcast %cst_20 : f32 to vector<128x128xf32>
    %62 = vector.extract_strided_slice %58 {offsets = [0, 0], sizes = [128, 32], strides = [1, 1]} : vector<128x128xbf16> to vector<128x32xbf16>
    %63 = vector.extract_strided_slice %60 {offsets = [0, 0], sizes = [128, 32], strides = [1, 1]} : vector<128x128xbf16> to vector<128x32xbf16>
    %64 = vector.extract_strided_slice %60 {offsets = [0, 64], sizes = [128, 32], strides = [1, 1]} : vector<128x128xbf16> to vector<128x32xbf16>
    %cst_21 = arith.constant dense<0.000000e+00> : vector<128x128xf32>
    %65 = tpu.matmul %62, %63, %cst_21 {dimension_numbers = #tpu.dot_dimension_numbers<[1], [1], [0], [0], [0, 0, 1, 0], [], []>} : vector<128x32xbf16>, vector<128x32xbf16>, vector<128x128xf32> -> vector<128x128xf32>
    %66 = arith.addf %65, %54 : vector<128x128xf32>
    %cst_22 = arith.constant dense<0xFF800000> : vector<128xf32>
    %67 = vector.multi_reduction <maximumf>, %66, %cst_22 [1] : vector<128x128xf32> to vector<128xf32>
    %68 = vector.shape_cast %67 : vector<128xf32> to vector<128x1xf32>
    %69 = vector.broadcast %68 : vector<128x1xf32> to vector<128x128xf32>
    %70 = arith.subf %66, %69 : vector<128x128xf32>
    %71 = math.exp %70 : vector<128x128xf32>
    %cst_23 = arith.constant dense<0.000000e+00> : vector<128xf32>
    %72 = vector.multi_reduction <add>, %71, %cst_23 [1] : vector<128x128xf32> to vector<128xf32>
    %73 = vector.shape_cast %72 : vector<128xf32> to vector<128x1xf32>
    %74 = vector.broadcast %73 : vector<128x1xf32> to vector<128x128xf32>
    %75 = arith.divf %71, %74 : vector<128x128xf32>
    %76 = arith.truncf %75 : vector<128x128xf32> to vector<128x128xbf16>
    %cst_24 = arith.constant dense<0.000000e+00> : vector<128x32xf32>
    %77 = tpu.matmul %76, %64, %cst_24 {dimension_numbers = #tpu.dot_dimension_numbers<[1], [0], [0], [1], [0, 0, 1, 1], [], []>} : vector<128x128xbf16>, vector<128x32xbf16>, vector<128x32xf32> -> vector<128x32xf32>
    %78 = arith.truncf %77 : vector<128x32xf32> to vector<128x32xbf16>
    %c0_25 = arith.constant 0 : index
    %c0_26 = arith.constant 0 : index
    %79 = vector.load %arg7[%c0_25, %c0_26] : memref<128x128xbf16, #tpu.memory_space<vmem>>, vector<32x128xbf16>
    %cst_27 = arith.constant dense<0.000000e+00> : vector<128x128xf32>
    %80 = tpu.matmul %78, %79, %cst_27 {dimension_numbers = #tpu.dot_dimension_numbers<[1], [0], [0], [1], [0, 0, 1, 1], [], []>} : vector<128x32xbf16>, vector<32x128xbf16>, vector<128x128xf32> -> vector<128x128xf32>
    %81 = arith.addf %61, %80 : vector<128x128xf32>
    %82 = vector.extract_strided_slice %58 {offsets = [0, 32], sizes = [128, 32], strides = [1, 1]} : vector<128x128xbf16> to vector<128x32xbf16>
    %83 = vector.extract_strided_slice %60 {offsets = [0, 0], sizes = [128, 32], strides = [1, 1]} : vector<128x128xbf16> to vector<128x32xbf16>
    %84 = vector.extract_strided_slice %60 {offsets = [0, 64], sizes = [128, 32], strides = [1, 1]} : vector<128x128xbf16> to vector<128x32xbf16>
    %cst_28 = arith.constant dense<0.000000e+00> : vector<128x128xf32>
    %85 = tpu.matmul %82, %83, %cst_28 {dimension_numbers = #tpu.dot_dimension_numbers<[1], [1], [0], [0], [0, 0, 1, 0], [], []>} : vector<128x32xbf16>, vector<128x32xbf16>, vector<128x128xf32> -> vector<128x128xf32>
    %86 = arith.addf %85, %54 : vector<128x128xf32>
    %cst_29 = arith.constant dense<0xFF800000> : vector<128xf32>
    %87 = vector.multi_reduction <maximumf>, %86, %cst_29 [1] : vector<128x128xf32> to vector<128xf32>
    %88 = vector.shape_cast %87 : vector<128xf32> to vector<128x1xf32>
    %89 = vector.broadcast %88 : vector<128x1xf32> to vector<128x128xf32>
    %90 = arith.subf %86, %89 : vector<128x128xf32>
    %91 = math.exp %90 : vector<128x128xf32>
    %cst_30 = arith.constant dense<0.000000e+00> : vector<128xf32>
    %92 = vector.multi_reduction <add>, %91, %cst_30 [1] : vector<128x128xf32> to vector<128xf32>
    %93 = vector.shape_cast %92 : vector<128xf32> to vector<128x1xf32>
    %94 = vector.broadcast %93 : vector<128x1xf32> to vector<128x128xf32>
    %95 = arith.divf %91, %94 : vector<128x128xf32>
    %96 = arith.truncf %95 : vector<128x128xf32> to vector<128x128xbf16>
    %cst_31 = arith.constant dense<0.000000e+00> : vector<128x32xf32>
    %97 = tpu.matmul %96, %84, %cst_31 {dimension_numbers = #tpu.dot_dimension_numbers<[1], [0], [0], [1], [0, 0, 1, 1], [], []>} : vector<128x128xbf16>, vector<128x32xbf16>, vector<128x32xf32> -> vector<128x32xf32>
    %98 = arith.truncf %97 : vector<128x32xf32> to vector<128x32xbf16>
    %c32 = arith.constant 32 : index
    %c0_32 = arith.constant 0 : index
    %99 = vector.load %arg7[%c32, %c0_32] : memref<128x128xbf16, #tpu.memory_space<vmem>>, vector<32x128xbf16>
    %cst_33 = arith.constant dense<0.000000e+00> : vector<128x128xf32>
    %100 = tpu.matmul %98, %99, %cst_33 {dimension_numbers = #tpu.dot_dimension_numbers<[1], [0], [0], [1], [0, 0, 1, 1], [], []>} : vector<128x32xbf16>, vector<32x128xbf16>, vector<128x128xf32> -> vector<128x128xf32>
    %101 = arith.addf %81, %100 : vector<128x128xf32>
    %102 = vector.extract_strided_slice %58 {offsets = [0, 64], sizes = [128, 32], strides = [1, 1]} : vector<128x128xbf16> to vector<128x32xbf16>
    %103 = vector.extract_strided_slice %60 {offsets = [0, 32], sizes = [128, 32], strides = [1, 1]} : vector<128x128xbf16> to vector<128x32xbf16>
    %104 = vector.extract_strided_slice %60 {offsets = [0, 96], sizes = [128, 32], strides = [1, 1]} : vector<128x128xbf16> to vector<128x32xbf16>
    %cst_34 = arith.constant dense<0.000000e+00> : vector<128x128xf32>
    %105 = tpu.matmul %102, %103, %cst_34 {dimension_numbers = #tpu.dot_dimension_numbers<[1], [1], [0], [0], [0, 0, 1, 0], [], []>} : vector<128x32xbf16>, vector<128x32xbf16>, vector<128x128xf32> -> vector<128x128xf32>
    %106 = arith.addf %105, %54 : vector<128x128xf32>
    %cst_35 = arith.constant dense<0xFF800000> : vector<128xf32>
    %107 = vector.multi_reduction <maximumf>, %106, %cst_35 [1] : vector<128x128xf32> to vector<128xf32>
    %108 = vector.shape_cast %107 : vector<128xf32> to vector<128x1xf32>
    %109 = vector.broadcast %108 : vector<128x1xf32> to vector<128x128xf32>
    %110 = arith.subf %106, %109 : vector<128x128xf32>
    %111 = math.exp %110 : vector<128x128xf32>
    %cst_36 = arith.constant dense<0.000000e+00> : vector<128xf32>
    %112 = vector.multi_reduction <add>, %111, %cst_36 [1] : vector<128x128xf32> to vector<128xf32>
    %113 = vector.shape_cast %112 : vector<128xf32> to vector<128x1xf32>
    %114 = vector.broadcast %113 : vector<128x1xf32> to vector<128x128xf32>
    %115 = arith.divf %111, %114 : vector<128x128xf32>
    %116 = arith.truncf %115 : vector<128x128xf32> to vector<128x128xbf16>
    %cst_37 = arith.constant dense<0.000000e+00> : vector<128x32xf32>
    %117 = tpu.matmul %116, %104, %cst_37 {dimension_numbers = #tpu.dot_dimension_numbers<[1], [0], [0], [1], [0, 0, 1, 1], [], []>} : vector<128x128xbf16>, vector<128x32xbf16>, vector<128x32xf32> -> vector<128x32xf32>
    %118 = arith.truncf %117 : vector<128x32xf32> to vector<128x32xbf16>
    %c64 = arith.constant 64 : index
    %c0_38 = arith.constant 0 : index
    %119 = vector.load %arg7[%c64, %c0_38] : memref<128x128xbf16, #tpu.memory_space<vmem>>, vector<32x128xbf16>
    %cst_39 = arith.constant dense<0.000000e+00> : vector<128x128xf32>
    %120 = tpu.matmul %118, %119, %cst_39 {dimension_numbers = #tpu.dot_dimension_numbers<[1], [0], [0], [1], [0, 0, 1, 1], [], []>} : vector<128x32xbf16>, vector<32x128xbf16>, vector<128x128xf32> -> vector<128x128xf32>
    %121 = arith.addf %101, %120 : vector<128x128xf32>
    %122 = vector.extract_strided_slice %58 {offsets = [0, 96], sizes = [128, 32], strides = [1, 1]} : vector<128x128xbf16> to vector<128x32xbf16>
    %123 = vector.extract_strided_slice %60 {offsets = [0, 32], sizes = [128, 32], strides = [1, 1]} : vector<128x128xbf16> to vector<128x32xbf16>
    %124 = vector.extract_strided_slice %60 {offsets = [0, 96], sizes = [128, 32], strides = [1, 1]} : vector<128x128xbf16> to vector<128x32xbf16>
    %cst_40 = arith.constant dense<0.000000e+00> : vector<128x128xf32>
    %125 = tpu.matmul %122, %123, %cst_40 {dimension_numbers = #tpu.dot_dimension_numbers<[1], [1], [0], [0], [0, 0, 1, 0], [], []>} : vector<128x32xbf16>, vector<128x32xbf16>, vector<128x128xf32> -> vector<128x128xf32>
    %126 = arith.addf %125, %54 : vector<128x128xf32>
    %cst_41 = arith.constant dense<0xFF800000> : vector<128xf32>
    %127 = vector.multi_reduction <maximumf>, %126, %cst_41 [1] : vector<128x128xf32> to vector<128xf32>
    %128 = vector.shape_cast %127 : vector<128xf32> to vector<128x1xf32>
    %129 = vector.broadcast %128 : vector<128x1xf32> to vector<128x128xf32>
    %130 = arith.subf %126, %129 : vector<128x128xf32>
    %131 = math.exp %130 : vector<128x128xf32>
    %cst_42 = arith.constant dense<0.000000e+00> : vector<128xf32>
    %132 = vector.multi_reduction <add>, %131, %cst_42 [1] : vector<128x128xf32> to vector<128xf32>
    %133 = vector.shape_cast %132 : vector<128xf32> to vector<128x1xf32>
    %134 = vector.broadcast %133 : vector<128x1xf32> to vector<128x128xf32>
    %135 = arith.divf %131, %134 : vector<128x128xf32>
    %136 = arith.truncf %135 : vector<128x128xf32> to vector<128x128xbf16>
    %cst_43 = arith.constant dense<0.000000e+00> : vector<128x32xf32>
    %137 = tpu.matmul %136, %124, %cst_43 {dimension_numbers = #tpu.dot_dimension_numbers<[1], [0], [0], [1], [0, 0, 1, 1], [], []>} : vector<128x128xbf16>, vector<128x32xbf16>, vector<128x32xf32> -> vector<128x32xf32>
    %138 = arith.truncf %137 : vector<128x32xf32> to vector<128x32xbf16>
    %c96 = arith.constant 96 : index
    %c0_44 = arith.constant 0 : index
    %139 = vector.load %arg7[%c96, %c0_44] : memref<128x128xbf16, #tpu.memory_space<vmem>>, vector<32x128xbf16>
    %cst_45 = arith.constant dense<0.000000e+00> : vector<128x128xf32>
    %140 = tpu.matmul %138, %139, %cst_45 {dimension_numbers = #tpu.dot_dimension_numbers<[1], [0], [0], [1], [0, 0, 1, 1], [], []>} : vector<128x32xbf16>, vector<32x128xbf16>, vector<128x128xf32> -> vector<128x128xf32>
    %141 = arith.addf %121, %140 : vector<128x128xf32>
    %142 = arith.addf %1, %141 : vector<128x128xf32>
    %c0_46 = arith.constant 0 : index
    %c0_47 = arith.constant 0 : index
    %143 = vector.load %arg5[%c0_46, %c0_47] : memref<1x128xf32, #tpu.memory_space<vmem>>, vector<1x128xf32>
    %144 = arith.mulf %142, %142 : vector<128x128xf32>
    %cst_48 = arith.constant dense<0.000000e+00> : vector<128xf32>
    %145 = vector.multi_reduction <add>, %144, %cst_48 [1] : vector<128x128xf32> to vector<128xf32>
    %146 = vector.shape_cast %145 : vector<128xf32> to vector<128x1xf32>
    %cst_49 = arith.constant 1.280000e+02 : f32
    %147 = vector.broadcast %cst_49 : f32 to vector<128x1xf32>
    %148 = arith.divf %146, %147 : vector<128x1xf32>
    %cst_50 = arith.constant 9.99999974E-6 : f32
    %149 = vector.broadcast %cst_50 : f32 to vector<128x1xf32>
    %150 = arith.addf %148, %149 : vector<128x1xf32>
    %151 = math.rsqrt %150 : vector<128x1xf32>
    %152 = vector.broadcast %151 : vector<128x1xf32> to vector<128x128xf32>
    %153 = arith.mulf %142, %152 : vector<128x128xf32>
    %154 = vector.broadcast %143 : vector<1x128xf32> to vector<128x128xf32>
    %155 = arith.mulf %153, %154 : vector<128x128xf32>
    %156 = arith.truncf %155 : vector<128x128xf32> to vector<128x128xbf16>
    %c0_51 = arith.constant 0 : index
    %c0_52 = arith.constant 0 : index
    %157 = vector.load %arg8[%c0_51, %c0_52] : memref<128x768xbf16, #tpu.memory_space<vmem>>, vector<128x768xbf16>
    %cst_53 = arith.constant dense<0.000000e+00> : vector<128x768xf32>
    %158 = tpu.matmul %156, %157, %cst_53 {dimension_numbers = #tpu.dot_dimension_numbers<[1], [0], [0], [1], [0, 0, 1, 1], [], []>} : vector<128x128xbf16>, vector<128x768xbf16>, vector<128x768xf32> -> vector<128x768xf32>
    %159 = vector.extract_strided_slice %158 {offsets = [0, 0], sizes = [128, 384], strides = [1, 1]} : vector<128x768xf32> to vector<128x384xf32>
    %160 = vector.extract_strided_slice %158 {offsets = [0, 384], sizes = [128, 384], strides = [1, 1]} : vector<128x768xf32> to vector<128x384xf32>
    %161 = arith.negf %159 : vector<128x384xf32>
    %162 = math.exp %161 : vector<128x384xf32>
    %cst_54 = arith.constant 1.000000e+00 : f32
    %163 = vector.broadcast %cst_54 : f32 to vector<128x384xf32>
    %164 = arith.addf %163, %162 : vector<128x384xf32>
    %165 = arith.divf %163, %164 : vector<128x384xf32>
    %166 = arith.mulf %159, %165 : vector<128x384xf32>
    %167 = arith.mulf %166, %160 : vector<128x384xf32>
    %168 = arith.truncf %167 : vector<128x384xf32> to vector<128x384xbf16>
    %c0_55 = arith.constant 0 : index
    %c0_56 = arith.constant 0 : index
    %169 = vector.load %arg9[%c0_55, %c0_56] : memref<384x128xbf16, #tpu.memory_space<vmem>>, vector<384x128xbf16>
    %cst_57 = arith.constant dense<0.000000e+00> : vector<128x128xf32>
    %170 = tpu.matmul %168, %169, %cst_57 {dimension_numbers = #tpu.dot_dimension_numbers<[1], [0], [0], [1], [0, 0, 1, 1], [], []>} : vector<128x384xbf16>, vector<384x128xbf16>, vector<128x128xf32> -> vector<128x128xf32>
    %171 = arith.addf %142, %170 : vector<128x128xf32>
    %c0_58 = arith.constant 0 : index
    %c0_59 = arith.constant 0 : index
    %c0_60 = arith.constant 0 : index
    %172 = vector.load %arg10[%c0_58, %c0_59, %c0_60] : memref<1x128x128xf32, #tpu.memory_space<vmem>>, vector<1x128x128xf32>
    %173 = vector.shape_cast %172 : vector<1x128x128xf32> to vector<128x128xf32>
    %174 = vector.shape_cast %171 : vector<128x128xf32> to vector<1x128x128xf32>
    tpu.vector_store %arg10[%c0_58, %c0_59, %c0_60], %174 {strides = array<i32>} : memref<1x128x128xf32, #tpu.memory_space<vmem>>, vector<1x128x128xf32>,
    return
  }
  func.func @transform_0(%arg0: i32) -> (i32, i32, i32) {
    %c0_i32 = arith.constant 0 : i32
    %c0_i32_0 = arith.constant 0 : i32
    %c0_i32_1 = arith.constant 0 : i32
    return %arg0, %c0_i32, %c0_i32_0 : i32, i32, i32
  }
  func.func @transform_1(%arg0: i32) -> (i32, i32) {
    %c0_i32 = arith.constant 0 : i32
    %c0_i32_0 = arith.constant 0 : i32
    %c0_i32_1 = arith.constant 0 : i32
    return %c0_i32, %c0_i32_0 : i32, i32
  }
  func.func @transform_2(%arg0: i32) -> (i32, i32) {
    %c0_i32 = arith.constant 0 : i32
    %c0_i32_0 = arith.constant 0 : i32
    %c0_i32_1 = arith.constant 0 : i32
    return %c0_i32, %c0_i32_0 : i32, i32
  }
  func.func @transform_3(%arg0: i32) -> (i32, i32) {
    %c0_i32 = arith.constant 0 : i32
    %c0_i32_0 = arith.constant 0 : i32
    %c0_i32_1 = arith.constant 0 : i32
    return %c0_i32, %c0_i32_0 : i32, i32
  }
  func.func @transform_4(%arg0: i32) -> (i32, i32) {
    %c0_i32 = arith.constant 0 : i32
    %c0_i32_0 = arith.constant 0 : i32
    %c0_i32_1 = arith.constant 0 : i32
    return %c0_i32, %c0_i32_0 : i32, i32
  }
  func.func @transform_5(%arg0: i32) -> (i32, i32) {
    %c0_i32 = arith.constant 0 : i32
    %c0_i32_0 = arith.constant 0 : i32
    %c0_i32_1 = arith.constant 0 : i32
    return %c0_i32, %c0_i32_0 : i32, i32
  }
  func.func @transform_6(%arg0: i32) -> (i32, i32) {
    %c0_i32 = arith.constant 0 : i32
    %c0_i32_0 = arith.constant 0 : i32
    %c0_i32_1 = arith.constant 0 : i32
    return %c0_i32, %c0_i32_0 : i32, i32
  }
  func.func @transform_7(%arg0: i32) -> (i32, i32) {
    %c0_i32 = arith.constant 0 : i32
    %c0_i32_0 = arith.constant 0 : i32
    %c0_i32_1 = arith.constant 0 : i32
    return %c0_i32, %c0_i32_0 : i32, i32
  }
  func.func @transform_8(%arg0: i32) -> (i32, i32) {
    %c0_i32 = arith.constant 0 : i32
    %c0_i32_0 = arith.constant 0 : i32
    %c0_i32_1 = arith.constant 0 : i32
    return %c0_i32, %c0_i32_0 : i32, i32
  }
  func.func @transform_9(%arg0: i32) -> (i32, i32, i32) {
    %c0_i32 = arith.constant 0 : i32
    %c0_i32_0 = arith.constant 0 : i32
    %c0_i32_1 = arith.constant 0 : i32
    return %arg0, %c0_i32, %c0_i32_0 : i32, i32, i32
  }
}

</mosaic_0001>

<bundles_post_ra>
// kernel: minimind_block.1
= control target key start
LH: loop header
LB: loop body
LE: loop exit
PB: predicated region body
PF: predicated region fallthrough
CT: control target
= control target key end

     0   :  { %s12607_s0 = inlined_call_operand.hbm [shape: f32[2,128,128], index: 0, kind: input, shape index: {}]   ;;  %s12608_s1 = inlined_call_operand.hbm [shape: f32[128,256], index: 1, kind: input, shape index: {}]   ;;  %s12609_s2 = inlined_call_operand.hbm [shape: f32[128,256], index: 2, kind: input, shape index: {}]   ;;  %s12610_s3 = inlined_call_operand.vmem [shape: f32[1,128], index: 3, kind: input, shape index: {}]   ;;  %s12611_s4 = inlined_call_operand.vmem [shape: f32[1,128], index: 4, kind: input, shape index: {}]   ;;  %s12612_s5 = inlined_call_operand.hbm [shape: bf16[128,256], index: 5, kind: input, shape index: {}]   ;;  %s12613_s6 = inlined_call_operand.hbm [shape: bf16[128,128], index: 6, kind: input, shape index: {}]   ;;  %s12614_s7 = inlined_call_operand.hbm [shape: bf16[128,768], index: 7, kind: input, shape index: {}]   ;;  %s12615_s8 = inlined_call_operand.hbm [shape: bf16[384,128], index: 8, kind: input, shape index: {}]   ;;  %s12616_s9 = inlined_call_operand.hbm [shape: f32[2,128,128], index: 9, kind: output, shape index: {}]  }
   0x1   :  { %12707 = sst [smem:[#allocation62_spill]] %s12608_s1 }
   0x2   :  { %12708 = sst [smem:[#allocation63_spill]] %s12609_s2 }
   0x3   :  { %12709 = sst [smem:[#allocation64_spill]] %s12612_s5 }
   0x4   :  { %12710 = sst [smem:[#allocation65_spill]] %s12613_s6 }
   0x5   :  { %14 = vsyncpa [#allocation3], 0 }
   0x6   :  { %16 = vsyncpa [#allocation3 + $0x1], 0 }
   0x7   :  { %17 = vsyncpa [#allocation6], 0 }
   0x8   :  { %18 = vsyncpa [#allocation9], 0 }
   0x9   :  { %19 = vsyncpa [#allocation12], 0 }
   0xa   :  { %20 = vsyncpa [#allocation4], 0 }
   0xb   :  { %22 = vsyncpa [#allocation4 + $0x1], 0  ;;  %s8277_s30 = smov 0   ;;  %s8279_s10 = smov 0  }
   0xc   :  { %s8281_s11 = smov 0   ;;  %s8283_s12 = smov 0  }
   0xd LB: > { %s12711_s1 = sld [smem:[#allocation62_spill]]  ;;  %s8301_s16 = sadd.s32 4294967295, %s8202_s12   ;;  %s8202_s12 = sphi %s8283_s12, %s13095_s12   ;;  %s8198_s11 = sphi %s8281_s11, %s13094_s11   ;;  %s8194_s10 = sphi %s8279_s10, %s13093_s10   ;;  %s8190_s30 = sphi %s8277_s30, %s13092_s30  }
   0xe   : > { %p6615_p0 = scmp.ge.s32.totalorder %s8202_s12, 1  ;;  %p49_p1 = scmp.eq.s32.totalorder %s8301_s16, 0 }
   0xf   : > { %p253_p2 = scmp.lt.s32.totalorder %s8202_s12, 3  ;;  %s8204_s18 = smov [#allocation5]  }
  0x10   : > { %s266_s19 = sshll.u32 %s8204_s18, 4  ;;  %s12713_s5 = sld [smem:[#allocation64_spill]]  ;;  %s267_s19 = int_to_ptr.vmem [resolvable:$true] %s266_s19 }
  0x11   : > { %p8306_p3 = pnand %p6615_p0, %p253_p2  ;;  %s8205_s24 = smov [#allocation8]  }
  0x12   : > { %s300_s25 = sshll.u32 %s8205_s24, 4  ;;  %s8206_s26 = smov 256   ;;  %s301_s25 = int_to_ptr.vmem [resolvable:$true] %s300_s25 }
  0x13   : > { %s264_s15 = sshll.u32 %s12711_s1, 4  ;;  %p7286_p4 = pneg %p8306_p3  ;;  %s265_s15 = int_to_ptr.hbm [resolvable:$true] %s264_s15 }
  0x14   : > { %s8207_s27 = smov 16   ;;  %s12617_s28 = smov 128  }
  0x15   : > { %p8318_p6 = pnand %p7286_p4, %p49_p1  ;;  %s12618_s29 = smov 8  }
  0x16   : > { %s298_s22 = sshll.u32 %s12713_s5, 4  ;;  %s326_s18 = sshll.u32 %s12614_s7, 4  ;;  %s299_s22 = int_to_ptr.hbm [resolvable:$true] %s298_s22  ;;  %s327_s18 = int_to_ptr.hbm [resolvable:$true] %s326_s18 }
  0x17   : > { %7289 = dma.hbm_to_vmem [thread:$0]  (!%p8318_p6), %s265_s15, 4096, %s267_s19, [#allocation6], %s8206_s26, %s8206_s26, %s8207_s27  }
  0x18   : > { %7295 = dma.hbm_to_vmem [thread:$0]  (!%p8318_p6), %s299_s22, 2048, %s301_s25, [#allocation9], %s12617_s28, %s12617_s28, %s12618_s29  }
  0x19   : > { %s8210_s20 = smov [#allocation11]   ;;  %s12715_s2 = sld [smem:[#allocation63_spill]] }
  0x1a   : > { %s328_s21 = sshll.u32 %s8210_s20, 4  ;;  %s8211_s19 = smov 384   ;;  %s329_s21 = int_to_ptr.vmem [resolvable:$true] %s328_s21 }
  0x1b   : > { %s8212_s5 = smov 24   ;;  %s8213_s22 = smov [#allocation7]  }
  0x1c   : > { %7301 = dma.hbm_to_vmem [thread:$0]  (!%p8318_p6), %s327_s18, 6144, %s329_s21, [#allocation12], %s8211_s19, %s8211_s19, %s8212_s5  }
  0x1d   : > { %s280_s25 = sshll.u32 %s8213_s22, 4  ;;  %s12716_s6 = sld [smem:[#allocation65_spill]]  ;;  %s281_s25 = int_to_ptr.vmem [resolvable:$true] %s280_s25 }
  0x1e   : > { %s8214_s1 = smov [#allocation10]   ;;  %s340_s28 = sshll.u32 %s12615_s8, 4  ;;  %s341_s28 = int_to_ptr.hbm [resolvable:$true] %s340_s28 }
  0x1f   : > { %s278_s15 = sshll.u32 %s12715_s2, 4  ;;  %s314_s20 = sshll.u32 %s8214_s1, 4  ;;  %s279_s15 = int_to_ptr.hbm [resolvable:$true] %s278_s15  ;;  %s315_s20 = int_to_ptr.vmem [resolvable:$true] %s314_s20 }
  0x20   : > { %7292 = dma.hbm_to_vmem [thread:$0]  (!%p8318_p6), %s279_s15, 4096, %s281_s25, [#allocation6], %s8206_s26, %s8206_s26, %s8207_s27  }
  0x21   : > { %s8215_s21 = smov 64   ;;  %s8216_s24 = smov 4  }
  0x22   : > { %s8217_s26 = smov [#allocation13]   ;;  %s6614_s15 = sadd.s32 4294967294, %s8202_s12  }
  0x23   : > { %s312_s14 = sshll.u32 %s12716_s6, 4  ;;  %s342_s27 = sshll.u32 %s8217_s26, 4  ;;  %s313_s14 = int_to_ptr.hbm [resolvable:$true] %s312_s14  ;;  %s343_s27 = int_to_ptr.vmem [resolvable:$true] %s342_s27 }
  0x24   : > { %7298 = dma.hbm_to_vmem [thread:$0]  (!%p8318_p6), %s313_s14, 1024, %s315_s20, [#allocation9], %s8215_s21, %s8215_s21, %s8216_s24  }
  0x25   : > { %7304 = dma.hbm_to_vmem [thread:$0]  (!%p8318_p6), %s341_s28, 3072, %s343_s27, [#allocation12], %s8215_s21, %s8215_s21, %s8216_s24  }
  0x26   : > { %s8351_s19 = sadd.s32 1, %s8202_s12   ;;  %s35_s25 = sadd.s32 1, %s8198_s11 }
  0x27   : > { %s32_s22 = ssub.s32 %s8202_s12, %s8351_s19  ;;  %p42_p8 = scmp.ne.s32.totalorder %s8198_s11, %s8194_s10 }
  0x28   : > { %p33_p7 = scmp.eq.s32.totalorder %s32_s22, 0  ;;  %p43_p9 = scmp.eq.s32.totalorder %s8202_s12, 0 }
  0x29   : > { %p48_p10 = scmp.ne.s32.totalorder %s8194_s10, %s8190_s30  ;;  %p240_p13 = scmp.eq.s32.totalorder %s8301_s16, 1 }
  0x2a   : > { %s8362_s13 = scalar_select %p33_p7, %s8198_s11, %s35_s25  }
  0x2b   : > { %p8364_p11 = por %p43_p9, %p42_p8  ;;  %p8370_p12 = por %p49_p1, %p48_p10 }
  0x2c   : > { %p246_p0 = scmp.eq.s32.totalorder %s6614_s15, 1  ;;  %p7319_p2 = scmp.lt.s32.totalorder %s8202_s12, 2 }
  0x2d   : > { %s356_s1 = sand.u32 1, %s8198_s11   ;;  %p8377_p4 = por %p240_p13, %p42_p8 }
  0x2e   : > { %p8381_p6 = por %p246_p0, %p48_p10  ;;  %s6623_s18 = sshll.u32 %s356_s1, 7 }
  0x2f   : > { %s7136_s28 = sshll.u32 %s8202_s12, 7  ;;  %s360_s27 = scalar_lea.vmem [#allocation2], %s6623_s18 }
  0x30   : > { %s365_s26 = scalar_lea.hbm %s12607_s0, %s7136_s28  ;;  %s368_s22 = sshll.u32 %s360_s27, 4  ;;  %s369_s22 = int_to_ptr.vmem [resolvable:$true] %s368_s22 }
  0x31   : > { %s366_s25 = sshll.u32 %s365_s26, 4  ;;  %p8391_p7 = pnand %p7319_p2, %p8364_p11  ;;  %s367_s25 = int_to_ptr.hbm [resolvable:$true] %s366_s25 }
  0x32   : > { %s357_s29 = scalar_lea.sflag [#allocation3], %s356_s1  ;;  %s8094_s2 = sshra.s32 %s367_s25, 4  ;;  %s8095_s2 = int_to_ptr.hbm [resolvable:$true] %s8094_s2 }
  0x33   : > { %s8096_s6 = scalar_lea.hbm %s8095_s2, 128  ;;  %p8098_p9 = pneg %p8391_p7 }
  0x34   : > { %p8097_p8 = scmp.ne.s32.totalorder %s8095_s2, %s8096_s6  ;;  %s8101_s21 = scalar_lea.hbm %s12607_s0, 256 }
  0x35   : > { %p8102_p11 = scmp.lt.s32.totalorder %s8095_s2, %s12607_s0  ;;  %p8103_p0 = scmp.lt.s32.totalorder %s8101_s21, %s8096_s6 }
  0x36   : > { %p8099_p10 = pnand %p8098_p9, %p8097_p8 }
  0x37   : > { %p8104_p2 = por %p8103_p0, %p8102_p11 }
  0x38   : > { %p8100_p13 = pneg %p8099_p10 }
  0x3a   : > { %p8105_p5 = pnand %p8104_p2, %p8100_p13 }
  0x3c   : > { %8108 = shalt.err (!%p8105_p5)
}
  0x3d   : > { %s12722_s1 = smov 8   ;;  %s12723_s26 = smov 128  }
  0x3e   : > { %7308 = dma.hbm_to_vmem [thread:$0]  (!%p8391_p7), %s367_s25, 2048, %s369_s22, %s357_s29, %s12723_s26, %s12723_s26, %s12722_s1  }
  0x3f   : > { %380 = sbr.rel (%p8306_p3) target bundleno = 2990 (0xbae), region = 56 }
  0x44   : > { %s8411_s27 = sand.u32 1, %s8194_s10  }
  0x45   : > { %s6627_s2 = sshll.u32 %s8411_s27, 7  ;;  %s383_s6 = scalar_lea.sflag [#allocation3], %s8411_s27 }
  0x46   : > { %s8417_s18 = scalar_lea.vmem [#allocation2], %s6627_s2 }
  0x47   : > { %8169 = dma.done.wait (%p8370_p12), %s383_s6, 2048  }
  0x48   : > { %8171 = vsyncadd (%p8370_p12), %s383_s6, 4294965248 }
  0x49   : > { %8173 = dma.done.wait (%p49_p1), [#allocation6], 8192  }
  0x4a   : > { %8175 = vsyncadd (%p49_p1), [#allocation6], 4294959104 }
  0x4b   : > { %8177 = dma.done.wait (%p49_p1), [#allocation9], 3072  }
  0x4c   : > { %8179 = vsyncadd (%p49_p1), [#allocation9], 4294964224 }
  0x4d   : > { %8181 = dma.done.wait (%p49_p1), [#allocation12], 9216  }
  0x4e   : > { %8183 = vsyncadd (%p49_p1), [#allocation12], 4294958080  ;;  %v8436_v0 = vld [vmem:[%s8417_s18 + $0x20] sm:$0xff]  ;;  %v8439_v1 = vld [vmem:[%s8417_s18 + $0x10] sm:$0xff]  ;;  %v8218_v35 = vmov 128.0   ;;  %s8219_s23 = smov 127  }
  0x4f   : > { %v8442_v2 = vld [vmem:[%s8417_s18] sm:$0xff]  ;;  %v474_v3 = vmul.f32 %v8436_v0, %v8436_v0  ;;  %v472_v4 = vmul.f32 %v8439_v1, %v8439_v1  ;;  %v8451_v6 = vld [vmem:[%s8417_s18 + $0x28] sm:$0xff]  ;;  %v8454_v7 = vld [vmem:[%s8417_s18 + $0x18] sm:$0xff]  ;;  %7384 = vrcp.f32 %v8218_v35  ;;  %s8220_s22 = smov 1   ;;  %s8221_s25 = smov 96  }
  0x50   : > { %v470_v5 = vmul.f32 %v8442_v2, %v8442_v2  ;;  %v8457_v8 = vld [vmem:[%s8417_s18 + $0x8] sm:$0xff]  ;;  %v475_v9 = vmul.f32 %v8451_v6, %v8451_v6  ;;  %v473_v10 = vmul.f32 %v8454_v7, %v8454_v7  ;;  %v8466_v12 = vld [vmem:[%s8417_s18 + $0x40] sm:$0xff]  ;;  %v8469_v13 = vld [vmem:[%s8417_s18 + $0x38] sm:$0xff]  ;;  %s8222_s15 = smov 64   ;;  %s8224_s28 = smov 32  }
  0x51   : > { %494 = vadd.xlane.f32.xlu2 %v474_v3  ;;  %490 = vadd.xlane.f32.xlu1 %v472_v4  ;;  %v471_v11 = vmul.f32 %v8457_v8, %v8457_v8  ;;  %v8472_v14 = vld [vmem:[%s8417_s18 + $0x30] sm:$0xff]  ;;  %v478_v15 = vmul.f32 %v8466_v12, %v8466_v12  ;;  %v477_v16 = vmul.f32 %v8469_v13, %v8469_v13  ;;  %v8481_v18 = vld [vmem:[%s8417_s18 + $0x58] sm:$0xff]  ;;  %v8487_v20 = vld [vmem:[%s8417_s18 + $0x48] sm:$0xff]  ;;  %s12540_s14 = scalar_lea.vmem [#allocation14], %s6627_s2  ;;  %s7233_s1 = sshll.u32 %s8301_s16, 7 }
  0x52   : > { %486 = vadd.xlane.f32.xlu0 %v470_v5  ;;  %v476_v17 = vmul.f32 %v8472_v14, %v8472_v14  ;;  %v8484_v19 = vld [vmem:[%s8417_s18 + $0x50] sm:$0xff]  ;;  %v481_v21 = vmul.f32 %v8481_v18, %v8481_v18  ;;  %v479_v23 = vmul.f32 %v8487_v20, %v8487_v20  ;;  %v8496_v24 = vld [vmem:[%s8417_s18 + $0x68] sm:$0xff]  ;;  %v8502_v26 = vld [vmem:[%s8417_s18 + $0x60] sm:$0xff]  ;;  %s6480_s6 = scalar_lea.hbm %s12616_s9, %s7233_s1  ;;  %s6469_s16 = scalar_lea.sflag [#allocation4], %s8411_s27 }
  0x53   : > { %v480_v22 = vmul.f32 %v8484_v19, %v8484_v19  ;;  %v8499_v25 = vld [vmem:[%s8417_s18 + $0x70] sm:$0xff]  ;;  %v483_v27 = vmul.f32 %v8496_v24, %v8496_v24  ;;  %v482_v29 = vmul.f32 %v8502_v26, %v8502_v26  ;;  %v8511_v30 = vld [vmem:[%s8417_s18 + $0x78] sm:$0xff]  ;;  %v6685_v39 = vld [vmem:[#allocation8 + $0x60] sm:$0xf]  ;;  %s6483_s17 = sshll.u32 %s6480_s6, 4  ;;  %s6484_s17 = int_to_ptr.hbm [resolvable:$true] %s6483_s17 }
  0x54   : > { %v484_v28 = vmul.f32 %v8499_v25, %v8499_v25  ;;  %v485_v31 = vmul.f32 %v8511_v30, %v8511_v30  ;;  %v6693_v32 = vld [vmem:[#allocation8 + $0x70] sm:$0xf]  ;;  %v7152_v33 = vld [vmem:[#allocation8 + $0x74] sm:$0xf0]  ;;  %v7151_v34 = vld [vmem:[#allocation8 + $0x74] sm:$0xf] }
  0x55   : > { %v6694_v36 = vor.u32 %v7152_v33, %v6693_v32  ;;  %v6695_v37 = vld [vmem:[#allocation8 + $0x78] sm:$0xf0]  ;;  %v7150_v40 = vld [vmem:[#allocation8 + $0x64] sm:$0xf0]  ;;  %v7149_v41 = vld [vmem:[#allocation8 + $0x64] sm:$0xf]  ;;  %v7385_v45 = vpop.eup %7384 }
  0x56   : > { %v6698_v38 = vor.u32 %v7151_v34, %v6695_v37  ;;  %v6686_v42 = vor.u32 %v7150_v40, %v6685_v39  ;;  %v6687_v43 = vld [vmem:[#allocation8 + $0x68] sm:$0xf0]  ;;  %v6677_v46 = vld [vmem:[#allocation8 + $0x50] sm:$0xf]  ;;  %v7148_v47 = vld [vmem:[#allocation8 + $0x54] sm:$0xf0]  ;;  %vm523_vm0 = vweird.f32 %v7385_v45 }
  0x57   : > { %856 = vmatpush.bf16.msra.mxu0 %v6694_v36  ;;  %7234 = vmatpush.bf16.msra.mxu2 %v6694_v36  ;;  %v6690_v44 = vor.u32 %v7149_v41, %v6687_v43  ;;  %v7147_v48 = vld [vmem:[#allocation8 + $0x54] sm:$0xf]  ;;  %v6678_v49 = vor.u32 %v7148_v47, %v6677_v46  ;;  %v6679_v50 = vld [vmem:[#allocation8 + $0x58] sm:$0xf0]  ;;  %v519_v51 = vmul.f32 128.0, %v7385_v45  ;;  %s8138_s29 = sshra.s32 %s6484_s17, 4  ;;  %s8139_s29 = int_to_ptr.hbm [resolvable:$true] %s8138_s29 }
  0x58   : > { %905 = vmatpush.bf16.msra.mxu1 %v6698_v38  ;;  %v6682_v52 = vor.u32 %v7147_v48, %v6679_v50  ;;  %v6669_v53 = vld [vmem:[#allocation8 + $0x40] sm:$0xf]  ;;  %v7146_v54 = vld [vmem:[#allocation8 + $0x44] sm:$0xf0]  ;;  %v7145_v55 = vld [vmem:[#allocation8 + $0x44] sm:$0xf]  ;;  %p8145_p12 = scmp.lt.s32.totalorder %s8139_s29, %s12616_s9 }
  0x59   : > { %496 = vadd.xlane.f32.xlu2 %v475_v9  ;;  %492 = vadd.xlane.f32.xlu1 %v473_v10  ;;  %v6670_v56 = vor.u32 %v7146_v54, %v6669_v53  ;;  %v6671_v57 = vld [vmem:[#allocation8 + $0x48] sm:$0xf0]  ;;  %v520_v58 = vsub.f32 1.0, %v519_v51  ;;  %v6661_v60 = vld [vmem:[#allocation8 + $0x30] sm:$0xf] }
  0x5a   : > { %488 = vadd.xlane.f32.xlu0 %v471_v11  ;;  %v6674_v59 = vor.u32 %v7145_v55, %v6671_v57  ;;  %v7144_v61 = vld [vmem:[#allocation8 + $0x34] sm:$0xf0]  ;;  %v7143_v62 = vld [vmem:[#allocation8 + $0x34] sm:$0xf]  ;;  %v6663_v3 = vld [vmem:[#allocation8 + $0x38] sm:$0xf0] }
  0x5b   : > { %857 = vmatpush.bf16.msra.mxu0 %v6686_v42  ;;  %7235 = vmatpush.bf16.msra.mxu2 %v6686_v42  ;;  %v6662_v63 = vor.u32 %v7144_v61, %v6661_v60  ;;  %v521_v4 = vmul.f32 %v7385_v45, %v520_v58  ;;  %v6666_v5 = vor.u32 %v7143_v62, %v6663_v3  ;;  %v6653_v9 = vld [vmem:[#allocation8 + $0x20] sm:$0xf]  ;;  %v7142_v10 = vld [vmem:[#allocation8 + $0x24] sm:$0xf0]  ;;  %v7141_v11 = vld [vmem:[#allocation8 + $0x24] sm:$0xf] }
  0x5c   : > { %906 = vmatpush.bf16.msra.mxu1 %v6690_v44  ;;  %v6637_v36 = vld [vmem:[#allocation8] sm:$0xf]  ;;  %v7138_v37 = vld [vmem:[#allocation8 + $0x4] sm:$0xf0]  ;;  %v7137_v38 = vld [vmem:[#allocation8 + $0x4] sm:$0xf] }
  0x5d   : > { %v6638_v40 = vor.u32 %v7138_v37, %v6637_v36  ;;  %v6639_v41 = vld [vmem:[#allocation8 + $0x8] sm:$0xf0] }
  0x5e   : > { %v6642_v42 = vor.u32 %v7137_v38, %v6639_v41 }
  0x5f   : > { %858 = vmatpush.bf16.msra.mxu0 %v6678_v49  ;;  %7236 = vmatpush.bf16.msra.mxu2 %v6678_v49 }
  0x60   : > { %907 = vmatpush.bf16.msra.mxu1 %v6682_v52 }
  0x61   : > { %502 = vadd.xlane.f32.xlu2 %v478_v15  ;;  %500 = vadd.xlane.f32.xlu1 %v477_v16  ;;  %v6654_v15 = vor.u32 %v7142_v10, %v6653_v9  ;;  %v6655_v16 = vld [vmem:[#allocation8 + $0x28] sm:$0xf0] }
  0x62   : > { %498 = vadd.xlane.f32.xlu0 %v476_v17  ;;  %v522_v17 = vadd.f32 %v7385_v45, %v521_v4 }
  0x63   : > { %859 = vmatpush.bf16.msra.mxu0 %v6670_v56  ;;  %7237 = vmatpush.bf16.msra.mxu2 %v6670_v56 }
  0x64   : > { %908 = vmatpush.bf16.msra.mxu1 %v6674_v59 }
  0x67   : > { %860 = vmatpush.bf16.msra.mxu0 %v6662_v63  ;;  %7238 = vmatpush.bf16.msra.mxu2 %v6662_v63 }
  0x68   : > { %909 = vmatpush.bf16.msra.mxu1 %v6666_v5 }
  0x69   : > { %508 = vadd.xlane.f32.xlu2 %v481_v21  ;;  %506 = vadd.xlane.f32.xlu1 %v480_v22  ;;  %v6658_v21 = vor.u32 %v7141_v11, %v6655_v16  ;;  %v6645_v22 = vld [vmem:[#allocation8 + $0x10] sm:$0xf] }
  0x6a   : > { %504 = vadd.xlane.f32.xlu0 %v479_v23  ;;  %v7140_v23 = vld [vmem:[#allocation8 + $0x14] sm:$0xf0] }
  0x6b   : > { %861 = vmatpush.bf16.msra.mxu0 %v6654_v15  ;;  %7239 = vmatpush.bf16.msra.mxu2 %v6654_v15 }
  0x6c   : > { %910 = vmatpush.bf16.msra.mxu1 %v6658_v21 }
  0x71   : > { %512 = vadd.xlane.f32.xlu1 %v483_v27  ;;  %514 = vadd.xlane.f32.xlu2 %v484_v28  ;;  %v7139_v27 = vld [vmem:[#allocation8 + $0x14] sm:$0xf]  ;;  %v6646_v28 = vor.u32 %v7140_v23, %v6645_v22 }
  0x72   : > { %510 = vadd.xlane.f32.xlu0 %v482_v29  ;;  %v6647_v29 = vld [vmem:[#allocation8 + $0x18] sm:$0xf0] }
  0x73   : > { %v6650_v32 = vor.u32 %v7139_v27, %v6647_v29  ;;  %862 = vmatpush.bf16.msra.mxu0 %v6646_v28  ;;  %7240 = vmatpush.bf16.msra.mxu2 %v6646_v28 }
  0x75   : > { %911 = vmatpush.bf16.msra.mxu1 %v6650_v32 }
  0x77   : > { %863 = vmatpush.bf16.msra.mxu0 %v6638_v40  ;;  %7241 = vmatpush.bf16.msra.mxu2 %v6638_v40 }
  0x79   : > { %912 = vmatpush.bf16.msra.mxu1 %v6642_v42 }
  0x7a   : > { %516 = vadd.xlane.f32.xlu0 %v485_v31  ;;  %v8515_v31 = vsel %vm523_vm0, %v7385_v45, %v522_v17 }
  0x7b   : > { %12724 = vst [vmem:[#allocation20_spill] sm:$0xff] %v8515_v31 }
  0xc4   : > { %v495_v33 = vpop.xlane.xlu2 %494  ;;  %v491_v34 = vpop.xlane.xlu1 %490 }
  0xc5   : > { %v487_v35 = vpop.xlane.xlu0 %486  ;;  %v527_v44 = vmul.f32 %v8515_v31, %v491_v34  ;;  %v529_v55 = vmul.f32 %v8515_v31, %v495_v33 }
  0xc6   : > { %v525_v39 = vmul.f32 %v8515_v31, %v487_v35 }
  0xc7   : > { %v8519_v47 = vadd.f32 1e-05, %v527_v44  ;;  %v8536_v5 = vadd.f32 1e-05, %v529_v55  ;;  %v8578_v55 = vld [vmem:[%s12610_s3] ss:$0 sm:$0xff] }
  0xc8   : > { %v541_v43 = vadd.f32 1e-05, %v525_v39 }
  0xc9   : > { %vm583_vm7 = vweird.f32 %v8519_v47 }
  0xca   : > { %7386 = vrsqrt.f32 %v541_v43  ;;  %vm563_vm2 = vweird.f32 %v541_v43 }
  0xcb   : > { %7388 = vrsqrt.f32 %v8519_v47 }
  0xcc   : > { %v497_v45 = vpop.xlane.xlu2 %496  ;;  %v493_v46 = vpop.xlane.xlu1 %492 }
  0xcd   : > { %v528_v48 = vmul.f32 %v8515_v31, %v493_v46  ;;  %v489_v49 = vpop.xlane.xlu0 %488  ;;  %v530_v63 = vmul.f32 %v8515_v31, %v497_v45 }
  0xce   : > { %v526_v50 = vmul.f32 %v8515_v31, %v489_v49 }
  0xcf   : > { %v8523_v51 = vadd.f32 1e-05, %v528_v48  ;;  %v8541_v16 = vadd.f32 1e-05, %v530_v63 }
  0xd0   : > { %v542_v52 = vadd.f32 1e-05, %v526_v50  ;;  %v7387_v53 = vpop.eup %7386 }
  0xd1   : > { %v558_v54 = vmul.f32 %v7387_v53, %v541_v43  ;;  %7390 = vrsqrt.f32 %v8523_v51  ;;  %v8529_v62 = vpop.eup %7388  ;;  %vm564_vm1 = vweird.f32 %v7387_v53  ;;  %vm593_vm8 = vweird.f32 %v8523_v51 }
  0xd2   : > { %7392 = vrsqrt.f32 %v542_v52  ;;  %v578_v15 = vmul.f32 %v8529_v62, %v8519_v47  ;;  %vm8557_vm3 = vmor %vm563_vm2, %vm564_vm1  ;;  %vm573_vm5 = vweird.f32 %v542_v52  ;;  %vm584_vm12 = vweird.f32 %v8529_v62 }
  0xd3   : > { %v559_v56 = vmul.f32 %v7387_v53, %v558_v54  ;;  %vm8640_vm15 = vmor %vm583_vm7, %vm584_vm12 }
  0xd4   : > { %v503_v57 = vpop.xlane.xlu2 %502  ;;  %v501_v58 = vpop.xlane.xlu1 %500  ;;  %v579_v36 = vmul.f32 %v8529_v62, %v578_v15 }
  0xd5   : > { %v533_v59 = vmul.f32 %v8515_v31, %v503_v57  ;;  %v499_v60 = vpop.xlane.xlu0 %498  ;;  %v560_v61 = vmul.f32 0.5, %v559_v56 }
  0xd6   : > { %v580_v48 = vmul.f32 0.5, %v579_v36 }
  0xd7   : > { %v8532_v3 = vadd.f32 1e-05, %v533_v59  ;;  %v8534_v4 = vpop.eup %7390  ;;  %v561_v10 = vsub.f32 1.5, %v560_v61  ;;  %v532_v61 = vmul.f32 %v8515_v31, %v501_v58 }
  0xd8   : > { %v7393_v9 = vpop.eup %7392  ;;  %v588_v17 = vmul.f32 %v8534_v4, %v8523_v51  ;;  %vm594_vm9 = vweird.f32 %v8534_v4 }
  0xd9   : > { %7394 = vrsqrt.f32 %v8532_v3  ;;  %v568_v11 = vmul.f32 %v7393_v9, %v542_v52  ;;  %v562_v32 = vmul.f32 %v7387_v53, %v561_v10  ;;  %vm574_vm4 = vweird.f32 %v7393_v9  ;;  %vm8617_vm13 = vmor %vm593_vm8, %vm594_vm9 }
  0xda   : > { %7396 = vrsqrt.f32 %v8536_v5  ;;  %v589_v40 = vmul.f32 %v8534_v4, %v588_v17  ;;  %vm575_vm6 = vmor %vm573_vm5, %vm574_vm4  ;;  %v531_v10 = vmul.f32 %v8515_v31, %v499_v60  ;;  %vm643_vm10 = vweird.f32 %v8532_v3 }
  0xdb   : > { %v569_v21 = vmul.f32 %v7393_v9, %v568_v11  ;;  %7398 = vrsqrt.f32 %v8541_v16  ;;  %v566_v44 = vsel %vm8557_vm3, %v7387_v53, %v562_v32  ;;  %vm613_vm8 = vweird.f32 %v8541_v16 }
  0xdc   : > { %v509_v22 = vpop.xlane.xlu2 %508  ;;  %v507_v23 = vpop.xlane.xlu1 %506  ;;  %v590_v49 = vmul.f32 0.5, %v589_v40  ;;  %v717_v54 = vmul.f32 %v566_v44, %v8442_v2  ;;  %v8633_v51 = vadd.f32 1e-05, %v531_v10 }
  0xdd   : > { %v505_v27 = vpop.xlane.xlu0 %504  ;;  %v536_v28 = vmul.f32 %v8515_v31, %v509_v22  ;;  %v535_v29 = vmul.f32 %v8515_v31, %v507_v23  ;;  %v570_v33 = vmul.f32 0.5, %v569_v21  ;;  %v581_v21 = vsub.f32 1.5, %v580_v48 }
  0xde   : > { %v534_v34 = vmul.f32 %v8515_v31, %v505_v27  ;;  %v591_v22 = vsub.f32 1.5, %v590_v49  ;;  %v736_v23 = vmul.f32 %v8578_v55, %v717_v54 }
  0xdf   : > { %v8549_v35 = vpop.eup %7394  ;;  %v8553_v37 = vadd.f32 1e-05, %v536_v28  ;;  %v8555_v38 = vadd.f32 1e-05, %v535_v29  ;;  %v571_v41 = vsub.f32 1.5, %v570_v33  ;;  %v582_v54 = vmul.f32 %v8529_v62, %v581_v21 }
  0xe0   : > { %v638_v42 = vmul.f32 %v8549_v35, %v8532_v3  ;;  %v8564_v43 = vadd.f32 1e-05, %v534_v34  ;;  %v8569_v45 = vpop.eup %7396  ;;  %vm644_vm11 = vweird.f32 %v8549_v35 }
  0xe1   : > { %7400 = vrsqrt.f32 %v8553_v37  ;;  %v572_v50 = vmul.f32 %v7393_v9, %v571_v41  ;;  %v8580_v56 = vpop.eup %7398  ;;  %v598_v52 = vmul.f32 %v8569_v45, %v8536_v5  ;;  %v592_v41 = vmul.f32 %v8534_v4, %v591_v22  ;;  %vm8628_vm14 = vmor %vm643_vm10, %vm644_vm11 }
  0xe2   : > { %v639_v46 = vmul.f32 %v8549_v35, %v638_v42  ;;  %7402 = vrsqrt.f32 %v8564_v43  ;;  %v608_v39 = vmul.f32 %v8580_v56, %v8541_v16  ;;  %vm653_vm1 = vweird.f32 %v8564_v43 }
  0xe3   : > { %7404 = vrsqrt.f32 %v8555_v38  ;;  %v576_v63 = vsel %vm575_vm6, %v7393_v9, %v572_v50  ;;  %v596_v47 = vsel %vm8617_vm13, %v8534_v4, %v592_v41  ;;  %vm673_vm3 = vweird.f32 %v8553_v37 }
  0xe4   : > { %v513_v53 = vpop.xlane.xlu1 %512  ;;  %v640_v57 = vmul.f32 0.5, %v639_v46  ;;  %v718_v11 = vmul.f32 %v576_v63, %v8457_v8  ;;  %v8602_v8 = vadd.f32 1e-05, %v532_v61  ;;  %v609_v61 = vmul.f32 %v8580_v56, %v608_v39 }
  0xe5   : > { %v511_v59 = vpop.xlane.xlu0 %510  ;;  %v538_v15 = vmul.f32 %v8515_v31, %v513_v53  ;;  %vm663_vm5 = vweird.f32 %v8555_v38  ;;  %vm614_vm10 = vweird.f32 %v8580_v56  ;;  %vm603_vm11 = vweird.f32 %v8536_v5 }
  0xe6   : > { %v537_v27 = vmul.f32 %v8515_v31, %v511_v59  ;;  %v641_v58 = vsub.f32 1.5, %v640_v57  ;;  %v737_v60 = vmul.f32 %v8578_v55, %v718_v11  ;;  %7406 = vrsqrt.f32 %v8602_v8  ;;  %vm615_vm13 = vmor %vm613_vm8, %vm614_vm10 }
  0xe7   : > { %v8586_v2 = vpop.eup %7400  ;;  %v8607_v36 = vadd.f32 1e-05, %v538_v15  ;;  %v599_v59 = vmul.f32 %v8569_v45, %v598_v52  ;;  %v720_v15 = vmul.f32 %v596_v47, %v8454_v7  ;;  %v610_v4 = vmul.f32 0.5, %v609_v61 }
  0xe8   : > { %v7403_v17 = vpop.eup %7402  ;;  %v668_v29 = vmul.f32 %v8586_v2, %v8553_v37  ;;  %v752_v34 = vpack.c.bf16 %v737_v60, %v736_v23  ;;  %v8612_v40 = vadd.f32 1e-05, %v537_v27  ;;  %v642_v49 = vmul.f32 %v8549_v35, %v641_v58  ;;  %v515_v23 = vpop.xlane.xlu2 %514 }
  0xe9   : > { %v8594_v28 = vpop.eup %7404  ;;  %v648_v9 = vmul.f32 %v7403_v17, %v8564_v43  ;;  %vm654_vm0 = vweird.f32 %v7403_v17  ;;  %7408 = vrsqrt.f32 %v8607_v36  ;;  %v600_v58 = vmul.f32 0.5, %v599_v59 }
  0xea   : > { %v658_v32 = vmul.f32 %v8594_v28, %v8555_v38  ;;  %v669_v46 = vmul.f32 %v8586_v2, %v668_v29  ;;  %864 = vmatmul.bf16.vlgmr.msra.gmra.mxu0 %v752_v34  ;;  %913 = vmatmul.bf16.vlgmr.msra.gmra.mxu1 %v752_v34  ;;  %v646_v3 = vsel %vm8628_vm14, %v8549_v35, %v642_v49  ;;  %7410 = vrsqrt.f32 %v8612_v40  ;;  %vm655_vm2 = vmor %vm653_vm1, %vm654_vm0 }
  0xeb   : > { %v649_v33 = vmul.f32 %v7403_v17, %v648_v9  ;;  %7412 = vrsqrt.f32 %v8633_v51  ;;  %v586_v35 = vsel %vm8640_vm15, %v8529_v62, %v582_v54  ;;  %v725_v52 = vmul.f32 %v646_v3, %v8466_v12 }
  0xec   : > { %v659_v48 = vmul.f32 %v8594_v28, %v658_v32  ;;  %v670_v63 = vmul.f32 0.5, %v669_v46  ;;  %v8661_v22 = vpop.eup %7406  ;;  %v719_v60 = vmul.f32 %v586_v35, %v8439_v1  ;;  %vm674_vm4 = vweird.f32 %v8586_v2 }
  0xed   : > { %v650_v44 = vmul.f32 0.5, %v649_v33  ;;  %v517_v32 = vpop.xlane.xlu0 %516  ;;  %v744_v7 = vmul.f32 %v8578_v55, %v725_v52  ;;  %vm664_vm6 = vweird.f32 %v8594_v28  ;;  %v611_v33 = vsub.f32 1.5, %v610_v4  ;;  %vm8684_vm7 = vmor %vm673_vm3, %vm674_vm4 }
  0xee   : > { %v660_v10 = vmul.f32 0.5, %v659_v48  ;;  %v671_v9 = vsub.f32 1.5, %v670_v63  ;;  %v540_v39 = vmul.f32 %v8515_v31, %v517_v32  ;;  %v601_v49 = vsub.f32 1.5, %v600_v58  ;;  %vm8698_vm9 = vmor %vm663_vm5, %vm664_vm6 }
  0xef   : > { %v651_v57 = vsub.f32 1.5, %v650_v44  ;;  %v8664_v27 = vpop.eup %7408  ;;  %v738_v44 = vmul.f32 %v8578_v55, %v719_v60  ;;  %v628_v54 = vmul.f32 %v8661_v22, %v8602_v8  ;;  %v612_v61 = vmul.f32 %v8580_v56, %v611_v33 }
  0xf0   : > { %v661_v29 = vsub.f32 1.5, %v660_v10  ;;  %v8667_v62 = vpop.eup %7410  ;;  %v688_v37 = vmul.f32 %v8664_v27, %v8607_v36  ;;  %v672_v48 = vmul.f32 %v8586_v2, %v671_v9  ;;  %v8711_v38 = vadd.f32 1e-05, %v540_v39 }
  0xf1   : > { %v652_v11 = vmul.f32 %v7403_v17, %v651_v57  ;;  %v8677_v1 = vpop.eup %7412  ;;  %v678_v42 = vmul.f32 %v8667_v62, %v8612_v40  ;;  %vm604_vm12 = vweird.f32 %v8569_v45  ;;  %v629_v35 = vmul.f32 %v8661_v22, %v628_v54 }
  0xf2   : > { %v662_v46 = vmul.f32 %v8594_v28, %v661_v29  ;;  %v618_v53 = vmul.f32 %v8677_v1, %v8633_v51  ;;  %v689_v59 = vmul.f32 %v8664_v27, %v688_v37  ;;  %v676_v10 = vsel %vm8684_vm7, %v8586_v2, %v672_v48  ;;  %vm605_vm14 = vmor %vm603_vm11, %vm604_vm12 }
  0xf3   : > { %v656_v21 = vsel %vm655_vm2, %v7403_v17, %v652_v11  ;;  %v539_v17 = vmul.f32 %v8515_v31, %v515_v23  ;;  %v679_v47 = vmul.f32 %v8667_v62, %v678_v42  ;;  %v602_v11 = vmul.f32 %v8569_v45, %v601_v49 }
  0xf4   : > { %v726_v43 = vmul.f32 %v656_v21, %v8487_v20  ;;  %v739_v20 = vmul.f32 %v8578_v55, %v720_v15  ;;  %v666_v63 = vsel %vm8698_vm9, %v8594_v28, %v662_v46  ;;  %v619_v52 = vmul.f32 %v8677_v1, %v618_v53 }
  0xf5   : > { %v8707_v3 = vadd.f32 1e-05, %v539_v17  ;;  %v616_v28 = vsel %vm615_vm13, %v8580_v56, %v612_v61  ;;  %v727_v2 = vmul.f32 %v666_v63, %v8484_v19  ;;  %v728_v5 = vmul.f32 %v676_v10, %v8481_v18 }
  0xf6   : > { %v745_v12 = vmul.f32 %v8578_v55, %v726_v43  ;;  %v753_v57 = vpack.c.bf16 %v739_v20, %v738_v44  ;;  %v690_v15 = vmul.f32 0.5, %v689_v59  ;;  %v680_v21 = vmul.f32 0.5, %v679_v47 }
  0xf7   : > { %7414 = vrsqrt.f32 %v8707_v3  ;;  %v606_v16 = vsel %vm605_vm14, %v8569_v45, %v602_v11  ;;  %v722_v4 = vmul.f32 %v616_v28, %v8451_v6  ;;  %v630_v43 = vmul.f32 0.5, %v629_v35 }
  0xf8   : > { %v8681_v34 = vpack.c.bf16 %v745_v12, %v744_v7  ;;  %7416 = vrsqrt.f32 %v8711_v38  ;;  %v620_v23 = vmul.f32 0.5, %v619_v52  ;;  %v746_v58 = vmul.f32 %v8578_v55, %v727_v2 }
  0xf9   : > { %v747_v9 = vmul.f32 %v8578_v55, %v728_v5  ;;  %v691_v56 = vsub.f32 1.5, %v690_v15  ;;  %v681_v60 = vsub.f32 1.5, %v680_v21  ;;  %v721_v19 = vmul.f32 %v606_v16, %v8436_v0 }
  0xfa   : > { %884 = vmatmul.bf16.vlgmr.msra.gmra.mxu2 %v8681_v34  ;;  %869 = vmatmul.bf16.gmra.mxu0 %v753_v57  ;;  %vm693_vm15 = vweird.f32 %v8607_v36  ;;  %vm694_vm0 = vweird.f32 %v8664_v27  ;;  %vm683_vm1 = vweird.f32 %v8612_v40  ;;  %vm684_vm2 = vweird.f32 %v8667_v62 }
  0xfb   : > { %918 = vmatmul.bf16.gmra.mxu1 %v753_v57  ;;  %v741_v6 = vmul.f32 %v8578_v55, %v722_v4  ;;  %v631_v45 = vsub.f32 1.5, %v630_v43  ;;  %v621_v32 = vsub.f32 1.5, %v620_v23  ;;  %v757_v12 = vpack.c.bf16 %v747_v9, %v746_v58  ;;  %vm8749_vm3 = vmor %vm693_vm15, %vm694_vm0 }
  0xfc   : > { %v740_v20 = vmul.f32 %v8578_v55, %v721_v19  ;;  %v682_v40 = vmul.f32 %v8667_v62, %v681_v60  ;;  %v692_v17 = vmul.f32 %v8664_v27, %v691_v56  ;;  %vm633_vm4 = vweird.f32 %v8602_v8  ;;  %vm8760_vm6 = vmor %vm683_vm1, %vm684_vm2 }
  0xfd   : > { %v8737_v29 = vpop.eup %7414  ;;  %vm634_vm5 = vweird.f32 %v8661_v22  ;;  %vm624_vm7 = vweird.f32 %v8677_v1  ;;  %v622_v41 = vmul.f32 %v8677_v1, %v621_v32  ;;  %v632_v42 = vmul.f32 %v8661_v22, %v631_v45 }
  0xfe   : > { %v8740_v18 = vpop.eup %7416  ;;  %v698_v7 = vmul.f32 %v8737_v29, %v8707_v3  ;;  %v754_v37 = vpack.c.bf16 %v741_v6, %v740_v20  ;;  %vm635_vm8 = vmor %vm633_vm4, %vm634_vm5  ;;  %v686_v8 = vsel %vm8760_vm6, %v8667_v62, %v682_v40  ;;  %v696_v46 = vsel %vm8749_vm3, %v8664_v27, %v692_v17 }
  0xff   : > { %v708_v36 = vmul.f32 %v8740_v18, %v8711_v38  ;;  %vm623_vm9 = vweird.f32 %v8633_v51  ;;  %v636_v49 = vsel %vm635_vm8, %v8661_v22, %v632_v42  ;;  %v729_v50 = vmul.f32 %v686_v8, %v8502_v26 }
 0x100   : > { %v699_v39 = vmul.f32 %v8737_v29, %v698_v7  ;;  %vm625_vm10 = vmor %vm623_vm9, %vm624_vm7  ;;  %v730_v54 = vmul.f32 %v696_v46, %v8496_v24  ;;  %v724_v62 = vmul.f32 %v636_v49, %v8469_v13  ;;  %vm703_vm11 = vweird.f32 %v8707_v3 }
 0x101   : > { %v709_v44 = vmul.f32 %v8740_v18, %v708_v36  ;;  %v626_v48 = vsel %vm625_vm10, %v8677_v1, %v622_v41  ;;  %v748_v61 = vmul.f32 %v8578_v55, %v729_v50  ;;  %vm704_vm12 = vweird.f32 %v8737_v29 }
 0x102   : > { %v700_v53 = vmul.f32 0.5, %v699_v39  ;;  %v723_v59 = vmul.f32 %v626_v48, %v8472_v14  ;;  %v749_v27 = vmul.f32 %v8578_v55, %v730_v54  ;;  %vm713_vm13 = vweird.f32 %v8711_v38  ;;  %vm705_vm15 = vmor %vm703_vm11, %vm704_vm12 }
 0x103   : > { %v710_v57 = vmul.f32 0.5, %v709_v44  ;;  %vm714_vm14 = vweird.f32 %v8740_v18  ;;  %v743_v14 = vmul.f32 %v8578_v55, %v724_v62  ;;  %vm1240_vm1 = vcmask 7168  }
 0x104   : > { %v701_v51 = vsub.f32 1.5, %v700_v53  ;;  %v742_v24 = vmul.f32 %v8578_v55, %v723_v59  ;;  %v758_v26 = vpack.c.bf16 %v749_v27, %v748_v61  ;;  %vm715_vm0 = vmor %vm713_vm13, %vm714_vm14  ;;  %vm1079_vm2 = vcmask 1039360  }
 0x105   : > { %v711_v47 = vsub.f32 1.5, %v710_v57  ;;  %vm1674_vm5 = vcmask 261120  }
 0x106   : > { %v702_v13 = vmul.f32 %v8737_v29, %v701_v51  ;;  %v755_v1 = vpack.c.bf16 %v743_v14, %v742_v24 }
 0x107   : > { %v712_v22 = vmul.f32 %v8740_v18, %v711_v47 }
 0x108   : > { %v706_v3 = vsel %vm705_vm15, %v8737_v29, %v702_v13 }
 0x109   : > { %v716_v38 = vsel %vm715_vm0, %v8740_v18, %v712_v22  ;;  %v731_v63 = vmul.f32 %v706_v3, %v8499_v25 }
 0x10a   : > { %889 = vmatmul.bf16.gmra.mxu2 %v757_v12  ;;  %874 = vmatmul.bf16.gmra.mxu0 %v754_v37  ;;  %v732_v10 = vmul.f32 %v716_v38, %v8511_v30 }
 0x10b   : > { %923 = vmatmul.bf16.gmra.mxu1 %v754_v37  ;;  %v750_v11 = vmul.f32 %v8578_v55, %v731_v63 }
 0x10c   : > { %v751_v35 = vmul.f32 %v8578_v55, %v732_v10 }
 0x10e   : > { %v759_v52 = vpack.c.bf16 %v751_v35, %v750_v11 }
 0x11a   : > { %894 = vmatmul.bf16.gmra.mxu2 %v758_v26  ;;  %879 = vmatmul.bf16.gmra.mxu0 %v755_v1 }
 0x11b   : > { %928 = vmatmul.bf16.gmra.mxu1 %v755_v1 }
 0x12a   : > { %899 = vmatmul.bf16.gmra.mxu2 %v759_v52 }
 0x12b   : > { %933 = vmatmul.bf16.gmra.mxu1 %v8681_v34 }
 0x13b   : > { %938 = vmatmul.bf16.gmra.mxu1 %v757_v12 }
 0x14b   : > { %943 = vmatmul.bf16.gmra.mxu1 %v758_v26 }
 0x15b   : > { %948 = vmatmul.bf16.gmra.mxu1 %v759_v52 }
 0x167   : > { %v8799_v28 = vpop.f32.mrf.mxu1  ;;  %v8801_v2 = vpop.f32.mrf.mxu0 }
 0x168   : > { %12741 = vst [vmem:[#allocation21_spill] sm:$0xff] %v8799_v28 }
 0x169   : > { %12742 = vst [vmem:[#allocation22_spill] sm:$0xff] %v8801_v2 }
 0x16f   : > { %v8803_v5 = vpop.f32.mrf.mxu1  ;;  %v8805_v25 = vpop.f32.mrf.mxu0 }
 0x170   : > { %12743 = vst [vmem:[#allocation23_spill] sm:$0xff] %v8803_v5 }
 0x171   : > { %12744 = vst [vmem:[#allocation24_spill] sm:$0xff] %v8805_v25 }
 0x177   : > { %v8813_v55 = vpop.f32.mrf.mxu0 }
 0x178   : > { %v8807_v30 = vpop.f32.mrf.mxu1  ;;  %12746 = vst [vmem:[#allocation26_spill] sm:$0xff] %v8813_v55 }
 0x179   : > { %12745 = vst [vmem:[#allocation25_spill] sm:$0xff] %v8807_v30 }
 0x17d   : > { %v8809_v15 = vpop.f32.mrf.mxu2 }
 0x17e   : > { %1047 = vrot.lane.b32.xlu2 %v8809_v15, %s8219_s23 }
 0x17f   : > { %v8825_v16 = vpop.f32.mrf.mxu0 }
 0x180   : > { %v8815_v34 = vpop.f32.mrf.mxu1  ;;  %12748 = vst [vmem:[#allocation28_spill] sm:$0xff] %v8825_v16 }
 0x181   : > { %12747 = vst [vmem:[#allocation27_spill] sm:$0xff] %v8815_v34 }
 0x185   : > { %v8817_v21 = vpop.f32.mrf.mxu2 }
 0x186   : > { %1224 = vrot.lane.b32.xlu2 %v8809_v15, %s8220_s22  ;;  %1226 = vrot.lane.b32.xlu1 %v8817_v21, %s8220_s22 }
 0x187   : > { %1051 = vrot.lane.b32.xlu0 %v8817_v21, %s8219_s23  ;;  %v8835_v58 = vpop.f32.mrf.mxu0 }
 0x188   : > { %v8827_v4 = vpop.f32.mrf.mxu1 }
 0x189   : > { %12749 = vst [vmem:[#allocation29_spill] sm:$0xff] %v8827_v4 }
 0x18d   : > { %v8829_v43 = vpop.f32.mrf.mxu2 }
 0x18e   : > { %12750 = vst [vmem:[#allocation30_spill] sm:$0xff] %v8829_v43  ;;  %1055 = vrot.lane.b32.xlu1 %v8829_v43, %s8219_s23 }
 0x18f   : > { %v8849_v60 = vpop.f32.mrf.mxu0 }
 0x190   : > { %v8833_v23 = vpop.f32.mrf.mxu1 }
 0x191   : > { %12751 = vst [vmem:[#allocation31_spill] sm:$0xff] %v8833_v23 }
 0x195   : > { %v8837_v9 = vpop.f32.mrf.mxu2 }
 0x196   : > { %12752 = vst [vmem:[#allocation32_spill] sm:$0xff] %v8837_v9  ;;  %1228 = vrot.lane.b32.xlu1 %v8829_v43, %s8220_s22  ;;  %1230 = vrot.lane.b32.xlu0 %v8837_v9, %s8220_s22 }
 0x197   : > { %1059 = vrot.lane.b32.xlu2 %v8837_v9, %s8219_s23  ;;  %v8867_v6 = vpop.f32.mrf.mxu0 }
 0x198   : > { %v8845_v29 = vpop.f32.mrf.mxu1  ;;  %12757 = vst [vmem:[#allocation37_spill] sm:$0xff] %v8867_v6 }
 0x199   : > { %12753 = vst [vmem:[#allocation33_spill] sm:$0xff] %v8845_v29 }
 0x19d   : > { %v8847_v56 = vpop.f32.mrf.mxu2 }
 0x19e   : > { %12754 = vst [vmem:[#allocation34_spill] sm:$0xff] %v8847_v56  ;;  %1031 = vrot.lane.b32.xlu1 %v8835_v58, %s8219_s23  ;;  %1033 = vrot.lane.b32.xlu0 %v8827_v4, %s8219_s23 }
 0x19f   : > { %1035 = vrot.lane.b32.xlu2 %v8849_v60, %s8219_s23  ;;  %v8879_v7 = vpop.f32.mrf.mxu0 }
 0x1a0   : > { %v8857_v19 = vpop.f32.mrf.mxu1  ;;  %12759 = vst [vmem:[#allocation39_spill] sm:$0xff] %v8879_v7 }
 0x1a1   : > { %12755 = vst [vmem:[#allocation35_spill] sm:$0xff] %v8857_v19 }
 0x1a5   : > { %v8859_v18 = vpop.f32.mrf.mxu2 }
 0x1a6   : > { %12756 = vst [vmem:[#allocation36_spill] sm:$0xff] %v8859_v18  ;;  %1063 = vrot.lane.b32.xlu0 %v8847_v56, %s8219_s23  ;;  %1067 = vrot.lane.b32.xlu1 %v8859_v18, %s8219_s23 }
 0x1a7   : > { %1234 = vrot.lane.b32.xlu2 %v8859_v18, %s8220_s22 }
 0x1a8   : > { %v8875_v32 = vpop.f32.mrf.mxu1 }
 0x1ad   : > { %v8869_v45 = vpop.f32.mrf.mxu2 }
 0x1ae   : > { %12758 = vst [vmem:[#allocation38_spill] sm:$0xff] %v8869_v45  ;;  %1232 = vrot.lane.b32.xlu0 %v8847_v56, %s8220_s22  ;;  %1071 = vrot.lane.b32.xlu1 %v8869_v45, %s8219_s23 }
 0x1af   : > { %1041 = vrot.lane.b32.xlu2 %v8845_v29, %s8219_s23 }
 0x1b0   : > { %v8887_v12 = vpop.f32.mrf.mxu1 }
 0x1b5   : > { %v8897_v36 = vpop.f32.mrf.mxu2 }
 0x1b6   : > { %1039 = vrot.lane.b32.xlu0 %v8867_v6, %s8219_s23  ;;  %1043 = vrot.lane.b32.xlu1 %v8879_v7, %s8219_s23  ;;  %12760 = vst [vmem:[#allocation40_spill] sm:$0xff] %v8897_v36 }
 0x1b7   : > { %1172 = vrot.lane.b32.xlu2 %v8845_v29, %s8220_s22 }
 0x1b8   : > { %v8895_v0 = vpop.f32.mrf.mxu1 }
 0x1be   : > { %1220 = vrot.lane.b32.xlu0 %v8867_v6, %s8220_s22  ;;  %1174 = vrot.lane.b32.xlu1 %v8857_v19, %s8220_s22 }
 0x1bf   : > { %1236 = vrot.lane.b32.xlu2 %v8869_v45, %s8220_s22 }
 0x1c0   : > { %v8905_v20 = vpop.f32.mrf.mxu1 }
 0x1c6   : > { %1045 = vrot.lane.b32.xlu0 %v8857_v19, %s8219_s23  ;;  %1238 = vrot.lane.b32.xlu1 %v8897_v36, %s8220_s22  ;;  %v1366_v19 = vld [vmem:[#allocation5 + $0xe8] sm:$0xff] }
 0x1c7   : > { %1222 = vrot.lane.b32.xlu2 %v8879_v7, %s8220_s22 }
 0x1c8   : > { %v8917_v40 = vpop.f32.mrf.mxu1 }
 0x1ce   : > { %1049 = vrot.lane.b32.xlu1 %v8875_v32, %s8219_s23  ;;  %1075 = vrot.lane.b32.xlu0 %v8897_v36, %s8219_s23 }
 0x1cf   : > { %1053 = vrot.lane.b32.xlu2 %v8887_v12, %s8219_s23 }
 0x1d0   : > { %v8929_v33 = vpop.f32.mrf.mxu1 }
 0x1d6   : > { %1176 = vrot.lane.b32.xlu1 %v8875_v32, %s8220_s22  ;;  %1178 = vrot.lane.b32.xlu0 %v8887_v12, %s8220_s22 }
 0x1d7   : > { %1182 = vrot.lane.b32.xlu2 %v8905_v20, %s8220_s22 }
 0x1d8   : > { %v8925_v17 = vpop.permute.xlu2 %1047  ;;  %v8939_v39 = vpop.f32.mrf.mxu1 }
 0x1de   : > { %1061 = vrot.lane.b32.xlu1 %v8905_v20, %s8219_s23  ;;  %1057 = vrot.lane.b32.xlu0 %v8895_v0, %s8219_s23 }
 0x1df   : > { %1065 = vrot.lane.b32.xlu2 %v8917_v40, %s8219_s23 }
 0x1e0   : > { %v8937_v37 = vpop.permute.xlu2 %1224  ;;  %v8949_v42 = vpop.f32.mrf.mxu1 }
 0x1e6   : > { %1186 = vrot.lane.b32.xlu1 %v8929_v33, %s8220_s22  ;;  %1180 = vrot.lane.b32.xlu0 %v8895_v0, %s8220_s22 }
 0x1e7   : > { %1184 = vrot.lane.b32.xlu2 %v8917_v40, %s8220_s22 }
 0x1ee   : > { %1188 = vrot.lane.b32.xlu1 %v8939_v39, %s8220_s22  ;;  %1069 = vrot.lane.b32.xlu0 %v8929_v33, %s8219_s23 }
 0x1ef   : > { %1073 = vrot.lane.b32.xlu2 %v8939_v39, %s8219_s23 }
 0x1f1   : > { %v8947_v41 = vpop.permute.xlu2 %1059 }
 0x1f6   : > { %1037 = vrot.lane.b32.xlu1 %v8833_v23, %s8219_s23  ;;  %1190 = vrot.lane.b32.xlu0 %v8949_v42, %s8220_s22 }
 0x1f7   : > { %1077 = vrot.lane.b32.xlu2 %v8949_v42, %s8219_s23 }
 0x1f8   : > { %v8957_v44 = vpop.permute.xlu1 %1226 }
 0x1f9   : > { %v8959_v8 = vpop.permute.xlu2 %1035  ;;  %v8967_v46 = vpop.permute.xlu0 %1051 }
 0x1fe   : > { %1216 = vrot.lane.b32.xlu1 %v8835_v58, %s8220_s22  ;;  %1168 = vrot.lane.b32.xlu0 %v8827_v4, %s8220_s22 }
 0x1ff   : > { %1170 = vrot.lane.b32.xlu2 %v8833_v23, %s8220_s22  ;;  %v1430_v23 = vld [vmem:[#allocation7 + $0xe8] sm:$0xff] }
 0x200   : > { %v8969_v48 = vpop.permute.xlu1 %1055 }
 0x201   : > { %v8971_v49 = vpop.permute.xlu2 %1234 }
 0x202   : > { %12761 = vst [vmem:[#allocation41_spill] sm:$0xff] %v8971_v49 }
 0x206   : > { %1025 = vrot.lane.b32.xlu1 %v8807_v30, %s8219_s23  ;;  %1218 = vrot.lane.b32.xlu0 %v8849_v60, %s8220_s22 }
 0x207   : > { %1023 = vrot.lane.b32.xlu2 %v8813_v55, %s8219_s23 }
 0x208   : > { %v8979_v50 = vpop.permute.xlu1 %1228  ;;  %v8981_v54 = vpop.permute.xlu0 %1230 }
 0x209   : > { %v8983_v53 = vpop.permute.xlu2 %1041 }
 0x20a   : > { %12762 = vst [vmem:[#allocation42_spill] sm:$0xff] %v8983_v53 }
 0x20e   : > { %1164 = vrot.lane.b32.xlu1 %v8807_v30, %s8220_s22  ;;  %1027 = vrot.lane.b32.xlu0 %v8825_v16, %s8219_s23 }
 0x20f   : > { %1029 = vrot.lane.b32.xlu2 %v8815_v34, %s8219_s23 }
 0x210   : > { %v8991_v57 = vpop.permute.xlu1 %1031  ;;  %v8993_v59 = vpop.permute.xlu0 %1033 }
 0x211   : > { %v8995_v62 = vpop.permute.xlu2 %1172 }
 0x216   : > { %1214 = vrot.lane.b32.xlu1 %v8825_v16, %s8220_s22  ;;  %1166 = vrot.lane.b32.xlu0 %v8815_v34, %s8220_s22 }
 0x217   : > { %1212 = vrot.lane.b32.xlu2 %v8813_v55, %s8220_s22  ;;  %v12636_v55 = vlaneseq }
 0x218   : > { %v9003_v61 = vpop.permute.xlu1 %1067  ;;  %v9005_v27 = vpop.permute.xlu0 %1063 }
 0x219   : > { %12763 = vst [vmem:[#allocation43_spill] sm:$0xff] %v9003_v61  ;;  %v9007_v51 = vpop.permute.xlu2 %1236  ;;  %v9068_v16 = vand.u32 127, %v12636_v55 }
 0x21a   : > { %12764 = vst [vmem:[#allocation44_spill] sm:$0xff] %v9005_v27 }
 0x21b   : > { %12765 = vst [vmem:[#allocation45_spill] sm:$0xff] %v9007_v51 }
 0x21c   : > { %12775 = vst [vmem:[#allocation55_spill] sm:$0xff] %v9068_v16 }
 0x21e   : > { %1019 = vrot.lane.b32.xlu1 %v8805_v25, %s8219_s23  ;;  %1015 = vrot.lane.b32.xlu0 %v8801_v2, %s8219_s23 }
 0x21f   : > { %1017 = vrot.lane.b32.xlu2 %v8799_v28, %s8219_s23 }
 0x220   : > { %v9015_v47 = vpop.permute.xlu1 %1071  ;;  %v9017_v24 = vpop.permute.xlu0 %1232 }
 0x221   : > { %12766 = vst [vmem:[#allocation46_spill] sm:$0xff] %v9015_v47  ;;  %v9019_v14 = vpop.permute.xlu2 %1222 }
 0x222   : > { %12767 = vst [vmem:[#allocation47_spill] sm:$0xff] %v9017_v24 }
 0x226   : > { %1162 = vrot.lane.b32.xlu1 %v8803_v5, %s8220_s22  ;;  %1021 = vrot.lane.b32.xlu0 %v8803_v5, %s8219_s23  ;;  %v956_v5 = vadd.s32 128, %v9068_v16  ;;  %s8140_s23 = scalar_lea.hbm %s8139_s29, 128 }
 0x227   : > { %1160 = vrot.lane.b32.xlu2 %v8799_v28, %s8220_s22  ;;  %p8141_p1 = scmp.ne.s32.totalorder %s8139_s29, %s8140_s23 }
 0x228   : > { %v9027_v26 = vpop.permute.xlu1 %1043  ;;  %v9029_v13 = vpop.permute.xlu0 %1039 }
 0x229   : > { %12768 = vst [vmem:[#allocation48_spill] sm:$0xff] %v9029_v13  ;;  %v9031_v22 = vpop.permute.xlu2 %1053  ;;  %v1428_v13 = vld [vmem:[#allocation7 + $0xd8] sm:$0xff]  ;;  %p8142_p3 = pnand %p8141_p1, %p8377_p4 }
 0x22b   : > { %p8143_p5 = pneg %p8142_p3 }
 0x22e   : > { %1208 = vrot.lane.b32.xlu0 %v8801_v2, %s8220_s22 }
 0x22f   : > { %1210 = vrot.lane.b32.xlu2 %v8805_v25, %s8220_s22  ;;  %v968_v25 = vand.u32 1, %v956_v5 }
 0x230   : > { %v9037_v1 = vpop.permute.xlu1 %1174  ;;  %v9039_v3 = vpop.permute.xlu0 %1220 }
 0x231   : > { %12769 = vst [vmem:[#allocation49_spill] sm:$0xff] %v9039_v3  ;;  %v9041_v38 = vpop.permute.xlu2 %1182  ;;  %vm9084_vm3 = vcmp.eq.s32.totalorder %v968_v25, 0  ;;  %v1345_v25 = vld [vmem:[#allocation5 + $0x40] sm:$0xff] }
 0x238   : > { %v9043_v63 = vpop.permute.xlu1 %1238  ;;  %v9045_v10 = vpop.permute.xlu0 %1045 }
 0x239   : > { %v9047_v11 = vpop.permute.xlu2 %1065 }
 0x23a   : > { %12770 = vst [vmem:[#allocation50_spill] sm:$0xff] %v9047_v11 }
 0x240   : > { %v9049_v35 = vpop.permute.xlu1 %1049  ;;  %v9051_v52 = vpop.permute.xlu0 %1075 }
 0x241   : > { %12771 = vst [vmem:[#allocation51_spill] sm:$0xff] %v9051_v52  ;;  %v9053_v31 = vpop.permute.xlu2 %1184 }
 0x242   : > { %12772 = vst [vmem:[#allocation52_spill] sm:$0xff] %v9053_v31 }
 0x248   : > { %v9055_v45 = vpop.permute.xlu1 %1176  ;;  %v9057_v36 = vpop.permute.xlu0 %1178 }
 0x249   : > { %v9059_v56 = vpop.permute.xlu2 %1073 }
 0x24a   : > { %12773 = vst [vmem:[#allocation53_spill] sm:$0xff] %v9059_v56  ;;  %v1158_v4 = vsel %vm1079_vm2, %v9059_v56, %v9015_v47 }
 0x250   : > { %v9061_v18 = vpop.permute.xlu1 %1061  ;;  %v9063_v9 = vpop.permute.xlu0 %1057 }
 0x251   : > { %v9065_v43 = vpop.permute.xlu2 %1077 }
 0x252   : > { %12774 = vst [vmem:[#allocation54_spill] sm:$0xff] %v9065_v43 }
 0x258   : > { %v9070_v6 = vpop.permute.xlu1 %1186  ;;  %v9072_v7 = vpop.permute.xlu0 %1180 }
 0x259   : > { %12776 = vst [vmem:[#allocation56_spill] sm:$0xff] %v9070_v6  ;;  %v9075_v28 = vpop.permute.xlu2 %1170  ;;  %v1254_v47 = vsel %vm1240_vm1, %v8971_v49, %v9070_v6  ;;  %v1362_v6 = vld [vmem:[#allocation5 + $0xc8] sm:$0xff] }
 0x260   : > { %v9077_v2 = vpop.permute.xlu1 %1188  ;;  %v9079_v30 = vpop.permute.xlu0 %1069 }
 0x261   : > { %12777 = vst [vmem:[#allocation57_spill] sm:$0xff] %v9077_v2  ;;  %v1255_v55 = vsel %vm1240_vm1, %v9007_v51, %v9077_v2  ;;  %v1157_v29 = vsel %vm1079_vm2, %v9079_v30, %v9003_v61  ;;  %v9096_v53 = vpop.permute.xlu2 %1023  ;;  %v1353_v2 = vld [vmem:[#allocation5 + $0x80] sm:$0xff]  ;;  %v1253_v51 = vsel %vm1240_vm1, %v9017_v24, %v9053_v31  ;;  %v1364_v61 = vld [vmem:[#allocation5 + $0xd8] sm:$0xff] }
 0x262   : > { %12778 = vst [vmem:[#allocation58_spill] sm:$0xff] %v9079_v30  ;;  %v1334_v5 = vsel %vm9084_vm3, %v1158_v4, %v1255_v55  ;;  %v1332_v55 = vsel %vm9084_vm3, %v1157_v29, %v1254_v47  ;;  %v1358_v4 = vld [vmem:[#allocation5 + $0xa8] sm:$0xff]  ;;  %v1398_v30 = vmul.f32 %v1366_v19, %v8939_v39  ;;  %v9115_v24 = vmul.f32 %v1353_v2, %v8809_v15  ;;  %v1432_v19 = vld [vmem:[#allocation7 + $0xf8] sm:$0xff] }
 0x263   : > { %12781 = vst [vmem:[#allocation59_spill] sm:$0xff] %v9096_v53  ;;  %v1462_v56 = vmul.f32 %v1430_v23, %v1334_v5  ;;  %v1156_v53 = vsel %vm1079_vm2, %v9047_v11, %v9005_v27  ;;  %v9118_v23 = vmul.f32 %v1345_v25, %v8835_v58  ;;  %v1368_v5 = vld [vmem:[#allocation5 + $0xf8] sm:$0xff]  ;;  %v1426_v29 = vld [vmem:[#allocation7 + $0xc8] sm:$0xff]  ;;  %v1159_v27 = vsel %vm1079_vm2, %v9065_v43, %v9051_v52 }
 0x264   : > { %v1330_v47 = vsel %vm9084_vm3, %v1156_v53, %v1253_v51  ;;  %v1360_v39 = vld [vmem:[#allocation5 + $0xb8] sm:$0xff]  ;;  %v1460_v49 = vmul.f32 %v1428_v13, %v1332_v55  ;;  %v1390_v15 = vmul.f32 %v1358_v4, %v8895_v0  ;;  %v961_v58 = vand.u32 1, %v9068_v16  ;;  %v1422_v16 = vld [vmem:[#allocation7 + $0xa8] sm:$0xff] }
 0x265   : > { %v1494_v11 = vadd.f32 %v1462_v56, %v1398_v30  ;;  %v1251_v53 = vsel %vm1240_vm1, %v8979_v50, %v9072_v7  ;;  %v1396_v25 = vmul.f32 %v1364_v61, %v8929_v33  ;;  %v1400_v30 = vmul.f32 %v1368_v5, %v8949_v42 }
 0x266   : > { %v1458_v56 = vmul.f32 %v1426_v29, %v1330_v47  ;;  %v1392_v55 = vmul.f32 %v1360_v39, %v8905_v20  ;;  %v1394_v52 = vmul.f32 %v1362_v6, %v8917_v40  ;;  %v1155_v0 = vsel %vm1079_vm2, %v9061_v18, %v8947_v41 }
 0x267   : > { %v1154_v4 = vsel %vm1079_vm2, %v9063_v9, %v8969_v48  ;;  %v1592_v61 = vpack.c.bf16 %v1494_v11, %v1494_v11  ;;  %v1492_v42 = vadd.f32 %v1460_v49, %v1396_v25  ;;  %v1084_v20 = vsel %vm1079_vm2, %v8991_v57, %v8993_v59  ;;  %v1409_v25 = vld [vmem:[#allocation7 + $0x40] sm:$0xff] }
 0x268   : > { %v9110_v3 = vpop.permute.xlu1 %1037  ;;  %v9112_v31 = vpop.permute.xlu0 %1190  ;;  %v1326_v33 = vsel %vm9084_vm3, %v1154_v4, %v1251_v53  ;;  %v1089_v6 = vsel %vm1079_vm2, %v8967_v46, %v9031_v22  ;;  %v1252_v40 = vsel %vm1240_vm1, %v8981_v54, %v9041_v38  ;;  %vm9156_vm4 = vcmp.eq.s32.totalorder %v961_v58, 0  ;;  %v1424_v53 = vld [vmem:[#allocation7 + $0xb8] sm:$0xff] }
 0x269   : > { %v1256_v2 = vsel %vm1240_vm1, %v9043_v63, %v9112_v31  ;;  %v9160_v29 = vpop.permute.xlu2 %1029  ;;  %v1490_v49 = vadd.f32 %v1458_v56, %v1394_v52  ;;  %v1249_v11 = vsel %vm1240_vm1, %v8937_v37, %v9055_v45  ;;  %v1297_v47 = vsel %vm1240_vm1, %v9055_v45, %v8937_v37 }
 0x26a   : > { %v1336_v51 = vsel %vm9084_vm3, %v1159_v27, %v1256_v2  ;;  %v1298_v58 = vsel %vm1240_vm1, %v9057_v36, %v8957_v44  ;;  %v1328_v52 = vsel %vm9084_vm3, %v1155_v0, %v1252_v40  ;;  %v1664_v45 = vunpack.c.l.b16 %v1592_v61  ;;  %v1355_v61 = vld [vmem:[#allocation5 + $0x90] sm:$0xff] }
 0x26b   : > { %v1464_v13 = vmul.f32 %v1432_v19, %v1336_v51  ;;  %v1454_v51 = vmul.f32 %v1422_v16, %v1326_v33  ;;  %v1591_v37 = vpack.c.bf16 %v1492_v42, %v1492_v42  ;;  %v1153_v4 = vsel %vm1079_vm2, %v9031_v22, %v8967_v46  ;;  %v1347_v42 = vld [vmem:[#allocation5 + $0x50] sm:$0xff]  ;;  %v1417_v46 = vld [vmem:[#allocation7 + $0x80] sm:$0xff] }
 0x26c   : > { %v1088_v0 = vsel %vm1079_vm2, %v8925_v17, %v9049_v35  ;;  %v1152_v16 = vsel %vm1079_vm2, %v9049_v35, %v8925_v17  ;;  %v1250_v33 = vsel %vm1240_vm1, %v8957_v44, %v9057_v36  ;;  %v1456_v40 = vmul.f32 %v1424_v53, %v1328_v52  ;;  %v1418_v36 = vld [vmem:[#allocation7 + $0x88] sm:$0xff]  ;;  %v1419_v44 = vld [vmem:[#allocation7 + $0x90] sm:$0xff]  ;;  %v1420_v35 = vld [vmem:[#allocation7 + $0x98] sm:$0xff] }
 0x26d   : > { %v1496_v27 = vadd.f32 %v1464_v13, %v1400_v30  ;;  %v1321_v22 = vsel %vm9156_vm4, %v1088_v0, %v1297_v47  ;;  %v1322_v43 = vsel %vm9084_vm3, %v1152_v16, %v1249_v11  ;;  %v1323_v17 = vsel %vm9156_vm4, %v1089_v6, %v1298_v58  ;;  %v1356_v6 = vld [vmem:[#allocation5 + $0x98] sm:$0xff] }
 0x26e   : > { %v1486_v53 = vadd.f32 %v1454_v51, %v1390_v15  ;;  %v1663_v52 = vunpack.c.l.b16 %v1591_v37  ;;  %v1387_v47 = vmul.f32 %v1355_v61, %v8817_v21  ;;  %v1151_v58 = vsel %vm1079_vm2, %v9045_v10, %v9027_v26 }
 0x26f   : > { %v1593_v19 = vpack.c.bf16 %v1496_v27, %v1496_v27  ;;  %v1354_v27 = vld [vmem:[#allocation5 + $0x88] sm:$0xff]  ;;  %v1450_v21 = vmul.f32 %v1418_v36, %v1322_v43  ;;  %v1451_v0 = vmul.f32 %v1419_v44, %v1323_v17  ;;  %v1085_v61 = vsel %vm1079_vm2, %v8959_v8, %v9110_v3  ;;  %v1416_v36 = vld [vmem:[#allocation7 + $0x78] sm:$0xff] }
 0x270   : > { %v9168_v39 = vpop.permute.xlu1 %1216  ;;  %v9170_v2 = vpop.permute.xlu0 %1168  ;;  %v1386_v11 = vmul.f32 %v1354_v27, %v8875_v32  ;;  %v1411_v32 = vld [vmem:[#allocation7 + $0x50] sm:$0xff]  ;;  %v1248_v43 = vsel %vm1240_vm1, %v9019_v14, %v9037_v1  ;;  %v12786_v27 = vld [vmem:[#allocation49_spill] sm:$0xff] }
 0x271   : > { %v1293_v30 = vsel %vm1240_vm1, %v9170_v2, %v9168_v39  ;;  %v1665_v56 = vunpack.c.l.b16 %v1593_v19  ;;  %v9215_v16 = vpop.permute.xlu2 %1212 }
 0x272   : > { %v1313_v13 = vsel %vm9156_vm4, %v1084_v20, %v1293_v30  ;;  %v1590_v20 = vpack.c.bf16 %v1490_v49, %v1490_v49  ;;  %v1324_v49 = vsel %vm9084_vm3, %v1153_v4, %v1250_v33  ;;  %v1449_v4 = vmul.f32 %v1417_v46, %v1321_v22 }
 0x273   : > { %v1441_v19 = vmul.f32 %v1409_v25, %v1313_v13  ;;  %v9194_v30 = vpack.c.b16 %v1665_v56, %v1664_v45  ;;  %v1379_v45 = vmul.f32 %v1347_v42, %v8849_v60  ;;  %v1488_v13 = vadd.f32 %v1456_v40, %v1392_v55 }
 0x274   : > { %v1662_v56 = vunpack.c.l.b16 %v1590_v20  ;;  %v1452_v60 = vmul.f32 %v1420_v35, %v1324_v49  ;;  %v1588_v33 = vpack.c.bf16 %v1486_v53, %v1486_v53  ;;  %v1247_v20 = vsel %vm1240_vm1, %v12786_v27, %v8995_v62  ;;  %v12787_v53 = vld [vmem:[#allocation48_spill] sm:$0xff] }
 0x275   : > { %12784 = vst [vmem:[#allocation60_spill] sm:$0xff] %v9194_v30  ;;  %v1721_v25 = vsel %vm1674_vm5, %v9194_v30, 0  ;;  %v1473_v15 = vadd.f32 %v1441_v19, %v9118_v23  ;;  %v1388_v23 = vmul.f32 %v1356_v6, %v8887_v12  ;;  %v1320_v19 = vsel %vm9084_vm3, %v1151_v58, %v1248_v43 }
 0x276   : > { %1723 = vmatpush.bf16.xpose.msrb.mxu2 %v1721_v25  ;;  %2257 = vmatpush.bf16.xpose.msrb.mxu0 %v1721_v25  ;;  %v9222_v42 = vpack.c.b16 %v1663_v52, %v1662_v56  ;;  %v1589_v46 = vpack.c.bf16 %v1488_v13, %v1488_v13  ;;  %v1481_v12 = vadd.f32 %v1449_v4, %v9115_v24  ;;  %v12788_v52 = vld [vmem:[#allocation42_spill] sm:$0xff]  ;;  %v1660_v6 = vunpack.c.l.b16 %v1588_v33  ;;  %v1350_v13 = vld [vmem:[#allocation5 + $0x68] sm:$0xff] }
 0x277   : > { %v1550_v22 = vmul.f32 0.17677669, %v1473_v15  ;;  %v1482_v44 = vadd.f32 %v1450_v21, %v1386_v11  ;;  %v1483_v35 = vadd.f32 %v1451_v0, %v1387_v47  ;;  %v1484_v49 = vadd.f32 %v1452_v60, %v1388_v23  ;;  %v1414_v24 = vld [vmem:[#allocation7 + $0x68] sm:$0xff]  ;;  %v12789_v23 = vld [vmem:[#allocation35_spill] sm:$0xff] }
 0x278   : > { %v9213_v51 = vpop.permute.xlu1 %1025  ;;  %v1219_v37 = vpop.permute.xlu0 %1218  ;;  %12785 = vst [vmem:[#allocation61_spill] sm:$0xff] %v9222_v42  ;;  %v1150_v25 = vsel %vm1079_vm2, %v12788_v52, %v12787_v53  ;;  %v1448_v11 = vmul.f32 %v1416_v36, %v1320_v19  ;;  %v1661_v47 = vunpack.c.l.b16 %v1589_v46 }
 0x279   : > { %v1294_v55 = vsel %vm1240_vm1, %v9075_v28, %v1219_v37  ;;  %v1318_v58 = vsel %vm9084_vm3, %v1150_v25, %v1247_v20  ;;  %v1566_v15 = vpack.c.bf16 %v1550_v22, %v1550_v22  ;;  %v1586_v60 = vpack.c.bf16 %v1482_v44, %v1482_v44  ;;  %v9251_v19 = vpop.permute.xlu2 %1017 }
 0x27a   : > { %v1315_v40 = vsel %vm9156_vm4, %v1085_v61, %v1294_v55  ;;  %v1718_v61 = vsel %vm1674_vm5, %v9222_v42, 0  ;;  %v1352_v55 = vld [vmem:[#allocation5 + $0x78] sm:$0xff]  ;;  %v1587_v33 = vpack.c.bf16 %v1484_v49, %v1484_v49  ;;  %v9248_v20 = vpack.c.b16 %v1661_v47, %v1660_v6  ;;  %v1410_v47 = vld [vmem:[#allocation7 + $0x48] sm:$0xff] }
 0x27b   : > { %v1443_v17 = vmul.f32 %v1411_v32, %v1315_v40  ;;  %v1555_v32 = vmul.f32 0.17677669, %v1483_v35  ;;  %v1384_v43 = vmul.f32 %v1352_v55, %v12789_v23  ;;  %v1246_v22 = vsel %vm1240_vm1, %v1219_v37, %v9075_v28  ;;  %v1412_v28 = vld [vmem:[#allocation7 + $0x58] sm:$0xff] }
 0x27c   : > { %12790 = vst [vmem:[#allocation49_spill] sm:$0xff] %v9248_v20  ;;  %v1614_v36 = vunpack.c.l.b16 %v1566_v15  ;;  %v1658_v44 = vunpack.c.l.b16 %v1586_v60  ;;  %v1659_v49 = vunpack.c.l.b16 %v1587_v33  ;;  %v1149_v6 = vsel %vm1079_vm2, %v9110_v3, %v8959_v8 }
 0x27d   : > { %v1475_v56 = vadd.f32 %v1443_v17, %v1379_v45  ;;  %v1554_v45 = vmul.f32 0.17677669, %v1481_v12  ;;  %v12791_v17 = vld [vmem:[#allocation33_spill] sm:$0xff]  ;;  %v1480_v46 = vadd.f32 %v1448_v11, %v1384_v43  ;;  %v1571_v35 = vpack.c.bf16 %v1555_v32, %v1555_v32  ;;  %v12793_v32 = vld [vmem:[#allocation31_spill] sm:$0xff] }
 0x27e   : > { %1724 = vmatpush.bf16.xpose.msrb.mxu2 %v1718_v61  ;;  %2258 = vmatpush.bf16.xpose.msrb.mxu0 %v1718_v61  ;;  %v1382_v25 = vmul.f32 %v1350_v13, %v12791_v17  ;;  %v1446_v61 = vmul.f32 %v1414_v24, %v1318_v58  ;;  %v1245_v55 = vsel %vm1240_vm1, %v9168_v39, %v9170_v2  ;;  %v1715_v58 = vsel %vm1674_vm5, %v9248_v20, 0  ;;  %v1348_v2 = vld [vmem:[#allocation5 + $0x58] sm:$0xff]  ;;  %v12794_v17 = vld [vmem:[#allocation29_spill] sm:$0xff] }
 0x27f   : > { %v1551_v4 = vmul.f32 0.17677669, %v1475_v56  ;;  %v1570_v12 = vpack.c.bf16 %v1554_v45, %v1554_v45  ;;  %v1316_v37 = vsel %vm9084_vm3, %v1149_v6, %v1246_v22  ;;  %v1148_v24 = vsel %vm1079_vm2, %v8993_v59, %v8991_v57  ;;  %v1346_v45 = vld [vmem:[#allocation5 + $0x48] sm:$0xff] }
 0x280   : > { %v9243_v21 = vpop.permute.xlu1 %1164  ;;  %v9245_v0 = vpop.permute.xlu0 %1027  ;;  %v1478_v8 = vadd.f32 %v1446_v61, %v1382_v25  ;;  %v1585_v11 = vpack.c.bf16 %v1480_v46, %v1480_v46  ;;  %v1314_v15 = vsel %vm9084_vm3, %v1148_v24, %v1245_v55  ;;  %v1444_v60 = vmul.f32 %v1412_v28, %v1316_v37 }
 0x281   : > { %v1567_v40 = vpack.c.bf16 %v1551_v4, %v1551_v4  ;;  %v9278_v4 = vpack.c.b16 %v1659_v49, %v1658_v44  ;;  %v1618_v57 = vunpack.c.l.b16 %v1570_v12  ;;  %v1619_v59 = vunpack.c.l.b16 %v1571_v35  ;;  %v9285_v46 = vpop.permute.xlu2 %1160  ;;  %v1408_v35 = vld [vmem:[#allocation7 + $0x38] sm:$0xff] }
 0x282   : > { %v1380_v33 = vmul.f32 %v1348_v2, %v12793_v32  ;;  %v1584_v23 = vpack.c.bf16 %v1478_v8, %v1478_v8  ;;  %v1442_v43 = vmul.f32 %v1410_v47, %v1314_v15  ;;  %v1378_v25 = vmul.f32 %v1346_v45, %v12794_v17  ;;  %v1344_v8 = vld [vmem:[#allocation5 + $0x38] sm:$0xff]  ;;  %v1406_v2 = vld [vmem:[#allocation7 + $0x28] sm:$0xff] }
 0x283   : > { %v1615_v56 = vunpack.c.l.b16 %v1567_v40  ;;  %12792 = vst [vmem:[#allocation48_spill] sm:$0xff] %v9278_v4  ;;  %v1657_v61 = vunpack.c.l.b16 %v1585_v11  ;;  %v1712_v22 = vsel %vm1674_vm5, %v9278_v4, 0  ;;  %v1147_v12 = vsel %vm1079_vm2, %v9160_v29, %v9245_v0 }
 0x284   : > { %v9295_v44 = vpack.c.b16 %v1619_v59, %v1618_v57  ;;  %v1656_v6 = vunpack.c.l.b16 %v1584_v23  ;;  %v1474_v55 = vadd.f32 %v1442_v43, %v1378_v25  ;;  %v12797_v57 = vld [vmem:[#allocation27_spill] sm:$0xff]  ;;  %v12798_v23 = vld [vmem:[#allocation25_spill] sm:$0xff] }
 0x285   : > { %v9263_v13 = vpack.c.b16 %v1615_v56, %v1614_v36  ;;  %v1476_v36 = vadd.f32 %v1444_v60, %v1380_v33  ;;  %v1243_v56 = vsel %vm1240_vm1, %v9215_v16, %v9243_v21  ;;  %v1342_v60 = vld [vmem:[#allocation5 + $0x28] sm:$0xff]  ;;  %v1376_v59 = vmul.f32 %v1344_v8, %v12797_v57 }
 0x286   : > { %1725 = vmatpush.bf16.xpose.msrb.mxu2 %v1715_v58  ;;  %2259 = vmatpush.bf16.xpose.msrb.mxu0 %v1715_v58  ;;  %v12795_v58 = vld [vmem:[#allocation59_spill] sm:$0xff]  ;;  %v9308_v45 = vpack.c.b16 %v1657_v61, %v1656_v6  ;;  %v1582_v32 = vpack.c.bf16 %v1474_v55, %v1474_v55  ;;  %v1374_v43 = vmul.f32 %v1342_v60, %v12798_v23  ;;  %v1338_v57 = vld [vmem:[#allocation5 + $0x8] sm:$0xff] }
 0x287   : > { %2221 = vrot.lane.b32.xlu0 %v9263_v13, %s8221_s25  ;;  %v1146_v28 = vsel %vm1079_vm2, %v9213_v51, %v12795_v58  ;;  %v1583_v47 = vpack.c.bf16 %v1476_v36, %v1476_v36  ;;  %v1087_v61 = vsel %vm1079_vm2, %v9027_v26, %v9045_v10  ;;  %v1404_v10 = vld [vmem:[#allocation7 + $0x18] sm:$0xff]  ;;  %v1082_v34 = vsel %vm1079_vm2, %v12795_v58, %v9213_v51  ;;  %v12806_v51 = vld [vmem:[#allocation28_spill] sm:$0xff] }
 0x288   : > { %v9272_v3 = vpop.permute.xlu1 %1214  ;;  %v9274_v39 = vpop.permute.xlu0 %1166  ;;  %v1310_v11 = vsel %vm9084_vm3, %v1146_v28, %v1243_v56  ;;  %12796 = vst [vmem:[#allocation42_spill] sm:$0xff] %v9308_v45  ;;  %v1709_v25 = vsel %vm1674_vm5, %v9308_v45, 0  ;;  %v1654_v36 = vunpack.c.l.b16 %v1582_v32  ;;  %v1340_v32 = vld [vmem:[#allocation5 + $0x18] sm:$0xff] }
 0x289   : > { %v1244_v40 = vsel %vm1240_vm1, %v9272_v3, %v9274_v39  ;;  %v1438_v33 = vmul.f32 %v1406_v2, %v1310_v11  ;;  %v1337_v2 = vld [vmem:[#allocation5] sm:$0xff]  ;;  %v1339_v11 = vld [vmem:[#allocation5 + $0x10] sm:$0xff] }
 0x28a   : > { %v1312_v49 = vsel %vm9084_vm3, %v1147_v12, %v1244_v40  ;;  %v1655_v40 = vunpack.c.l.b16 %v1583_v47 }
 0x28b   : > { %v1440_v15 = vmul.f32 %v1408_v35, %v1312_v49  ;;  %v1470_v56 = vadd.f32 %v1438_v33, %v1374_v43  ;;  %v1403_v35 = vld [vmem:[#allocation7 + $0x10] sm:$0xff]  ;;  %v1296_v33 = vsel %vm1240_vm1, %v9037_v1, %v9019_v14  ;;  %v1086_v14 = vsel %vm1079_vm2, %v12787_v53, %v12788_v52  ;;  %v1401_v52 = vld [vmem:[#allocation7] sm:$0xff] }
 0x28c   : > { %v9327_v60 = vpack.c.b16 %v1655_v40, %v1654_v36  ;;  %v12800_v43 = vld [vmem:[#allocation22_spill] sm:$0xff]  ;;  %v1319_v40 = vsel %vm9156_vm4, %v1087_v61, %v1296_v33 }
 0x28d   : > { %v1472_v17 = vadd.f32 %v1440_v15, %v1376_v59  ;;  %v1580_v23 = vpack.c.bf16 %v1470_v56, %v1470_v56 }
 0x28e   : > { %1726 = vmatpush.bf16.xpose.msrb.mxu2 %v1712_v22  ;;  %2260 = vmatpush.bf16.xpose.msrb.mxu0 %v1712_v22  ;;  %v1211_v22 = vpop.permute.xlu2 %1210  ;;  %12799 = vst [vmem:[#allocation35_spill] sm:$0xff] %v9327_v60 }
 0x28f   : > { %2225 = vrot.lane.b32.xlu0 %v9295_v44, %s8221_s25  ;;  %v1581_v26 = vpack.c.bf16 %v1472_v17, %v1472_v17  ;;  %v1369_v17 = vmul.f32 %v1337_v2, %v12800_v43  ;;  %v1402_v2 = vld [vmem:[#allocation7 + $0x8] sm:$0xff]  ;;  %v12804_v43 = vld [vmem:[#allocation39_spill] sm:$0xff] }
 0x290   : > { %v1020_v37 = vpop.permute.xlu1 %1019  ;;  %v9304_v24 = vpop.permute.xlu0 %1015 }
 0x291   : > { %v1653_v1 = vunpack.c.l.b16 %v1581_v26  ;;  %v1080_v53 = vsel %vm1079_vm2, %v9304_v24, %v9251_v19  ;;  %v1351_v26 = vld [vmem:[#allocation5 + $0x70] sm:$0xff] }
 0x296   : > { %1727 = vmatpush.bf16.xpose.msrb.mxu2 %v1709_v25  ;;  %2261 = vmatpush.bf16.xpose.msrb.mxu0 %v1709_v25  ;;  %v12801_v25 = vld [vmem:[#allocation24_spill] sm:$0xff] }
 0x297   : > { %2144 = vrot.lane.b32.xlu0 %v9222_v42, %s8222_s15 }
 0x298   : > { %v1163_v12 = vpop.permute.xlu1 %1162  ;;  %v1022_v49 = vpop.permute.xlu0 %1021 }
 0x299   : > { %v1242_v6 = vsel %vm1240_vm1, %v1211_v22, %v1163_v12  ;;  %v1290_v55 = vsel %vm1240_vm1, %v1163_v12, %v1211_v22  ;;  %v1081_v28 = vsel %vm1079_vm2, %v1020_v37, %v1022_v49  ;;  %v1145_v8 = vsel %vm1079_vm2, %v1022_v49, %v1020_v37  ;;  %v1415_v12 = vld [vmem:[#allocation7 + $0x70] sm:$0xff] }
 0x29a   : > { %v1307_v47 = vsel %vm9156_vm4, %v1081_v28, %v1290_v55  ;;  %v1308_v15 = vsel %vm9084_vm3, %v1145_v8, %v1242_v6  ;;  %v1295_v37 = vsel %vm1240_vm1, %v8995_v62, %v12786_v27  ;;  %v1371_v22 = vmul.f32 %v1339_v11, %v12801_v25  ;;  %v12803_v27 = vld [vmem:[#allocation23_spill] sm:$0xff] }
 0x29b   : > { %v1435_v59 = vmul.f32 %v1403_v35, %v1307_v47  ;;  %v1436_v36 = vmul.f32 %v1404_v10, %v1308_v15  ;;  %v12802_v35 = vld [vmem:[#allocation21_spill] sm:$0xff]  ;;  %v1706_v62 = vsel %vm1674_vm5, %v9327_v60, 0  ;;  %v1372_v56 = vmul.f32 %v1340_v32, %v12803_v27  ;;  %v1413_v10 = vld [vmem:[#allocation7 + $0x60] sm:$0xff] }
 0x29c   : > { %v1370_v49 = vmul.f32 %v1338_v57, %v12802_v35  ;;  %v1317_v6 = vsel %vm9156_vm4, %v1086_v14, %v1295_v37  ;;  %v1447_v61 = vmul.f32 %v1415_v12, %v1319_v40  ;;  %v1652_v28 = vunpack.c.l.b16 %v1580_v23  ;;  %v1343_v12 = vld [vmem:[#allocation5 + $0x30] sm:$0xff]  ;;  %v12805_v14 = vld [vmem:[#allocation37_spill] sm:$0xff] }
 0x29d   : > { %v1467_v55 = vadd.f32 %v1435_v59, %v1371_v22  ;;  %v1292_v8 = vsel %vm1240_vm1, %v9274_v39, %v9272_v3  ;;  %v1144_v47 = vsel %vm1079_vm2, %v9251_v19, %v9304_v24  ;;  %v1468_v15 = vadd.f32 %v1436_v36, %v1372_v56  ;;  %v1349_v19 = vld [vmem:[#allocation5 + $0x60] sm:$0xff] }
 0x29e   : > { %1728 = vmatpush.bf16.xpose.msrb.mxu2 %v1706_v62  ;;  %2262 = vmatpush.bf16.xpose.msrb.mxu0 %v1706_v62  ;;  %v1291_v39 = vsel %vm1240_vm1, %v9243_v21, %v9215_v16  ;;  %v9368_v33 = vpack.c.b16 %v1653_v1, %v1652_v28  ;;  %v1083_v24 = vsel %vm1079_vm2, %v9245_v0, %v9160_v29  ;;  %v1407_v16 = vld [vmem:[#allocation7 + $0x30] sm:$0xff]  ;;  %v1405_v1 = vld [vmem:[#allocation7 + $0x20] sm:$0xff] }
 0x29f   : > { %v1547_v37 = vmul.f32 0.17677669, %v1467_v55  ;;  %v1383_v25 = vmul.f32 %v1351_v26, %v12804_v43  ;;  %v1445_v22 = vmul.f32 %v1413_v10, %v1317_v6  ;;  %v1311_v21 = vsel %vm9156_vm4, %v1083_v24, %v1292_v8  ;;  %v1341_v56 = vld [vmem:[#allocation5 + $0x20] sm:$0xff] }
 0x2a0   : > { %v1209_v11 = vpop.permute.xlu0 %1208  ;;  %v1579_v40 = vpack.c.bf16 %v1468_v15, %v1468_v15  ;;  %v1381_v29 = vmul.f32 %v1349_v19, %v12805_v14  ;;  %v1309_v62 = vsel %vm9156_vm4, %v1082_v34, %v1291_v39  ;;  %v1703_v27 = vsel %vm1674_vm5, %v9368_v33, 0  ;;  %v1421_v14 = vld [vmem:[#allocation7 + $0xa0] sm:$0xff] }
 0x2a1   : > { %v1241_v57 = vsel %vm1240_vm1, %v1209_v11, %v9285_v46  ;;  %v1289_v3 = vsel %vm1240_vm1, %v9285_v46, %v1209_v11  ;;  %v1479_v0 = vadd.f32 %v1447_v61, %v1383_v25  ;;  %v1439_v6 = vmul.f32 %v1407_v16, %v1311_v21 }
 0x2a2   : > { %v1305_v59 = vsel %vm9156_vm4, %v1080_v53, %v1289_v3  ;;  %v1306_v32 = vsel %vm9084_vm3, %v1144_v47, %v1241_v57  ;;  %v1563_v55 = vpack.c.bf16 %v1547_v37, %v1547_v37  ;;  %v1375_v58 = vmul.f32 %v1343_v12, %v12806_v51 }
 0x2a3   : > { %v1433_v23 = vmul.f32 %v1401_v52, %v1305_v59  ;;  %v1434_v46 = vmul.f32 %v1402_v2, %v1306_v32  ;;  %v1651_v52 = vunpack.c.l.b16 %v1579_v40  ;;  %v12807_v2 = vld [vmem:[#allocation26_spill] sm:$0xff]  ;;  %v1553_v26 = vmul.f32 0.17677669, %v1479_v0 }
 0x2a4   : > { %v1373_v11 = vmul.f32 %v1341_v56, %v12807_v2  ;;  %v1471_v10 = vadd.f32 %v1439_v6, %v1375_v58  ;;  %v1611_v57 = vunpack.c.l.b16 %v1563_v55  ;;  %v1299_v40 = vsel %vm1240_vm1, %v9072_v7, %v8979_v50  ;;  %v12809_v6 = vld [vmem:[#allocation32_spill] sm:$0xff]  ;;  %v12812_v58 = vld [vmem:[#allocation47_spill] sm:$0xff] }
 0x2a5   : > { %v1465_v36 = vadd.f32 %v1433_v23, %v1369_v17  ;;  %v1466_v35 = vadd.f32 %v1434_v46, %v1370_v49  ;;  %v1477_v17 = vadd.f32 %v1445_v22, %v1381_v29  ;;  %v1437_v49 = vmul.f32 %v1405_v1, %v1309_v62  ;;  %v1357_v1 = vld [vmem:[#allocation5 + $0xa0] sm:$0xff]  ;;  %v1423_v62 = vld [vmem:[#allocation7 + $0xb0] sm:$0xff] }
 0x2a6   : > { %1729 = vmatpush.bf16.xpose.msrb.mxu2 %v1703_v27  ;;  %2263 = vmatpush.bf16.xpose.msrb.mxu0 %v1703_v27  ;;  %v1569_v19 = vpack.c.bf16 %v1553_v26, %v1553_v26  ;;  %v1549_v24 = vmul.f32 0.17677669, %v1471_v10  ;;  %v1300_v0 = vsel %vm1240_vm1, %v9041_v38, %v8981_v54  ;;  %v1359_v27 = vld [vmem:[#allocation5 + $0xb0] sm:$0xff]  ;;  %v12811_v38 = vld [vmem:[#allocation43_spill] sm:$0xff] }
 0x2a7   : > { %v1546_v28 = vmul.f32 0.17677669, %v1465_v36  ;;  %v1578_v8 = vpack.c.bf16 %v1466_v35, %v1466_v35  ;;  %v1552_v3 = vmul.f32 0.17677669, %v1477_v17  ;;  %v1469_v39 = vadd.f32 %v1437_v49, %v1373_v11  ;;  %v12810_v54 = vld [vmem:[#allocation58_spill] sm:$0xff]  ;;  %v12813_v17 = vld [vmem:[#allocation52_spill] sm:$0xff] }
 0x2a8   : > { %v1617_v46 = vunpack.c.l.b16 %v1569_v19  ;;  %v1565_v43 = vpack.c.bf16 %v1549_v24, %v1549_v24  ;;  %v1091_v36 = vsel %vm1079_vm2, %v8947_v41, %v9061_v18  ;;  %v1090_v35 = vsel %vm1079_vm2, %v8969_v48, %v9063_v9  ;;  %v12808_v18 = vld [vmem:[#allocation30_spill] sm:$0xff] }
 0x2a9   : > { %v1562_v53 = vpack.c.bf16 %v1546_v28, %v1546_v28  ;;  %v1650_v61 = vunpack.c.l.b16 %v1578_v8  ;;  %v1568_v37 = vpack.c.bf16 %v1552_v3, %v1552_v3  ;;  %v1548_v23 = vmul.f32 0.17677669, %v1469_v39  ;;  %v1427_v11 = vld [vmem:[#allocation7 + $0xd0] sm:$0xff] }
 0x2aa   : > { %v1613_v21 = vunpack.c.l.b16 %v1565_v43  ;;  %v1325_v29 = vsel %vm9156_vm4, %v1090_v35, %v1299_v40  ;;  %v1327_v7 = vsel %vm9156_vm4, %v1091_v36, %v1300_v0  ;;  %v1389_v41 = vmul.f32 %v1357_v1, %v12808_v18  ;;  %v12816_v10 = vld [vmem:[#allocation50_spill] sm:$0xff]  ;;  %v12823_v18 = vld [vmem:[#allocation57_spill] sm:$0xff] }
 0x2ab   : > { %v9386_v47 = vpack.c.b16 %v1651_v52, %v1650_v61  ;;  %v1610_v15 = vunpack.c.l.b16 %v1562_v53  ;;  %v1616_v25 = vunpack.c.l.b16 %v1568_v37  ;;  %v1564_v22 = vpack.c.bf16 %v1548_v23, %v1548_v23  ;;  %v12814_v53 = vld [vmem:[#allocation41_spill] sm:$0xff]  ;;  %v12815_v61 = vld [vmem:[#allocation56_spill] sm:$0xff]  ;;  %v1363_v39 = vld [vmem:[#allocation5 + $0xd0] sm:$0xff] }
 0x2ac   : > { %v1453_v50 = vmul.f32 %v1421_v14, %v1325_v29  ;;  %v1455_v56 = vmul.f32 %v1423_v62, %v1327_v7  ;;  %v1391_v9 = vmul.f32 %v1359_v27, %v12809_v6  ;;  %v1093_v51 = vsel %vm1079_vm2, %v12811_v38, %v12810_v54  ;;  %v1361_v23 = vld [vmem:[#allocation5 + $0xc0] sm:$0xff]  ;;  %v12820_v62 = vld [vmem:[#allocation54_spill] sm:$0xff]  ;;  %v12821_v7 = vld [vmem:[#allocation51_spill] sm:$0xff] }
 0x2ad   : > { %2132 = vrot.lane.b32.xlu2 %v9386_v47, %s8222_s15  ;;  %v1700_v59 = vsel %vm1674_vm5, %v9386_v47, 0  ;;  %v9392_v32 = vpack.c.b16 %v1611_v57, %v1610_v15  ;;  %v9400_v16 = vpack.c.b16 %v1617_v46, %v1616_v25  ;;  %v1612_v12 = vunpack.c.l.b16 %v1564_v22  ;;  %v12817_v15 = vld [vmem:[#allocation44_spill] sm:$0xff]  ;;  %v12822_v27 = vld [vmem:[#allocation45_spill] sm:$0xff]  ;;  %v1431_v6 = vld [vmem:[#allocation7 + $0xf0] sm:$0xff] }
 0x2ae   : > { %1730 = vmatpush.bf16.xpose.msrb.mxu2 %v1700_v59  ;;  %2264 = vmatpush.bf16.xpose.msrb.mxu0 %v1700_v59  ;;  %v1485_v48 = vadd.f32 %v1453_v50, %v1389_v41  ;;  %v1487_v55 = vadd.f32 %v1455_v56, %v1391_v9  ;;  %v1301_v49 = vsel %vm1240_vm1, %v12813_v17, %v12812_v58  ;;  %v1425_v59 = vld [vmem:[#allocation7 + $0xc0] sm:$0xff]  ;;  %v1367_v54 = vld [vmem:[#allocation5 + $0xf0] sm:$0xff] }
 0x2af   : > { %2217 = vrot.lane.b32.xlu1 %v9392_v32, %s8221_s25  ;;  %v9404_v34 = vpack.c.b16 %v1613_v21, %v1612_v12  ;;  %v1302_v52 = vsel %vm1240_vm1, %v12815_v61, %v12814_v53  ;;  %v1092_v57 = vsel %vm1079_vm2, %v12817_v15, %v12816_v10  ;;  %v12818_v46 = vld [vmem:[#allocation36_spill] sm:$0xff]  ;;  %v12819_v21 = vld [vmem:[#allocation34_spill] sm:$0xff]  ;;  %v1304_v1 = vsel %vm1240_vm1, %v9112_v31, %v9043_v63 }
 0x2b0   : > { %v1556_v28 = vmul.f32 0.17677669, %v1485_v48  ;;  %v1557_v8 = vmul.f32 0.17677669, %v1487_v55  ;;  %v1331_v26 = vsel %vm9156_vm4, %v1093_v51, %v1302_v52  ;;  %v1329_v19 = vsel %vm9156_vm4, %v1092_v57, %v1301_v49  ;;  %v12824_v55 = vld [vmem:[#allocation53_spill] sm:$0xff]  ;;  %v1429_v31 = vld [vmem:[#allocation7 + $0xe0] sm:$0xff] }
 0x2b1   : > { %v1459_v24 = vmul.f32 %v1427_v11, %v1331_v26  ;;  %v1395_v43 = vmul.f32 %v1363_v39, %v12818_v46  ;;  %v1457_v25 = vmul.f32 %v1425_v59, %v1329_v19  ;;  %v1393_v12 = vmul.f32 %v1361_v23, %v12819_v21  ;;  %v1365_v17 = vld [vmem:[#allocation5 + $0xe0] sm:$0xff] }
 0x2b2   : > { %v1572_v2 = vpack.c.bf16 %v1556_v28, %v1556_v28  ;;  %v1573_v3 = vpack.c.bf16 %v1557_v8, %v1557_v8  ;;  %v1095_v50 = vsel %vm1079_vm2, %v12821_v7, %v12820_v62  ;;  %v1303_v41 = vsel %vm1240_vm1, %v12823_v18, %v12822_v27  ;;  %v12825_v28 = vld [vmem:[#allocation46_spill] sm:$0xff]  ;;  %v12826_v49 = vld [vmem:[#allocation40_spill] sm:$0xff] }
 0x2b3   : > { %v1491_v40 = vadd.f32 %v1459_v24, %v1395_v43  ;;  %v1489_v35 = vadd.f32 %v1457_v25, %v1393_v12  ;;  %v1335_v9 = vsel %vm9156_vm4, %v1095_v50, %v1304_v1  ;;  %v1094_v8 = vsel %vm1079_vm2, %v12825_v28, %v12824_v55 }
 0x2b4   : > { %v1620_v37 = vunpack.c.l.b16 %v1572_v2  ;;  %v1621_v22 = vunpack.c.l.b16 %v1573_v3  ;;  %v1333_v63 = vsel %vm9156_vm4, %v1094_v8, %v1303_v41  ;;  %v1463_v51 = vmul.f32 %v1431_v6, %v1335_v9  ;;  %v12827_v2 = vld [vmem:[#allocation38_spill] sm:$0xff] }
 0x2b5   : > { %2134 = vrot.lane.b32.xlu2 %v9368_v33, %s8222_s15  ;;  %6699 = vmatmul.msk.bf16.vlgmr.msrb.gmra.mxu2 %vm1674_vm5, %v9392_v32  ;;  %v1559_v29 = vmul.f32 0.17677669, %v1491_v40  ;;  %v1558_v0 = vmul.f32 0.17677669, %v1489_v35  ;;  %v1399_v53 = vmul.f32 %v1367_v54, %v12826_v49  ;;  %v1461_v61 = vmul.f32 %v1429_v31, %v1333_v63 }
 0x2b6   : > { %v9466_v36 = vpack.c.b16 %v1621_v22, %v1620_v37  ;;  %v1397_v11 = vmul.f32 %v1365_v17, %v12827_v2  ;;  %v12828_v12 = vlaneseq  ;;  %v8223_v62 = vmov -1e+30  }
 0x2b7   : > { %2223 = vrot.lane.b32.xlu1 %v9400_v16, %s8221_s25  ;;  %v1575_v56 = vpack.c.bf16 %v1559_v29, %v1559_v29  ;;  %v1574_v48 = vpack.c.bf16 %v1558_v0, %v1558_v0  ;;  %v1495_v26 = vadd.f32 %v1463_v51, %v1399_v53  ;;  %v12829_v0 = vld [vmem:[#allocation55_spill] sm:$0xff] }
 0x2b8   : > { %v1493_v15 = vadd.f32 %v1461_v61, %v1397_v11  ;;  %v9502_v40 = vshrl.u32 %v12828_v12, 7 }
 0x2b9   : > { %v1623_v58 = vunpack.c.l.b16 %v1575_v56  ;;  %v1622_v52 = vunpack.c.l.b16 %v1574_v48  ;;  %v1561_v57 = vmul.f32 0.17677669, %v1495_v26 }
 0x2ba   : > { %v1560_v3 = vmul.f32 0.17677669, %v1493_v15  ;;  %vm1514_vm6 = vcmp.le.s32.totalorder %v12829_v0, %v9502_v40  ;;  %v1499_v50 = vadd.s32 8, %v9502_v40  ;;  %v1500_v55 = vadd.s32 16, %v9502_v40 }
 0x2bb   : > { %v9492_v10 = vpack.c.b16 %v1623_v58, %v1622_v52  ;;  %v1577_v39 = vpack.c.bf16 %v1561_v57, %v1561_v57  ;;  %v9510_v7 = vsel %vm1514_vm6, 0.0, %v8223_v62  ;;  %v1501_v63 = vadd.s32 24, %v9502_v40 }
 0x2bc   : > { %v1576_v59 = vpack.c.bf16 %v1560_v3, %v1560_v3  ;;  %vm1515_vm7 = vcmp.le.s32.totalorder %v12829_v0, %v1499_v50  ;;  %vm1516_vm8 = vcmp.le.s32.totalorder %v12829_v0, %v1500_v55  ;;  %v1502_v49 = vadd.s32 32, %v9502_v40 }
 0x2bd   : > { %2219 = vrot.lane.b32.xlu2 %v9404_v34, %s8221_s25  ;;  %v1625_v24 = vunpack.c.l.b16 %v1577_v39  ;;  %v9519_v9 = vsel %vm1515_vm7, 0.0, %v8223_v62  ;;  %v9533_v54 = vsel %vm1516_vm8, 0.0, %v8223_v62  ;;  %vm1517_vm9 = vcmp.le.s32.totalorder %v12829_v0, %v1501_v63 }
 0x2be   : > { %v1624_v23 = vunpack.c.l.b16 %v1576_v59  ;;  %v9546_v17 = vsel %vm1517_vm9, 0.0, %v8223_v62  ;;  %vm1518_vm10 = vcmp.le.s32.totalorder %v12829_v0, %v1502_v49  ;;  %v1503_v2 = vadd.s32 40, %v9502_v40 }
 0x2bf   : > { %2925 = vrot.lane.b32.xlu1 %v9222_v42, %s8221_s25  ;;  %v9561_v52 = vsel %vm1518_vm10, 0.0, %v8223_v62  ;;  %v1504_v15 = vadd.s32 48, %v9502_v40  ;;  %v1505_v3 = vadd.s32 56, %v9502_v40  ;;  %v1510_v55 = vadd.s32 96, %v9502_v40 }
 0x2c0   : > { %v9497_v46 = vpack.c.b16 %v1625_v24, %v1624_v23  ;;  %vm1519_vm11 = vcmp.le.s32.totalorder %v12829_v0, %v1503_v2  ;;  %v1506_v24 = vadd.s32 64, %v9502_v40  ;;  %v1511_v49 = vadd.s32 104, %v9502_v40 }
 0x2c1   : > { %vm1520_vm12 = vcmp.le.s32.totalorder %v12829_v0, %v1504_v15  ;;  %vm1521_vm13 = vcmp.le.s32.totalorder %v12829_v0, %v1505_v3  ;;  %vm1526_vm2 = vcmp.le.s32.totalorder %v12829_v0, %v1510_v55  ;;  %v1512_v15 = vadd.s32 112, %v9502_v40 }
 0x2c2   : > { %vm1522_vm14 = vcmp.le.s32.totalorder %v12829_v0, %v1506_v24  ;;  %vm1527_vm3 = vcmp.le.s32.totalorder %v12829_v0, %v1511_v49  ;;  %v1513_v24 = vadd.s32 120, %v9502_v40 }
 0x2c3   : > { %vm1528_vm4 = vcmp.le.s32.totalorder %v12829_v0, %v1512_v15 }
 0x2c4   : > { %vm1529_vm6 = vcmp.le.s32.totalorder %v12829_v0, %v1513_v24 }
 0x2c5   : > { %2136 = vrot.lane.b32.xlu2 %v9327_v60, %s8222_s15  ;;  %6700 = vmatmul.msk.bf16.gmra.mxu2 %vm1674_vm5, %v9404_v34 }
 0x2c7   : > { %2146 = vrot.lane.b32.xlu1 %v9194_v30, %s8222_s15 }
 0x2cd   : > { %2138 = vrot.lane.b32.xlu2 %v9308_v45, %s8222_s15 }
 0x2d5   : > { %2140 = vrot.lane.b32.xlu2 %v9278_v4, %s8222_s15  ;;  %6701 = vmatmul.msk.bf16.gmra.mxu2 %vm1674_vm5, %v9263_v13 }
 0x2dd   : > { %2142 = vrot.lane.b32.xlu2 %v9248_v20, %s8222_s15 }
 0x2e5   : > { %2927 = vrot.lane.b32.xlu2 %v9194_v30, %s8221_s25  ;;  %6702 = vmatmul.msk.bf16.gmra.mxu2 %vm1674_vm5, %v9400_v16 }
 0x2f5   : > { %6703 = vmatmul.msk.bf16.gmra.mxu2 %vm1674_vm5, %v9295_v44 }
 0x2f9   : > { %v2222_v25 = vpop.permute.xlu0 %2221 }
 0x301   : > { %v9505_v29 = vpop.permute.xlu0 %2225 }
 0x305   : > { %6704 = vmatmul.msk.bf16.gmra.mxu2 %vm1674_vm5, %v9466_v36 }
 0x307   : > { %v9470_v14 = vpop.permute.xlu2 %2132 }
 0x309   : > { %v2145_v56 = vpop.permute.xlu0 %2144 }
 0x30f   : > { %v9488_v38 = vpop.permute.xlu2 %2134 }
 0x315   : > { %6705 = vmatmul.msk.bf16.gmra.mxu2 %vm1674_vm5, %v9492_v10 }
 0x317   : > { %v2220_v5 = vpop.permute.xlu2 %2219 }
 0x31f   : > { %v2137_v19 = vpop.permute.xlu2 %2136 }
 0x321   : > { %v2218_v37 = vpop.permute.xlu1 %2217 }
 0x322   : > { %6707 = vmatmul.msk.bf16.vlgmr.msrb.gmra.mxu0 %vm1674_vm5, %v2218_v37 }
 0x325   : > { %6706 = vmatmul.msk.bf16.gmra.mxu2 %vm1674_vm5, %v9497_v46 }
 0x327   : > { %v2139_v43 = vpop.permute.xlu2 %2138 }
 0x329   : > { %v2224_v22 = vpop.permute.xlu1 %2223 }
 0x32f   : > { %v2141_v21 = vpop.permute.xlu2 %2140 }
 0x331   : > { %v2926_v35 = vpop.permute.xlu1 %2925 }
 0x332   : > { %6708 = vmatmul.msk.bf16.gmra.mxu0 %vm1674_vm5, %v2220_v5  ;;  %v9536_v31 = vsel %vm1674_vm5, %v2926_v35, 0  ;;  %v1508_v35 = vadd.s32 80, %v9502_v40 }
 0x334   : > { %vm1524_vm0 = vcmp.le.s32.totalorder %v12829_v0, %v1508_v35  ;;  %v9663_v35 = vsel %vm1529_vm6, 0.0, %v8223_v62 }
 0x335   : > { %v9618_v50 = vsel %vm1524_vm0, 0.0, %v8223_v62  ;;  %12832 = vst [vmem:[#allocation29_spill] sm:$0xff] %v9663_v35 }
 0x337   : > { %v2143_v1 = vpop.permute.xlu2 %2142 }
 0x338   : > { %v1732_v27 = vpop.f32.mrf.mxu2 }
 0x339   : > { %v9514_v18 = vadd.f32 %v1732_v27, %v9510_v7  ;;  %v2147_v41 = vpop.permute.xlu1 %2146  ;;  %v1509_v27 = vadd.s32 88, %v9502_v40 }
 0x33a   : > { %2156 = vmatpush.bf16.msra.mxu2 %v2147_v41  ;;  %7242 = vmatpush.bf16.msra.mxu3 %v2147_v41 }
 0x33b   : > { %2666 = vmatpush.bf16.msrb.mxu1 %v2147_v41  ;;  %1772 = vmax.xlane.f32.xlu1 %v9514_v18  ;;  %vm1525_vm1 = vcmp.le.s32.totalorder %v12829_v0, %v1509_v27 }
 0x33e   : > { %2157 = vmatpush.bf16.msra.mxu2 %v2145_v56  ;;  %7243 = vmatpush.bf16.msra.mxu3 %v2145_v56 }
 0x33f   : > { %v2928_v6 = vpop.permute.xlu2 %2927  ;;  %2667 = vmatpush.bf16.msrb.mxu1 %v2145_v56 }
 0x340   : > { %v9522_v48 = vsel %vm1674_vm5, %v2928_v6, 0  ;;  %v1734_v28 = vpop.f32.mrf.mxu2  ;;  %v9627_v6 = vsel %vm1525_vm1, 0.0, %v8223_v62 }
 0x341   : > { %2977 = vmatpush.bf16.xpose.msra.mxu0 %v9522_v48  ;;  %v9527_v8 = vadd.f32 %v1734_v28, %v9519_v9 }
 0x342   : > { %2158 = vmatpush.bf16.msra.mxu2 %v2143_v1  ;;  %7244 = vmatpush.bf16.msra.mxu3 %v2143_v1 }
 0x343   : > { %6709 = vmatmul.msk.bf16.gmra.mxu0 %vm1674_vm5, %v2222_v25  ;;  %2668 = vmatpush.bf16.msrb.mxu1 %v2143_v1  ;;  %v1507_v25 = vadd.s32 72, %v9502_v40 }
 0x344   : > { %1774 = vmax.xlane.f32.xlu0 %v9527_v8 }
 0x345   : > { %vm1523_vm15 = vcmp.le.s32.totalorder %v12829_v0, %v1507_v25 }
 0x346   : > { %2159 = vmatpush.bf16.msra.mxu2 %v2141_v21  ;;  %7245 = vmatpush.bf16.msra.mxu3 %v2141_v21  ;;  %v9609_v12 = vsel %vm1523_vm15, 0.0, %v8223_v62 }
 0x347   : > { %2669 = vmatpush.bf16.msrb.mxu1 %v2141_v21 }
 0x348   : > { %v1737_v51 = vpop.f32.mrf.mxu2 }
 0x349   : > { %2978 = vmatpush.bf16.xpose.msra.mxu0 %v9536_v31  ;;  %v9541_v58 = vadd.f32 %v1737_v51, %v9533_v54  ;;  %v9636_v51 = vsel %vm1526_vm2, 0.0, %v8223_v62 }
 0x34a   : > { %2160 = vmatpush.bf16.msra.mxu2 %v2139_v43  ;;  %7246 = vmatpush.bf16.msra.mxu3 %v2139_v43 }
 0x34b   : > { %2670 = vmatpush.bf16.msrb.mxu1 %v2139_v43  ;;  %1776 = vmax.xlane.f32.xlu2 %v9541_v58  ;;  %v9600_v43 = vsel %vm1522_vm14, 0.0, %v8223_v62 }
 0x34e   : > { %2161 = vmatpush.bf16.msra.mxu2 %v2137_v19  ;;  %7247 = vmatpush.bf16.msra.mxu3 %v2137_v19 }
 0x34f   : > { %2671 = vmatpush.bf16.msrb.mxu1 %v2137_v19  ;;  %v9591_v19 = vsel %vm1521_vm13, 0.0, %v8223_v62 }
 0x350   : > { %v1739_v53 = vpop.f32.mrf.mxu2 }
 0x351   : > { %v9550_v61 = vadd.f32 %v1739_v53, %v9546_v17 }
 0x352   : > { %2162 = vmatpush.bf16.msra.mxu2 %v9488_v38  ;;  %7248 = vmatpush.bf16.msra.mxu3 %v9488_v38 }
 0x353   : > { %6710 = vmatmul.msk.bf16.gmra.mxu0 %vm1674_vm5, %v2224_v22  ;;  %2672 = vmatpush.bf16.msrb.mxu1 %v9488_v38  ;;  %v9571_v38 = vsel %vm1519_vm11, 0.0, %v8223_v62 }
 0x354   : > { %1778 = vmax.xlane.f32.xlu1 %v9550_v61 }
 0x356   : > { %2163 = vmatpush.bf16.msra.mxu2 %v9470_v14  ;;  %7249 = vmatpush.bf16.msra.mxu3 %v9470_v14 }
 0x357   : > { %2673 = vmatpush.bf16.msrb.mxu1 %v9470_v14  ;;  %v9582_v14 = vsel %vm1520_vm12, 0.0, %v8223_v62 }
 0x358   : > { %v1742_v11 = vpop.f32.mrf.mxu2 }
 0x359   : > { %v9566_v26 = vadd.f32 %v1742_v11, %v9561_v52  ;;  %v9645_v11 = vsel %vm1527_vm3, 0.0, %v8223_v62 }
 0x35a   : > { %12830 = vst [vmem:[#allocation33_spill] sm:$0xff] %v9645_v11 }
 0x35b   : > { %1780 = vmax.xlane.f32.xlu0 %v9566_v26 }
 0x360   : > { %v1744_v5 = vpop.f32.mrf.mxu2 }
 0x361   : > { %v9575_v57 = vadd.f32 %v1744_v5, %v9571_v38 }
 0x363   : > { %6711 = vmatmul.msk.bf16.gmra.mxu0 %vm1674_vm5, %v9505_v29  ;;  %1782 = vmax.xlane.f32.xlu2 %v9575_v57 }
 0x368   : > { %v1747_v39 = vpop.f32.mrf.mxu2 }
 0x369   : > { %v9586_v59 = vadd.f32 %v1747_v39, %v9582_v14  ;;  %v9654_v39 = vsel %vm1528_vm4, 0.0, %v8223_v62 }
 0x36a   : > { %12831 = vst [vmem:[#allocation31_spill] sm:$0xff] %v9654_v39 }
 0x36b   : > { %1784 = vmax.xlane.f32.xlu2 %v9586_v59 }
 0x370   : > { %v1749_v37 = vpop.f32.mrf.mxu2 }
 0x371   : > { %v9595_v23 = vadd.f32 %v1749_v37, %v9591_v19 }
 0x373   : > { %1786 = vmax.xlane.f32.xlu2 %v9595_v23 }
 0x378   : > { %v1752_v22 = vpop.f32.mrf.mxu2 }
 0x379   : > { %v9604_v21 = vadd.f32 %v1752_v22, %v9600_v43 }
 0x37b   : > { %1788 = vmax.xlane.f32.xlu0 %v9604_v21 }
 0x380   : > { %v1754_v29 = vpop.f32.mrf.mxu2 }
 0x381   : > { %v9613_v1 = vadd.f32 %v1754_v29, %v9609_v12 }
 0x383   : > { %1790 = vmax.xlane.f32.xlu1 %v9613_v1 }
 0x388   : > { %v1757_v41 = vpop.f32.mrf.mxu2 }
 0x389   : > { %v9622_v56 = vadd.f32 %v1757_v41, %v9618_v50 }
 0x38b   : > { %1792 = vmax.xlane.f32.xlu0 %v9622_v56 }
 0x390   : > { %v1759_v28 = vpop.f32.mrf.mxu2 }
 0x391   : > { %v9631_v63 = vadd.f32 %v1759_v28, %v9627_v6 }
 0x393   : > { %1794 = vmax.xlane.f32.xlu1 %v9631_v63 }
 0x398   : > { %v1762_v53 = vpop.f32.mrf.mxu2 }
 0x399   : > { %v9640_v2 = vadd.f32 %v1762_v53, %v9636_v51 }
 0x39b   : > { %1796 = vmax.xlane.f32.xlu1 %v9640_v2 }
 0x3a0   : > { %v1764_v5 = vpop.f32.mrf.mxu2 }
 0x3a1   : > { %v9649_v3 = vadd.f32 %v1764_v5, %v9645_v11 }
 0x3a3   : > { %1798 = vmax.xlane.f32.xlu0 %v9649_v3 }
 0x3a8   : > { %v1767_v37 = vpop.f32.mrf.mxu2 }
 0x3a9   : > { %v9658_v25 = vadd.f32 %v1767_v37, %v9654_v39 }
 0x3ab   : > { %1800 = vmax.xlane.f32.xlu1 %v9658_v25 }
 0x3ae   : > { %v1773_v22 = vpop.xlane.xlu1 %1772 }
 0x3af   : > { %v1804_v29 = vsub.f32 %v9514_v18, %v1773_v22 }
 0x3b0   : > { %v1769_v27 = vpop.f32.mrf.mxu2 }
 0x3b1   : > { %v1820_v41 = vmul.f32 1.442695, %v1804_v29  ;;  %v9667_v55 = vadd.f32 %v1769_v27, %v9663_v35 }
 0x3b3   : > { %7418 = vpow2.f32 %v1820_v41  ;;  %1802 = vmax.xlane.f32.xlu0 %v9667_v55 }
 0x3b7   : > { %v1775_v40 = vpop.xlane.xlu0 %1774 }
 0x3b8   : > { %v1805_v28 = vsub.f32 %v9527_v8, %v1775_v40 }
 0x3b9   : > { %v9671_v49 = vpop.eup %7418 }
 0x3ba   : > { %v1822_v0 = vmul.f32 1.442695, %v1805_v28 }
 0x3bb   : > { %1852 = vadd.xlane.f32.xlu0 %v9671_v49 }
 0x3bc   : > { %7420 = vpow2.f32 %v1822_v0 }
 0x3be   : > { %v1777_v29 = vpop.xlane.xlu2 %1776 }
 0x3bf   : > { %v1806_v27 = vsub.f32 %v9541_v58, %v1777_v29 }
 0x3c1   : > { %v1824_v41 = vmul.f32 1.442695, %v1806_v27 }
 0x3c2   : > { %v9674_v62 = vpop.eup %7420 }
 0x3c3   : > { %1854 = vadd.xlane.f32.xlu1 %v9674_v62 }
 0x3c7   : > { %v1779_v18 = vpop.xlane.xlu1 %1778 }
 0x3c8   : > { %v1807_v53 = vsub.f32 %v9550_v61, %v1779_v18 }
 0x3ca   : > { %v1826_v15 = vmul.f32 1.442695, %v1807_v53 }
 0x3cc   : > { %7422 = vpow2.f32 %v1826_v15 }
 0x3ce   : > { %v1781_v5 = vpop.xlane.xlu0 %1780 }
 0x3cf   : > { %v1808_v24 = vsub.f32 %v9566_v26, %v1781_v5  ;;  %2227 = vrot.lane.b32.xlu0 %v9466_v36, %s8221_s25 }
 0x3d1   : > { %v1828_v8 = vmul.f32 1.442695, %v1808_v24 }
 0x3d2   : > { %v9681_v37 = vpop.eup %7422 }
 0x3d3   : > { %7424 = vpow2.f32 %v1828_v8  ;;  %1858 = vadd.xlane.f32.xlu1 %v9681_v37 }
 0x3d4   : > { %7426 = vpow2.f32 %v1824_v41 }
 0x3d6   : > { %v1783_v61 = vpop.xlane.xlu2 %1782 }
 0x3d7   : > { %v1809_v40 = vsub.f32 %v9575_v57, %v1783_v61 }
 0x3d9   : > { %v9684_v22 = vpop.eup %7424  ;;  %v1830_v28 = vmul.f32 1.442695, %v1809_v40 }
 0x3da   : > { %1860 = vadd.xlane.f32.xlu2 %v9684_v22  ;;  %v9693_v18 = vpop.eup %7426 }
 0x3db   : > { %7428 = vpow2.f32 %v1830_v28 }
 0x3de   : > { %v1785_v26 = vpop.xlane.xlu2 %1784 }
 0x3df   : > { %v1810_v29 = vsub.f32 %v9586_v59, %v1785_v26 }
 0x3e1   : > { %v9697_v5 = vpop.eup %7428  ;;  %v1832_v27 = vmul.f32 1.442695, %v1810_v29 }
 0x3e6   : > { %v1787_v0 = vpop.xlane.xlu2 %1786 }
 0x3e7   : > { %v1811_v58 = vsub.f32 %v9595_v23, %v1787_v0 }
 0x3e9   : > { %v1834_v53 = vmul.f32 1.442695, %v1811_v58 }
 0x3eb   : > { %7430 = vpow2.f32 %v1834_v53 }
 0x3ec   : > { %2921 = vrot.lane.b32.xlu1 %v9278_v4, %s8221_s25 }
 0x3ee   : > { %v1789_v23 = vpop.xlane.xlu0 %1788 }
 0x3ef   : > { %v1812_v28 = vsub.f32 %v9604_v21, %v1789_v23 }
 0x3f1   : > { %v9702_v61 = vpop.eup %7430  ;;  %v1836_v59 = vmul.f32 1.442695, %v1812_v28 }
 0x3f2   : > { %2923 = vrot.lane.b32.xlu2 %v9248_v20, %s8221_s25 }
 0x3f6   : > { %v1791_v15 = vpop.xlane.xlu1 %1790 }
 0x3f7   : > { %v1813_v57 = vsub.f32 %v9613_v1, %v1791_v15 }
 0x3f9   : > { %1856 = vadd.xlane.f32.xlu0 %v9693_v18  ;;  %v1838_v24 = vmul.f32 1.442695, %v1813_v57 }
 0x3fb   : > { %7432 = vpow2.f32 %v1838_v24 }
 0x3fc   : > { %7434 = vpow2.f32 %v1832_v27 }
 0x3fe   : > { %v1793_v26 = vpop.xlane.xlu0 %1792 }
 0x401   : > { %1862 = vadd.xlane.f32.xlu0 %v9697_v5  ;;  %v9708_v1 = vpop.eup %7432 }
 0x402   : > { %v9711_v15 = vpop.eup %7434 }
 0x406   : > { %v1795_v8 = vpop.xlane.xlu1 %1794 }
 0x407   : > { %v1815_v41 = vsub.f32 %v9631_v63, %v1795_v8  ;;  %v1814_v63 = vsub.f32 %v9622_v56, %v1793_v26 }
 0x409   : > { %1866 = vadd.xlane.f32.xlu0 %v9702_v61  ;;  %v1842_v58 = vmul.f32 1.442695, %v1815_v41  ;;  %v1840_v57 = vmul.f32 1.442695, %v1814_v63  ;;  %v7154_v41 = vld [vmem:[#allocation10 + $0x8] sm:$0xff] }
 0x40a   : > { %2854 = vmatpush.bf16.msrb.mxu2 %v7154_v41 }
 0x40e   : > { %v1797_v40 = vpop.xlane.xlu1 %1796 }
 0x40f   : > { %v1816_v0 = vsub.f32 %v9640_v2, %v1797_v40  ;;  %v7153_v40 = vld [vmem:[#allocation10] sm:$0xff] }
 0x410   : > { %2855 = vmatpush.bf16.msrb.mxu2 %v7153_v40 }
 0x411   : > { %v1844_v53 = vmul.f32 1.442695, %v1816_v0  ;;  %1870 = vadd.xlane.f32.xlu0 %v9708_v1 }
 0x413   : > { %7436 = vpow2.f32 %v1844_v53 }
 0x414   : > { %7438 = vpow2.f32 %v1842_v58 }
 0x415   : > { %7440 = vpow2.f32 %v1836_v59 }
 0x416   : > { %1864 = vadd.xlane.f32.xlu1 %v9711_v15  ;;  %v9723_v8 = vpop.xlane.xlu0 %1798  ;;  %7442 = vpow2.f32 %v1840_v57 }
 0x419   : > { %v9715_v21 = vpop.eup %7436 }
 0x41a   : > { %v9717_v2 = vpop.eup %7438  ;;  %1876 = vadd.xlane.f32.xlu0 %v9715_v21 }
 0x41b   : > { %1874 = vadd.xlane.f32.xlu2 %v9717_v2  ;;  %v9721_v24 = vpop.eup %7440 }
 0x41c   : > { %v9726_v29 = vpop.eup %7442 }
 0x41e   : > { %1868 = vadd.xlane.f32.xlu1 %v9721_v24  ;;  %v1801_v27 = vpop.xlane.xlu1 %1800 }
 0x426   : > { %1872 = vadd.xlane.f32.xlu1 %v9726_v29  ;;  %v1803_v56 = vpop.xlane.xlu0 %1802 }
 0x42e   : > { %2229 = vrot.lane.b32.xlu0 %v9492_v10, %s8221_s25  ;;  %v1853_v23 = vpop.xlane.xlu0 %1852 }
 0x42f   : > { %7444 = vrcp.f32 %v1853_v23  ;;  %v1895_v20 = vand.u32 2147483648, %v1853_v23  ;;  %vm1889_vm8 = vweird.f32 %v1853_v23  ;;  %v1893_v42 = vand.u32 2147483647, %v1853_v23 }
 0x431   : > { %v1896_v40 = vor.u32 1.1754944e-38, %v1895_v20  ;;  %vm1894_vm11 = vcmp.eq.f32.partialorder %v1893_v42, 8.507059e+37 }
 0x433   : > { %2919 = vrot.lane.b32.xlu2 %v9308_v45, %s8221_s25 }
 0x435   : > { %v7445_v28 = vpop.eup %7444 }
 0x436   : > { %v1885_v0 = vmul.f32 %v7445_v28, %v1853_v23  ;;  %v1855_v58 = vpop.xlane.xlu1 %1854  ;;  %vm1890_vm7 = vweird.f32 %v7445_v28 }
 0x437   : > { %7446 = vrcp.f32 %v1855_v58  ;;  %vm1891_vm9 = vmor %vm1889_vm8, %vm1890_vm7  ;;  %v1910_v41 = vand.u32 2147483648, %v1855_v58  ;;  %vm1904_vm12 = vweird.f32 %v1855_v58 }
 0x438   : > { %v1886_v53 = vsub.f32 1.0, %v1885_v0  ;;  %v1908_v0 = vand.u32 2147483647, %v1855_v58 }
 0x439   : > { %v1911_v39 = vor.u32 1.1754944e-38, %v1910_v41 }
 0x43a   : > { %v1887_v59 = vmul.f32 %v7445_v28, %v1886_v53  ;;  %vm1909_vm14 = vcmp.eq.f32.partialorder %v1908_v0, 8.507059e+37 }
 0x43c   : > { %v1888_v63 = vadd.f32 %v7445_v28, %v1887_v59 }
 0x43d   : > { %v7447_v26 = vpop.eup %7446 }
 0x43e   : > { %v1900_v57 = vmul.f32 %v7447_v26, %v1855_v58  ;;  %v1892_v30 = vsel %vm1891_vm9, %v7445_v28, %v1888_v63  ;;  %vm1905_vm10 = vweird.f32 %v7447_v26 }
 0x43f   : > { %2917 = vrot.lane.b32.xlu1 %v9327_v60, %s8221_s25  ;;  %v1897_v59 = vsel %vm1894_vm11, %v1896_v40, %v1892_v30  ;;  %vm1906_vm13 = vmor %vm1904_vm12, %vm1905_vm10 }
 0x440   : > { %v1901_v45 = vsub.f32 1.0, %v1900_v57  ;;  %v1898_v57 = vmul.f32 %v9671_v49, %v1897_v59 }
 0x441   : > { %v2228_v4 = vpop.permute.xlu0 %2227 }
 0x442   : > { %v1902_v35 = vmul.f32 %v7447_v26, %v1901_v45  ;;  %6712 = vmatmul.msk.bf16.gmra.mxu0 %vm1674_vm5, %v2228_v4  ;;  %v1819_v45 = vsub.f32 %v9667_v55, %v1803_v56  ;;  %v1818_v4 = vsub.f32 %v9658_v25, %v1801_v27 }
 0x444   : > { %v1903_v53 = vadd.f32 %v7447_v26, %v1902_v35  ;;  %v1850_v20 = vmul.f32 1.442695, %v1819_v45  ;;  %v1848_v30 = vmul.f32 1.442695, %v1818_v4 }
 0x446   : > { %v1907_v60 = vsel %vm1906_vm13, %v7447_v26, %v1903_v53  ;;  %7448 = vpow2.f32 %v1850_v20 }
 0x447   : > { %v1912_v23 = vsel %vm1909_vm14, %v1911_v39, %v1907_v60  ;;  %7450 = vpow2.f32 %v1848_v30  ;;  %v1859_v39 = vpop.xlane.xlu1 %1858 }
 0x448   : > { %v1913_v11 = vmul.f32 %v9674_v62, %v1912_v23  ;;  %7452 = vrcp.f32 %v1859_v39  ;;  %v1940_v23 = vand.u32 2147483648, %v1859_v39  ;;  %vm1934_vm0 = vweird.f32 %v1859_v39 }
 0x449   : > { %v1938_v45 = vand.u32 2147483647, %v1859_v39 }
 0x44a   : > { %v2124_v28 = vpack.c.bf16 %v1913_v11, %v1898_v57  ;;  %v1817_v11 = vsub.f32 %v9649_v3, %v9723_v8 }
 0x44b   : > { %vm1939_vm4 = vcmp.eq.f32.partialorder %v1938_v45, 8.507059e+37 }
 0x44c   : > { %2164 = vmatmul.bf16.vlgmr.msra.gmra.mxu2 %v2124_v28  ;;  %v9745_v49 = vpop.eup %7448  ;;  %v1846_v25 = vmul.f32 1.442695, %v1817_v11 }
 0x44d   : > { %3612 = vmatpush.bf16.xpose.msra.mxu2 %v9522_v48  ;;  %v9741_v42 = vpop.xlane.xlu2 %1860  ;;  %v9750_v48 = vpop.eup %7450 }
 0x44e   : > { %7454 = vpow2.f32 %v1846_v25  ;;  %v7453_v62 = vpop.eup %7452  ;;  %vm1949_vm9 = vweird.f32 %v9741_v42 }
 0x44f   : > { %7456 = vrcp.f32 %v9741_v42  ;;  %v1930_v27 = vmul.f32 %v7453_v62, %v1859_v39  ;;  %vm1935_vm15 = vweird.f32 %v7453_v62 }
 0x450   : > { %vm1936_vm1 = vmor %vm1934_vm0, %vm1935_vm15 }
 0x451   : > { %v1931_v8 = vsub.f32 1.0, %v1930_v27 }
 0x453   : > { %v1932_v63 = vmul.f32 %v7453_v62, %v1931_v8 }
 0x454   : > { %v9755_v56 = vpop.eup %7454 }
 0x455   : > { %3613 = vmatpush.bf16.xpose.msra.mxu2 %v9536_v31  ;;  %v2924_v60 = vpop.permute.xlu2 %2923  ;;  %v9758_v3 = vpop.eup %7456  ;;  %v1933_v59 = vadd.f32 %v7453_v62, %v1932_v63 }
 0x456   : > { %v2969_v35 = vsel %vm1674_vm5, %v2924_v60, 0  ;;  %v1945_v26 = vmul.f32 %v9758_v3, %v9741_v42  ;;  %vm1950_vm7 = vweird.f32 %v9758_v3 }
 0x457   : > { %2979 = vmatpush.bf16.xpose.msra.mxu0 %v2969_v35  ;;  %v1937_v60 = vsel %vm1936_vm1, %v7453_v62, %v1933_v59  ;;  %vm9790_vm10 = vmor %vm1949_vm9, %vm1950_vm7 }
 0x458   : > { %1882 = vadd.xlane.f32.xlu0 %v9745_v49  ;;  %v1946_v0 = vsub.f32 1.0, %v1945_v26  ;;  %v1955_v26 = vand.u32 2147483648, %v9741_v42 }
 0x45a   : > { %v1947_v28 = vmul.f32 %v9758_v3, %v1946_v0 }
 0x45c   : > { %1880 = vadd.xlane.f32.xlu2 %v9750_v48  ;;  %v1948_v39 = vadd.f32 %v9758_v3, %v1947_v28 }
 0x45d   : > { %3614 = vmatpush.bf16.xpose.msra.mxu2 %v2969_v35  ;;  %v1941_v35 = vor.u32 1.1754944e-38, %v1940_v23 }
 0x45e   : > { %v2922_v55 = vpop.permute.xlu1 %2921  ;;  %v1952_v23 = vsel %vm9790_vm10, %v9758_v3, %v1948_v39 }
 0x45f   : > { %v2966_v31 = vsel %vm1674_vm5, %v2922_v55, 0  ;;  %v1942_v27 = vsel %vm1939_vm4, %v1941_v35, %v1937_v60 }
 0x460   : > { %2980 = vmatpush.bf16.xpose.msra.mxu0 %v2966_v31  ;;  %v1943_v59 = vmul.f32 %v9681_v37, %v1942_v27 }
 0x465   : > { %3615 = vmatpush.bf16.xpose.msra.mxu2 %v2966_v31 }
 0x469   : > { %1878 = vadd.xlane.f32.xlu1 %v9755_v56 }
 0x46c   : > { %2231 = vrot.lane.b32.xlu0 %v9497_v46, %s8221_s25  ;;  %v1857_v58 = vpop.xlane.xlu0 %1856 }
 0x46d   : > { %7458 = vrcp.f32 %v1857_v58  ;;  %v1925_v4 = vand.u32 2147483648, %v1857_v58  ;;  %v1923_v30 = vand.u32 2147483647, %v1857_v58  ;;  %vm1919_vm3 = vweird.f32 %v1857_v58 }
 0x46f   : > { %v1926_v31 = vor.u32 1.1754944e-38, %v1925_v4  ;;  %vm1924_vm8 = vcmp.eq.f32.partialorder %v1923_v30, 8.507059e+37 }
 0x473   : > { %v7459_v41 = vpop.eup %7458 }
 0x474   : > { %v1915_v40 = vmul.f32 %v7459_v41, %v1857_v58  ;;  %2915 = vrot.lane.b32.xlu2 %v9368_v33, %s8221_s25  ;;  %2897 = vrot.lane.b32.xlu0 %v9392_v32, %s8222_s15  ;;  %v1863_v53 = vpop.xlane.xlu0 %1862  ;;  %vm1920_vm2 = vweird.f32 %v7459_v41 }
 0x475   : > { %7460 = vrcp.f32 %v1863_v53  ;;  %vm9769_vm6 = vmor %vm1919_vm3, %vm1920_vm2  ;;  %v1968_v4 = vand.u32 2147483647, %v1863_v53  ;;  %vm1964_vm13 = vweird.f32 %v1863_v53 }
 0x476   : > { %v1916_v57 = vsub.f32 1.0, %v1915_v40 }
 0x477   : > { %vm1969_vm15 = vcmp.eq.f32.partialorder %v1968_v4, 8.507059e+37 }
 0x478   : > { %v1917_v20 = vmul.f32 %v7459_v41, %v1916_v57  ;;  %v1970_v57 = vand.u32 2147483648, %v1863_v53 }
 0x47a   : > { %v1918_v11 = vadd.f32 %v7459_v41, %v1917_v20 }
 0x47b   : > { %v7461_v25 = vpop.eup %7460 }
 0x47c   : > { %v1960_v8 = vmul.f32 %v7461_v25, %v1863_v53  ;;  %2899 = vrot.lane.b32.xlu2 %v9404_v34, %s8222_s15  ;;  %3574 = vrot.lane.b32.xlu0 %v9404_v34, %s8224_s28  ;;  %v9779_v62 = vpop.xlane.xlu0 %1866  ;;  %v1922_v58 = vsel %vm9769_vm6, %v7459_v41, %v1918_v11  ;;  %v1953_v41 = vand.u32 2147483647, %v9741_v42  ;;  %vm1965_vm11 = vweird.f32 %v7461_v25 }
 0x47d   : > { %7462 = vrcp.f32 %v9779_v62  ;;  %v1927_v63 = vsel %vm1924_vm8, %v1926_v31, %v1922_v58  ;;  %vm1966_vm14 = vmor %vm1964_vm13, %vm1965_vm11  ;;  %v1971_v42 = vor.u32 1.1754944e-38, %v1970_v57  ;;  %vm1994_vm1 = vweird.f32 %v9779_v62 }
 0x47e   : > { %v1961_v0 = vsub.f32 1.0, %v1960_v8  ;;  %v1928_v40 = vmul.f32 %v9693_v18, %v1927_v63  ;;  %v1956_v18 = vor.u32 1.1754944e-38, %v1955_v26  ;;  %vm1954_vm12 = vcmp.eq.f32.partialorder %v1953_v41, 8.507059e+37  ;;  %v9809_v8 = vpop.f32.mrf.mxu0 }
 0x480   : > { %v2125_v45 = vpack.c.bf16 %v1943_v59, %v1928_v40  ;;  %v1962_v28 = vmul.f32 %v7461_v25, %v1961_v0  ;;  %v1957_v30 = vsel %vm1954_vm12, %v1956_v18, %v1952_v23  ;;  %v1998_v59 = vand.u32 2147483647, %v9779_v62 }
 0x481   : > { %v1958_v11 = vmul.f32 %v9684_v22, %v1957_v30 }
 0x482   : > { %2913 = vrot.lane.b32.xlu1 %v9386_v47, %s8221_s25  ;;  %2169 = vmatmul.bf16.gmra.mxu2 %v2125_v45  ;;  %v1963_v37 = vadd.f32 %v7461_v25, %v1962_v28  ;;  %vm1999_vm6 = vcmp.eq.f32.partialorder %v1998_v59, 8.507059e+37 }
 0x483   : > { %v7463_v20 = vpop.eup %7462 }
 0x484   : > { %2901 = vrot.lane.b32.xlu2 %v9263_v13, %s8222_s15  ;;  %v1967_v3 = vsel %vm1966_vm14, %v7461_v25, %v1963_v37  ;;  %v1990_v60 = vmul.f32 %v7463_v20, %v9779_v62  ;;  %v9805_v39 = vpop.xlane.xlu0 %1870  ;;  %vm1995_vm0 = vweird.f32 %v7463_v20 }
 0x485   : > { %v1972_v35 = vsel %vm1969_vm15, %v1971_v42, %v1967_v3  ;;  %vm9824_vm2 = vmor %vm1994_vm1, %vm1995_vm0  ;;  %vm2024_vm13 = vweird.f32 %v9805_v39 }
 0x486   : > { %v1973_v55 = vmul.f32 %v9697_v5, %v1972_v35  ;;  %v1991_v27 = vsub.f32 1.0, %v1990_v60  ;;  %v9828_v57 = vpop.f32.mrf.mxu0 }
 0x488   : > { %v2126_v31 = vpack.c.bf16 %v1973_v55, %v1958_v11  ;;  %v1992_v25 = vmul.f32 %v7463_v20, %v1991_v27 }
 0x489   : > { %v1865_v53 = vpop.xlane.xlu1 %1864 }
 0x48a   : > { %7464 = vrcp.f32 %v1865_v53  ;;  %3572 = vrot.lane.b32.xlu1 %v9392_v32, %s8224_s28  ;;  %2174 = vmatmul.bf16.vlgmr.msra.gmra.mxu3 %v2126_v31  ;;  %v1993_v63 = vadd.f32 %v7463_v20, %v1992_v25  ;;  %v2000_v32 = vand.u32 2147483648, %v9779_v62  ;;  %v1983_v34 = vand.u32 2147483647, %v1865_v53 }
 0x48b   : > { %7466 = vrcp.f32 %v9805_v39  ;;  %v1985_v41 = vand.u32 2147483648, %v1865_v53  ;;  %vm1979_vm4 = vweird.f32 %v1865_v53 }
 0x48c   : > { %v2001_v18 = vor.u32 1.1754944e-38, %v2000_v32  ;;  %vm1984_vm8 = vcmp.eq.f32.partialorder %v1983_v34, 8.507059e+37 }
 0x48d   : > { %v9835_v42 = vpop.xlane.xlu0 %1876  ;;  %v1986_v3 = vor.u32 1.1754944e-38, %v1985_v41 }
 0x48e   : > { %v9812_v58 = vpop.xlane.xlu2 %1874 }
 0x490   : > { %v7465_v22 = vpop.eup %7464 }
 0x491   : > { %v1975_v26 = vmul.f32 %v7465_v22, %v1865_v53  ;;  %v9814_v5 = vpop.xlane.xlu1 %1868  ;;  %v9816_v0 = vpop.eup %7466  ;;  %vm1980_vm3 = vweird.f32 %v7465_v22 }
 0x492   : > { %7468 = vrcp.f32 %v9814_v5  ;;  %3576 = vrot.lane.b32.xlu1 %v9263_v13, %s8224_s28  ;;  %v2020_v45 = vmul.f32 %v9816_v0, %v9805_v39  ;;  %v1997_v13 = vsel %vm9824_vm2, %v7463_v20, %v1993_v63  ;;  %vm1981_vm7 = vmor %vm1979_vm4, %vm1980_vm3  ;;  %v2015_v41 = vand.u32 2147483648, %v9814_v5 }
 0x493   : > { %v1976_v40 = vsub.f32 1.0, %v1975_v26  ;;  %v2002_v60 = vsel %vm1999_vm6, %v2001_v18, %v1997_v13  ;;  %vm2009_vm10 = vweird.f32 %v9814_v5  ;;  %vm2025_vm11 = vweird.f32 %v9816_v0 }
 0x494   : > { %v2021_v35 = vsub.f32 1.0, %v2020_v45  ;;  %v2003_v25 = vmul.f32 %v9702_v61, %v2002_v60  ;;  %v2013_v61 = vand.u32 2147483647, %v9814_v5  ;;  %v2030_v45 = vand.u32 2147483648, %v9805_v39  ;;  %vm2026_vm14 = vmor %vm2024_vm13, %vm2025_vm11 }
 0x495   : > { %v1977_v28 = vmul.f32 %v7465_v22, %v1976_v40  ;;  %v9847_v40 = vpop.f32.mrf.mxu0  ;;  %v2016_v18 = vor.u32 1.1754944e-38, %v2015_v41  ;;  %vm2054_vm6 = vweird.f32 %v9812_v58  ;;  %vm2069_vm11 = vweird.f32 %v9835_v42 }
 0x496   : > { %v2920_v4 = vpop.permute.xlu2 %2919  ;;  %v2022_v32 = vmul.f32 %v9816_v0, %v2021_v35  ;;  %vm2014_vm15 = vcmp.eq.f32.partialorder %v2013_v61, 8.507059e+37 }
 0x497   : > { %v2963_v62 = vsel %vm1674_vm5, %v2920_v4, 0  ;;  %v1978_v37 = vadd.f32 %v7465_v22, %v1977_v28  ;;  %v2028_v4 = vand.u32 2147483647, %v9805_v39 }
 0x498   : > { %v7469_v30 = vpop.eup %7468  ;;  %2981 = vmatpush.bf16.xpose.msra.mxu0 %v2963_v62  ;;  %3616 = vmatpush.bf16.xpose.msra.mxu2 %v2963_v62 }
 0x499   : > { %v2005_v11 = vmul.f32 %v7469_v30, %v9814_v5  ;;  %v9838_v55 = vpop.xlane.xlu1 %1872  ;;  %v1982_v20 = vsel %vm1981_vm7, %v7465_v22, %v1978_v37  ;;  %vm2010_vm9 = vweird.f32 %v7469_v30  ;;  %v9863_v5 = vadd.f32 %v9809_v8, %v9510_v7 }
 0x49a   : > { %7470 = vrcp.f32 %v9838_v55  ;;  %2903 = vrot.lane.b32.xlu1 %v9400_v16, %s8222_s15  ;;  %v1987_v31 = vsel %vm1984_vm8, %v1986_v3, %v1982_v20  ;;  %vm2011_vm12 = vmor %vm2009_vm10, %vm2010_vm9  ;;  %v2031_v3 = vor.u32 1.1754944e-38, %v2030_v45  ;;  %vm2029_vm0 = vcmp.eq.f32.partialorder %v2028_v4, 8.507059e+37 }
 0x49b   : > { %v2006_v27 = vsub.f32 1.0, %v2005_v11  ;;  %v1988_v53 = vmul.f32 %v9711_v15, %v1987_v31  ;;  %7472 = vrcp.f32 %v9812_v58  ;;  %v2023_v15 = vadd.f32 %v9816_v0, %v2022_v32 }
 0x49c   : > { %v9871_v8 = vadd.f32 %v9828_v57, %v9519_v9  ;;  %vm2039_vm2 = vweird.f32 %v9838_v55  ;;  %7474 = vrcp.f32 %v9835_v42 }
 0x49d   : > { %v2127_v26 = vpack.c.bf16 %v2003_v25, %v1988_v53  ;;  %v2007_v63 = vmul.f32 %v7469_v30, %v2006_v27  ;;  %v2273_v35 = vpop.f32.mrf.mxu0 }
 0x49f   : > { %2179 = vmatmul.bf16.gmra.mxu3 %v2127_v26  ;;  %v2008_v22 = vadd.f32 %v7469_v30, %v2007_v63  ;;  %v2060_v63 = vand.u32 2147483648, %v9812_v58 }
 0x4a0   : > { %v7471_v59 = vpop.eup %7470  ;;  %v2230_v34 = vpop.permute.xlu0 %2229 }
 0x4a1   : > { %6713 = vmatmul.msk.bf16.gmra.mxu0 %vm1674_vm5, %v2230_v34  ;;  %v7473_v23 = vpop.eup %7472  ;;  %v2035_v28 = vmul.f32 %v7471_v59, %v9838_v55  ;;  %v2012_v13 = vsel %vm2011_vm12, %v7469_v30, %v2008_v22  ;;  %vm2040_vm1 = vweird.f32 %v7471_v59  ;;  %v2058_v34 = vand.u32 2147483647, %v9812_v58 }
 0x4a2   : > { %3578 = vrot.lane.b32.xlu1 %v9400_v16, %s8224_s28  ;;  %v2050_v62 = vmul.f32 %v7473_v23, %v9812_v58  ;;  %v2027_v16 = vsel %vm2026_vm14, %v9816_v0, %v2023_v15  ;;  %v2017_v37 = vsel %vm2014_vm15, %v2016_v18, %v2012_v13  ;;  %v9875_v0 = vadd.f32 %v2273_v35, %v9546_v17  ;;  %vm2041_vm4 = vmor %vm2039_vm2, %vm2040_vm1  ;;  %v7475_v18 = vpop.eup %7474 }
 0x4a3   : > { %v2036_v30 = vsub.f32 1.0, %v2035_v28  ;;  %v2032_v60 = vsel %vm2029_vm0, %v2031_v3, %v2027_v16  ;;  %v2018_v11 = vmul.f32 %v9721_v24, %v2017_v37  ;;  %v2045_v24 = vand.u32 2147483648, %v9838_v55 }
 0x4a4   : > { %v2051_v39 = vsub.f32 1.0, %v2050_v62  ;;  %v2033_v20 = vmul.f32 %v9708_v1, %v2032_v60  ;;  %v2043_v1 = vand.u32 2147483647, %v9838_v55  ;;  %vm2055_vm3 = vweird.f32 %v7473_v23 }
 0x4a5   : > { %v2037_v31 = vmul.f32 %v7471_v59, %v2036_v30  ;;  %v2046_v41 = vor.u32 1.1754944e-38, %v2045_v24  ;;  %vm2056_vm7 = vmor %vm2054_vm6, %vm2055_vm3  ;;  %v2061_v55 = vor.u32 1.1754944e-38, %v2060_v63  ;;  %vm2059_vm9 = vcmp.eq.f32.partialorder %v2058_v34, 8.507059e+37 }
 0x4a6   : > { %2306 = vmax.xlane.f32.xlu0 %v9863_v5  ;;  %v2052_v27 = vmul.f32 %v7473_v23, %v2051_v39  ;;  %v2128_v53 = vpack.c.bf16 %v2033_v20, %v2018_v11  ;;  %vm2044_vm8 = vcmp.eq.f32.partialorder %v2043_v1, 8.507059e+37  ;;  %v9894_v58 = vadd.f32 %v9847_v40, %v9533_v54 }
 0x4a7   : > { %v2038_v25 = vadd.f32 %v7471_v59, %v2037_v31  ;;  %v2065_v40 = vmul.f32 %v7475_v18, %v9835_v42  ;;  %vm2070_vm10 = vweird.f32 %v7475_v18  ;;  %v2075_v24 = vand.u32 2147483648, %v9835_v42 }
 0x4a8   : > { %v2053_v57 = vadd.f32 %v7473_v23, %v2052_v27  ;;  %vm2071_vm12 = vmor %vm2069_vm11, %vm2070_vm10 }
 0x4a9   : > { %v2042_v22 = vsel %vm2041_vm4, %v7471_v59, %v2038_v25  ;;  %v2066_v30 = vsub.f32 1.0, %v2065_v40 }
 0x4aa   : > { %v2057_v61 = vsel %vm2056_vm7, %v7473_v23, %v2053_v57  ;;  %v2047_v15 = vsel %vm2044_vm8, %v2046_v41, %v2042_v22  ;;  %v2073_v57 = vand.u32 2147483647, %v9835_v42 }
 0x4ab   : > { %v2062_v45 = vsel %vm2059_vm9, %v2061_v55, %v2057_v61  ;;  %v2048_v28 = vmul.f32 %v9726_v29, %v2047_v15  ;;  %v2276_v29 = vpop.f32.mrf.mxu0  ;;  %v2067_v39 = vmul.f32 %v7475_v18, %v2066_v30  ;;  %v2076_v61 = vor.u32 1.1754944e-38, %v2075_v24 }
 0x4ac   : > { %v2063_v13 = vmul.f32 %v9717_v2, %v2062_v45  ;;  %v9903_v23 = vadd.f32 %v2276_v29, %v9561_v52  ;;  %vm2074_vm14 = vcmp.eq.f32.partialorder %v2073_v57, 8.507059e+37 }
 0x4ad   : > { %2308 = vmax.xlane.f32.xlu2 %v9871_v8  ;;  %v2068_v31 = vadd.f32 %v7475_v18, %v2067_v39 }
 0x4ae   : > { %2312 = vmax.xlane.f32.xlu0 %v9875_v0  ;;  %v2129_v4 = vpack.c.bf16 %v2063_v13, %v2048_v28 }
 0x4af   : > { %2184 = vmatmul.bf16.gmra.mxu3 %v2128_v53  ;;  %v2072_v63 = vsel %vm2071_vm12, %v7475_v18, %v2068_v31 }
 0x4b0   : > { %v2077_v45 = vsel %vm2074_vm14, %v2076_v61, %v2072_v63 }
 0x4b1   : > { %v2918_v26 = vpop.permute.xlu1 %2917  ;;  %v2078_v18 = vmul.f32 %v9715_v21, %v2077_v45 }
 0x4b2   : > { %v2960_v32 = vsel %vm1674_vm5, %v2918_v26, 0 }
 0x4b3   : > { %2982 = vmatpush.bf16.xpose.msra.mxu0 %v2960_v32  ;;  %3617 = vmatpush.bf16.xpose.msra.mxu2 %v2960_v32  ;;  %v2278_v25 = vpop.f32.mrf.mxu0 }
 0x4b4   : > { %v9926_v13 = vadd.f32 %v2278_v25, %v9571_v38 }
 0x4bf   : > { %2189 = vmatmul.bf16.gmra.mxu3 %v2129_v4 }
 0x4c2   : > { %3580 = vrot.lane.b32.xlu0 %v9295_v44, %s8224_s28 }
 0x4c5   : > { %2905 = vrot.lane.b32.xlu2 %v9295_v44, %s8222_s15 }
 0x4ca   : > { %2907 = vrot.lane.b32.xlu0 %v9466_v36, %s8222_s15 }
 0x4cb   : > { %v9906_v44 = vpop.xlane.xlu0 %1882 }
 0x4cc   : > { %2310 = vmax.xlane.f32.xlu1 %v9894_v58  ;;  %vm2114_vm7 = vweird.f32 %v9906_v44  ;;  %v2118_v31 = vand.u32 2147483647, %v9906_v44 }
 0x4ce   : > { %vm2119_vm10 = vcmp.eq.f32.partialorder %v2118_v31, 8.507059e+37 }
 0x4cf   : > { %v2165_v2 = vpop.f32.mrf.mxu2  ;;  %v9900_v59 = vpop.xlane.xlu2 %1880 }
 0x4d0   : > { %7476 = vrcp.f32 %v9900_v59  ;;  %vm2099_vm3 = vweird.f32 %v9900_v59  ;;  %v2103_v21 = vand.u32 2147483647, %v9900_v59 }
 0x4d2   : > { %vm2104_vm9 = vcmp.eq.f32.partialorder %v2103_v21, 8.507059e+37 }
 0x4d4   : > { %2314 = vmax.xlane.f32.xlu1 %v9903_v23 }
 0x4d6   : > { %v9914_v11 = vpop.eup %7476 }
 0x4d7   : > { %v2167_v62 = vpop.f32.mrf.mxu2  ;;  %v2916_v16 = vpop.permute.xlu2 %2915  ;;  %v2095_v26 = vmul.f32 %v9914_v11, %v9900_v59  ;;  %vm2100_vm2 = vweird.f32 %v9914_v11 }
 0x4d8   : > { %v2205_v37 = vpack.c.bf16 %v2167_v62, %v2165_v2  ;;  %v2957_v3 = vsel %vm1674_vm5, %v2916_v16, 0  ;;  %v2281_v62 = vpop.f32.mrf.mxu0  ;;  %vm2101_vm6 = vmor %vm2099_vm3, %vm2100_vm2 }
 0x4d9   : > { %2983 = vmatpush.bf16.xpose.msra.mxu0 %v2957_v3  ;;  %3618 = vmatpush.bf16.xpose.msra.mxu2 %v2957_v3  ;;  %v2096_v15 = vsub.f32 1.0, %v2095_v26  ;;  %v9936_v3 = vadd.f32 %v2281_v62, %v9582_v14 }
 0x4da   : > { %6739 = vmatmul.msk.bf16.vlgmr.msrb.gmra.mxu2 %vm1674_vm5, %v2205_v37 }
 0x4db   : > { %v2097_v2 = vmul.f32 %v9914_v11, %v2096_v15 }
 0x4dc   : > { %v1879_v60 = vpop.xlane.xlu1 %1878 }
 0x4dd   : > { %7478 = vrcp.f32 %v1879_v60  ;;  %v2090_v32 = vand.u32 2147483648, %v1879_v60  ;;  %v2088_v41 = vand.u32 2147483647, %v1879_v60  ;;  %vm2084_vm15 = vweird.f32 %v1879_v60 }
 0x4de   : > { %v2232_v35 = vpop.permute.xlu0 %2231  ;;  %7480 = vrcp.f32 %v9906_v44  ;;  %v2098_v30 = vadd.f32 %v9914_v11, %v2097_v2 }
 0x4df   : > { %6714 = vmatmul.msk.bf16.gmra.mxu0 %vm1674_vm5, %v2232_v35  ;;  %v2091_v28 = vor.u32 1.1754944e-38, %v2090_v32  ;;  %vm2089_vm1 = vcmp.eq.f32.partialorder %v2088_v41, 8.507059e+37  ;;  %v2120_v35 = vand.u32 2147483648, %v9906_v44 }
 0x4e1   : > { %v2121_v24 = vor.u32 1.1754944e-38, %v2120_v35 }
 0x4e3   : > { %v7479_v20 = vpop.eup %7478 }
 0x4e4   : > { %v2080_v27 = vmul.f32 %v7479_v20, %v1879_v60  ;;  %v9916_v53 = vpop.eup %7480  ;;  %vm2085_vm13 = vweird.f32 %v7479_v20 }
 0x4e5   : > { %v2110_v22 = vmul.f32 %v9916_v53, %v9906_v44  ;;  %vm2086_vm0 = vmor %vm2084_vm15, %vm2085_vm13  ;;  %vm2115_vm4 = vweird.f32 %v9916_v53  ;;  %v2283_v44 = vpop.f32.mrf.mxu0 }
 0x4e6   : > { %v2081_v1 = vsub.f32 1.0, %v2080_v27  ;;  %vm2116_vm8 = vmor %vm2114_vm7, %vm2115_vm4  ;;  %v9964_v61 = vadd.f32 %v2283_v44, %v9591_v19 }
 0x4e7   : > { %v2111_v42 = vsub.f32 1.0, %v2110_v22  ;;  %v2900_v22 = vpop.permute.xlu2 %2899 }
 0x4e8   : > { %v2082_v34 = vmul.f32 %v7479_v20, %v2081_v1  ;;  %v2898_v1 = vpop.permute.xlu0 %2897 }
 0x4e9   : > { %v2112_v16 = vmul.f32 %v9916_v53, %v2111_v42 }
 0x4ea   : > { %v2083_v55 = vadd.f32 %v7479_v20, %v2082_v34 }
 0x4ec   : > { %v2087_v4 = vsel %vm2086_vm0, %v7479_v20, %v2083_v55  ;;  %v2102_v20 = vsel %vm2101_vm6, %v9914_v11, %v2098_v30 }
 0x4ed   : > { %3582 = vrot.lane.b32.xlu1 %v9466_v36, %s8224_s28  ;;  %v2092_v29 = vsel %vm2089_vm1, %v2091_v28, %v2087_v4  ;;  %v2105_v36 = vand.u32 2147483648, %v9900_v59 }
 0x4ee   : > { %2316 = vmax.xlane.f32.xlu2 %v9926_v13  ;;  %v2093_v40 = vmul.f32 %v9755_v56, %v2092_v29  ;;  %v2113_v56 = vadd.f32 %v9916_v53, %v2112_v16 }
 0x4ef   : > { %v2106_v27 = vor.u32 1.1754944e-38, %v2105_v36  ;;  %v2902_v15 = vpop.permute.xlu2 %2901 }
 0x4f0   : > { %v2130_v37 = vpack.c.bf16 %v2093_v40, %v2078_v18  ;;  %v2117_v59 = vsel %vm2116_vm8, %v9916_v53, %v2113_v56 }
 0x4f1   : > { %v2107_v25 = vsel %vm2104_vm9, %v2106_v27, %v2102_v20  ;;  %v2122_v26 = vsel %vm2119_vm10, %v2121_v24, %v2117_v59 }
 0x4f2   : > { %2194 = vmatmul.bf16.gmra.mxu3 %v2130_v37  ;;  %v2108_v57 = vmul.f32 %v9750_v48, %v2107_v25  ;;  %v2123_v63 = vmul.f32 %v9745_v49, %v2122_v26  ;;  %v2286_v48 = vpop.f32.mrf.mxu0  ;;  %v9961_v49 = vpop.permute.xlu0 %3574 }
 0x4f3   : > { %v9996_v31 = vadd.f32 %v2286_v48, %v9600_v43 }
 0x4f4   : > { %v2914_v60 = vpop.permute.xlu1 %2913  ;;  %2318 = vmax.xlane.f32.xlu0 %v9936_v3  ;;  %v2131_v32 = vpack.c.bf16 %v2123_v63, %v2108_v57 }
 0x4f5   : > { %v2954_v39 = vsel %vm1674_vm5, %v2914_v60, 0 }
 0x4f6   : > { %2984 = vmatpush.bf16.xpose.msra.mxu0 %v2954_v39  ;;  %3619 = vmatpush.bf16.xpose.msra.mxu2 %v2954_v39 }
 0x4fa   : > { %v2288_v28 = vpop.f32.mrf.mxu0 }
 0x4fb   : > { %v9973_v29 = vadd.f32 %v2288_v28, %v9609_v12 }
 0x4fc   : > { %v9969_v55 = vpop.permute.xlu1 %3572 }
 0x4fd   : > { %6747 = vmatmul.msk.bf16.vlgmr.msra.gmra.mxu0 %vm1674_vm5, %v2898_v1 }
 0x502   : > { %2199 = vmatmul.bf16.gmra.mxu3 %v2131_v32 }
 0x505   : > { %v2170_v11 = vpop.f32.mrf.mxu2 }
 0x506   : > { %2909 = vrot.lane.b32.xlu2 %v9492_v10, %s8222_s15 }
 0x50d   : > { %6748 = vmatmul.msk.bf16.gmra.mxu0 %vm1674_vm5, %v2900_v22  ;;  %v2172_v53 = vpop.f32.mrf.mxu2  ;;  %v2175_v41 = vpop.f32.mrf.mxu3 }
 0x50e   : > { %v2206_v34 = vpack.c.bf16 %v2172_v53, %v2170_v11  ;;  %3584 = vrot.lane.b32.xlu2 %v9492_v10, %s8224_s28 }
 0x510   : > { %6740 = vmatmul.msk.bf16.gmra.mxu2 %vm1674_vm5, %v2206_v34 }
 0x515   : > { %v2177_v10 = vpop.f32.mrf.mxu3 }
 0x516   : > { %2911 = vrot.lane.b32.xlu2 %v9497_v46, %s8222_s15  ;;  %v2207_v2 = vpack.c.bf16 %v2177_v10, %v2175_v41  ;;  %s8144_s15 = scalar_lea.hbm %s12616_s9, 256 }
 0x517   : > { %2320 = vmax.xlane.f32.xlu1 %v9964_v61  ;;  %p8146_p7 = scmp.lt.s32.totalorder %s8144_s15, %s8140_s23 }
 0x519   : > { %v2307_v45 = vpop.xlane.xlu0 %2306  ;;  %p8147_p8 = por %p8146_p7, %p8145_p12 }
 0x51a   : > { %v2338_v42 = vsub.f32 %v9863_v5, %v2307_v45  ;;  %v9981_v5 = vpop.permute.xlu1 %3576 }
 0x51b   : > { %p8148_p9 = pnand %p8147_p8, %p8143_p5 }
 0x51c   : > { %v2354_v4 = vmul.f32 1.442695, %v2338_v42 }
 0x51d   : > { %6749 = vmatmul.msk.bf16.gmra.mxu0 %vm1674_vm5, %v2902_v15 }
 0x51e   : > { %7482 = vpow2.f32 %v2354_v4  ;;  %3586 = vrot.lane.b32.xlu2 %v9497_v46, %s8224_s28  ;;  %v2291_v46 = vpop.f32.mrf.mxu0 }
 0x51f   : > { %2324 = vmax.xlane.f32.xlu1 %v9973_v29  ;;  %v10021_v28 = vadd.f32 %v2291_v46, %v9618_v50 }
 0x520   : > { %v2309_v18 = vpop.xlane.xlu2 %2308  ;;  %6741 = vmatmul.msk.bf16.gmra.mxu2 %vm1674_vm5, %v2207_v2 }
 0x521   : > { %v2339_v40 = vsub.f32 %v9871_v8, %v2309_v18  ;;  %v2313_v62 = vpop.xlane.xlu0 %2312 }
 0x522   : > { %v2180_v16 = vpop.f32.mrf.mxu3  ;;  %v2341_v37 = vsub.f32 %v9875_v0, %v2313_v62  ;;  %v2904_v8 = vpop.permute.xlu1 %2903 }
 0x523   : > { %v2356_v30 = vmul.f32 1.442695, %v2339_v40 }
 0x524   : > { %v9984_v36 = vpop.eup %7482  ;;  %v2360_v60 = vmul.f32 1.442695, %v2341_v37 }
 0x525   : > { %7484 = vpow2.f32 %v2356_v30  ;;  %2386 = vadd.xlane.f32.xlu0 %v9984_v36 }
 0x526   : > { %7486 = vpow2.f32 %v2360_v60  ;;  %v2293_v39 = vpop.f32.mrf.mxu0 }
 0x527   : > { %v9999_v27 = vadd.f32 %v2293_v39, %v9627_v6 }
 0x528   : > { %v2906_v1 = vpop.permute.xlu2 %2905 }
 0x52a   : > { %v2182_v21 = vpop.f32.mrf.mxu3  ;;  %v10003_v59 = vpop.permute.xlu1 %3578 }
 0x52b   : > { %v9987_v56 = vpop.eup %7484  ;;  %v2208_v0 = vpack.c.bf16 %v2182_v21, %v2180_v16  ;;  %v12839_v21 = vld [vmem:[#allocation33_spill] sm:$0xff] }
 0x52c   : > { %v9989_v35 = vpop.eup %7486 }
 0x52d   : > { %6750 = vmatmul.msk.bf16.gmra.mxu0 %vm1674_vm5, %v2904_v8  ;;  %2388 = vadd.xlane.f32.xlu0 %v9987_v56 }
 0x52e   : > { %2392 = vadd.xlane.f32.xlu1 %v9989_v35  ;;  %v2296_v25 = vpop.f32.mrf.mxu0 }
 0x52f   : > { %v10006_v26 = vadd.f32 %v2296_v25, %v9636_v51 }
 0x530   : > { %6742 = vmatmul.msk.bf16.gmra.mxu2 %vm1674_vm5, %v2208_v0 }
 0x532   : > { %v2185_v20 = vpop.f32.mrf.mxu3 }
 0x534   : > { %v10012_v11 = vpop.permute.xlu0 %3580 }
 0x535   : > { %2322 = vmax.xlane.f32.xlu0 %v9996_v31 }
 0x536   : > { %2328 = vmax.xlane.f32.xlu1 %v9999_v27 }
 0x53a   : > { %v2187_v24 = vpop.f32.mrf.mxu3 }
 0x53b   : > { %v2209_v57 = vpack.c.bf16 %v2187_v24, %v2185_v20 }
 0x53c   : > { %v2908_v45 = vpop.permute.xlu0 %2907 }
 0x53d   : > { %6751 = vmatmul.msk.bf16.gmra.mxu0 %vm1674_vm5, %v2906_v1 }
 0x53e   : > { %2330 = vmax.xlane.f32.xlu1 %v10006_v26 }
 0x53f   : > { %v2311_v63 = vpop.xlane.xlu1 %2310 }
 0x540   : > { %v2340_v32 = vsub.f32 %v9894_v58, %v2311_v63  ;;  %6743 = vmatmul.msk.bf16.gmra.mxu2 %vm1674_vm5, %v2209_v57  ;;  %v12840_v57 = vld [vmem:[#allocation31_spill] sm:$0xff] }
 0x542   : > { %v2358_v44 = vmul.f32 1.442695, %v2340_v32  ;;  %v2190_v22 = vpop.f32.mrf.mxu3 }
 0x544   : > { %7488 = vpow2.f32 %v2358_v44 }
 0x547   : > { %v2315_v53 = vpop.xlane.xlu1 %2314 }
 0x548   : > { %v2342_v34 = vsub.f32 %v9903_v23, %v2315_v53  ;;  %v2298_v23 = vpop.f32.mrf.mxu0 }
 0x549   : > { %v10038_v8 = vadd.f32 %v2298_v23, %v12839_v21 }
 0x54a   : > { %v10015_v48 = vpop.eup %7488  ;;  %v2362_v41 = vmul.f32 1.442695, %v2342_v34  ;;  %v2192_v15 = vpop.f32.mrf.mxu3 }
 0x54b   : > { %2390 = vadd.xlane.f32.xlu0 %v10015_v48  ;;  %v2210_v58 = vpack.c.bf16 %v2192_v15, %v2190_v22 }
 0x54c   : > { %7490 = vpow2.f32 %v2362_v41 }
 0x54d   : > { %6752 = vmatmul.msk.bf16.gmra.mxu0 %vm1674_vm5, %v2908_v45 }
 0x550   : > { %6744 = vmatmul.msk.bf16.gmra.mxu2 %vm1674_vm5, %v2210_v58 }
 0x552   : > { %v10023_v10 = vpop.eup %7490 }
 0x553   : > { %2394 = vadd.xlane.f32.xlu2 %v10023_v10  ;;  %2326 = vmax.xlane.f32.xlu0 %v10021_v28 }
 0x55c   : > { %v2301_v40 = vpop.f32.mrf.mxu0 }
 0x55d   : > { %v10051_v63 = vadd.f32 %v2301_v40, %v12840_v57  ;;  %v10055_v15 = vpop.f32.mrf.mxu2 }
 0x55e   : > { %12841 = vst [vmem:[#allocation59_spill] sm:$0xff] %v10055_v15 }
 0x55f   : > { %v10048_v1 = vpop.permute.xlu1 %3582 }
 0x561   : > { %v2317_v42 = vpop.xlane.xlu2 %2316 }
 0x562   : > { %v2343_v4 = vsub.f32 %v9926_v13, %v2317_v42 }
 0x564   : > { %v2364_v2 = vmul.f32 1.442695, %v2343_v4  ;;  %v2303_v13 = vpop.f32.mrf.mxu0 }
 0x566   : > { %7492 = vpow2.f32 %v2364_v2  ;;  %v10062_v2 = vpop.f32.mrf.mxu2 }
 0x567   : > { %v2319_v18 = vpop.xlane.xlu0 %2318  ;;  %12842 = vst [vmem:[#allocation27_spill] sm:$0xff] %v10062_v2 }
 0x568   : > { %v2344_v62 = vsub.f32 %v9936_v3, %v2319_v18 }
 0x569   : > { %v2910_v16 = vpop.permute.xlu2 %2909 }
 0x56a   : > { %v2366_v37 = vmul.f32 1.442695, %v2344_v62  ;;  %6753 = vmatmul.msk.bf16.gmra.mxu0 %vm1674_vm5, %v2910_v16 }
 0x56c   : > { %v10030_v30 = vpop.eup %7492  ;;  %7494 = vpow2.f32 %v2366_v37 }
 0x56d   : > { %2396 = vadd.xlane.f32.xlu0 %v10030_v30 }
 0x571   : > { %v10033_v60 = vpop.permute.xlu2 %3584 }
 0x572   : > { %v10035_v46 = vpop.eup %7494 }
 0x573   : > { %2398 = vadd.xlane.f32.xlu1 %v10035_v46 }
 0x575   : > { %v2195_v3 = vpop.f32.mrf.mxu3  ;;  %2332 = vmax.xlane.f32.xlu0 %v10038_v8 }
 0x579   : > { %v2912_v0 = vpop.permute.xlu2 %2911 }
 0x57a   : > { %v2986_v39 = vpop.f32.mrf.mxu0  ;;  %6754 = vmatmul.msk.bf16.gmra.mxu0 %vm1674_vm5, %v2912_v0 }
 0x57b   : > { %v10044_v20 = vadd.f32 %v2986_v39, %v9510_v7  ;;  %v12844_v39 = vld [vmem:[#allocation29_spill] sm:$0xff] }
 0x57d   : > { %v2197_v25 = vpop.f32.mrf.mxu3  ;;  %3026 = vmax.xlane.f32.xlu1 %v10044_v20 }
 0x57e   : > { %v2211_v24 = vpack.c.bf16 %v2197_v25, %v2195_v3  ;;  %v10078_v25 = vadd.f32 %v2303_v13, %v12844_v39 }
 0x580   : > { %6745 = vmatmul.msk.bf16.gmra.mxu2 %vm1674_vm5, %v2211_v24 }
 0x585   : > { %v2200_v32 = vpop.f32.mrf.mxu3  ;;  %2334 = vmax.xlane.f32.xlu1 %v10051_v63 }
 0x58a   : > { %v2321_v44 = vpop.xlane.xlu1 %2320 }
 0x58b   : > { %v2345_v22 = vsub.f32 %v9964_v61, %v2321_v44  ;;  %v2988_v61 = vpop.f32.mrf.mxu0 }
 0x58c   : > { %v10065_v18 = vadd.f32 %v2988_v61, %v9519_v9 }
 0x58d   : > { %v2368_v53 = vmul.f32 1.442695, %v2345_v22  ;;  %v2202_v34 = vpop.f32.mrf.mxu3 }
 0x58e   : > { %v2212_v41 = vpack.c.bf16 %v2202_v34, %v2200_v32 }
 0x58f   : > { %7496 = vpow2.f32 %v2368_v53 }
 0x590   : > { %6746 = vmatmul.msk.bf16.gmra.mxu2 %vm1674_vm5, %v2212_v41 }
 0x592   : > { %v2325_v45 = vpop.xlane.xlu1 %2324 }
 0x593   : > { %v2347_v58 = vsub.f32 %v9973_v29, %v2325_v45  ;;  %v10073_v37 = vpop.f32.mrf.mxu2  ;;  %v2991_v44 = vpop.f32.mrf.mxu0 }
 0x594   : > { %12843 = vst [vmem:[#allocation25_spill] sm:$0xff] %v10073_v37  ;;  %v10084_v13 = vadd.f32 %v2991_v44, %v9533_v54 }
 0x595   : > { %v10059_v23 = vpop.eup %7496  ;;  %v2372_v42 = vmul.f32 1.442695, %v2347_v58 }
 0x596   : > { %2400 = vadd.xlane.f32.xlu0 %v10059_v23 }
 0x597   : > { %7498 = vpow2.f32 %v2372_v42 }
 0x598   : > { %v2387_v4 = vpop.xlane.xlu0 %2386 }
 0x599   : > { %7500 = vrcp.f32 %v2387_v4  ;;  %vm2423_vm12 = vweird.f32 %v2387_v4  ;;  %v2427_v58 = vand.u32 2147483647, %v2387_v4 }
 0x59b   : > { %vm2428_vm15 = vcmp.eq.f32.partialorder %v2427_v58, 8.507059e+37  ;;  %v2993_v58 = vpop.f32.mrf.mxu0 }
 0x59d   : > { %v10067_v40 = vpop.eup %7498 }
 0x59e   : > { %2404 = vadd.xlane.f32.xlu2 %v10067_v40  ;;  %3028 = vmax.xlane.f32.xlu0 %v10065_v18 }
 0x59f   : > { %v7501_v29 = vpop.eup %7500 }
 0x5a0   : > { %v2419_v62 = vmul.f32 %v7501_v29, %v2387_v4  ;;  %6771 = vmatmul.msk.bf16.vlgmr.msra.gmra.mxu2 %vm1674_vm5, %v9969_v55  ;;  %v2389_v16 = vpop.xlane.xlu0 %2388  ;;  %vm2424_vm11 = vweird.f32 %v7501_v29  ;;  %v2429_v55 = vand.u32 2147483648, %v2387_v4 }
 0x5a1   : > { %v10075_v3 = vpop.xlane.xlu1 %2392  ;;  %7502 = vrcp.f32 %v2389_v16  ;;  %vm10086_vm13 = vmor %vm2423_vm12, %vm2424_vm11  ;;  %v2444_v37 = vand.u32 2147483648, %v2389_v16  ;;  %vm2438_vm0 = vweird.f32 %v2389_v16 }
 0x5a2   : > { %v2420_v0 = vsub.f32 1.0, %v2419_v62  ;;  %vm2468_vm4 = vweird.f32 %v10075_v3 }
 0x5a3   : > { %v2445_v44 = vor.u32 1.1754944e-38, %v2444_v37 }
 0x5a4   : > { %v2421_v24 = vmul.f32 %v7501_v29, %v2420_v0  ;;  %v10090_v0 = vpop.f32.mrf.mxu2 }
 0x5a6   : > { %2336 = vmax.xlane.f32.xlu0 %v10078_v25  ;;  %v2422_v22 = vadd.f32 %v7501_v29, %v2421_v24  ;;  %v2442_v24 = vand.u32 2147483647, %v2389_v16 }
 0x5a7   : > { %v7503_v32 = vpop.eup %7502 }
 0x5a8   : > { %v2434_v53 = vmul.f32 %v7503_v32, %v2389_v16  ;;  %v2323_v34 = vpop.xlane.xlu0 %2322  ;;  %vm2439_vm14 = vweird.f32 %v7503_v32  ;;  %v2426_v4 = vsel %vm10086_vm13, %v7501_v29, %v2422_v22  ;;  %vm2443_vm2 = vcmp.eq.f32.partialorder %v2442_v24, 8.507059e+37 }
 0x5a9   : > { %v2329_v41 = vpop.xlane.xlu1 %2328  ;;  %v2346_v45 = vsub.f32 %v9996_v31, %v2323_v34  ;;  %vm2440_vm1 = vmor %vm2438_vm0, %vm2439_vm14 }
 0x5aa   : > { %v2435_v42 = vsub.f32 1.0, %v2434_v53  ;;  %v2349_v61 = vsub.f32 %v9999_v27, %v2329_v41  ;;  %v2430_v53 = vor.u32 1.1754944e-38, %v2429_v55 }
 0x5ab   : > { %v2370_v2 = vmul.f32 1.442695, %v2346_v45 }
 0x5ac   : > { %v2436_v15 = vmul.f32 %v7503_v32, %v2435_v42  ;;  %v2376_v31 = vmul.f32 1.442695, %v2349_v61  ;;  %v2431_v34 = vsel %vm2428_vm15, %v2430_v53, %v2426_v4  ;;  %v10105_v55 = vpop.f32.mrf.mxu2 }
 0x5ad   : > { %7504 = vpow2.f32 %v2370_v2  ;;  %v2432_v2 = vmul.f32 %v9984_v36, %v2431_v34  ;;  %12847 = vst [vmem:[#allocation22_spill] sm:$0xff] %v10105_v55  ;;  %v10110_v36 = vadd.f32 %v2993_v58, %v9546_v17  ;;  %v2474_v34 = vand.u32 2147483648, %v10075_v3  ;;  %v12850_v58 = vld [vmem:[#allocation60_spill] sm:$0xff] }
 0x5ae   : > { %v2437_v27 = vadd.f32 %v7503_v32, %v2436_v15  ;;  %7506 = vpow2.f32 %v2376_v31  ;;  %3030 = vmax.xlane.f32.xlu0 %v10084_v13 }
 0x5af   : > { %7508 = vrcp.f32 %v10075_v3 }
 0x5b0   : > { %6772 = vmatmul.msk.bf16.gmra.mxu2 %vm1674_vm5, %v9961_v49  ;;  %v2441_v41 = vsel %vm2440_vm1, %v7503_v32, %v2437_v27 }
 0x5b1   : > { %v2446_v45 = vsel %vm2443_vm2, %v2445_v44, %v2441_v41  ;;  %v2331_v29 = vpop.xlane.xlu1 %2330 }
 0x5b2   : > { %v2447_v15 = vmul.f32 %v9987_v56, %v2446_v45  ;;  %v2350_v49 = vsub.f32 %v10006_v26, %v2331_v29  ;;  %v10123_v45 = vpop.permute.xlu2 %3586 }
 0x5b3   : > { %v10100_v16 = vpop.eup %7504 }
 0x5b4   : > { %v10102_v22 = vpop.eup %7506  ;;  %2402 = vadd.xlane.f32.xlu1 %v10100_v16  ;;  %v2658_v37 = vpack.c.bf16 %v2447_v15, %v2432_v2  ;;  %v2378_v42 = vmul.f32 1.442695, %v2350_v49  ;;  %v10114_v24 = vpop.f32.mrf.mxu2 }
 0x5b5   : > { %v7509_v32 = vpop.eup %7508  ;;  %12848 = vst [vmem:[#allocation24_spill] sm:$0xff] %v10114_v24 }
 0x5b6   : > { %2408 = vadd.xlane.f32.xlu0 %v10102_v22  ;;  %2674 = vmatmul.bf16.vlgmr.msrb.gmra.mxu1 %v2658_v37  ;;  %v2464_v56 = vmul.f32 %v7509_v32, %v10075_v3  ;;  %7510 = vpow2.f32 %v2378_v42  ;;  %vm2469_vm3 = vweird.f32 %v7509_v32 }
 0x5b7   : > { %vm2470_vm6 = vmor %vm2468_vm4, %vm2469_vm3 }
 0x5b8   : > { %v2465_v61 = vsub.f32 1.0, %v2464_v56 }
 0x5ba   : > { %v2466_v26 = vmul.f32 %v7509_v32, %v2465_v61 }
 0x5bc   : > { %3032 = vmax.xlane.f32.xlu1 %v10110_v36  ;;  %v10118_v31 = vpop.eup %7510  ;;  %v2467_v44 = vadd.f32 %v7509_v32, %v2466_v26  ;;  %v10127_v2 = vpop.f32.mrf.mxu2 }
 0x5bd   : > { %12849 = vst [vmem:[#allocation21_spill] sm:$0xff] %v10127_v2 }
 0x5be   : > { %v2391_v62 = vpop.xlane.xlu0 %2390  ;;  %v2471_v56 = vsel %vm2470_vm6, %v7509_v32, %v2467_v44 }
 0x5bf   : > { %7512 = vrcp.f32 %v2391_v62  ;;  %v2459_v15 = vand.u32 2147483648, %v2391_v62  ;;  %v2457_v42 = vand.u32 2147483647, %v2391_v62  ;;  %vm2453_vm8 = vweird.f32 %v2391_v62 }
 0x5c0   : > { %6773 = vmatmul.msk.bf16.gmra.mxu2 %vm1674_vm5, %v9981_v5  ;;  %v2472_v5 = vand.u32 2147483647, %v10075_v3 }
 0x5c1   : > { %v2460_v26 = vor.u32 1.1754944e-38, %v2459_v15  ;;  %vm2458_vm11 = vcmp.eq.f32.partialorder %v2457_v42, 8.507059e+37 }
 0x5c2   : > { %vm2473_vm9 = vcmp.eq.f32.partialorder %v2472_v5, 8.507059e+37 }
 0x5c4   : > { %2410 = vadd.xlane.f32.xlu1 %v10118_v31 }
 0x5c5   : > { %v7513_v4 = vpop.eup %7512 }
 0x5c6   : > { %v2449_v53 = vmul.f32 %v7513_v4, %v2391_v62  ;;  %v2327_v27 = vpop.xlane.xlu0 %2326  ;;  %vm2454_vm7 = vweird.f32 %v7513_v4  ;;  %v12851_v62 = vld [vmem:[#allocation48_spill] sm:$0xff] }
 0x5c7   : > { %v2348_v41 = vsub.f32 %v10021_v28, %v2327_v27  ;;  %v2475_v28 = vor.u32 1.1754944e-38, %v2474_v34  ;;  %vm2455_vm10 = vmor %vm2453_vm8, %vm2454_vm7  ;;  %v10140_v34 = vpop.f32.mrf.mxu2 }
 0x5c8   : > { %v2450_v29 = vsub.f32 1.0, %v2449_v53  ;;  %12852 = vst [vmem:[#allocation23_spill] sm:$0xff] %v10140_v34 }
 0x5c9   : > { %v2374_v37 = vmul.f32 1.442695, %v2348_v41  ;;  %v2476_v3 = vsel %vm2473_vm9, %v2475_v28, %v2471_v56  ;;  %v2395_v41 = vpop.xlane.xlu2 %2394 }
 0x5ca   : > { %v2451_v49 = vmul.f32 %v7513_v4, %v2450_v29  ;;  %3400 = vrot.lane.b32.xlu0 %v12850_v58, %s8224_s28  ;;  %v2477_v58 = vmul.f32 %v9989_v35, %v2476_v3  ;;  %vm2483_vm13 = vweird.f32 %v2395_v41 }
 0x5cb   : > { %7514 = vpow2.f32 %v2374_v37 }
 0x5cc   : > { %v2452_v61 = vadd.f32 %v7513_v4, %v2451_v49  ;;  %7516 = vrcp.f32 %v2395_v41 }
 0x5ce   : > { %v2456_v53 = vsel %vm2455_vm10, %v7513_v4, %v2452_v61 }
 0x5cf   : > { %v2461_v27 = vsel %vm2458_vm11, %v2460_v26, %v2456_v53  ;;  %v10142_v15 = vpop.f32.mrf.mxu2  ;;  %v2489_v26 = vand.u32 2147483648, %v2395_v41 }
 0x5d0   : > { %6774 = vmatmul.msk.bf16.gmra.mxu2 %vm1674_vm5, %v10003_v59  ;;  %v2462_v29 = vmul.f32 %v10015_v48, %v2461_v27  ;;  %12853 = vst [vmem:[#allocation39_spill] sm:$0xff] %v10142_v15  ;;  %v12854_v59 = vld [vmem:[#allocation61_spill] sm:$0xff] }
 0x5d1   : > { %v10135_v32 = vpop.eup %7514 }
 0x5d2   : > { %3394 = vrot.lane.b32.xlu0 %v12851_v62, %s8224_s28  ;;  %2406 = vadd.xlane.f32.xlu2 %v10135_v32  ;;  %v2659_v44 = vpack.c.bf16 %v2477_v58, %v2462_v29  ;;  %v7517_v4 = vpop.eup %7516  ;;  %v2487_v29 = vand.u32 2147483647, %v2395_v41 }
 0x5d3   : > { %v2479_v5 = vmul.f32 %v7517_v4, %v2395_v41  ;;  %vm2484_vm12 = vweird.f32 %v7517_v4 }
 0x5d4   : > { %2679 = vmatmul.bf16.gmra.mxu1 %v2659_v44  ;;  %vm2485_vm14 = vmor %vm2483_vm13, %vm2484_vm12  ;;  %vm2488_vm1 = vcmp.eq.f32.partialorder %v2487_v29, 8.507059e+37 }
 0x5d5   : > { %v2480_v35 = vsub.f32 1.0, %v2479_v5 }
 0x5d7   : > { %v2481_v37 = vmul.f32 %v7517_v4, %v2480_v35  ;;  %v10148_v42 = vpop.f32.mrf.mxu2  ;;  %v2490_v35 = vor.u32 1.1754944e-38, %v2489_v26 }
 0x5d8   : > { %12855 = vst [vmem:[#allocation37_spill] sm:$0xff] %v10148_v42 }
 0x5d9   : > { %v2482_v61 = vadd.f32 %v7517_v4, %v2481_v37 }
 0x5db   : > { %v2486_v44 = vsel %vm2485_vm14, %v7517_v4, %v2482_v61 }
 0x5dc   : > { %v2491_v42 = vsel %vm2488_vm1, %v2490_v35, %v2486_v44 }
 0x5dd   : > { %3398 = vrot.lane.b32.xlu1 %v12854_v59, %s8224_s28  ;;  %v2996_v59 = vpop.f32.mrf.mxu0  ;;  %v2492_v4 = vmul.f32 %v10023_v10, %v2491_v42 }
 0x5de   : > { %v10177_v29 = vadd.f32 %v2996_v59, %v9561_v52 }
 0x5df   : > { %v10155_v41 = vpop.f32.mrf.mxu2 }
 0x5e0   : > { %6775 = vmatmul.msk.bf16.gmra.mxu2 %vm1674_vm5, %v10012_v11  ;;  %v2397_v48 = vpop.xlane.xlu0 %2396  ;;  %12856 = vst [vmem:[#allocation28_spill] sm:$0xff] %v10155_v41 }
 0x5e1   : > { %7518 = vrcp.f32 %v2397_v48  ;;  %v2504_v58 = vand.u32 2147483648, %v2397_v48  ;;  %v2502_v5 = vand.u32 2147483647, %v2397_v48  ;;  %vm2498_vm0 = vweird.f32 %v2397_v48 }
 0x5e3   : > { %v2505_v15 = vor.u32 1.1754944e-38, %v2504_v58  ;;  %vm2503_vm3 = vcmp.eq.f32.partialorder %v2502_v5, 8.507059e+37 }
 0x5e6   : > { %v10150_v3 = vpop.xlane.xlu1 %2398 }
 0x5e7   : > { %v7519_v49 = vpop.eup %7518  ;;  %vm2513_vm6 = vweird.f32 %v10150_v3 }
 0x5e8   : > { %v2494_v56 = vmul.f32 %v7519_v49, %v2397_v48  ;;  %v2333_v28 = vpop.xlane.xlu0 %2332  ;;  %vm2499_vm15 = vweird.f32 %v7519_v49 }
 0x5e9   : > { %v2351_v53 = vsub.f32 %v10038_v8, %v2333_v28  ;;  %vm2500_vm2 = vmor %vm2498_vm0, %vm2499_vm15 }
 0x5ea   : > { %v2495_v27 = vsub.f32 1.0, %v2494_v56 }
 0x5eb   : > { %v2380_v11 = vmul.f32 1.442695, %v2351_v53  ;;  %v2998_v53 = vpop.f32.mrf.mxu0 }
 0x5ec   : > { %v2496_v62 = vmul.f32 %v7519_v49, %v2495_v27 }
 0x5ed   : > { %7520 = vpow2.f32 %v2380_v11 }
 0x5ee   : > { %v2497_v37 = vadd.f32 %v7519_v49, %v2496_v62  ;;  %7522 = vrcp.f32 %v10150_v3 }
 0x5f0   : > { %6776 = vmatmul.msk.bf16.gmra.mxu2 %vm1674_vm5, %v10048_v1  ;;  %v2501_v8 = vsel %vm2500_vm2, %v7519_v49, %v2497_v37  ;;  %v10161_v48 = vpop.xlane.xlu1 %3026  ;;  %v10165_v1 = vadd.f32 %v2998_v53, %v9571_v38  ;;  %v10167_v49 = vpop.f32.mrf.mxu2 }
 0x5f1   : > { %v2506_v56 = vsel %vm2503_vm3, %v2505_v15, %v2501_v8  ;;  %12857 = vst [vmem:[#allocation26_spill] sm:$0xff] %v10167_v49 }
 0x5f2   : > { %v2507_v28 = vmul.f32 %v10030_v30, %v2506_v56  ;;  %v2519_v56 = vand.u32 2147483648, %v10150_v3 }
 0x5f3   : > { %v10159_v61 = vpop.eup %7520 }
 0x5f4   : > { %2412 = vadd.xlane.f32.xlu2 %v10159_v61  ;;  %v2660_v26 = vpack.c.bf16 %v2507_v28, %v2492_v4  ;;  %v7523_v15 = vpop.eup %7522 }
 0x5f5   : > { %v2509_v58 = vmul.f32 %v7523_v15, %v10150_v3  ;;  %vm2514_vm4 = vweird.f32 %v7523_v15 }
 0x5f6   : > { %2684 = vmatmul.bf16.gmra.mxu1 %v2660_v26  ;;  %v2517_v26 = vand.u32 2147483647, %v10150_v3  ;;  %vm2515_vm7 = vmor %vm2513_vm6, %vm2514_vm4 }
 0x5f7   : > { %v2510_v11 = vsub.f32 1.0, %v2509_v58  ;;  %v2520_v58 = vor.u32 1.1754944e-38, %v2519_v56 }
 0x5f8   : > { %v2335_v10 = vpop.xlane.xlu1 %2334  ;;  %vm2518_vm10 = vcmp.eq.f32.partialorder %v2517_v26, 8.507059e+37 }
 0x5f9   : > { %v2352_v30 = vsub.f32 %v10051_v63, %v2335_v10  ;;  %v12860_v63 = vld [vmem:[#allocation49_spill] sm:$0xff]  ;;  %v12862_v10 = vld [vmem:[#allocation42_spill] sm:$0xff] }
 0x5fb   : > { %v2382_v27 = vmul.f32 1.442695, %v2352_v30 }
 0x5fc   : > { %3036 = vmax.xlane.f32.xlu0 %v10165_v1 }
 0x5fd   : > { %7524 = vpow2.f32 %v2382_v27 }
 0x600   : > { %6777 = vmatmul.msk.bf16.gmra.mxu2 %vm1674_vm5, %v10033_v60  ;;  %v2511_v60 = vmul.f32 %v7523_v15, %v2510_v11 }
 0x602   : > { %v2512_v8 = vadd.f32 %v7523_v15, %v2511_v60 }
 0x603   : > { %v10174_v42 = vpop.f32.mrf.mxu2  ;;  %v10185_v5 = vpop.eup %7524 }
 0x604   : > { %12858 = vst [vmem:[#allocation30_spill] sm:$0xff] %v10174_v42  ;;  %v2516_v30 = vsel %vm2515_vm7, %v7523_v15, %v2512_v8 }
 0x607   : > { %3034 = vmax.xlane.f32.xlu1 %v10177_v29 }
 0x609   : > { %v2401_v62 = vpop.xlane.xlu0 %2400 }
 0x60a   : > { %7526 = vrcp.f32 %v2401_v62  ;;  %v2534_v53 = vand.u32 2147483648, %v2401_v62  ;;  %v2532_v27 = vand.u32 2147483647, %v2401_v62  ;;  %vm2528_vm9 = vweird.f32 %v2401_v62 }
 0x60b   : > { %v10181_v44 = vpop.f32.mrf.mxu2 }
 0x60c   : > { %12859 = vst [vmem:[#allocation32_spill] sm:$0xff] %v10181_v44  ;;  %3396 = vrot.lane.b32.xlu2 %v12860_v63, %s8224_s28  ;;  %v7156_v63 = vld [vmem:[#allocation10 + $0x18] sm:$0xff]  ;;  %vm2533_vm12 = vcmp.eq.f32.partialorder %v2532_v27, 8.507059e+37 }
 0x60d   : > { %2769 = vmatpush.bf16.msrb.mxu3 %v7156_v63 }
 0x60f   : > { %2414 = vadd.xlane.f32.xlu1 %v10185_v5 }
 0x610   : > { %v7527_v59 = vpop.eup %7526  ;;  %6778 = vmatmul.msk.bf16.gmra.mxu2 %vm1674_vm5, %v10123_v45 }
 0x611   : > { %v2524_v35 = vmul.f32 %v7527_v59, %v2401_v62  ;;  %v10190_v37 = vpop.xlane.xlu0 %3028  ;;  %vm2529_vm8 = vweird.f32 %v7527_v59  ;;  %v2405_v60 = vpop.xlane.xlu2 %2404 }
 0x612   : > { %vm2530_vm11 = vmor %vm2528_vm9, %vm2529_vm8  ;;  %7528 = vrcp.f32 %v2405_v60  ;;  %vm2558_vm14 = vweird.f32 %v2405_v60 }
 0x613   : > { %v2525_v4 = vsub.f32 1.0, %v2524_v35  ;;  %v10194_v28 = vpop.f32.mrf.mxu2  ;;  %v2521_v35 = vsel %vm2518_vm10, %v2520_v58, %v2516_v30 }
 0x614   : > { %12861 = vst [vmem:[#allocation58_spill] sm:$0xff] %v10194_v28  ;;  %3392 = vrot.lane.b32.xlu2 %v12862_v10, %s8224_s28  ;;  %v2535_v28 = vor.u32 1.1754944e-38, %v2534_v53  ;;  %v2522_v8 = vmul.f32 %v10035_v46, %v2521_v35 }
 0x615   : > { %v2526_v45 = vmul.f32 %v7527_v59, %v2525_v4 }
 0x617   : > { %v2527_v11 = vadd.f32 %v7527_v59, %v2526_v45 }
 0x618   : > { %v7529_v26 = vpop.eup %7528 }
 0x619   : > { %v2337_v44 = vpop.xlane.xlu0 %2336  ;;  %v2531_v3 = vsel %vm2530_vm11, %v7527_v59, %v2527_v11  ;;  %v3059_v11 = vsub.f32 %v10065_v18, %v10190_v37  ;;  %vm2559_vm13 = vweird.f32 %v7529_v26 }
 0x61a   : > { %v2353_v10 = vsub.f32 %v10078_v25, %v2337_v44  ;;  %v2536_v42 = vsel %vm2533_vm12, %v2535_v28, %v2531_v3  ;;  %v2554_v25 = vmul.f32 %v7529_v26, %v2405_v60  ;;  %v7155_v28 = vld [vmem:[#allocation10 + $0x10] sm:$0xff]  ;;  %v2564_v3 = vand.u32 2147483648, %v2405_v60  ;;  %vm10215_vm15 = vmor %vm2558_vm14, %vm2559_vm13 }
 0x61b   : > { %v10200_v15 = vpop.f32.mrf.mxu2  ;;  %v2537_v62 = vmul.f32 %v10059_v23, %v2536_v42  ;;  %2770 = vmatpush.bf16.msrb.mxu3 %v7155_v28 }
 0x61c   : > { %12863 = vst [vmem:[#allocation43_spill] sm:$0xff] %v10200_v15  ;;  %v2384_v56 = vmul.f32 1.442695, %v2353_v10  ;;  %v2555_v23 = vsub.f32 1.0, %v2554_v25  ;;  %v2565_v37 = vor.u32 1.1754944e-38, %v2564_v3 }
 0x61d   : > { %v2661_v4 = vpack.c.bf16 %v2537_v62, %v2522_v8  ;;  %v2562_v8 = vand.u32 2147483647, %v2405_v60 }
 0x61e   : > { %7530 = vpow2.f32 %v2384_v56  ;;  %v2556_v58 = vmul.f32 %v7529_v26, %v2555_v23  ;;  %v3076_v56 = vmul.f32 1.442695, %v3059_v11 }
 0x61f   : > { %2689 = vmatmul.bf16.gmra.mxu1 %v2661_v4  ;;  %vm2563_vm2 = vcmp.eq.f32.partialorder %v2562_v8, 8.507059e+37 }
 0x620   : > { %v2557_v35 = vadd.f32 %v7529_v26, %v2556_v58 }
 0x621   : > { %v3031_v53 = vpop.xlane.xlu0 %3030 }
 0x622   : > { %v3060_v59 = vsub.f32 %v10084_v13, %v3031_v53  ;;  %v2561_v18 = vsel %vm10215_vm15, %v7529_v26, %v2557_v35 }
 0x623   : > { %v10205_v45 = vpop.f32.mrf.mxu2  ;;  %v2566_v11 = vsel %vm2563_vm2, %v2565_v37, %v2561_v18 }
 0x624   : > { %v10207_v30 = vpop.eup %7530  ;;  %v3078_v44 = vmul.f32 1.442695, %v3060_v59  ;;  %v2567_v15 = vmul.f32 %v10067_v40, %v2566_v11  ;;  %v12866_v40 = vld [vmem:[#allocation35_spill] sm:$0xff] }
 0x625   : > { %2416 = vadd.xlane.f32.xlu1 %v10207_v30 }
 0x626   : > { %7532 = vpow2.f32 %v3078_v44 }
 0x627   : > { %v2403_v46 = vpop.xlane.xlu1 %2402 }
 0x628   : > { %7534 = vrcp.f32 %v2403_v46  ;;  %v2549_v53 = vand.u32 2147483648, %v2403_v46  ;;  %v2547_v44 = vand.u32 2147483647, %v2403_v46  ;;  %vm2543_vm1 = vweird.f32 %v2403_v46 }
 0x629   : > { %v10219_v28 = vpop.xlane.xlu0 %2408  ;;  %7536 = vpow2.f32 %v3076_v56 }
 0x62a   : > { %v2550_v60 = vor.u32 1.1754944e-38, %v2549_v53  ;;  %vm2548_vm4 = vcmp.eq.f32.partialorder %v2547_v44, 8.507059e+37  ;;  %7538 = vrcp.f32 %v10219_v28  ;;  %vm2588_vm7 = vweird.f32 %v10219_v28 }
 0x62b   : > { %v3623_v42 = vpop.f32.mrf.mxu2 }
 0x62c   : > { %v10210_v27 = vpop.eup %7532 }
 0x62d   : > { %3110 = vadd.xlane.f32.xlu0 %v10210_v27 }
 0x62e   : > { %v7535_v13 = vpop.eup %7534 }
 0x62f   : > { %v2539_v63 = vmul.f32 %v7535_v13, %v2403_v46  ;;  %vm2544_vm0 = vweird.f32 %v7535_v13  ;;  %v10231_v8 = vpop.eup %7536 }
 0x630   : > { %vm2545_vm3 = vmor %vm2543_vm1, %vm2544_vm0 }
 0x631   : > { %v2540_v10 = vsub.f32 1.0, %v2539_v63 }
 0x633   : > { %v2541_v4 = vmul.f32 %v7535_v13, %v2540_v10  ;;  %v3626_v59 = vpop.f32.mrf.mxu2  ;;  %v2675_v25 = vpop.f32.mrf.mxu1 }
 0x634   : > { %v10250_v37 = vadd.f32 %v3626_v59, %v9533_v54 }
 0x635   : > { %v2542_v23 = vadd.f32 %v7535_v13, %v2541_v4 }
 0x637   : > { %v2546_v58 = vsel %vm2545_vm3, %v7535_v13, %v2542_v23  ;;  %v10233_v13 = vpop.xlane.xlu1 %3032 }
 0x638   : > { %v2551_v63 = vsel %vm2548_vm4, %v2550_v60, %v2546_v58  ;;  %v2592_v58 = vand.u32 2147483647, %v10219_v28 }
 0x639   : > { %v2552_v10 = vmul.f32 %v10100_v16, %v2551_v63  ;;  %v7539_v16 = vpop.eup %7538 }
 0x63a   : > { %vm2589_vm6 = vweird.f32 %v7539_v16  ;;  %vm2593_vm10 = vcmp.eq.f32.partialorder %v2592_v58, 8.507059e+37 }
 0x63b   : > { %v3628_v49 = vpop.f32.mrf.mxu2  ;;  %v2677_v62 = vpop.f32.mrf.mxu1  ;;  %v2662_v3 = vpack.c.bf16 %v2567_v15, %v2552_v10  ;;  %v10244_v15 = vadd.f32 %v3623_v42, %v9519_v9  ;;  %v2594_v42 = vand.u32 2147483648, %v10219_v28  ;;  %vm10262_vm8 = vmor %vm2588_vm7, %vm2589_vm6 }
 0x63c   : > { %v10227_v26 = vadd.f32 %v3628_v49, %v9546_v17  ;;  %v2715_v46 = vpack.c.bf16 %v2677_v62, %v2675_v25  ;;  %v10229_v35 = vpop.permute.xlu0 %3400  ;;  %v2584_v17 = vmul.f32 %v7539_v16, %v10219_v28 }
 0x63d   : > { %3410 = vmatpush.bf16.msrb.mxu0 %v10229_v35  ;;  %7250 = vmatpush.bf16.msra.mxu1 %v10229_v35  ;;  %v2595_v28 = vor.u32 1.1754944e-38, %v2594_v42 }
 0x63e   : > { %2694 = vmatmul.bf16.gmra.mxu1 %v2662_v3  ;;  %3108 = vadd.xlane.f32.xlu2 %v10231_v8  ;;  %v2585_v56 = vsub.f32 1.0, %v2584_v17 }
 0x63f   : > { %3390 = vrot.lane.b32.xlu1 %v12866_v40, %s8224_s28  ;;  %3667 = vmax.xlane.f32.xlu0 %v10227_v26  ;;  %v10247_v53 = vpop.xlane.xlu1 %2410 }
 0x640   : > { %6723 = vmatmul.msk.bf16.vlgmr.msrb.gmra.mxu3 %vm1674_vm5, %v2715_v46  ;;  %v2586_v25 = vmul.f32 %v7539_v16, %v2585_v56  ;;  %vm2603_vm15 = vweird.f32 %v10247_v53 }
 0x642   : > { %v2587_v60 = vadd.f32 %v7539_v16, %v2586_v25  ;;  %v3001_v25 = vpop.f32.mrf.mxu0 }
 0x643   : > { %v3631_v49 = vpop.f32.mrf.mxu2 }
 0x644   : > { %v2591_v46 = vsel %vm10262_vm8, %v7539_v16, %v2587_v60  ;;  %v10271_v40 = vadd.f32 %v3631_v49, %v9561_v52  ;;  %v10280_v49 = vadd.f32 %v3001_v25, %v9582_v14 }
 0x645   : > { %v2407_v4 = vpop.xlane.xlu2 %2406  ;;  %v2596_v56 = vsel %vm2593_vm10, %v2595_v28, %v2591_v46  ;;  %v10302_v28 = vadd.f32 %v10205_v45, %v9510_v7 }
 0x646   : > { %7540 = vrcp.f32 %v2407_v4  ;;  %3663 = vmax.xlane.f32.xlu2 %v10244_v15  ;;  %v2577_v10 = vand.u32 2147483647, %v2407_v4  ;;  %vm2573_vm11 = vweird.f32 %v2407_v4  ;;  %v2597_v16 = vmul.f32 %v10102_v22, %v2596_v56 }
 0x647   : > { %7542 = vrcp.f32 %v10247_v53 }
 0x648   : > { %vm2578_vm13 = vcmp.eq.f32.partialorder %v2577_v10, 8.507059e+37 }
 0x64b   : > { %v3633_v44 = vpop.f32.mrf.mxu2 }
 0x64c   : > { %v7541_v18 = vpop.eup %7540  ;;  %v10253_v23 = vadd.f32 %v3633_v44, %v9571_v38  ;;  %v2579_v38 = vand.u32 2147483648, %v2407_v4 }
 0x64d   : > { %v2569_v9 = vmul.f32 %v7541_v18, %v2407_v4  ;;  %vm2574_vm9 = vweird.f32 %v7541_v18  ;;  %v3058_v4 = vsub.f32 %v10044_v20, %v10161_v48  ;;  %v7543_v58 = vpop.eup %7542 }
 0x64e   : > { %3665 = vmax.xlane.f32.xlu2 %v10250_v37  ;;  %3671 = vmax.xlane.f32.xlu0 %v10253_v23  ;;  %vm2575_vm12 = vmor %vm2573_vm11, %vm2574_vm9  ;;  %v2580_v17 = vor.u32 1.1754944e-38, %v2579_v38  ;;  %v2599_v20 = vmul.f32 %v7543_v58, %v10247_v53  ;;  %vm2604_vm14 = vweird.f32 %v7543_v58 }
 0x64f   : > { %v2570_v11 = vsub.f32 1.0, %v2569_v9  ;;  %v10260_v63 = vpop.permute.xlu1 %3398  ;;  %vm10312_vm0 = vmor %vm2603_vm15, %vm2604_vm14 }
 0x650   : > { %3411 = vmatpush.bf16.msrb.mxu0 %v10260_v63  ;;  %7251 = vmatpush.bf16.msra.mxu1 %v10260_v63  ;;  %v2600_v54 = vsub.f32 1.0, %v2599_v20 }
 0x651   : > { %v2571_v59 = vmul.f32 %v7541_v18, %v2570_v11  ;;  %v2680_v62 = vpop.f32.mrf.mxu1 }
 0x653   : > { %v2572_v3 = vadd.f32 %v7541_v18, %v2571_v59  ;;  %v10290_v48 = vpop.f32.mrf.mxu2 }
 0x655   : > { %v2576_v44 = vsel %vm2575_vm12, %v7541_v18, %v2572_v3  ;;  %v3074_v18 = vmul.f32 1.442695, %v3058_v4 }
 0x656   : > { %3669 = vmax.xlane.f32.xlu2 %v10271_v40  ;;  %v2581_v9 = vsel %vm2578_vm13, %v2580_v17, %v2576_v44  ;;  %v2609_v44 = vand.u32 2147483648, %v10247_v53 }
 0x657   : > { %v2582_v11 = vmul.f32 %v10135_v32, %v2581_v9  ;;  %v3003_v32 = vpop.f32.mrf.mxu0  ;;  %7544 = vpow2.f32 %v3074_v18  ;;  %v2607_v9 = vand.u32 2147483647, %v10247_v53 }
 0x658   : > { %v10288_v22 = vadd.f32 %v3003_v32, %v9591_v19  ;;  %v2610_v18 = vor.u32 1.1754944e-38, %v2609_v44 }
 0x659   : > { %v2682_v60 = vpop.f32.mrf.mxu1  ;;  %v2663_v42 = vpack.c.bf16 %v2597_v16, %v2582_v11  ;;  %v10316_v16 = vpop.permute.xlu0 %3394  ;;  %vm2608_vm2 = vcmp.eq.f32.partialorder %v2607_v9, 8.507059e+37 }
 0x65a   : > { %v2716_v52 = vpack.c.bf16 %v2682_v60, %v2680_v62  ;;  %v2601_v62 = vmul.f32 %v7543_v58, %v2600_v54 }
 0x65b   : > { %2699 = vmatmul.bf16.gmra.mxu1 %v2663_v42  ;;  %v3638_v17 = vpop.f32.mrf.mxu2 }
 0x65c   : > { %6724 = vmatmul.msk.bf16.gmra.mxu3 %vm1674_vm5, %v2716_v52  ;;  %v2602_v3 = vadd.f32 %v7543_v58, %v2601_v62  ;;  %v10321_v53 = vadd.f32 %v3638_v17, %v9591_v19 }
 0x65d   : > { %v10293_v59 = vpop.eup %7544 }
 0x65e   : > { %3038 = vmax.xlane.f32.xlu2 %v10280_v49  ;;  %v2606_v52 = vsel %vm10312_vm0, %v7543_v58, %v2602_v3 }
 0x65f   : > { %v3006_v10 = vpop.f32.mrf.mxu0  ;;  %v2611_v54 = vsel %vm2608_vm2, %v2610_v18, %v2606_v52 }
 0x660   : > { %v2612_v3 = vmul.f32 %v10118_v31, %v2611_v54 }
 0x662   : > { %3386 = vrot.lane.b32.xlu0 %v9386_v47, %s8224_s28  ;;  %v10297_v47 = vadd.f32 %v3006_v10, %v9600_v43 }
 0x663   : > { %v3641_v62 = vpop.f32.mrf.mxu2 }
 0x664   : > { %v10333_v44 = vadd.f32 %v3641_v62, %v9600_v43 }
 0x666   : > { %3040 = vmax.xlane.f32.xlu2 %v10288_v22 }
 0x667   : > { %v2413_v38 = vpop.xlane.xlu2 %2412 }
 0x668   : > { %7546 = vrcp.f32 %v2413_v38  ;;  %v2624_v45 = vand.u32 2147483648, %v2413_v38  ;;  %v2622_v42 = vand.u32 2147483647, %v2413_v38  ;;  %vm2618_vm3 = vweird.f32 %v2413_v38 }
 0x669   : > { %3106 = vadd.xlane.f32.xlu1 %v10293_v59 }
 0x66a   : > { %v2625_v20 = vor.u32 1.1754944e-38, %v2624_v45  ;;  %vm2623_vm6 = vcmp.eq.f32.partialorder %v2622_v42, 8.507059e+37 }
 0x66e   : > { %v7547_v46 = vpop.eup %7546  ;;  %3042 = vmax.xlane.f32.xlu2 %v10297_v47 }
 0x66f   : > { %v2614_v56 = vmul.f32 %v7547_v46, %v2413_v38  ;;  %v10304_v25 = vpop.permute.xlu2 %3396  ;;  %vm2619_vm1 = vweird.f32 %v7547_v46 }
 0x670   : > { %3412 = vmatpush.bf16.msrb.mxu0 %v10304_v25  ;;  %7252 = vmatpush.bf16.msra.mxu1 %v10304_v25  ;;  %vm2620_vm4 = vmor %vm2618_vm3, %vm2619_vm1 }
 0x671   : > { %v2615_v11 = vsub.f32 1.0, %v2614_v56  ;;  %3661 = vmax.xlane.f32.xlu1 %v10302_v28 }
 0x673   : > { %v2616_v60 = vmul.f32 %v7547_v46, %v2615_v11  ;;  %v2685_v4 = vpop.f32.mrf.mxu1 }
 0x674   : > { %3413 = vmatpush.bf16.msrb.mxu0 %v10316_v16  ;;  %7253 = vmatpush.bf16.msra.mxu1 %v10316_v16 }
 0x675   : > { %v2617_v32 = vadd.f32 %v7547_v46, %v2616_v60 }
 0x676   : > { %3675 = vmax.xlane.f32.xlu2 %v10321_v53 }
 0x677   : > { %v10326_v10 = vpop.permute.xlu2 %3392  ;;  %v2621_v58 = vsel %vm2620_vm4, %v7547_v46, %v2617_v32  ;;  %v10337_v46 = vpop.f32.mrf.mxu2 }
 0x678   : > { %3414 = vmatpush.bf16.msrb.mxu0 %v10326_v10  ;;  %7254 = vmatpush.bf16.msra.mxu1 %v10326_v10  ;;  %v2626_v19 = vsel %vm2623_vm6, %v2625_v20, %v2621_v58 }
 0x679   : > { %v2627_v17 = vmul.f32 %v10159_v61, %v2626_v19  ;;  %v10342_v61 = vadd.f32 %v10290_v48, %v9582_v14  ;;  %v10356_v19 = vpop.xlane.xlu0 %3036 }
 0x67a   : > { %v3035_v11 = vpop.xlane.xlu1 %3034 }
 0x67b   : > { %v2687_v38 = vpop.f32.mrf.mxu1  ;;  %v2664_v56 = vpack.c.bf16 %v2627_v17, %v2612_v3  ;;  %v3062_v7 = vsub.f32 %v10177_v29, %v3035_v11 }
 0x67c   : > { %v2717_v9 = vpack.c.bf16 %v2687_v38, %v2685_v4 }
 0x67d   : > { %2704 = vmatmul.bf16.gmra.mxu1 %v2664_v56  ;;  %v3082_v31 = vmul.f32 1.442695, %v3062_v7 }
 0x67e   : > { %3677 = vmax.xlane.f32.xlu2 %v10333_v44  ;;  %6725 = vmatmul.msk.bf16.gmra.mxu3 %vm1674_vm5, %v2717_v9 }
 0x67f   : > { %v10347_v43 = vpop.f32.mrf.mxu2 }
 0x682   : > { %v2415_v45 = vpop.xlane.xlu1 %2414 }
 0x683   : > { %7548 = vrcp.f32 %v2415_v45  ;;  %v2639_v58 = vand.u32 2147483648, %v2415_v45  ;;  %vm2633_vm8 = vweird.f32 %v2415_v45  ;;  %v2637_v62 = vand.u32 2147483647, %v2415_v45 }
 0x684   : > { %7550 = vpow2.f32 %v3082_v31  ;;  %v3008_v31 = vpop.f32.mrf.mxu0 }
 0x685   : > { %vm2638_vm11 = vcmp.eq.f32.partialorder %v2637_v62, 8.507059e+37 }
 0x687   : > { %v3648_v29 = vpop.f32.mrf.mxu2 }
 0x688   : > { %v10353_v14 = vadd.f32 %v3648_v29, %v9627_v6  ;;  %v2640_v29 = vor.u32 1.1754944e-38, %v2639_v58 }
 0x689   : > { %v7549_v60 = vpop.eup %7548 }
 0x68a   : > { %3388 = vrot.lane.b32.xlu1 %v9368_v33, %s8224_s28  ;;  %v10349_v42 = vpop.eup %7550  ;;  %v2629_v4 = vmul.f32 %v7549_v60, %v2415_v45  ;;  %vm2634_vm7 = vweird.f32 %v7549_v60 }
 0x68b   : > { %vm10358_vm9 = vmor %vm2633_vm8, %vm2634_vm7 }
 0x68c   : > { %3673 = vmax.xlane.f32.xlu0 %v10342_v61  ;;  %v2630_v52 = vsub.f32 1.0, %v2629_v4  ;;  %v3061_v4 = vsub.f32 %v10110_v36, %v10233_v13 }
 0x68e   : > { %v2631_v33 = vmul.f32 %v7549_v60, %v2630_v52  ;;  %v3080_v41 = vmul.f32 1.442695, %v3061_v4  ;;  %v10395_v4 = vadd.f32 %v10337_v46, %v9609_v12 }
 0x690   : > { %v2632_v20 = vadd.f32 %v7549_v60, %v2631_v33 }
 0x692   : > { %v2636_v7 = vsel %vm10358_vm9, %v7549_v60, %v2632_v20 }
 0x694   : > { %3114 = vadd.xlane.f32.xlu0 %v10349_v42 }
 0x698   : > { %v2417_v18 = vpop.xlane.xlu1 %2416 }
 0x699   : > { %7552 = vrcp.f32 %v2417_v18  ;;  %v2654_v38 = vand.u32 2147483648, %v2417_v18  ;;  %v2652_v9 = vand.u32 2147483647, %v2417_v18  ;;  %vm2648_vm12 = vweird.f32 %v2417_v18 }
 0x69a   : > { %7554 = vpow2.f32 %v3080_v41 }
 0x69b   : > { %v2655_v33 = vor.u32 1.1754944e-38, %v2654_v38  ;;  %vm2653_vm14 = vcmp.eq.f32.partialorder %v2652_v9, 8.507059e+37 }
 0x69c   : > { %v2690_v48 = vpop.f32.mrf.mxu1  ;;  %3683 = vmax.xlane.f32.xlu0 %v10353_v14 }
 0x69f   : > { %v7553_v32 = vpop.eup %7552 }
 0x6a0   : > { %v2644_v54 = vmul.f32 %v7553_v32, %v2417_v18  ;;  %vm2649_vm10 = vweird.f32 %v7553_v32  ;;  %v10367_v17 = vpop.xlane.xlu0 %3110  ;;  %v10377_v58 = vpop.eup %7554 }
 0x6a1   : > { %vm2650_vm13 = vmor %vm2648_vm12, %vm2649_vm10  ;;  %vm3173_vm9 = vweird.f32 %v10367_v17 }
 0x6a2   : > { %v2645_v3 = vsub.f32 1.0, %v2644_v54  ;;  %v2641_v54 = vsel %vm2638_vm11, %v2640_v29, %v2636_v7 }
 0x6a3   : > { %v2642_v60 = vmul.f32 %v10185_v5, %v2641_v54 }
 0x6a4   : > { %v2646_v56 = vmul.f32 %v7553_v32, %v2645_v3  ;;  %v2692_v11 = vpop.f32.mrf.mxu1 }
 0x6a5   : > { %v2718_v52 = vpack.c.bf16 %v2692_v11, %v2690_v48  ;;  %v3011_v48 = vpop.f32.mrf.mxu0 }
 0x6a6   : > { %v2647_v45 = vadd.f32 %v7553_v32, %v2646_v56  ;;  %v10411_v54 = vadd.f32 %v3011_v48, %v9618_v50 }
 0x6a7   : > { %6726 = vmatmul.msk.bf16.gmra.mxu3 %vm1674_vm5, %v2718_v52 }
 0x6a8   : > { %v2651_v3 = vsel %vm2650_vm13, %v7553_v32, %v2647_v45 }
 0x6a9   : > { %v2656_v34 = vsel %vm2653_vm14, %v2655_v33, %v2651_v3 }
 0x6aa   : > { %v2657_v36 = vmul.f32 %v10207_v30, %v2656_v34  ;;  %v10384_v30 = vadd.f32 %v3008_v31, %v9609_v12  ;;  %v3063_v12 = vsub.f32 %v10165_v1, %v10356_v19 }
 0x6ac   : > { %v2665_v13 = vpack.c.bf16 %v2657_v36, %v2642_v60  ;;  %v3084_v46 = vmul.f32 1.442695, %v3063_v12 }
 0x6ad   : > { %v10381_v41 = vpop.f32.mrf.mxu0 }
 0x6ae   : > { %2709 = vmatmul.bf16.gmra.mxu1 %v2665_v13 }
 0x6b1   : > { %v10371_v18 = vpop.permute.xlu1 %3390  ;;  %v10373_v20 = vpop.xlane.xlu2 %3108 }
 0x6b2   : > { %3415 = vmatpush.bf16.msrb.mxu0 %v10371_v18  ;;  %7255 = vmatpush.bf16.msra.mxu1 %v10371_v18  ;;  %v3668_v32 = vpop.xlane.xlu0 %3667  ;;  %vm3158_vm3 = vweird.f32 %v10373_v20 }
 0x6b3   : > { %v3696_v62 = vsub.f32 %v10227_v26, %v3668_v32 }
 0x6b4   : > { %3112 = vadd.xlane.f32.xlu1 %v10377_v58 }
 0x6b5   : > { %v3715_v34 = vmul.f32 1.442695, %v3696_v62  ;;  %v3016_v26 = vpop.f32.mrf.mxu0 }
 0x6b6   : > { %v10398_v31 = vadd.f32 %v3016_v26, %v9636_v51 }
 0x6b7   : > { %7556 = vpow2.f32 %v3715_v34 }
 0x6b9   : > { %v3664_v5 = vpop.xlane.xlu2 %3663 }
 0x6ba   : > { %v3694_v9 = vsub.f32 %v10244_v15, %v3664_v5 }
 0x6bb   : > { %v2695_v38 = vpop.f32.mrf.mxu1 }
 0x6bc   : > { %3044 = vmax.xlane.f32.xlu1 %v10384_v30  ;;  %v3711_v11 = vmul.f32 1.442695, %v3694_v9 }
 0x6bd   : > { %v10387_v56 = vpop.eup %7556  ;;  %v3018_v3 = vpop.f32.mrf.mxu0 }
 0x6be   : > { %3747 = vadd.xlane.f32.xlu0 %v10387_v56  ;;  %7558 = vpow2.f32 %v3711_v11  ;;  %v10426_v9 = vadd.f32 %v3018_v3, %v12839_v21  ;;  %v3651_v3 = vpop.f32.mrf.mxu2 }
 0x6bf   : > { %7560 = vpow2.f32 %v3084_v46 }
 0x6c1   : > { %v10391_v7 = vpop.xlane.xlu2 %3665 }
 0x6c3   : > { %v2697_v29 = vpop.f32.mrf.mxu1 }
 0x6c4   : > { %v2719_v52 = vpack.c.bf16 %v2697_v29, %v2695_v38  ;;  %3679 = vmax.xlane.f32.xlu1 %v10395_v4  ;;  %v10403_v45 = vpop.eup %7558 }
 0x6c5   : > { %v10415_v32 = vpop.eup %7560  ;;  %v10421_v19 = vpop.f32.mrf.mxu0 }
 0x6c6   : > { %3050 = vmax.xlane.f32.xlu0 %v10398_v31  ;;  %6727 = vmatmul.msk.bf16.gmra.mxu3 %vm1674_vm5, %v2719_v52 }
 0x6c9   : > { %v3670_v15 = vpop.xlane.xlu2 %3669 }
 0x6ca   : > { %v3697_v1 = vsub.f32 %v10271_v40, %v3670_v15 }
 0x6cc   : > { %3743 = vadd.xlane.f32.xlu1 %v10403_v45  ;;  %v3717_v5 = vmul.f32 1.442695, %v3697_v1 }
 0x6cd   : > { %v3023_v12 = vpop.f32.mrf.mxu0 }
 0x6d1   : > { %v10408_v33 = vpop.xlane.xlu2 %3038 }
 0x6d4   : > { %3046 = vmax.xlane.f32.xlu1 %v10411_v54 }
 0x6d8   : > { %v2700_v60 = vpop.f32.mrf.mxu1 }
 0x6d9   : > { %v3041_v36 = vpop.xlane.xlu2 %3040 }
 0x6da   : > { %v3065_v13 = vsub.f32 %v10288_v22, %v3041_v36 }
 0x6dc   : > { %v3088_v62 = vmul.f32 1.442695, %v3065_v13  ;;  %v10417_v34 = vpop.xlane.xlu1 %3106  ;;  %3116 = vadd.xlane.f32.xlu1 %v10415_v32 }
 0x6dd   : > { %vm3143_vm1 = vweird.f32 %v10417_v34 }
 0x6de   : > { %7562 = vpow2.f32 %v3088_v62  ;;  %v10439_v62 = vadd.f32 %v3023_v12, %v12844_v39 }
 0x6df   : > { %7564 = vrcp.f32 %v10417_v34 }
 0x6e0   : > { %v2702_v48 = vpop.f32.mrf.mxu1  ;;  %7566 = vrcp.f32 %v10373_v20 }
 0x6e1   : > { %v2720_v38 = vpack.c.bf16 %v2702_v48, %v2700_v60  ;;  %v3043_v22 = vpop.xlane.xlu2 %3042  ;;  %7568 = vpow2.f32 %v3717_v5 }
 0x6e3   : > { %6728 = vmatmul.msk.bf16.gmra.mxu3 %vm1674_vm5, %v2720_v38  ;;  %v10446_v38 = vpop.xlane.xlu0 %3671 }
 0x6e4   : > { %v10429_v26 = vpop.eup %7562  ;;  %v3662_v11 = vpop.xlane.xlu1 %3661  ;;  %3052 = vmax.xlane.f32.xlu1 %v10426_v9 }
 0x6e5   : > { %v7565_v40 = vpop.eup %7564  ;;  %v3693_v29 = vsub.f32 %v10302_v28, %v3662_v11  ;;  %3120 = vadd.xlane.f32.xlu0 %v10429_v26 }
 0x6e6   : > { %v7567_v52 = vpop.eup %7566  ;;  %v3139_v46 = vmul.f32 %v7565_v40, %v10417_v34  ;;  %vm3144_vm15 = vweird.f32 %v7565_v40 }
 0x6e7   : > { %v3709_v15 = vmul.f32 1.442695, %v3693_v29  ;;  %v3154_v60 = vmul.f32 %v7567_v52, %v10373_v20  ;;  %v10436_v13 = vpop.eup %7568  ;;  %vm3159_vm0 = vweird.f32 %v7567_v52  ;;  %vm3145_vm2 = vmor %vm3143_vm1, %vm3144_vm15 }
 0x6e8   : > { %v3140_v1 = vsub.f32 1.0, %v3139_v46  ;;  %v10452_v46 = vpop.f32.mrf.mxu2  ;;  %vm3160_vm4 = vmor %vm3158_vm3, %vm3159_vm0 }
 0x6e9   : > { %7570 = vpow2.f32 %v3709_v15  ;;  %v3676_v36 = vpop.xlane.xlu2 %3675  ;;  %v3155_v48 = vsub.f32 1.0, %v3154_v60  ;;  %v10450_v15 = vadd.f32 %v3651_v3, %v9636_v51  ;;  %v3149_v60 = vand.u32 2147483648, %v10417_v34 }
 0x6ea   : > { %v3700_v28 = vsub.f32 %v10321_v53, %v3676_v36  ;;  %v3141_v11 = vmul.f32 %v7565_v40, %v3140_v1  ;;  %v10457_v53 = vadd.f32 %v10381_v41, %v9627_v6  ;;  %v3066_v36 = vsub.f32 %v10297_v47, %v3043_v22 }
 0x6eb   : > { %v3156_v12 = vmul.f32 %v7567_v52, %v3155_v48  ;;  %v3147_v51 = vand.u32 2147483647, %v10417_v34  ;;  %v3164_v3 = vand.u32 2147483648, %v10373_v20  ;;  %v3162_v6 = vand.u32 2147483647, %v10373_v20 }
 0x6ec   : > { %3749 = vadd.xlane.f32.xlu1 %v10436_v13  ;;  %v3723_v29 = vmul.f32 1.442695, %v3700_v28  ;;  %v3142_v2 = vadd.f32 %v7565_v40, %v3141_v11  ;;  %v10464_v28 = vpop.permute.xlu0 %3386  ;;  %v3695_v47 = vsub.f32 %v10250_v37, %v10391_v7  ;;  %v3150_v22 = vor.u32 1.1754944e-38, %v3149_v60 }
 0x6ed   : > { %3056 = vmax.xlane.f32.xlu0 %v10439_v62  ;;  %v3157_v1 = vadd.f32 %v7567_v52, %v3156_v12  ;;  %v3090_v48 = vmul.f32 1.442695, %v3066_v36  ;;  %vm3148_vm6 = vcmp.eq.f32.partialorder %v3147_v51, 8.507059e+37  ;;  %v3165_v12 = vor.u32 1.1754944e-38, %v3164_v3 }
 0x6ee   : > { %7572 = vpow2.f32 %v3723_v29  ;;  %v3146_v41 = vsel %vm3145_vm2, %v7565_v40, %v3142_v2  ;;  %vm3163_vm7 = vcmp.eq.f32.partialorder %v3162_v6, 8.507059e+37  ;;  %v3713_v40 = vmul.f32 1.442695, %v3695_v47 }
 0x6ef   : > { %v10444_v5 = vpop.eup %7570  ;;  %v3161_v11 = vsel %vm3160_vm4, %v7567_v52, %v3157_v1  ;;  %v3151_v24 = vsel %vm3148_vm6, %v3150_v22, %v3146_v41  ;;  %7574 = vpow2.f32 %v3090_v48  ;;  %v10476_v37 = vadd.f32 %v10347_v43, %v9618_v50 }
 0x6f0   : > { %3741 = vadd.xlane.f32.xlu2 %v10444_v5  ;;  %v3656_v2 = vpop.f32.mrf.mxu2  ;;  %v3166_v20 = vsel %vm3163_vm7, %v3165_v12, %v3161_v11  ;;  %v3152_v7 = vmul.f32 %v10293_v59, %v3151_v24  ;;  %7576 = vpow2.f32 %v3713_v40  ;;  %v3064_v1 = vsub.f32 %v10280_v49, %v10408_v33 }
 0x6f1   : > { %v3167_v60 = vmul.f32 %v10231_v8, %v3166_v20  ;;  %v3179_v48 = vand.u32 2147483648, %v10367_v17  ;;  %v3678_v11 = vpop.xlane.xlu2 %3677 }
 0x6f3   : > { %v3378_v24 = vpack.c.bf16 %v3167_v60, %v3152_v7  ;;  %v3701_v7 = vsub.f32 %v10333_v44, %v3678_v11 }
 0x6f4   : > { %3685 = vmax.xlane.f32.xlu1 %v10450_v15  ;;  %v10471_v29 = vpop.eup %7572 }
 0x6f5   : > { %v10487_v59 = vpop.eup %7574 }
 0x6f6   : > { %v10492_v49 = vpop.eup %7576 }
 0x6f8   : > { %3048 = vmax.xlane.f32.xlu2 %v10457_v53  ;;  %v3658_v43 = vpop.f32.mrf.mxu2 }
 0x6f9   : > { %v10500_v3 = vadd.f32 %v3658_v43, %v12844_v39 }
 0x6fa   : > { %v2705_v34 = vpop.f32.mrf.mxu1 }
 0x6fc   : > { %v3389_v55 = vpop.permute.xlu1 %3388  ;;  %3755 = vadd.xlane.f32.xlu1 %v10471_v29 }
 0x6fd   : > { %3416 = vmatpush.bf16.msrb.mxu0 %v3389_v55  ;;  %7256 = vmatpush.bf16.msra.mxu1 %v3389_v55 }
 0x6ff   : > { %v3674_v52 = vpop.xlane.xlu0 %3673 }
 0x700   : > { %3681 = vmax.xlane.f32.xlu2 %v10476_v37  ;;  %v3699_v36 = vsub.f32 %v10342_v61, %v3674_v52  ;;  %v3086_v61 = vmul.f32 1.442695, %v3064_v1  ;;  %v3180_v1 = vor.u32 1.1754944e-38, %v3179_v48 }
 0x701   : > { %3417 = vmatpush.bf16.msrb.mxu0 %v10464_v28  ;;  %7257 = vmatpush.bf16.msra.mxu1 %v10464_v28 }
 0x702   : > { %v3721_v51 = vmul.f32 1.442695, %v3699_v36  ;;  %v2707_v50 = vpop.f32.mrf.mxu1 }
 0x703   : > { %v2721_v8 = vpack.c.bf16 %v2707_v50, %v2705_v34  ;;  %v3177_v34 = vand.u32 2147483647, %v10367_v17 }
 0x704   : > { %7578 = vpow2.f32 %v3721_v51  ;;  %3122 = vadd.xlane.f32.xlu1 %v10487_v59  ;;  %3418 = vmatmul.bf16.vlgmr.msrb.gmra.mxu0 %v3378_v24  ;;  %v3725_v24 = vmul.f32 1.442695, %v3701_v7 }
 0x705   : > { %4021 = vmatpush.bf16.msra.mxu0 %v10229_v35  ;;  %6729 = vmatmul.msk.bf16.gmra.mxu3 %vm1674_vm5, %v2721_v8  ;;  %v3698_v35 = vsub.f32 %v10253_v23, %v10446_v38  ;;  %7580 = vpow2.f32 %v3086_v61  ;;  %v10510_v23 = vadd.f32 %v3656_v2, %v12840_v57  ;;  %vm3178_vm12 = vcmp.eq.f32.partialorder %v3177_v34, 8.507059e+37 }
 0x708   : > { %3745 = vadd.xlane.f32.xlu2 %v10492_v49 }
 0x709   : > { %4022 = vmatpush.bf16.msra.mxu0 %v10260_v63  ;;  %v3719_v63 = vmul.f32 1.442695, %v3698_v35 }
 0x70a   : > { %v10497_v33 = vpop.eup %7578 }
 0x70b   : > { %3753 = vadd.xlane.f32.xlu0 %v10497_v33  ;;  %v10506_v6 = vpop.eup %7580  ;;  %7582 = vpow2.f32 %v3719_v63 }
 0x70c   : > { %3691 = vmax.xlane.f32.xlu1 %v10500_v3  ;;  %7584 = vrcp.f32 %v10367_v17 }
 0x70d   : > { %4023 = vmatpush.bf16.msra.mxu0 %v10304_v25  ;;  %v10521_v25 = vadd.f32 %v10452_v46, %v12839_v21 }
 0x710   : > { %3118 = vadd.xlane.f32.xlu2 %v10506_v6 }
 0x711   : > { %4024 = vmatpush.bf16.msra.mxu0 %v10316_v16  ;;  %v10515_v39 = vpop.eup %7582 }
 0x712   : > { %v7585_v16 = vpop.eup %7584 }
 0x713   : > { %3689 = vmax.xlane.f32.xlu0 %v10510_v23  ;;  %vm3174_vm8 = vweird.f32 %v7585_v16 }
 0x714   : > { %vm10534_vm10 = vmor %vm3173_vm9, %vm3174_vm8 }
 0x715   : > { %4025 = vmatpush.bf16.msra.mxu0 %v10326_v10  ;;  %v3169_v10 = vmul.f32 %v7585_v16, %v10367_v17 }
 0x717   : > { %v3170_v38 = vsub.f32 1.0, %v3169_v10 }
 0x718   : > { %3751 = vadd.xlane.f32.xlu2 %v10515_v39 }
 0x719   : > { %4026 = vmatpush.bf16.msra.mxu0 %v10371_v18  ;;  %v10528_v18 = vadd.f32 %v10421_v19, %v12840_v57 }
 0x71d   : > { %4027 = vmatpush.bf16.msra.mxu0 %v3389_v55  ;;  %v3171_v55 = vmul.f32 %v7585_v16, %v3170_v38  ;;  %v3115_v38 = vpop.xlane.xlu0 %3114 }
 0x71e   : > { %vm3203_vm1 = vweird.f32 %v3115_v38 }
 0x71f   : > { %v3172_v46 = vadd.f32 %v7585_v16, %v3171_v55 }
 0x720   : > { %3687 = vmax.xlane.f32.xlu2 %v10521_v25 }
 0x721   : > { %4028 = vmatpush.bf16.msra.mxu0 %v10464_v28  ;;  %v3176_v40 = vsel %vm10534_vm10, %v7585_v16, %v3172_v46 }
 0x722   : > { %v3181_v50 = vsel %vm3178_vm12, %v3180_v1, %v3176_v40 }
 0x723   : > { %v3182_v35 = vmul.f32 %v10210_v27, %v3181_v50 }
 0x725   : > { %v3684_v27 = vpop.xlane.xlu0 %3683 }
 0x726   : > { %v3704_v48 = vsub.f32 %v10353_v14, %v3684_v27 }
 0x727   : > { %v3113_v41 = vpop.xlane.xlu1 %3112 }
 0x728   : > { %7586 = vrcp.f32 %v3113_v41  ;;  %3054 = vmax.xlane.f32.xlu2 %v10528_v18  ;;  %v3194_v2 = vand.u32 2147483648, %v3113_v41  ;;  %v3192_v60 = vand.u32 2147483647, %v3113_v41  ;;  %vm3188_vm13 = vweird.f32 %v3113_v41 }
 0x729   : > { %v3731_v34 = vmul.f32 1.442695, %v3704_v48 }
 0x72a   : > { %v3195_v17 = vor.u32 1.1754944e-38, %v3194_v2  ;;  %vm3193_vm15 = vcmp.eq.f32.partialorder %v3192_v60, 8.507059e+37  ;;  %v3207_v60 = vand.u32 2147483647, %v3115_v38 }
 0x72b   : > { %v2710_v47 = vpop.f32.mrf.mxu1 }
 0x72c   : > { %vm3208_vm4 = vcmp.eq.f32.partialorder %v3207_v60, 8.507059e+37 }
 0x72e   : > { %v7587_v21 = vpop.eup %7586 }
 0x72f   : > { %v3184_v28 = vmul.f32 %v7587_v21, %v3113_v41  ;;  %v3045_v22 = vpop.xlane.xlu1 %3044  ;;  %vm3189_vm11 = vweird.f32 %v7587_v21 }
 0x730   : > { %v3067_v57 = vsub.f32 %v10384_v30, %v3045_v22  ;;  %vm3190_vm14 = vmor %vm3188_vm13, %vm3189_vm11 }
 0x731   : > { %v3185_v12 = vsub.f32 1.0, %v3184_v28  ;;  %v10559_v11 = vpop.xlane.xlu0 %3747 }
 0x732   : > { %v3092_v20 = vmul.f32 1.442695, %v3067_v57 }
 0x733   : > { %v3186_v52 = vmul.f32 %v7587_v21, %v3185_v12  ;;  %v2712_v36 = vpop.f32.mrf.mxu1 }
 0x734   : > { %7588 = vpow2.f32 %v3092_v20  ;;  %v2722_v30 = vpack.c.bf16 %v2712_v36, %v2710_v47 }
 0x735   : > { %v3187_v51 = vadd.f32 %v7587_v21, %v3186_v52  ;;  %7590 = vpow2.f32 %v3725_v24  ;;  %v3209_v52 = vand.u32 2147483648, %v3115_v38 }
 0x736   : > { %6730 = vmatmul.msk.bf16.gmra.mxu3 %vm1674_vm5, %v2722_v30 }
 0x737   : > { %v3680_v8 = vpop.xlane.xlu1 %3679  ;;  %v3191_v61 = vsel %vm3190_vm14, %v7587_v21, %v3187_v51 }
 0x738   : > { %v3702_v44 = vsub.f32 %v10395_v4, %v3680_v8  ;;  %v3196_v43 = vsel %vm3193_vm15, %v3195_v17, %v3191_v61  ;;  %v3210_v8 = vor.u32 1.1754944e-38, %v3209_v52 }
 0x739   : > { %v3197_v63 = vmul.f32 %v10377_v58, %v3196_v43  ;;  %v10565_v40 = vpop.xlane.xlu0 %3050 }
 0x73a   : > { %v10546_v16 = vpop.eup %7588  ;;  %v3727_v10 = vmul.f32 1.442695, %v3702_v44 }
 0x73b   : > { %3124 = vadd.xlane.f32.xlu2 %v10546_v16  ;;  %v3379_v41 = vpack.c.bf16 %v3197_v63, %v3182_v35  ;;  %v10551_v47 = vpop.eup %7590 }
 0x73c   : > { %7592 = vpow2.f32 %v3727_v10 }
 0x73d   : > { %3423 = vmatmul.bf16.gmra.mxu0 %v3379_v41  ;;  %7594 = vrcp.f32 %v3115_v38 }
 0x73f   : > { %v10549_v55 = vpop.xlane.xlu1 %3743 }
 0x740   : > { %vm3793_vm10 = vweird.f32 %v10549_v55 }
 0x742   : > { %v10553_v4 = vpop.eup %7592 }
 0x743   : > { %3757 = vadd.xlane.f32.xlu2 %v10551_v47  ;;  %3759 = vadd.xlane.f32.xlu0 %v10553_v4  ;;  %v7595_v21 = vpop.eup %7594 }
 0x744   : > { %v3199_v22 = vmul.f32 %v7595_v21, %v3115_v38  ;;  %vm3204_vm0 = vweird.f32 %v7595_v21 }
 0x745   : > { %vm3205_vm2 = vmor %vm3203_vm1, %vm3204_vm0 }
 0x746   : > { %v3200_v57 = vsub.f32 1.0, %v3199_v22 }
 0x747   : > { %v3047_v58 = vpop.xlane.xlu1 %3046 }
 0x748   : > { %v3068_v46 = vsub.f32 %v10411_v54, %v3047_v58  ;;  %v3201_v2 = vmul.f32 %v7595_v21, %v3200_v57 }
 0x74a   : > { %v3094_v28 = vmul.f32 1.442695, %v3068_v46  ;;  %v3202_v54 = vadd.f32 %v7595_v21, %v3201_v2 }
 0x74c   : > { %7596 = vpow2.f32 %v3094_v28  ;;  %v3206_v51 = vsel %vm3205_vm2, %v7595_v21, %v3202_v54  ;;  %vm3823_vm2 = vweird.f32 %v10559_v11 }
 0x74d   : > { %v3211_v44 = vsel %vm3208_vm4, %v3210_v8, %v3206_v51 }
 0x74e   : > { %v3212_v27 = vmul.f32 %v10349_v42, %v3211_v44  ;;  %v3799_v42 = vand.u32 2147483648, %v10549_v55 }
 0x74f   : > { %v3117_v19 = vpop.xlane.xlu1 %3116 }
 0x750   : > { %7598 = vrcp.f32 %v3117_v19  ;;  %v3224_v30 = vand.u32 2147483648, %v3117_v19  ;;  %v3222_v50 = vand.u32 2147483647, %v3117_v19  ;;  %vm3218_vm6 = vweird.f32 %v3117_v19 }
 0x751   : > { %7600 = vpow2.f32 %v3731_v34  ;;  %v3800_v8 = vor.u32 1.1754944e-38, %v3799_v42 }
 0x752   : > { %v10561_v12 = vpop.eup %7596  ;;  %7602 = vrcp.f32 %v10549_v55  ;;  %v3225_v43 = vor.u32 1.1754944e-38, %v3224_v30  ;;  %vm3223_vm8 = vcmp.eq.f32.partialorder %v3222_v50, 8.507059e+37 }
 0x753   : > { %3126 = vadd.xlane.f32.xlu1 %v10561_v12 }
 0x756   : > { %v7599_v20 = vpop.eup %7598 }
 0x757   : > { %v3214_v14 = vmul.f32 %v7599_v20, %v3117_v19  ;;  %v10567_v7 = vpop.xlane.xlu1 %3052  ;;  %v10569_v1 = vpop.eup %7600  ;;  %vm3219_vm3 = vweird.f32 %v7599_v20 }
 0x758   : > { %v7603_v24 = vpop.eup %7602  ;;  %vm3220_vm7 = vmor %vm3218_vm6, %vm3219_vm3  ;;  %v10573_v10 = vpop.xlane.xlu0 %3120 }
 0x759   : > { %v3215_v36 = vsub.f32 1.0, %v3214_v14  ;;  %v3789_v35 = vmul.f32 %v7603_v24, %v10549_v55  ;;  %vm3794_vm9 = vweird.f32 %v7603_v24 }
 0x75a   : > { %vm3795_vm11 = vmor %vm3793_vm10, %vm3794_vm9  ;;  %vm3248_vm10 = vweird.f32 %v10573_v10 }
 0x75b   : > { %v3216_v17 = vmul.f32 %v7599_v20, %v3215_v36  ;;  %3763 = vadd.xlane.f32.xlu1 %v10569_v1  ;;  %v3790_v21 = vsub.f32 1.0, %v3789_v35  ;;  %v3070_v36 = vsub.f32 %v10398_v31, %v10565_v40  ;;  %v7158_v35 = vld [vmem:[#allocation10 + $0x28] sm:$0xff] }
 0x75c   : > { %3513 = vmatpush.bf16.msra.mxu3 %v7158_v35 }
 0x75d   : > { %v3217_v61 = vadd.f32 %v7599_v20, %v3216_v17  ;;  %v3791_v22 = vmul.f32 %v7603_v24, %v3790_v21  ;;  %v3098_v40 = vmul.f32 1.442695, %v3070_v36 }
 0x75f   : > { %v3221_v63 = vsel %vm3220_vm7, %v7599_v20, %v3217_v61  ;;  %v10575_v38 = vpop.xlane.xlu1 %3749  ;;  %v3792_v20 = vadd.f32 %v7603_v24, %v3791_v22 }
 0x760   : > { %v3226_v41 = vsel %vm3223_vm8, %v3225_v43, %v3221_v63  ;;  %v3057_v19 = vpop.xlane.xlu0 %3056 }
 0x761   : > { %v3227_v58 = vmul.f32 %v10415_v32, %v3226_v41  ;;  %v3073_v32 = vsub.f32 %v10439_v62, %v3057_v19  ;;  %v3796_v17 = vsel %vm3795_vm11, %v7603_v24, %v3792_v20 }
 0x763   : > { %v3742_v46 = vpop.xlane.xlu2 %3741  ;;  %v3380_v28 = vpack.c.bf16 %v3227_v58, %v3212_v27  ;;  %v3104_v61 = vmul.f32 1.442695, %v3073_v32  ;;  %v7157_v58 = vld [vmem:[#allocation10 + $0x20] sm:$0xff] }
 0x764   : > { %7604 = vrcp.f32 %v3742_v46  ;;  %v3784_v30 = vand.u32 2147483648, %v3742_v46  ;;  %v3782_v62 = vand.u32 2147483647, %v3742_v46  ;;  %vm3778_vm14 = vweird.f32 %v3742_v46  ;;  %3514 = vmatpush.bf16.msra.mxu3 %v7157_v58 }
 0x765   : > { %3428 = vmatmul.bf16.vlgmr.msra.gmra.mxu1 %v3380_v28 }
 0x766   : > { %v3785_v43 = vor.u32 1.1754944e-38, %v3784_v30  ;;  %vm3783_vm0 = vcmp.eq.f32.partialorder %v3782_v62, 8.507059e+37  ;;  %v3829_v30 = vand.u32 2147483648, %v10559_v11 }
 0x767   : > { %v3686_v48 = vpop.xlane.xlu1 %3685 }
 0x768   : > { %v3705_v57 = vsub.f32 %v10450_v15, %v3686_v48  ;;  %v3797_v15 = vand.u32 2147483647, %v10549_v55 }
 0x76a   : > { %v7605_v34 = vpop.eup %7604  ;;  %v3733_v2 = vmul.f32 1.442695, %v3705_v57  ;;  %vm3798_vm13 = vcmp.eq.f32.partialorder %v3797_v15, 8.507059e+37 }
 0x76b   : > { %v3774_v54 = vmul.f32 %v7605_v34, %v3742_v46  ;;  %v3049_v14 = vpop.xlane.xlu2 %3048  ;;  %vm3779_vm12 = vweird.f32 %v7605_v34  ;;  %v3801_v55 = vsel %vm3798_vm13, %v3800_v8, %v3796_v17  ;;  %v3827_v17 = vand.u32 2147483647, %v10559_v11 }
 0x76c   : > { %7606 = vpow2.f32 %v3733_v2  ;;  %v3069_v52 = vsub.f32 %v10457_v53, %v3049_v14  ;;  %vm3780_vm15 = vmor %vm3778_vm14, %vm3779_vm12  ;;  %v3802_v21 = vmul.f32 %v10403_v45, %v3801_v55 }
 0x76d   : > { %7608 = vrcp.f32 %v10559_v11  ;;  %v3775_v60 = vsub.f32 1.0, %v3774_v54  ;;  %vm3828_vm6 = vcmp.eq.f32.partialorder %v3827_v17, 8.507059e+37 }
 0x76e   : > { %v3096_v51 = vmul.f32 1.442695, %v3069_v52 }
 0x76f   : > { %v3776_v50 = vmul.f32 %v7605_v34, %v3775_v60 }
 0x770   : > { %7610 = vpow2.f32 %v3096_v51 }
 0x771   : > { %v3777_v53 = vadd.f32 %v7605_v34, %v3776_v50  ;;  %7612 = vpow2.f32 %v3104_v61 }
 0x772   : > { %v10588_v44 = vpop.eup %7606  ;;  %7614 = vrcp.f32 %v10573_v10 }
 0x773   : > { %v10590_v31 = vpop.eup %7608  ;;  %v3781_v63 = vsel %vm3780_vm15, %v7605_v34, %v3777_v53  ;;  %v3682_v24 = vpop.xlane.xlu2 %3681  ;;  %3765 = vadd.xlane.f32.xlu1 %v10588_v44  ;;  %7616 = vpow2.f32 %v3098_v40 }
 0x774   : > { %v3786_v41 = vsel %vm3783_vm0, %v3785_v43, %v3781_v63  ;;  %v3703_v27 = vsub.f32 %v10476_v37, %v3682_v24  ;;  %v3819_v22 = vmul.f32 %v10590_v31, %v10559_v11  ;;  %v3071_v37 = vsub.f32 %v10426_v9, %v10567_v7  ;;  %v10642_v63 = vpop.xlane.xlu1 %3755 }
 0x775   : > { %v3787_v46 = vmul.f32 %v10444_v5, %v3786_v41  ;;  %vm3824_vm1 = vweird.f32 %v10590_v31  ;;  %v3830_v11 = vor.u32 1.1754944e-38, %v3829_v30 }
 0x776   : > { %v10596_v28 = vpop.eup %7610  ;;  %v3729_v48 = vmul.f32 1.442695, %v3703_v27  ;;  %v3820_v5 = vsub.f32 1.0, %v3819_v22  ;;  %v3100_v2 = vmul.f32 1.442695, %v3071_v37  ;;  %vm10627_vm3 = vmor %vm3823_vm2, %vm3824_vm1  ;;  %v3254_v27 = vand.u32 2147483648, %v10573_v10 }
 0x777   : > { %3128 = vadd.xlane.f32.xlu2 %v10596_v28  ;;  %v4013_v57 = vpack.c.bf16 %v3802_v21, %v3787_v46  ;;  %v10604_v45 = vpop.eup %7612  ;;  %vm3838_vm1 = vweird.f32 %v10575_v38 }
 0x778   : > { %7618 = vpow2.f32 %v3729_v48  ;;  %v10608_v34 = vpop.eup %7614  ;;  %v3821_v9 = vmul.f32 %v10590_v31, %v3820_v5 }
 0x779   : > { %4029 = vmatmul.bf16.vlgmr.msra.gmra.mxu0 %v4013_v57  ;;  %7620 = vrcp.f32 %v10575_v38  ;;  %v10610_v20 = vpop.eup %7616  ;;  %v3244_v7 = vmul.f32 %v10608_v34, %v10573_v10  ;;  %vm3249_vm9 = vweird.f32 %v10608_v34 }
 0x77a   : > { %v3822_v52 = vadd.f32 %v10590_v31, %v3821_v9  ;;  %vm10664_vm12 = vmor %vm3248_vm10, %vm3249_vm9 }
 0x77b   : > { %v3746_v19 = vpop.xlane.xlu2 %3745  ;;  %3136 = vadd.xlane.f32.xlu1 %v10604_v45  ;;  %v3245_v15 = vsub.f32 1.0, %v3244_v7 }
 0x77c   : > { %7622 = vrcp.f32 %v3746_v19  ;;  %v3826_v61 = vsel %vm10627_vm3, %v10590_v31, %v3822_v52  ;;  %v3814_v43 = vand.u32 2147483648, %v3746_v19  ;;  %v3812_v35 = vand.u32 2147483647, %v3746_v19 }
 0x77d   : > { %7624 = vpow2.f32 %v3100_v2  ;;  %v3246_v53 = vmul.f32 %v10608_v34, %v3245_v15  ;;  %vm3808_vm7 = vweird.f32 %v3746_v19  ;;  %v3831_v46 = vsel %vm3828_vm6, %v3830_v11, %v3826_v61 }
 0x77e   : > { %v10612_v54 = vpop.eup %7618  ;;  %v10649_v58 = vpop.xlane.xlu0 %3753  ;;  %v3815_v57 = vor.u32 1.1754944e-38, %v3814_v43  ;;  %vm3813_vm11 = vcmp.eq.f32.partialorder %v3812_v35, 8.507059e+37  ;;  %v3252_v2 = vand.u32 2147483647, %v10573_v10  ;;  %v3832_v15 = vmul.f32 %v10387_v56, %v3831_v46 }
 0x77f   : > { %3761 = vadd.xlane.f32.xlu0 %v10612_v54  ;;  %3130 = vadd.xlane.f32.xlu2 %v10610_v20  ;;  %v10619_v14 = vpop.eup %7620  ;;  %v3247_v48 = vadd.f32 %v10608_v34, %v3246_v53 }
 0x780   : > { %v3834_v50 = vmul.f32 %v10619_v14, %v10575_v38  ;;  %vm3253_vm14 = vcmp.eq.f32.partialorder %v3252_v2, 8.507059e+37  ;;  %vm3839_vm15 = vweird.f32 %v10619_v14 }
 0x781   : > { %v3419_v42 = vpop.f32.mrf.mxu0  ;;  %v3251_v10 = vsel %vm10664_vm12, %v10608_v34, %v3247_v48  ;;  %v3842_v34 = vand.u32 2147483647, %v10575_v38  ;;  %vm10687_vm3 = vmor %vm3838_vm1, %vm3839_vm15  ;;  %vm3883_vm15 = vweird.f32 %v10642_v63 }
 0x782   : > { %v7623_v32 = vpop.eup %7622  ;;  %v3835_v40 = vsub.f32 1.0, %v3834_v50 }
 0x783   : > { %v3804_v60 = vmul.f32 %v7623_v32, %v3746_v19  ;;  %v10623_v36 = vpop.xlane.xlu2 %3118  ;;  %v10635_v8 = vpop.eup %7624  ;;  %vm3809_vm4 = vweird.f32 %v7623_v32 }
 0x784   : > { %7626 = vrcp.f32 %v10623_v36  ;;  %vm10645_vm8 = vmor %vm3808_vm7, %vm3809_vm4  ;;  %v3836_v9 = vmul.f32 %v10619_v14, %v3835_v40  ;;  %v3239_v30 = vand.u32 2147483648, %v10623_v36  ;;  %v3237_v17 = vand.u32 2147483647, %v10623_v36 }
 0x785   : > { %v3805_v62 = vsub.f32 1.0, %v3804_v60  ;;  %v3255_v60 = vor.u32 1.1754944e-38, %v3254_v27  ;;  %vm3233_vm0 = vweird.f32 %v10623_v36  ;;  %vm3843_vm7 = vcmp.eq.f32.partialorder %v3842_v34, 8.507059e+37 }
 0x786   : > { %v3240_v43 = vor.u32 1.1754944e-38, %v3239_v30  ;;  %vm3238_vm4 = vcmp.eq.f32.partialorder %v3237_v17, 8.507059e+37  ;;  %v3889_v40 = vand.u32 2147483648, %v10642_v63 }
 0x787   : > { %v3806_v55 = vmul.f32 %v7623_v32, %v3805_v62  ;;  %3132 = vadd.xlane.f32.xlu0 %v10635_v8  ;;  %v3837_v62 = vadd.f32 %v10619_v14, %v3836_v9  ;;  %v3256_v61 = vsel %vm3253_vm14, %v3255_v60, %v3251_v10 }
 0x788   : > { %v3257_v48 = vmul.f32 %v10429_v26, %v3256_v61 }
 0x789   : > { %v3807_v24 = vadd.f32 %v7623_v32, %v3806_v55  ;;  %v3421_v41 = vpop.f32.mrf.mxu0  ;;  %v10683_v55 = vpop.xlane.xlu1 %3122 }
 0x78a   : > { %v3459_v21 = vpack.c.bf16 %v3421_v41, %v3419_v42  ;;  %v7627_v22 = vpop.eup %7626 }
 0x78b   : > { %v10653_v37 = vpop.xlane.xlu2 %3751  ;;  %v3811_v5 = vsel %vm10645_vm8, %v7623_v32, %v3807_v24  ;;  %v3229_v19 = vmul.f32 %v7627_v22, %v10623_v36  ;;  %vm3234_vm13 = vweird.f32 %v7627_v22  ;;  %v3844_v36 = vand.u32 2147483648, %v10575_v38  ;;  %v3690_v24 = vpop.xlane.xlu0 %3689 }
 0x78c   : > { %7628 = vrcp.f32 %v10653_v37  ;;  %6763 = vmatmul.msk.bf16.vlgmr.msra.gmra.mxu3 %vm1674_vm5, %v3459_v21  ;;  %v3816_v7 = vsel %vm3813_vm11, %v3815_v57, %v3811_v5  ;;  %vm3235_vm2 = vmor %vm3233_vm0, %vm3234_vm13  ;;  %v3841_v57 = vsel %vm10687_vm3, %v10619_v14, %v3837_v62  ;;  %v3859_v38 = vand.u32 2147483648, %v10653_v37 }
 0x78d   : > { %7630 = vrcp.f32 %v10649_v58  ;;  %v3230_v32 = vsub.f32 1.0, %v3229_v19  ;;  %v3817_v52 = vmul.f32 %v10492_v49, %v3816_v7  ;;  %v3857_v9 = vand.u32 2147483647, %v10653_v37 }
 0x78e   : > { %7632 = vrcp.f32 %v10642_v63  ;;  %v3845_v7 = vor.u32 1.1754944e-38, %v3844_v36  ;;  %vm3853_vm8 = vweird.f32 %v10653_v37  ;;  %vm3868_vm13 = vweird.f32 %v10649_v58 }
 0x78f   : > { %v3231_v51 = vmul.f32 %v7627_v22, %v3230_v32  ;;  %v4014_v50 = vpack.c.bf16 %v3832_v15, %v3817_v52  ;;  %v3860_v52 = vor.u32 1.1754944e-38, %v3859_v38  ;;  %vm3858_vm10 = vcmp.eq.f32.partialorder %v3857_v9, 8.507059e+37 }
 0x791   : > { %v3232_v49 = vadd.f32 %v7627_v22, %v3231_v51  ;;  %4034 = vmatmul.bf16.gmra.mxu0 %v4014_v50  ;;  %v3692_v17 = vpop.xlane.xlu1 %3691 }
 0x792   : > { %v7629_v56 = vpop.eup %7628 }
 0x793   : > { %v10679_v53 = vpop.eup %7630  ;;  %v3849_v11 = vmul.f32 %v7629_v56, %v10653_v37  ;;  %v3688_v35 = vpop.xlane.xlu2 %3687  ;;  %v3236_v27 = vsel %vm3235_vm2, %v7627_v22, %v3232_v49  ;;  %vm3854_vm6 = vweird.f32 %v7629_v56 }
 0x794   : > { %v3706_v41 = vsub.f32 %v10521_v25, %v3688_v35  ;;  %v10693_v31 = vpop.eup %7632  ;;  %v3241_v46 = vsel %vm3238_vm4, %v3240_v43, %v3236_v27  ;;  %v3864_v5 = vmul.f32 %v10679_v53, %v10649_v58  ;;  %v3707_v25 = vsub.f32 %v10510_v23, %v3690_v24  ;;  %vm3855_vm9 = vmor %vm3853_vm8, %vm3854_vm6 }
 0x795   : > { %v3850_v21 = vsub.f32 1.0, %v3849_v11  ;;  %v3242_v2 = vmul.f32 %v10506_v6, %v3241_v46  ;;  %v3879_v26 = vmul.f32 %v10693_v31, %v10642_v63  ;;  %v3846_v6 = vsel %vm3843_vm7, %v3845_v7, %v3841_v57 }
 0x796   : > { %v3735_v19 = vmul.f32 1.442695, %v3706_v41  ;;  %v3865_v32 = vsub.f32 1.0, %v3864_v5  ;;  %v3737_v23 = vmul.f32 1.442695, %v3707_v25  ;;  %v3847_v50 = vmul.f32 %v10436_v13, %v3846_v6 }
 0x797   : > { %v3851_v22 = vmul.f32 %v7629_v56, %v3850_v21  ;;  %v3381_v14 = vpack.c.bf16 %v3257_v48, %v3242_v2  ;;  %v3880_v30 = vsub.f32 1.0, %v3879_v26  ;;  %v3708_v43 = vsub.f32 %v10500_v3, %v3692_v17 }
 0x798   : > { %7634 = vpow2.f32 %v3735_v19  ;;  %v3866_v37 = vmul.f32 %v10679_v53, %v3865_v32  ;;  %vm3869_vm11 = vweird.f32 %v10679_v53  ;;  %vm3884_vm12 = vweird.f32 %v10693_v31 }
 0x799   : > { %v3852_v42 = vadd.f32 %v7629_v56, %v3851_v22  ;;  %3433 = vmatmul.bf16.gmra.mxu1 %v3381_v14  ;;  %7636 = vpow2.f32 %v3737_v23  ;;  %v3739_v11 = vmul.f32 1.442695, %v3708_v43  ;;  %v3872_v35 = vand.u32 2147483647, %v10649_v58  ;;  %vm3870_vm14 = vmor %vm3868_vm13, %vm3869_vm11 }
 0x79a   : > { %v3867_v13 = vadd.f32 %v10679_v53, %v3866_v37  ;;  %v3887_v24 = vand.u32 2147483647, %v10642_v63  ;;  %vm3885_vm0 = vmor %vm3883_vm15, %vm3884_vm12  ;;  %v3890_v46 = vor.u32 1.1754944e-38, %v3889_v40  ;;  %vm3263_vm4 = vweird.f32 %v10683_v55 }
 0x79b   : > { %v3055_v15 = vpop.xlane.xlu2 %3054  ;;  %v3856_v60 = vsel %vm3855_vm9, %v7629_v56, %v3852_v42  ;;  %v3881_v56 = vmul.f32 %v10693_v31, %v3880_v30  ;;  %vm3873_vm1 = vcmp.eq.f32.partialorder %v3872_v35, 8.507059e+37  ;;  %v3267_v42 = vand.u32 2147483647, %v10683_v55 }
 0x79c   : > { %v3072_v10 = vsub.f32 %v10528_v18, %v3055_v15  ;;  %v3861_v51 = vsel %vm3858_vm10, %v3860_v52, %v3856_v60  ;;  %v3871_v41 = vsel %vm3870_vm14, %v10679_v53, %v3867_v13  ;;  %vm3888_vm2 = vcmp.eq.f32.partialorder %v3887_v24, 8.507059e+37 }
 0x79d   : > { %v3862_v62 = vmul.f32 %v10515_v39, %v3861_v51  ;;  %v3874_v39 = vand.u32 2147483648, %v10649_v58  ;;  %v3882_v18 = vadd.f32 %v10693_v31, %v3881_v56  ;;  %vm3268_vm8 = vcmp.eq.f32.partialorder %v3267_v42, 8.507059e+37 }
 0x79e   : > { %v10711_v49 = vpop.eup %7634  ;;  %v3102_v61 = vmul.f32 1.442695, %v3072_v10 }
 0x79f   : > { %3767 = vadd.xlane.f32.xlu2 %v10711_v49  ;;  %v4015_v34 = vpack.c.bf16 %v3862_v62, %v3847_v50  ;;  %v10725_v3 = vpop.eup %7636  ;;  %v3875_v21 = vor.u32 1.1754944e-38, %v3874_v39  ;;  %v3886_v58 = vsel %vm3885_vm0, %v10693_v31, %v3882_v18 }
 0x7a0   : > { %7638 = vpow2.f32 %v3102_v61  ;;  %v3891_v5 = vsel %vm3888_vm2, %v3890_v46, %v3886_v58 }
 0x7a1   : > { %7640 = vrcp.f32 %v10683_v55  ;;  %4039 = vmatmul.bf16.gmra.mxu0 %v4015_v34  ;;  %v3876_v48 = vsel %vm3873_vm1, %v3875_v21, %v3871_v41  ;;  %v3892_v2 = vmul.f32 %v10471_v29, %v3891_v5 }
 0x7a2   : > { %7642 = vpow2.f32 %v3739_v11  ;;  %v3877_v63 = vmul.f32 %v10497_v33, %v3876_v48  ;;  %v3269_v33 = vand.u32 2147483648, %v10683_v55 }
 0x7a4   : > { %v4016_v25 = vpack.c.bf16 %v3892_v2, %v3877_v63  ;;  %v3270_v60 = vor.u32 1.1754944e-38, %v3269_v33 }
 0x7a6   : > { %v10728_v36 = vpop.eup %7638 }
 0x7a7   : > { %v7641_v27 = vpop.eup %7640  ;;  %3134 = vadd.xlane.f32.xlu0 %v10728_v36  ;;  %3769 = vadd.xlane.f32.xlu2 %v10725_v3 }
 0x7a8   : > { %v3259_v57 = vmul.f32 %v7641_v27, %v10683_v55  ;;  %v10738_v53 = vpop.eup %7642  ;;  %vm3264_vm3 = vweird.f32 %v7641_v27 }
 0x7a9   : > { %vm3265_vm6 = vmor %vm3263_vm4, %vm3264_vm3 }
 0x7aa   : > { %v3260_v38 = vsub.f32 1.0, %v3259_v57 }
 0x7ac   : > { %v3261_v22 = vmul.f32 %v7641_v27, %v3260_v38 }
 0x7ae   : > { %v3125_v19 = vpop.xlane.xlu2 %3124  ;;  %v3262_v9 = vadd.f32 %v7641_v27, %v3261_v22  ;;  %v7160_v22 = vld [vmem:[#allocation10 + $0x38] sm:$0xff] }
 0x7af   : > { %7644 = vrcp.f32 %v3125_v19  ;;  %3771 = vadd.xlane.f32.xlu0 %v10738_v53  ;;  %v3284_v32 = vand.u32 2147483648, %v3125_v19  ;;  %v3282_v6 = vand.u32 2147483647, %v3125_v19  ;;  %vm3278_vm9 = vweird.f32 %v3125_v19  ;;  %4124 = vmatpush.bf16.msrb.mxu1 %v7160_v22 }
 0x7b0   : > { %v3266_v15 = vsel %vm3265_vm6, %v7641_v27, %v3262_v9 }
 0x7b1   : > { %4044 = vmatmul.bf16.gmra.mxu0 %v4016_v25  ;;  %v3285_v51 = vor.u32 1.1754944e-38, %v3284_v32  ;;  %v3271_v17 = vsel %vm3268_vm8, %v3270_v60, %v3266_v15  ;;  %vm3283_vm11 = vcmp.eq.f32.partialorder %v3282_v6, 8.507059e+37 }
 0x7b2   : > { %v3272_v56 = vmul.f32 %v10487_v59, %v3271_v17 }
 0x7b5   : > { %v7645_v31 = vpop.eup %7644 }
 0x7b6   : > { %v3274_v7 = vmul.f32 %v7645_v31, %v3125_v19  ;;  %v3758_v26 = vpop.xlane.xlu2 %3757  ;;  %v3760_v14 = vpop.xlane.xlu0 %3759  ;;  %vm3279_vm7 = vweird.f32 %v7645_v31 }
 0x7b7   : > { %7646 = vrcp.f32 %v3758_v26  ;;  %vm3280_vm10 = vmor %vm3278_vm9, %vm3279_vm7  ;;  %v3904_v18 = vand.u32 2147483648, %v3758_v26  ;;  %v3902_v40 = vand.u32 2147483647, %v3758_v26  ;;  %v3919_v41 = vand.u32 2147483648, %v3760_v14 }
 0x7b8   : > { %v3275_v29 = vsub.f32 1.0, %v3274_v7  ;;  %7648 = vrcp.f32 %v3760_v14  ;;  %vm3898_vm13 = vweird.f32 %v3758_v26  ;;  %v3917_v58 = vand.u32 2147483647, %v3760_v14 }
 0x7b9   : > { %v3905_v59 = vor.u32 1.1754944e-38, %v3904_v18  ;;  %vm3913_vm0 = vweird.f32 %v3760_v14  ;;  %vm3903_vm1 = vcmp.eq.f32.partialorder %v3902_v40, 8.507059e+37  ;;  %v3920_v48 = vor.u32 1.1754944e-38, %v3919_v41 }
 0x7ba   : > { %v3276_v52 = vmul.f32 %v7645_v31, %v3275_v29  ;;  %v3424_v23 = vpop.f32.mrf.mxu0  ;;  %vm3918_vm3 = vcmp.eq.f32.partialorder %v3917_v58, 8.507059e+37 }
 0x7bc   : > { %v3277_v30 = vadd.f32 %v7645_v31, %v3276_v52 }
 0x7bd   : > { %v7647_v10 = vpop.eup %7646 }
 0x7be   : > { %v7649_v50 = vpop.eup %7648  ;;  %v3894_v55 = vmul.f32 %v7647_v10, %v3758_v26  ;;  %v3281_v62 = vsel %vm3280_vm10, %v7645_v31, %v3277_v30  ;;  %vm3899_vm12 = vweird.f32 %v7647_v10 }
 0x7bf   : > { %v3909_v37 = vmul.f32 %v7649_v50, %v3760_v14  ;;  %v3286_v61 = vsel %vm3283_vm11, %v3285_v51, %v3281_v62  ;;  %vm3914_vm14 = vweird.f32 %v7649_v50  ;;  %vm3900_vm15 = vmor %vm3898_vm13, %vm3899_vm12 }
 0x7c0   : > { %v3895_v34 = vsub.f32 1.0, %v3894_v55  ;;  %v3287_v43 = vmul.f32 %v10546_v16, %v3286_v61  ;;  %vm3915_vm2 = vmor %vm3913_vm0, %vm3914_vm14 }
 0x7c1   : > { %v3910_v13 = vsub.f32 1.0, %v3909_v37 }
 0x7c2   : > { %v3896_v39 = vmul.f32 %v7647_v10, %v3895_v34  ;;  %v3426_v11 = vpop.f32.mrf.mxu0  ;;  %v3382_v35 = vpack.c.bf16 %v3287_v43, %v3272_v56 }
 0x7c3   : > { %v3911_v24 = vmul.f32 %v7649_v50, %v3910_v13  ;;  %v3460_v27 = vpack.c.bf16 %v3426_v11, %v3424_v23 }
 0x7c4   : > { %v3897_v21 = vadd.f32 %v7647_v10, %v3896_v39  ;;  %3438 = vmatmul.bf16.gmra.mxu1 %v3382_v35 }
 0x7c5   : > { %v3912_v46 = vadd.f32 %v7649_v50, %v3911_v24  ;;  %6764 = vmatmul.msk.bf16.gmra.mxu3 %vm1674_vm5, %v3460_v27 }
 0x7c6   : > { %v3901_v16 = vsel %vm3900_vm15, %v7647_v10, %v3897_v21  ;;  %v3127_v25 = vpop.xlane.xlu1 %3126 }
 0x7c7   : > { %v3906_v57 = vsel %vm3903_vm1, %v3905_v59, %v3901_v16  ;;  %v3916_v5 = vsel %vm3915_vm2, %v7649_v50, %v3912_v46  ;;  %7650 = vrcp.f32 %v3127_v25  ;;  %v3299_v10 = vand.u32 2147483648, %v3127_v25 }
 0x7c8   : > { %v3907_v63 = vmul.f32 %v10551_v47, %v3906_v57  ;;  %v3921_v38 = vsel %vm3918_vm3, %v3920_v48, %v3916_v5  ;;  %vm3293_vm6 = vweird.f32 %v3127_v25  ;;  %v3297_v17 = vand.u32 2147483647, %v3127_v25 }
 0x7c9   : > { %v3922_v19 = vmul.f32 %v10553_v4, %v3921_v38  ;;  %v3300_v34 = vor.u32 1.1754944e-38, %v3299_v10 }
 0x7ca   : > { %vm3298_vm10 = vcmp.eq.f32.partialorder %v3297_v17, 8.507059e+37 }
 0x7cb   : > { %v4017_v2 = vpack.c.bf16 %v3922_v19, %v3907_v63 }
 0x7cd   : > { %4049 = vmatmul.bf16.gmra.mxu0 %v4017_v2  ;;  %v7651_v7 = vpop.eup %7650 }
 0x7ce   : > { %v10750_v31 = vpop.xlane.xlu1 %3763  ;;  %v3289_v26 = vmul.f32 %v7651_v7, %v3127_v25  ;;  %vm3294_vm4 = vweird.f32 %v7651_v7 }
 0x7cf   : > { %7652 = vrcp.f32 %v10750_v31  ;;  %vm10764_vm7 = vmor %vm3293_vm6, %vm3294_vm4  ;;  %v3949_v27 = vand.u32 2147483648, %v10750_v31  ;;  %vm3943_vm13 = vweird.f32 %v10750_v31  ;;  %v3947_v46 = vand.u32 2147483647, %v10750_v31 }
 0x7d0   : > { %v3290_v47 = vsub.f32 1.0, %v3289_v26 }
 0x7d1   : > { %v3950_v25 = vor.u32 1.1754944e-38, %v3949_v27  ;;  %vm3948_vm1 = vcmp.eq.f32.partialorder %v3947_v46, 8.507059e+37 }
 0x7d2   : > { %v3291_v32 = vmul.f32 %v7651_v7, %v3290_v47 }
 0x7d4   : > { %v3292_v30 = vadd.f32 %v7651_v7, %v3291_v32 }
 0x7d5   : > { %v10753_v42 = vpop.eup %7652 }
 0x7d6   : > { %v3939_v29 = vmul.f32 %v10753_v42, %v10750_v31  ;;  %v3296_v61 = vsel %vm10764_vm7, %v7651_v7, %v3292_v30  ;;  %vm3944_vm11 = vweird.f32 %v10753_v42 }
 0x7d7   : > { %v3301_v24 = vsel %vm3298_vm10, %v3300_v34, %v3296_v61  ;;  %vm10792_vm15 = vmor %vm3943_vm13, %vm3944_vm11 }
 0x7d8   : > { %v3940_v6 = vsub.f32 1.0, %v3939_v29  ;;  %v3302_v57 = vmul.f32 %v10561_v12, %v3301_v24 }
 0x7da   : > { %v3941_v55 = vmul.f32 %v10753_v42, %v3940_v6 }
 0x7dc   : > { %v3942_v11 = vadd.f32 %v10753_v42, %v3941_v55 }
 0x7de   : > { %v3946_v2 = vsel %vm10792_vm15, %v10753_v42, %v3942_v11 }
 0x7e2   : > { %v3429_v9 = vpop.f32.mrf.mxu1 }
 0x7ea   : > { %v3129_v14 = vpop.xlane.xlu2 %3128  ;;  %v3431_v33 = vpop.f32.mrf.mxu1 }
 0x7eb   : > { %7654 = vrcp.f32 %v3129_v14  ;;  %v3461_v4 = vpack.c.bf16 %v3431_v33, %v3429_v9  ;;  %v3314_v37 = vand.u32 2147483648, %v3129_v14  ;;  %vm3308_vm9 = vweird.f32 %v3129_v14  ;;  %v10804_v9 = vpop.xlane.xlu1 %3765 }
 0x7ec   : > { %v3312_v43 = vand.u32 2147483647, %v3129_v14  ;;  %vm3958_vm15 = vweird.f32 %v10804_v9  ;;  %v3964_v16 = vand.u32 2147483648, %v10804_v9 }
 0x7ed   : > { %6765 = vmatmul.msk.bf16.gmra.mxu3 %vm1674_vm5, %v3461_v4  ;;  %v3315_v21 = vor.u32 1.1754944e-38, %v3314_v37 }
 0x7ee   : > { %vm3313_vm14 = vcmp.eq.f32.partialorder %v3312_v43, 8.507059e+37 }
 0x7f1   : > { %v7655_v52 = vpop.eup %7654 }
 0x7f2   : > { %v3304_v23 = vmul.f32 %v7655_v52, %v3129_v14  ;;  %v10758_v15 = vpop.xlane.xlu2 %3130  ;;  %v10760_v60 = vpop.xlane.xlu0 %3761  ;;  %vm3309_vm8 = vweird.f32 %v7655_v52  ;;  %v3951_v14 = vsel %vm3948_vm1, %v3950_v25, %v3946_v2  ;;  %v3965_v25 = vor.u32 1.1754944e-38, %v3964_v16 }
 0x7f3   : > { %7656 = vrcp.f32 %v10758_v15  ;;  %vm10774_vm12 = vmor %vm3308_vm9, %vm3309_vm8  ;;  %v3934_v38 = vand.u32 2147483648, %v10760_v60  ;;  %v3932_v31 = vand.u32 2147483647, %v10760_v60  ;;  %vm3928_vm2 = vweird.f32 %v10760_v60  ;;  %v10826_v61 = vpop.xlane.xlu1 %3136 }
 0x7f4   : > { %v3305_v51 = vsub.f32 1.0, %v3304_v23  ;;  %7658 = vrcp.f32 %v10760_v60  ;;  %v3329_v47 = vand.u32 2147483648, %v10758_v15  ;;  %vm3323_vm7 = vweird.f32 %v10758_v15 }
 0x7f5   : > { %v3935_v33 = vor.u32 1.1754944e-38, %v3934_v38  ;;  %vm3933_vm6 = vcmp.eq.f32.partialorder %v3932_v31, 8.507059e+37  ;;  %v3327_v29 = vand.u32 2147483647, %v10758_v15  ;;  %v3952_v30 = vmul.f32 %v10569_v1, %v3951_v14  ;;  %v7159_v1 = vld [vmem:[#allocation10 + $0x30] sm:$0xff] }
 0x7f6   : > { %v3306_v62 = vmul.f32 %v7655_v52, %v3305_v51  ;;  %v3330_v17 = vor.u32 1.1754944e-38, %v3329_v47  ;;  %4125 = vmatpush.bf16.msrb.mxu1 %v7159_v1  ;;  %v3374_v14 = vand.u32 2147483648, %v10826_v61 }
 0x7f7   : > { %vm3328_vm10 = vcmp.eq.f32.partialorder %v3327_v29, 8.507059e+37 }
 0x7f8   : > { %v3307_v56 = vadd.f32 %v7655_v52, %v3306_v62 }
 0x7f9   : > { %v10771_v13 = vpop.eup %7656 }
 0x7fa   : > { %v7659_v18 = vpop.eup %7658  ;;  %v3319_v35 = vmul.f32 %v10771_v13, %v10758_v15  ;;  %v10781_v40 = vpop.xlane.xlu0 %3132  ;;  %v3311_v41 = vsel %vm10774_vm12, %v7655_v52, %v3307_v56  ;;  %vm3324_vm3 = vweird.f32 %v10771_v13 }
 0x7fb   : > { %v3924_v58 = vmul.f32 %v7659_v18, %v10760_v60  ;;  %7660 = vrcp.f32 %v10781_v40  ;;  %v3316_v5 = vsel %vm3313_vm14, %v3315_v21, %v3311_v41  ;;  %vm3929_vm0 = vweird.f32 %v7659_v18  ;;  %vm10814_vm8 = vmor %vm3323_vm7, %vm3324_vm3 }
 0x7fc   : > { %v3320_v59 = vsub.f32 1.0, %v3319_v35  ;;  %v3317_v19 = vmul.f32 %v10596_v28, %v3316_v5  ;;  %vm3930_vm4 = vmor %vm3928_vm2, %vm3929_vm0  ;;  %7662 = vrcp.f32 %v10804_v9  ;;  %v3344_v23 = vand.u32 2147483648, %v10781_v40 }
 0x7fd   : > { %v3925_v48 = vsub.f32 1.0, %v3924_v58  ;;  %v3342_v51 = vand.u32 2147483647, %v10781_v40  ;;  %vm3338_vm11 = vweird.f32 %v10781_v40  ;;  %7664 = vrcp.f32 %v10826_v61 }
 0x7fe   : > { %v3321_v63 = vmul.f32 %v10771_v13, %v3320_v59  ;;  %v3383_v12 = vpack.c.bf16 %v3317_v19, %v3302_v57  ;;  %v3345_v37 = vor.u32 1.1754944e-38, %v3344_v23  ;;  %v3962_v57 = vand.u32 2147483647, %v10804_v9 }
 0x7ff   : > { %v3926_v22 = vmul.f32 %v7659_v18, %v3925_v48  ;;  %vm3343_vm13 = vcmp.eq.f32.partialorder %v3342_v51, 8.507059e+37  ;;  %v3372_v23 = vand.u32 2147483647, %v10826_v61 }
 0x800   : > { %v3322_v28 = vadd.f32 %v10771_v13, %v3321_v63  ;;  %3443 = vmatmul.bf16.gmra.mxu1 %v3383_v12  ;;  %v10852_v12 = vpop.f32.mrf.mxu3  ;;  %vm3963_vm2 = vcmp.eq.f32.partialorder %v3962_v57, 8.507059e+37 }
 0x801   : > { %v7661_v7 = vpop.eup %7660  ;;  %v3927_v26 = vadd.f32 %v7659_v18, %v3926_v22 }
 0x802   : > { %v3334_v42 = vmul.f32 %v7661_v7, %v10781_v40  ;;  %vm3339_vm9 = vweird.f32 %v7661_v7  ;;  %v3326_v15 = vsel %vm10814_vm8, %v10771_v13, %v3322_v28  ;;  %v7663_v62 = vpop.eup %7662  ;;  %vm3368_vm8 = vweird.f32 %v10826_v61 }
 0x803   : > { %v3931_v4 = vsel %vm3930_vm4, %v7659_v18, %v3927_v26  ;;  %vm3340_vm12 = vmor %vm3338_vm11, %vm3339_vm9  ;;  %v3954_v39 = vmul.f32 %v7663_v62, %v10804_v9  ;;  %v10832_v40 = vpop.eup %7664  ;;  %vm3959_vm14 = vweird.f32 %v7663_v62  ;;  %vm3373_vm11 = vcmp.eq.f32.partialorder %v3372_v23, 8.507059e+37 }
 0x804   : > { %v3335_v32 = vsub.f32 1.0, %v3334_v42  ;;  %v3936_v52 = vsel %vm3933_vm6, %v3935_v33, %v3931_v4  ;;  %v3364_v41 = vmul.f32 %v10832_v40, %v10826_v61  ;;  %vm10843_vm0 = vmor %vm3958_vm15, %vm3959_vm14  ;;  %vm3369_vm4 = vweird.f32 %v10832_v40 }
 0x805   : > { %v3937_v60 = vmul.f32 %v10612_v54, %v3936_v52  ;;  %v3331_v54 = vsel %vm3328_vm10, %v3330_v17, %v3326_v15  ;;  %v3955_v11 = vsub.f32 1.0, %v3954_v39  ;;  %vm10873_vm9 = vmor %vm3368_vm8, %vm3369_vm4 }
 0x806   : > { %v3336_v10 = vmul.f32 %v7661_v7, %v3335_v32  ;;  %v3332_v43 = vmul.f32 %v10610_v20, %v3331_v54 }
 0x807   : > { %v4018_v50 = vpack.c.bf16 %v3952_v30, %v3937_v60  ;;  %v3956_v24 = vmul.f32 %v7663_v62, %v3955_v11 }
 0x808   : > { %v3337_v55 = vadd.f32 %v7661_v7, %v3336_v10 }
 0x809   : > { %4054 = vmatmul.bf16.gmra.mxu0 %v4018_v50  ;;  %v3957_v20 = vadd.f32 %v7663_v62, %v3956_v24  ;;  %v3375_v50 = vor.u32 1.1754944e-38, %v3374_v14 }
 0x80a   : > { %v3341_v34 = vsel %vm3340_vm12, %v7661_v7, %v3337_v55  ;;  %v4030_v55 = vpop.f32.mrf.mxu0 }
 0x80b   : > { %v3346_v56 = vsel %vm3343_vm13, %v3345_v37, %v3341_v34  ;;  %v3961_v63 = vsel %vm10843_vm0, %v7663_v62, %v3957_v20 }
 0x80c   : > { %v3347_v13 = vmul.f32 %v10635_v8, %v3346_v56  ;;  %v3365_v8 = vsub.f32 1.0, %v3364_v41  ;;  %v3966_v33 = vsel %vm3963_vm2, %v3965_v25, %v3961_v63 }
 0x80d   : > { %v3967_v15 = vmul.f32 %v10588_v44, %v3966_v33 }
 0x80e   : > { %v3384_v18 = vpack.c.bf16 %v3347_v13, %v3332_v43  ;;  %v3366_v38 = vmul.f32 %v10832_v40, %v3365_v8  ;;  %v10886_v43 = vpop.f32.mrf.mxu3 }
 0x810   : > { %3448 = vmatmul.bf16.gmra.mxu1 %v3384_v18  ;;  %v3367_v47 = vadd.f32 %v10832_v40, %v3366_v38 }
 0x812   : > { %v3768_v35 = vpop.xlane.xlu2 %3767  ;;  %v3371_v54 = vsel %vm10873_vm9, %v10832_v40, %v3367_v47  ;;  %v4032_v57 = vpop.f32.mrf.mxu0 }
 0x813   : > { %7666 = vrcp.f32 %v3768_v35  ;;  %v3979_v2 = vand.u32 2147483648, %v3768_v35  ;;  %v3977_v22 = vand.u32 2147483647, %v3768_v35  ;;  %vm3973_vm3 = vweird.f32 %v3768_v35 }
 0x815   : > { %v3980_v4 = vor.u32 1.1754944e-38, %v3979_v2  ;;  %vm3978_vm7 = vcmp.eq.f32.partialorder %v3977_v22, 8.507059e+37 }
 0x816   : > { %v3434_v27 = vpop.f32.mrf.mxu1 }
 0x819   : > { %v7667_v21 = vpop.eup %7666 }
 0x81a   : > { %v3969_v58 = vmul.f32 %v7667_v21, %v3768_v35  ;;  %v10836_v46 = vpop.xlane.xlu2 %3769  ;;  %v10838_v59 = vpop.xlane.xlu0 %3134  ;;  %vm3974_vm1 = vweird.f32 %v7667_v21 }
 0x81b   : > { %7668 = vrcp.f32 %v10836_v46  ;;  %vm10858_vm6 = vmor %vm3973_vm3, %vm3974_vm1  ;;  %v3359_v37 = vand.u32 2147483648, %v10838_v59  ;;  %v3357_v61 = vand.u32 2147483647, %v10838_v59  ;;  %vm3353_vm12 = vweird.f32 %v10838_v59 }
 0x81c   : > { %v3970_v5 = vsub.f32 1.0, %v3969_v58  ;;  %7670 = vrcp.f32 %v10838_v59  ;;  %v3994_v11 = vand.u32 2147483648, %v10836_v46  ;;  %vm3988_vm0 = vweird.f32 %v10836_v46 }
 0x81d   : > { %v3360_v39 = vor.u32 1.1754944e-38, %v3359_v37  ;;  %vm3358_vm15 = vcmp.eq.f32.partialorder %v3357_v61, 8.507059e+37  ;;  %v3992_v40 = vand.u32 2147483647, %v10836_v46 }
 0x81e   : > { %v3971_v19 = vmul.f32 %v7667_v21, %v3970_v5  ;;  %v3436_v31 = vpop.f32.mrf.mxu1  ;;  %v3995_v48 = vor.u32 1.1754944e-38, %v3994_v11 }
 0x81f   : > { %v3462_v9 = vpack.c.bf16 %v3436_v31, %v3434_v27  ;;  %vm3993_vm3 = vcmp.eq.f32.partialorder %v3992_v40, 8.507059e+37  ;;  %v4035_v31 = vpop.f32.mrf.mxu0 }
 0x820   : > { %v3972_v7 = vadd.f32 %v7667_v21, %v3971_v19 }
 0x821   : > { %v10854_v26 = vpop.eup %7668  ;;  %6766 = vmatmul.msk.bf16.gmra.mxu3 %vm1674_vm5, %v3462_v9  ;;  %v4070_v9 = vpack.c.bf16 %v4032_v57, %v4030_v55 }
 0x822   : > { %v7671_v42 = vpop.eup %7670  ;;  %v3984_v29 = vmul.f32 %v10854_v26, %v10836_v46  ;;  %v3772_v32 = vpop.xlane.xlu0 %3771  ;;  %v3976_v52 = vsel %vm10858_vm6, %v7667_v21, %v3972_v7  ;;  %vm3989_vm13 = vweird.f32 %v10854_v26 }
 0x823   : > { %v3349_v6 = vmul.f32 %v7671_v42, %v10838_v59  ;;  %7672 = vrcp.f32 %v3772_v32  ;;  %v3981_v30 = vsel %vm3978_vm7, %v3980_v4, %v3976_v52  ;;  %vm3354_vm10 = vweird.f32 %v7671_v42  ;;  %vm10893_vm1 = vmor %vm3988_vm0, %vm3989_vm13 }
 0x824   : > { %v3985_v60 = vsub.f32 1.0, %v3984_v29  ;;  %v3982_v17 = vmul.f32 %v10711_v49, %v3981_v30  ;;  %v3376_v49 = vsel %vm3373_vm11, %v3375_v50, %v3371_v54  ;;  %vm3355_vm14 = vmor %vm3353_vm12, %vm3354_vm10  ;;  %v4009_v21 = vand.u32 2147483648, %v3772_v32 }
 0x825   : > { %v3350_v51 = vsub.f32 1.0, %v3349_v6  ;;  %v3377_v8 = vmul.f32 %v10604_v45, %v3376_v49  ;;  %v4007_v59 = vand.u32 2147483647, %v3772_v32  ;;  %vm4003_vm4 = vweird.f32 %v3772_v32 }
 0x826   : > { %v3986_v62 = vmul.f32 %v10854_v26, %v3985_v60  ;;  %v4019_v34 = vpack.c.bf16 %v3982_v17, %v3967_v15  ;;  %v4010_v63 = vor.u32 1.1754944e-38, %v4009_v21 }
 0x827   : > { %v3351_v1 = vmul.f32 %v7671_v42, %v3350_v51  ;;  %vm4008_vm7 = vcmp.eq.f32.partialorder %v4007_v59, 8.507059e+37  ;;  %v4037_v14 = vpop.f32.mrf.mxu0  ;;  %v12899_v59 = vld [vmem:[#allocation59_spill] sm:$0xff] }
 0x828   : > { %4059 = vmatmul.bf16.gmra.mxu0 %v4019_v34  ;;  %v3987_v13 = vadd.f32 %v10854_v26, %v3986_v62 }
 0x829   : > { %v7673_v56 = vpop.eup %7672  ;;  %v3352_v44 = vadd.f32 %v7671_v42, %v3351_v1 }
 0x82a   : > { %v3999_v18 = vmul.f32 %v7673_v56, %v3772_v32  ;;  %vm4004_vm2 = vweird.f32 %v7673_v56  ;;  %v3991_v16 = vsel %vm10893_vm1, %v10854_v26, %v3987_v13 }
 0x82b   : > { %v3356_v35 = vsel %vm3355_vm14, %v7671_v42, %v3352_v44  ;;  %vm4005_vm6 = vmor %vm4003_vm4, %vm4004_vm2  ;;  %v3996_v38 = vsel %vm3993_vm3, %v3995_v48, %v3991_v16  ;;  %v2858_v16 = vadd.f32 %v12899_v59, %v10852_v12  ;;  %v6941_v59 = vld [vmem:[#allocation11 + $0x120] sm:$0xf] }
 0x82c   : > { %v4000_v24 = vsub.f32 1.0, %v3999_v18  ;;  %v3361_v41 = vsel %vm3358_vm15, %v3360_v39, %v3356_v35  ;;  %v3997_v2 = vmul.f32 %v10725_v3, %v3996_v38  ;;  %v7898_v38 = vld [vmem:[%s8417_s18] sm:$0xff] }
 0x82d   : > { %v3362_v20 = vmul.f32 %v10728_v36, %v3361_v41  ;;  %v10902_v36 = vpop.f32.mrf.mxu3 }
 0x82e   : > { %v4001_v58 = vmul.f32 %v7673_v56, %v4000_v24 }
 0x82f   : > { %v3385_v46 = vpack.c.bf16 %v3377_v8, %v3362_v20  ;;  %v4040_v47 = vpop.f32.mrf.mxu0 }
 0x830   : > { %v4002_v5 = vadd.f32 %v7673_v56, %v4001_v58 }
 0x831   : > { %3453 = vmatmul.bf16.gmra.mxu1 %v3385_v46 }
 0x832   : > { %v4006_v45 = vsel %vm4005_vm6, %v7673_v56, %v4002_v5 }
 0x833   : > { %v4011_v19 = vsel %vm4008_vm7, %v4010_v63, %v4006_v45 }
 0x834   : > { %v4012_v25 = vmul.f32 %v10738_v53, %v4011_v19  ;;  %v4071_v53 = vpack.c.bf16 %v4037_v14, %v4035_v31 }
 0x835   : > { %v10906_v7 = vpop.f32.mrf.mxu3 }
 0x836   : > { %v4020_v22 = vpack.c.bf16 %v4012_v25, %v3997_v2  ;;  %v12901_v2 = vld [vmem:[#allocation27_spill] sm:$0xff] }
 0x837   : > { %v4042_v29 = vpop.f32.mrf.mxu0  ;;  %v2860_v25 = vadd.f32 %v12901_v2, %v10886_v43 }
 0x838   : > { %4064 = vmatmul.bf16.gmra.mxu0 %v4020_v22  ;;  %v4072_v32 = vpack.c.bf16 %v4042_v29, %v4040_v47 }
 0x83d   : > { %v10909_v28 = vpop.f32.mrf.mxu3 }
 0x83f   : > { %v4045_v6 = vpop.f32.mrf.mxu0 }
 0x841   : > { %6787 = vmatmul.msk.bf16.vlgmr.msrb.gmra.mxu1 %vm1674_vm5, %v4070_v9  ;;  %v3439_v26 = vpop.f32.mrf.mxu1 }
 0x845   : > { %v10912_v3 = vpop.f32.mrf.mxu3 }
 0x847   : > { %v4047_v60 = vpop.f32.mrf.mxu0 }
 0x848   : > { %v4073_v30 = vpack.c.bf16 %v4047_v60, %v4045_v6  ;;  %v7900_v6 = vld [vmem:[%s8417_s18 + $0x10] sm:$0xff] }
 0x849   : > { %v3441_v33 = vpop.f32.mrf.mxu1 }
 0x84a   : > { %v3463_v42 = vpack.c.bf16 %v3441_v33, %v3439_v26  ;;  %v7899_v26 = vld [vmem:[%s8417_s18 + $0x8] sm:$0xff] }
 0x84b   : > { %v12903_v33 = vld [vmem:[#allocation25_spill] sm:$0xff] }
 0x84c   : > { %6767 = vmatmul.msk.bf16.gmra.mxu3 %vm1674_vm5, %v3463_v42  ;;  %v2863_v42 = vadd.f32 %v12903_v33, %v10902_v36  ;;  %v2865_v36 = vadd.f32 %v10090_v0, %v10906_v7 }
 0x84d   : > { %v10915_v4 = vpop.f32.mrf.mxu3 }
 0x84f   : > { %v4050_v51 = vpop.f32.mrf.mxu0 }
 0x851   : > { %6788 = vmatmul.msk.bf16.gmra.mxu1 %vm1674_vm5, %v4071_v53 }
 0x855   : > { %v10917_v52 = vpop.f32.mrf.mxu3 }
 0x857   : > { %v4052_v17 = vpop.f32.mrf.mxu0 }
 0x858   : > { %v4074_v50 = vpack.c.bf16 %v4052_v17, %v4050_v51  ;;  %v6967_v51 = vld [vmem:[#allocation11 + $0x168] sm:$0xf0]  ;;  %v6965_v17 = vld [vmem:[#allocation11 + $0x150] sm:$0xf] }
 0x85d   : > { %v10920_v23 = vpop.f32.mrf.mxu3 }
 0x861   : > { %6789 = vmatmul.msk.bf16.gmra.mxu1 %vm1674_vm5, %v4072_v32 }
 0x865   : > { %v10923_v10 = vpop.f32.mrf.mxu3 }
 0x86d   : > { %v10925_v15 = vpop.f32.mrf.mxu3 }
 0x871   : > { %6790 = vmatmul.msk.bf16.gmra.mxu1 %vm1674_vm5, %v4073_v30  ;;  %v7203_v30 = vld [vmem:[#allocation11 + $0x154] sm:$0xf] }
 0x875   : > { %v10928_v62 = vpop.f32.mrf.mxu3 }
 0x87d   : > { %v3444_v55 = vpop.f32.mrf.mxu1  ;;  %v10931_v61 = vpop.f32.mrf.mxu3 }
 0x881   : > { %6791 = vmatmul.msk.bf16.gmra.mxu1 %vm1674_vm5, %v4074_v50  ;;  %v6970_v50 = vor.u32 %v7203_v30, %v6967_v51 }
 0x883   : > { %4820 = vmatpush.bf16.msrb.mxu2 %v6970_v50 }
 0x885   : > { %v3446_v54 = vpop.f32.mrf.mxu1  ;;  %v10934_v49 = vpop.f32.mrf.mxu3 }
 0x886   : > { %v4055_v37 = vpop.f32.mrf.mxu0  ;;  %v3464_v1 = vpack.c.bf16 %v3446_v54, %v3444_v55  ;;  %v7206_v55 = vld [vmem:[#allocation11 + $0x164] sm:$0xf0] }
 0x887   : > { %v6966_v54 = vor.u32 %v7206_v55, %v6965_v17  ;;  %v7194_v17 = vld [vmem:[#allocation11 + $0x104] sm:$0xf0] }
 0x888   : > { %6768 = vmatmul.msk.bf16.gmra.mxu3 %vm1674_vm5, %v3464_v1 }
 0x889   : > { %4771 = vmatpush.bf16.msrb.mxu3 %v6966_v54 }
 0x88d   : > { %v3449_v56 = vpop.f32.mrf.mxu1  ;;  %v10937_v18 = vpop.f32.mrf.mxu3 }
 0x88e   : > { %v4057_v34 = vpop.f32.mrf.mxu0 }
 0x88f   : > { %v4075_v44 = vpack.c.bf16 %v4057_v34, %v4055_v37 }
 0x891   : > { %6792 = vmatmul.msk.bf16.gmra.mxu1 %vm1674_vm5, %v4075_v44 }
 0x895   : > { %v3451_v13 = vpop.f32.mrf.mxu1  ;;  %v10939_v35 = vpop.f32.mrf.mxu3 }
 0x896   : > { %v3465_v39 = vpack.c.bf16 %v3451_v13, %v3449_v56  ;;  %v7901_v13 = vld [vmem:[%s8417_s18 + $0x18] sm:$0xff] }
 0x898   : > { %6769 = vmatmul.msk.bf16.gmra.mxu3 %vm1674_vm5, %v3465_v39 }
 0x89d   : > { %v3516_v27 = vpop.f32.mrf.mxu3 }
 0x89e   : > { %v3556_v48 = vadd.f32 %v3516_v27, %v2858_v16 }
 0x8a5   : > { %v4060_v11 = vpop.f32.mrf.mxu0  ;;  %v3518_v58 = vpop.f32.mrf.mxu3 }
 0x8a6   : > { %v3557_v12 = vadd.f32 %v3518_v58, %v2860_v25  ;;  %v6943_v58 = vld [vmem:[#allocation11 + $0x138] sm:$0xf0]  ;;  %v7903_v25 = vld [vmem:[%s8417_s18 + $0x28] sm:$0xff] }
 0x8ad   : > { %v4062_v24 = vpop.f32.mrf.mxu0  ;;  %v3521_v19 = vpop.f32.mrf.mxu3 }
 0x8ae   : > { %v3454_v40 = vpop.f32.mrf.mxu1  ;;  %v4076_v41 = vpack.c.bf16 %v4062_v24, %v4060_v11  ;;  %v3558_v29 = vadd.f32 %v3521_v19, %v2863_v42  ;;  %v12906_v11 = vld [vmem:[#allocation22_spill] sm:$0xff] }
 0x8b0   : > { %6793 = vmatmul.msk.bf16.gmra.mxu1 %vm1674_vm5, %v4076_v41 }
 0x8b5   : > { %v4065_v20 = vpop.f32.mrf.mxu0  ;;  %v3523_v53 = vpop.f32.mrf.mxu3 }
 0x8b6   : > { %v3456_v21 = vpop.f32.mrf.mxu1  ;;  %v3559_v34 = vadd.f32 %v3523_v53, %v2865_v36 }
 0x8b7   : > { %v3466_v8 = vpack.c.bf16 %v3456_v21, %v3454_v40  ;;  %v2868_v40 = vadd.f32 %v12906_v11, %v10909_v28  ;;  %v7902_v21 = vld [vmem:[%s8417_s18 + $0x20] sm:$0xff] }
 0x8b9   : > { %6770 = vmatmul.msk.bf16.gmra.mxu3 %vm1674_vm5, %v3466_v8  ;;  %v7197_v8 = vld [vmem:[#allocation11 + $0x124] sm:$0xf] }
 0x8ba   : > { %v6946_v16 = vor.u32 %v7197_v8, %v6943_v58  ;;  %v7906_v8 = vld [vmem:[%s8417_s18 + $0x40] sm:$0xff] }
 0x8bc   : > { %4821 = vmatpush.bf16.msrb.mxu2 %v6946_v16 }
 0x8bd   : > { %v4067_v46 = vpop.f32.mrf.mxu0  ;;  %v3526_v1 = vpop.f32.mrf.mxu3 }
 0x8be   : > { %v4127_v57 = vpop.f32.mrf.mxu1  ;;  %v4077_v5 = vpack.c.bf16 %v4067_v46, %v4065_v20  ;;  %v3560_v7 = vadd.f32 %v3526_v1, %v2868_v40  ;;  %v12908_v46 = vld [vmem:[#allocation24_spill] sm:$0xff]  ;;  %v7905_v1 = vld [vmem:[%s8417_s18 + $0x38] sm:$0xff] }
 0x8bf   : > { %v4167_v63 = vadd.f32 %v4127_v57, %v3556_v48  ;;  %v7200_v48 = vld [vmem:[#allocation11 + $0x134] sm:$0xf0]  ;;  %v2870_v28 = vadd.f32 %v12908_v46, %v10912_v3  ;;  %v7185_v40 = vld [vmem:[#allocation11 + $0xc4] sm:$0xf] }
 0x8c0   : > { %6794 = vmatmul.msk.bf16.gmra.mxu1 %vm1674_vm5, %v4077_v5  ;;  %v6942_v5 = vor.u32 %v7200_v48, %v6941_v59 }
 0x8c1   : > { %v10946_v45 = vadd.f32 %v7898_v38, %v4167_v63 }
 0x8c2   : > { %4772 = vmatpush.bf16.msrb.mxu3 %v6942_v5  ;;  %v7907_v5 = vld [vmem:[%s8417_s18 + $0x48] sm:$0xff] }
 0x8c3   : > { %12900 = vst [vmem:[#allocation47_spill] sm:$0xff] %v10946_v45  ;;  %v4200_v22 = vmul.f32 %v10946_v45, %v10946_v45 }
 0x8c5   : > { %4216 = vadd.xlane.f32.xlu1 %v4200_v22  ;;  %v3528_v24 = vpop.f32.mrf.mxu3 }
 0x8c6   : > { %v4129_v31 = vpop.f32.mrf.mxu1  ;;  %v3561_v63 = vadd.f32 %v3528_v24, %v2870_v28 }
 0x8c7   : > { %v4168_v9 = vadd.f32 %v4129_v31, %v3557_v12  ;;  %v12910_v12 = vld [vmem:[#allocation21_spill] sm:$0xff] }
 0x8c8   : > { %v2873_v31 = vadd.f32 %v12910_v12, %v10915_v4 }
 0x8c9   : > { %v10954_v14 = vadd.f32 %v7899_v26, %v4168_v9 }
 0x8cb   : > { %12902 = vst [vmem:[#allocation52_spill] sm:$0xff] %v10954_v14  ;;  %v4201_v47 = vmul.f32 %v10954_v14, %v10954_v14 }
 0x8cd   : > { %4218 = vadd.xlane.f32.xlu2 %v4201_v47  ;;  %v3531_v38 = vpop.f32.mrf.mxu3  ;;  %v7904_v47 = vld [vmem:[%s8417_s18 + $0x30] sm:$0xff] }
 0x8ce   : > { %v4132_v43 = vpop.f32.mrf.mxu1  ;;  %v3562_v9 = vadd.f32 %v3531_v38, %v2873_v31 }
 0x8cf   : > { %v4169_v32 = vadd.f32 %v4132_v43, %v3558_v29  ;;  %v7191_v29 = vld [vmem:[#allocation11 + $0xf4] sm:$0xf]  ;;  %v6919_v43 = vld [vmem:[#allocation11 + $0x108] sm:$0xf0] }
 0x8d0   : > { %v6922_v51 = vor.u32 %v7191_v29, %v6919_v43  ;;  %v7182_v29 = vld [vmem:[#allocation11 + $0xa4] sm:$0xf0] }
 0x8d1   : > { %v10961_v60 = vadd.f32 %v7900_v6, %v4169_v32  ;;  %v6917_v32 = vld [vmem:[#allocation11 + $0xf0] sm:$0xf]  ;;  %v12912_v6 = vld [vmem:[#allocation23_spill] sm:$0xff] }
 0x8d2   : > { %v2875_v30 = vadd.f32 %v12912_v6, %v10917_v52  ;;  %v6918_v50 = vor.u32 %v7194_v17, %v6917_v32  ;;  %4822 = vmatpush.bf16.msrb.mxu2 %v6922_v51  ;;  %v12920_v32 = vld [vmem:[#allocation26_spill] sm:$0xff] }
 0x8d3   : > { %12904 = vst [vmem:[#allocation41_spill] sm:$0xff] %v10961_v60  ;;  %v4202_v37 = vmul.f32 %v10961_v60, %v10961_v60  ;;  %v2885_v6 = vadd.f32 %v12920_v32, %v10928_v62  ;;  %v12922_v62 = vld [vmem:[#allocation30_spill] sm:$0xff]  ;;  %v6901_v32 = vld [vmem:[#allocation11 + $0xc8] sm:$0xf] }
 0x8d4   : > { %4773 = vmatpush.bf16.msrb.mxu3 %v6918_v50  ;;  %v7909_v50 = vld [vmem:[%s8417_s18 + $0x58] sm:$0xff] }
 0x8d5   : > { %4220 = vadd.xlane.f32.xlu0 %v4202_v37  ;;  %v3533_v42 = vpop.f32.mrf.mxu3 }
 0x8d6   : > { %v4134_v56 = vpop.f32.mrf.mxu1  ;;  %v3563_v55 = vadd.f32 %v3533_v42, %v2875_v30 }
 0x8d7   : > { %v4170_v44 = vadd.f32 %v4134_v56, %v3559_v34  ;;  %v12914_v56 = vld [vmem:[#allocation39_spill] sm:$0xff] }
 0x8d8   : > { %v2878_v52 = vadd.f32 %v12914_v56, %v10920_v23  ;;  %v12916_v23 = vld [vmem:[#allocation37_spill] sm:$0xff] }
 0x8d9   : > { %v10968_v39 = vadd.f32 %v7901_v13, %v4170_v44  ;;  %v2880_v16 = vadd.f32 %v12916_v23, %v10923_v10  ;;  %v6949_v23 = vld [vmem:[#allocation11 + $0x128] sm:$0xf] }
 0x8db   : > { %12905 = vst [vmem:[#allocation56_spill] sm:$0xff] %v10968_v39  ;;  %v4203_v0 = vmul.f32 %v10968_v39, %v10968_v39 }
 0x8dd   : > { %4222 = vadd.xlane.f32.xlu1 %v4203_v0  ;;  %v3536_v54 = vpop.f32.mrf.mxu3  ;;  %v6895_v0 = vld [vmem:[#allocation11 + $0xd8] sm:$0xf0] }
 0x8de   : > { %v4137_v41 = vpop.f32.mrf.mxu1  ;;  %v3564_v13 = vadd.f32 %v3536_v54, %v2878_v52  ;;  %v2888_v54 = vadd.f32 %v12922_v62, %v10931_v61  ;;  %v6973_v52 = vld [vmem:[#allocation11 + $0x158] sm:$0xf]  ;;  %v7201_v61 = vld [vmem:[#allocation11 + $0x13c] sm:$0xf0] }
 0x8df   : > { %v4171_v27 = vadd.f32 %v4137_v41, %v3560_v7  ;;  %v6893_v7 = vld [vmem:[#allocation11 + $0xc0] sm:$0xf]  ;;  %v6898_v41 = vor.u32 %v7185_v40, %v6895_v0  ;;  %v6975_v0 = vld [vmem:[#allocation11 + $0x170] sm:$0xf0] }
 0x8e1   : > { %v10975_v20 = vadd.f32 %v7902_v21, %v4171_v27  ;;  %v7188_v27 = vld [vmem:[#allocation11 + $0xd4] sm:$0xf0]  ;;  %4823 = vmatpush.bf16.msrb.mxu2 %v6898_v41 }
 0x8e2   : > { %v6894_v21 = vor.u32 %v7188_v27, %v6893_v7  ;;  %v7173_v27 = vld [vmem:[#allocation11 + $0x64] sm:$0xf] }
 0x8e3   : > { %12907 = vst [vmem:[#allocation50_spill] sm:$0xff] %v10975_v20  ;;  %v4204_v57 = vmul.f32 %v10975_v20, %v10975_v20 }
 0x8e4   : > { %4774 = vmatpush.bf16.msrb.mxu3 %v6894_v21  ;;  %v6847_v21 = vld [vmem:[#allocation11 + $0x78] sm:$0xf0] }
 0x8e5   : > { %4224 = vadd.xlane.f32.xlu2 %v4204_v57  ;;  %v3538_v59 = vpop.f32.mrf.mxu3 }
 0x8e6   : > { %v4139_v19 = vpop.f32.mrf.mxu1  ;;  %v3565_v46 = vadd.f32 %v3538_v59, %v2880_v16  ;;  %v6850_v59 = vor.u32 %v7173_v27, %v6847_v21  ;;  %v7198_v16 = vld [vmem:[#allocation11 + $0x12c] sm:$0xf]  ;;  %v7912_v21 = vld [vmem:[%s8417_s18 + $0x70] sm:$0xff] }
 0x8e7   : > { %v4172_v2 = vadd.f32 %v4139_v19, %v3561_v63  ;;  %v12918_v19 = vld [vmem:[#allocation28_spill] sm:$0xff] }
 0x8e9   : > { %v10982_v22 = vadd.f32 %v7903_v25, %v4172_v2  ;;  %v2883_v2 = vadd.f32 %v12918_v19, %v10925_v15 }
 0x8eb   : > { %12909 = vst [vmem:[#allocation44_spill] sm:$0xff] %v10982_v22  ;;  %v4205_v3 = vmul.f32 %v10982_v22, %v10982_v22 }
 0x8ed   : > { %4226 = vadd.xlane.f32.xlu0 %v4205_v3  ;;  %v7179_v3 = vld [vmem:[#allocation11 + $0x94] sm:$0xf] }
 0x8ee   : > { %v4142_v26 = vpop.f32.mrf.mxu1 }
 0x8ef   : > { %v4173_v33 = vadd.f32 %v4142_v26, %v3562_v9  ;;  %v6871_v9 = vld [vmem:[#allocation11 + $0xa8] sm:$0xf0]  ;;  %v6869_v26 = vld [vmem:[#allocation11 + $0x90] sm:$0xf] }
 0x8f0   : > { %v6870_v43 = vor.u32 %v7182_v29, %v6869_v26  ;;  %v12926_v29 = vld [vmem:[#allocation20_spill] sm:$0xff] }
 0x8f1   : > { %v10989_v53 = vadd.f32 %v7904_v47, %v4173_v33  ;;  %v7908_v33 = vld [vmem:[%s8417_s18 + $0x50] sm:$0xff]  ;;  %v6874_v47 = vor.u32 %v7179_v3, %v6871_v9 }
 0x8f2   : > { %4775 = vmatpush.bf16.msrb.mxu3 %v6870_v43  ;;  %v6927_v9 = vld [vmem:[#allocation11 + $0x110] sm:$0xf0] }
 0x8f3   : > { %12911 = vst [vmem:[#allocation36_spill] sm:$0xff] %v10989_v53  ;;  %v4206_v4 = vmul.f32 %v10989_v53, %v10989_v53  ;;  %4824 = vmatpush.bf16.msrb.mxu2 %v6874_v47 }
 0x8f5   : > { %4228 = vadd.xlane.f32.xlu1 %v4206_v4 }
 0x8f6   : > { %v4144_v36 = vpop.f32.mrf.mxu1 }
 0x8f7   : > { %v4174_v37 = vadd.f32 %v4144_v36, %v3563_v55  ;;  %4825 = vmatpush.bf16.msrb.mxu2 %v6850_v59 }
 0x8f9   : > { %v10996_v34 = vadd.f32 %v7905_v1, %v4174_v37 }
 0x8fb   : > { %12913 = vst [vmem:[#allocation34_spill] sm:$0xff] %v10996_v34  ;;  %v4207_v44 = vmul.f32 %v10996_v34, %v10996_v34 }
 0x8fd   : > { %4230 = vadd.xlane.f32.xlu2 %v4207_v44  ;;  %v7207_v44 = vld [vmem:[#allocation11 + $0x16c] sm:$0xf0] }
 0x8fe   : > { %v4147_v11 = vpop.f32.mrf.mxu1  ;;  %v6974_v40 = vor.u32 %v7207_v44, %v6973_v52 }
 0x8ff   : > { %v4175_v24 = vadd.f32 %v4147_v11, %v3564_v13  ;;  %v7204_v13 = vld [vmem:[#allocation11 + $0x15c] sm:$0xf] }
 0x900   : > { %v6978_v7 = vor.u32 %v7204_v13, %v6975_v0  ;;  %4869 = vmatpush.bf16.msrb.mxu0 %v6974_v40  ;;  %v7183_v13 = vld [vmem:[#allocation11 + $0xac] sm:$0xf0] }
 0x901   : > { %v11003_v58 = vadd.f32 %v7906_v8, %v4175_v24  ;;  %v7910_v24 = vld [vmem:[%s8417_s18 + $0x60] sm:$0xff] }
 0x902   : > { %4918 = vmatpush.bf16.msra.mxu1 %v6978_v7  ;;  %v6879_v7 = vld [vmem:[#allocation11 + $0xb0] sm:$0xf0] }
 0x903   : > { %12915 = vst [vmem:[#allocation54_spill] sm:$0xff] %v11003_v58  ;;  %v4208_v48 = vmul.f32 %v11003_v58, %v11003_v58 }
 0x905   : > { %4232 = vadd.xlane.f32.xlu0 %v4208_v48  ;;  %v12924_v48 = vld [vmem:[#allocation32_spill] sm:$0xff] }
 0x906   : > { %v4149_v28 = vpop.f32.mrf.mxu1 }
 0x907   : > { %v4176_v57 = vadd.f32 %v4149_v28, %v3565_v46  ;;  %v2890_v46 = vadd.f32 %v12924_v48, %v10934_v49  ;;  %v6853_v48 = vld [vmem:[#allocation11 + $0x68] sm:$0xf] }
 0x909   : > { %v11010_v63 = vadd.f32 %v7907_v5, %v4176_v57  ;;  %v6950_v57 = vor.u32 %v7201_v61, %v6949_v23  ;;  %v6951_v5 = vld [vmem:[#allocation11 + $0x140] sm:$0xf0]  ;;  %v7167_v23 = vld [vmem:[#allocation11 + $0x34] sm:$0xf]  ;;  %v6823_v61 = vld [vmem:[#allocation11 + $0x48] sm:$0xf0] }
 0x90b   : > { %12917 = vst [vmem:[#allocation51_spill] sm:$0xff] %v11010_v63  ;;  %v4209_v38 = vmul.f32 %v11010_v63, %v11010_v63  ;;  %v3541_v25 = vpop.f32.mrf.mxu3  ;;  %4870 = vmatpush.bf16.msrb.mxu0 %v6950_v57 }
 0x90c   : > { %v3566_v10 = vadd.f32 %v3541_v25, %v2883_v2  ;;  %v6925_v25 = vld [vmem:[#allocation11 + $0xf8] sm:$0xf] }
 0x90d   : > { %4234 = vadd.xlane.f32.xlu1 %v4209_v38  ;;  %v6954_v38 = vor.u32 %v7198_v16, %v6951_v5  ;;  %v6826_v16 = vor.u32 %v7167_v23, %v6823_v61  ;;  %v12929_v5 = vld [vmem:[#allocation43_spill] sm:$0xff]  ;;  %v7162_v23 = vld [vmem:[#allocation11 + $0xc] sm:$0xf] }
 0x90e   : > { %v4152_v12 = vpop.f32.mrf.mxu1 }
 0x90f   : > { %v4177_v31 = vadd.f32 %v4152_v12, %v3566_v10  ;;  %4919 = vmatpush.bf16.msra.mxu1 %v6954_v38  ;;  %v7195_v10 = vld [vmem:[#allocation11 + $0x10c] sm:$0xf0]  ;;  %v7192_v12 = vld [vmem:[#allocation11 + $0xfc] sm:$0xf]  ;;  %v2895_v38 = vadd.f32 %v12929_v5, %v10939_v35  ;;  %4826 = vmatpush.bf16.msrb.mxu2 %v6826_v16  ;;  %v6807_v16 = vld [vmem:[#allocation11 + $0x20] sm:$0xf0] }
 0x910   : > { %v6926_v3 = vor.u32 %v7195_v10, %v6925_v25  ;;  %v6930_v26 = vor.u32 %v7192_v12, %v6927_v9  ;;  %v6855_v10 = vld [vmem:[#allocation11 + $0x80] sm:$0xf0] }
 0x911   : > { %v11017_v42 = vadd.f32 %v7908_v33, %v4177_v31  ;;  %v7911_v33 = vld [vmem:[%s8417_s18 + $0x68] sm:$0xff] }
 0x912   : > { %4871 = vmatpush.bf16.msrb.mxu0 %v6926_v3 }
 0x913   : > { %12919 = vst [vmem:[#allocation45_spill] sm:$0xff] %v11017_v42  ;;  %v4210_v15 = vmul.f32 %v11017_v42, %v11017_v42  ;;  %v3543_v30 = vpop.f32.mrf.mxu3  ;;  %4920 = vmatpush.bf16.msra.mxu1 %v6930_v26  ;;  %v6821_v26 = vld [vmem:[#allocation11 + $0x30] sm:$0xf] }
 0x914   : > { %v3567_v4 = vadd.f32 %v3543_v30, %v2885_v6  ;;  %v7189_v6 = vld [vmem:[#allocation11 + $0xdc] sm:$0xf0]  ;;  %v12927_v30 = vld [vmem:[#allocation58_spill] sm:$0xff] }
 0x915   : > { %4236 = vadd.xlane.f32.xlu2 %v4210_v15  ;;  %v7186_v15 = vld [vmem:[#allocation11 + $0xcc] sm:$0xf] }
 0x916   : > { %v4154_v51 = vpop.f32.mrf.mxu1 }
 0x917   : > { %v4178_v17 = vadd.f32 %v4154_v51, %v3567_v4  ;;  %v2893_v4 = vadd.f32 %v12927_v30, %v10937_v18  ;;  %v6877_v18 = vld [vmem:[#allocation11 + $0x98] sm:$0xf]  ;;  %v7168_v30 = vld [vmem:[#allocation11 + $0x3c] sm:$0xf] }
 0x918   : > { %v6878_v0 = vor.u32 %v7183_v13, %v6877_v18 }
 0x919   : > { %v11024_v55 = vadd.f32 %v7909_v50, %v4178_v17  ;;  %v6845_v50 = vld [vmem:[#allocation11 + $0x60] sm:$0xf] }
 0x91b   : > { %12921 = vst [vmem:[#allocation57_spill] sm:$0xff] %v11024_v55  ;;  %v4211_v36 = vmul.f32 %v11024_v55, %v11024_v55  ;;  %v3546_v37 = vpop.f32.mrf.mxu3 }
 0x91c   : > { %v3568_v1 = vadd.f32 %v3546_v37, %v2888_v54  ;;  %v6902_v37 = vor.u32 %v7189_v6, %v6901_v32 }
 0x91d   : > { %4238 = vadd.xlane.f32.xlu0 %v4211_v36  ;;  %v7176_v36 = vld [vmem:[#allocation11 + $0x74] sm:$0xf0] }
 0x91e   : > { %v6846_v54 = vor.u32 %v7176_v36, %v6845_v50  ;;  %4872 = vmatpush.bf16.msrb.mxu0 %v6902_v37 }
 0x920   : > { %4776 = vmatpush.bf16.msrb.mxu3 %v6846_v54 }
 0x922   : > { %4873 = vmatpush.bf16.msrb.mxu0 %v6878_v0  ;;  %v7161_v0 = vld [vmem:[#allocation11 + $0x4] sm:$0xf] }
 0x923   : > { %v3548_v8 = vpop.f32.mrf.mxu3 }
 0x924   : > { %v3569_v19 = vadd.f32 %v3548_v8, %v2890_v46  ;;  %v7177_v46 = vld [vmem:[#allocation11 + $0x7c] sm:$0xf0] }
 0x925   : > { %v6854_v25 = vor.u32 %v7177_v46, %v6853_v48 }
 0x927   : > { %4874 = vmatpush.bf16.msrb.mxu0 %v6854_v25 }
 0x92d   : > { %v4157_v56 = vpop.f32.mrf.mxu1 }
 0x92e   : > { %v4179_v11 = vadd.f32 %v4157_v56, %v3568_v1  ;;  %v6903_v1 = vld [vmem:[#allocation11 + $0xe0] sm:$0xf0] }
 0x92f   : > { %v6906_v52 = vor.u32 %v7186_v15, %v6903_v1  ;;  %v7171_v15 = vld [vmem:[#allocation11 + $0x4c] sm:$0xf0] }
 0x930   : > { %v11031_v41 = vadd.f32 %v7910_v24, %v4179_v11  ;;  %v7180_v11 = vld [vmem:[#allocation11 + $0x9c] sm:$0xf] }
 0x931   : > { %4921 = vmatpush.bf16.msra.mxu1 %v6906_v52  ;;  %v6882_v27 = vor.u32 %v7180_v11, %v6879_v7  ;;  %v6797_v52 = vld [vmem:[#allocation11] sm:$0xf]  ;;  %v6799_v7 = vld [vmem:[#allocation11 + $0x18] sm:$0xf0] }
 0x932   : > { %12923 = vst [vmem:[#allocation53_spill] sm:$0xff] %v11031_v41  ;;  %v4212_v28 = vmul.f32 %v11031_v41, %v11031_v41 }
 0x934   : > { %4240 = vadd.xlane.f32.xlu1 %v4212_v28  ;;  %v7174_v28 = vld [vmem:[#allocation11 + $0x6c] sm:$0xf] }
 0x935   : > { %v4159_v2 = vpop.f32.mrf.mxu1  ;;  %4922 = vmatpush.bf16.msra.mxu1 %v6882_v27  ;;  %v6858_v3 = vor.u32 %v7174_v28, %v6855_v10  ;;  %v6802_v27 = vor.u32 %v7161_v0, %v6799_v7  ;;  %v6810_v28 = vor.u32 %v7162_v23, %v6807_v16 }
 0x936   : > { %v4180_v31 = vadd.f32 %v4159_v2, %v3569_v19 }
 0x937   : > { %4827 = vmatpush.bf16.msrb.mxu2 %v6802_v27 }
 0x938   : > { %v4217_v49 = vpop.xlane.xlu1 %4216  ;;  %v11038_v47 = vadd.f32 %v7911_v33, %v4180_v31  ;;  %v7170_v33 = vld [vmem:[#allocation11 + $0x44] sm:$0xf0] }
 0x939   : > { %v4248_v43 = vmul.f32 %v4217_v49, %v12926_v29  ;;  %v6822_v6 = vor.u32 %v7170_v33, %v6821_v26  ;;  %4923 = vmatpush.bf16.msra.mxu1 %v6858_v3 }
 0x93a   : > { %12925 = vst [vmem:[#allocation46_spill] sm:$0xff] %v11038_v47  ;;  %v4213_v17 = vmul.f32 %v11038_v47, %v11038_v47 }
 0x93b   : > { %v11043_v51 = vadd.f32 1e-05, %v4248_v43  ;;  %v6829_v43 = vld [vmem:[#allocation11 + $0x38] sm:$0xf]  ;;  %4777 = vmatpush.bf16.msrb.mxu3 %v6822_v6 }
 0x93c   : > { %v3551_v62 = vpop.f32.mrf.mxu3  ;;  %4242 = vadd.xlane.f32.xlu2 %v4213_v17  ;;  %v6830_v36 = vor.u32 %v7171_v15, %v6829_v43 }
 0x93d   : > { %7674 = vrsqrt.f32 %v11043_v51  ;;  %v3570_v56 = vadd.f32 %v3551_v62, %v2893_v4  ;;  %v4162_v44 = vpop.f32.mrf.mxu1  ;;  %v6831_v4 = vld [vmem:[#allocation11 + $0x50] sm:$0xf0]  ;;  %v7913_v62 = vld [vmem:[%s8417_s18 + $0x78] sm:$0xff]  ;;  %vm4286_vm8 = vweird.f32 %v11043_v51  ;;  %s6481_s18 = sshll.u32 %s12540_s14, 4  ;;  %s6482_s18 = int_to_ptr.vmem [resolvable:$true] %s6481_s18 }
 0x93e   : > { %v6834_v37 = vor.u32 %v7168_v30, %v6831_v4  ;;  %4875 = vmatpush.bf16.msrb.mxu0 %v6830_v36 }
 0x93f   : > { %v4181_v40 = vadd.f32 %v4162_v44, %v3570_v56  ;;  %v7164_v44 = vld [vmem:[#allocation11 + $0x14] sm:$0xf0] }
 0x940   : > { %v4219_v24 = vpop.xlane.xlu2 %4218  ;;  %4924 = vmatpush.bf16.msra.mxu1 %v6834_v37 }
 0x941   : > { %v11049_v8 = vadd.f32 %v7912_v21, %v4181_v40  ;;  %v4249_v59 = vmul.f32 %v4219_v24, %v12926_v29  ;;  %v6798_v40 = vor.u32 %v7164_v44, %v6797_v52  ;;  %v6805_v21 = vld [vmem:[#allocation11 + $0x8] sm:$0xf]  ;;  %v7205_v52 = vld [vmem:[#allocation11 + $0x164] sm:$0xf]  ;;  %v6983_v44 = vld [vmem:[#allocation11 + $0x178] sm:$0xf0] }
 0x943   : > { %12928 = vst [vmem:[#allocation40_spill] sm:$0xff] %v11049_v8  ;;  %v11052_v57 = vpop.eup %7674  ;;  %v11056_v19 = vadd.f32 1e-05, %v4249_v59  ;;  %v4214_v2 = vmul.f32 %v11049_v8, %v11049_v8  ;;  %v7165_v59 = vld [vmem:[#allocation11 + $0x1c] sm:$0xf0]  ;;  %4778 = vmatpush.bf16.msrb.mxu3 %v6798_v40  ;;  %v6986_v40 = vor.u32 %v7205_v52, %v6983_v44 }
 0x944   : > { %v4281_v12 = vmul.f32 %v11052_v57, %v11043_v51  ;;  %v3553_v31 = vpop.f32.mrf.mxu3  ;;  %v6806_v61 = vor.u32 %v7165_v59, %v6805_v21  ;;  %vm4287_vm5 = vweird.f32 %v11052_v57  ;;  %4925 = vmatpush.bf16.msra.mxu1 %v6810_v28  ;;  %v11084_v51 = vld [vmem:[%s12611_s4] ss:$0 sm:$0xff] }
 0x945   : > { %7676 = vrsqrt.f32 %v11056_v19  ;;  %v3571_v9 = vadd.f32 %v3553_v31, %v2895_v38  ;;  %4244 = vadd.xlane.f32.xlu0 %v4214_v2  ;;  %v4164_v49 = vpop.f32.mrf.mxu1  ;;  %vm4288_vm9 = vmor %vm4286_vm8, %vm4287_vm5  ;;  %vm4296_vm11 = vweird.f32 %v11056_v19  ;;  %5016 = vmatpush.bf16.msra.mxu2 %v6986_v40 }
 0x946   : > { %v4282_v35 = vmul.f32 %v11052_v57, %v4281_v12  ;;  %4876 = vmatpush.bf16.msrb.mxu0 %v6806_v61 }
 0x947   : > { %v4182_v32 = vadd.f32 %v4164_v49, %v3571_v9 }
 0x948   : > { %v4283_v17 = vmul.f32 0.5, %v4282_v35  ;;  %v4221_v50 = vpop.xlane.xlu0 %4220 }
 0x949   : > { %v11065_v54 = vadd.f32 %v7913_v62, %v4182_v32  ;;  %v4250_v1 = vmul.f32 %v4221_v50, %v12926_v29 }
 0x94a   : > { %v4284_v56 = vsub.f32 1.5, %v4283_v17 }
 0x94b   : > { %12930 = vst [vmem:[#allocation38_spill] sm:$0xff] %v11065_v54  ;;  %v7677_v18 = vpop.eup %7676  ;;  %v11068_v13 = vadd.f32 1e-05, %v4250_v1  ;;  %v4215_v11 = vmul.f32 %v11065_v54, %v11065_v54 }
 0x94c   : > { %v4291_v24 = vmul.f32 %v7677_v18, %v11056_v19  ;;  %v4285_v48 = vmul.f32 %v11052_v57, %v4284_v56  ;;  %vm4297_vm10 = vweird.f32 %v7677_v18 }
 0x94d   : > { %7678 = vrsqrt.f32 %v11068_v13  ;;  %4246 = vadd.xlane.f32.xlu1 %v4215_v11  ;;  %vm4298_vm12 = vmor %vm4296_vm11, %vm4297_vm10  ;;  %vm4306_vm14 = vweird.f32 %v11068_v13 }
 0x94e   : > { %v4292_v46 = vmul.f32 %v7677_v18, %v4291_v24  ;;  %v4289_v25 = vsel %vm4288_vm9, %v11052_v57, %v4285_v48 }
 0x94f   : > { %v4440_v35 = vmul.f32 %v4289_v25, %v10946_v45 }
 0x950   : > { %v4293_v5 = vmul.f32 0.5, %v4292_v46  ;;  %v4223_v38 = vpop.xlane.xlu1 %4222 }
 0x951   : > { %v4251_v2 = vmul.f32 %v4223_v38, %v12926_v29  ;;  %v4459_v32 = vmul.f32 %v11084_v51, %v4440_v35 }
 0x952   : > { %v4294_v10 = vsub.f32 1.5, %v4293_v5 }
 0x953   : > { %v7679_v12 = vpop.eup %7678  ;;  %v4267_v31 = vadd.f32 1e-05, %v4251_v2 }
 0x954   : > { %v4295_v3 = vmul.f32 %v7677_v18, %v4294_v10  ;;  %v4301_v9 = vmul.f32 %v7679_v12, %v11068_v13  ;;  %vm4307_vm13 = vweird.f32 %v7679_v12  ;;  %v6981_v10 = vld [vmem:[#allocation11 + $0x160] sm:$0xf] }
 0x955   : > { %7680 = vrsqrt.f32 %v4267_v31  ;;  %vm4308_vm15 = vmor %vm4306_vm14, %vm4307_vm13  ;;  %vm4316_vm1 = vweird.f32 %v4267_v31 }
 0x956   : > { %v4299_v49 = vsel %vm4298_vm12, %v7677_v18, %v4295_v3  ;;  %v4302_v57 = vmul.f32 %v7679_v12, %v4301_v9 }
 0x957   : > { %v4441_v26 = vmul.f32 %v4299_v49, %v10954_v14 }
 0x958   : > { %v4303_v33 = vmul.f32 0.5, %v4302_v57  ;;  %v4225_v43 = vpop.xlane.xlu2 %4224 }
 0x959   : > { %v4460_v19 = vmul.f32 %v11084_v51, %v4441_v26  ;;  %v4252_v6 = vmul.f32 %v4225_v43, %v12926_v29  ;;  %v6959_v43 = vld [vmem:[#allocation11 + $0x148] sm:$0xf0] }
 0x95a   : > { %v4304_v15 = vsub.f32 1.5, %v4303_v33  ;;  %v7199_v33 = vld [vmem:[#allocation11 + $0x134] sm:$0xf] }
 0x95b   : > { %v7681_v30 = vpop.eup %7680  ;;  %v11091_v4 = vpack.c.bf16 %v4460_v19, %v4459_v32  ;;  %v4268_v17 = vadd.f32 1e-05, %v4252_v6  ;;  %v6962_v6 = vor.u32 %v7199_v33, %v6959_v43 }
 0x95c   : > { %v4311_v50 = vmul.f32 %v7681_v30, %v4267_v31  ;;  %v4305_v36 = vmul.f32 %v7679_v12, %v4304_v15  ;;  %vm4317_vm0 = vweird.f32 %v7681_v30 }
 0x95d   : > { %7682 = vrsqrt.f32 %v4268_v17  ;;  %4779 = vmatmul.bf16.vlgmr.msrb.gmra.mxu3 %v11091_v4  ;;  %4828 = vmatmul.bf16.vlgmr.msrb.gmra.mxu2 %v11091_v4  ;;  %vm4318_vm2 = vmor %vm4316_vm1, %vm4317_vm0  ;;  %vm4326_vm4 = vweird.f32 %v4268_v17 }
 0x95e   : > { %v4312_v37 = vmul.f32 %v7681_v30, %v4311_v50  ;;  %4877 = vmatmul.bf16.vlgmr.msrb.gmra.mxu0 %v11091_v4  ;;  %4926 = vmatmul.bf16.vlgmr.msra.gmra.mxu1 %v11091_v4  ;;  %v4309_v18 = vsel %vm4308_vm15, %v7679_v12, %v4305_v36  ;;  %v7208_v12 = vld [vmem:[#allocation11 + $0x174] sm:$0xf0] }
 0x95f   : > { %v4442_v21 = vmul.f32 %v4309_v18, %v10961_v60  ;;  %v6982_v3 = vor.u32 %v7208_v12, %v6981_v10  ;;  %5017 = vmatpush.bf16.msra.mxu2 %v6962_v6  ;;  %v6935_v10 = vld [vmem:[#allocation11 + $0x118] sm:$0xf0] }
 0x960   : > { %v4313_v62 = vmul.f32 0.5, %v4312_v37  ;;  %v4227_v1 = vpop.xlane.xlu0 %4226 }
 0x961   : > { %v4253_v56 = vmul.f32 %v4227_v1, %v12926_v29  ;;  %v4461_v48 = vmul.f32 %v11084_v51, %v4442_v21  ;;  %4967 = vmatpush.bf16.msra.mxu3 %v6982_v3  ;;  %v7202_v21 = vld [vmem:[#allocation11 + $0x144] sm:$0xf0] }
 0x962   : > { %v4314_v11 = vsub.f32 1.5, %v4313_v62 }
 0x963   : > { %v7683_v0 = vpop.eup %7682  ;;  %v4269_v7 = vadd.f32 1e-05, %v4253_v56 }
 0x964   : > { %v4315_v24 = vmul.f32 %v7681_v30, %v4314_v11  ;;  %v4321_v27 = vmul.f32 %v7683_v0, %v4268_v17  ;;  %vm4327_vm3 = vweird.f32 %v7683_v0 }
 0x965   : > { %7684 = vrsqrt.f32 %v4269_v7  ;;  %vm4328_vm6 = vmor %vm4326_vm4, %vm4327_vm3  ;;  %vm4336_vm5 = vweird.f32 %v4269_v7 }
 0x966   : > { %v4319_v13 = vsel %vm4318_vm2, %v7681_v30, %v4315_v24  ;;  %v4322_v59 = vmul.f32 %v7683_v0, %v4321_v27  ;;  %v6957_v27 = vld [vmem:[#allocation11 + $0x130] sm:$0xf] }
 0x967   : > { %v4443_v23 = vmul.f32 %v4319_v13, %v10968_v39 }
 0x968   : > { %v4323_v61 = vmul.f32 0.5, %v4322_v59  ;;  %v4229_v16 = vpop.xlane.xlu1 %4228  ;;  %v6958_v59 = vor.u32 %v7202_v21, %v6957_v27 }
 0x969   : > { %v4462_v46 = vmul.f32 %v11084_v51, %v4443_v23  ;;  %v4254_v28 = vmul.f32 %v4229_v16, %v12926_v29 }
 0x96a   : > { %v4324_v5 = vsub.f32 1.5, %v4323_v61  ;;  %4968 = vmatpush.bf16.msra.mxu3 %v6958_v59 }
 0x96b   : > { %v7685_v38 = vpop.eup %7684  ;;  %v11104_v2 = vpack.c.bf16 %v4462_v46, %v4461_v48  ;;  %v4270_v25 = vadd.f32 1e-05, %v4254_v28 }
 0x96c   : > { %v4331_v31 = vmul.f32 %v7685_v38, %v4269_v7  ;;  %v4325_v9 = vmul.f32 %v7683_v0, %v4324_v5  ;;  %vm4337_vm7 = vweird.f32 %v7685_v38 }
 0x96d   : > { %7686 = vrsqrt.f32 %v4270_v25  ;;  %4784 = vmatmul.bf16.gmra.mxu3 %v11104_v2  ;;  %4833 = vmatmul.bf16.gmra.mxu2 %v11104_v2  ;;  %vm4338_vm8 = vmor %vm4336_vm5, %vm4337_vm7  ;;  %vm4346_vm10 = vweird.f32 %v4270_v25 }
 0x96e   : > { %v4332_v35 = vmul.f32 %v7685_v38, %v4331_v31  ;;  %4882 = vmatmul.bf16.gmra.mxu0 %v11104_v2  ;;  %4931 = vmatmul.bf16.gmra.mxu1 %v11104_v2  ;;  %v4329_v32 = vsel %vm4328_vm6, %v7683_v0, %v4325_v9 }
 0x96f   : > { %v4444_v37 = vmul.f32 %v4329_v32, %v10975_v20 }
 0x970   : > { %v4333_v49 = vmul.f32 0.5, %v4332_v35  ;;  %v4231_v57 = vpop.xlane.xlu2 %4230 }
 0x971   : > { %v4255_v26 = vmul.f32 %v4231_v57, %v12926_v29  ;;  %v4463_v44 = vmul.f32 %v11084_v51, %v4444_v37 }
 0x972   : > { %v4334_v19 = vsub.f32 1.5, %v4333_v49 }
 0x973   : > { %v7687_v15 = vpop.eup %7686  ;;  %v4271_v30 = vadd.f32 1e-05, %v4255_v26 }
 0x974   : > { %v4335_v50 = vmul.f32 %v7685_v38, %v4334_v19  ;;  %v4341_v36 = vmul.f32 %v7687_v15, %v4270_v25  ;;  %vm4347_vm9 = vweird.f32 %v7687_v15 }
 0x975   : > { %7688 = vrsqrt.f32 %v4271_v30  ;;  %vm4348_vm11 = vmor %vm4346_vm10, %vm4347_vm9  ;;  %vm4356_vm13 = vweird.f32 %v4271_v30 }
 0x976   : > { %v4339_v17 = vsel %vm4338_vm8, %v7685_v38, %v4335_v50  ;;  %v4342_v62 = vmul.f32 %v7687_v15, %v4341_v36  ;;  %v7193_v38 = vld [vmem:[#allocation11 + $0x104] sm:$0xf] }
 0x977   : > { %v4445_v1 = vmul.f32 %v4339_v17, %v10982_v22  ;;  %v6938_v3 = vor.u32 %v7193_v38, %v6935_v10  ;;  %v6933_v17 = vld [vmem:[#allocation11 + $0x100] sm:$0xf] }
 0x978   : > { %v4343_v56 = vmul.f32 0.5, %v4342_v62  ;;  %v4233_v52 = vpop.xlane.xlu0 %4232  ;;  %v7196_v62 = vld [vmem:[#allocation11 + $0x114] sm:$0xf0] }
 0x979   : > { %v4464_v18 = vmul.f32 %v11084_v51, %v4445_v1  ;;  %v4256_v11 = vmul.f32 %v4233_v52, %v12926_v29  ;;  %5018 = vmatpush.bf16.msra.mxu2 %v6938_v3  ;;  %v6934_v1 = vor.u32 %v7196_v62, %v6933_v17  ;;  %v6911_v52 = vld [vmem:[#allocation11 + $0xe8] sm:$0xf0] }
 0x97a   : > { %v4344_v40 = vsub.f32 1.5, %v4343_v56  ;;  %v7187_v56 = vld [vmem:[#allocation11 + $0xd4] sm:$0xf] }
 0x97b   : > { %v7689_v0 = vpop.eup %7688  ;;  %v11116_v7 = vpack.c.bf16 %v4464_v18, %v4463_v44  ;;  %v11118_v24 = vadd.f32 1e-05, %v4256_v11  ;;  %v6909_v11 = vld [vmem:[#allocation11 + $0xd0] sm:$0xf]  ;;  %4969 = vmatpush.bf16.msra.mxu3 %v6934_v1 }
 0x97c   : > { %v4351_v13 = vmul.f32 %v7689_v0, %v4271_v30  ;;  %v4345_v23 = vmul.f32 %v7687_v15, %v4344_v40  ;;  %vm4357_vm12 = vweird.f32 %v7689_v0  ;;  %v7190_v40 = vld [vmem:[#allocation11 + $0xe4] sm:$0xf0] }
 0x97d   : > { %7690 = vrsqrt.f32 %v11118_v24  ;;  %4789 = vmatmul.bf16.gmra.mxu3 %v11116_v7  ;;  %4838 = vmatmul.bf16.gmra.mxu2 %v11116_v7  ;;  %vm4358_vm14 = vmor %vm4356_vm13, %vm4357_vm12  ;;  %v6910_v27 = vor.u32 %v7190_v40, %v6909_v11  ;;  %vm4366_vm0 = vweird.f32 %v11118_v24  ;;  %v7184_v11 = vld [vmem:[#allocation11 + $0xb4] sm:$0xf0] }
 0x97e   : > { %v4352_v61 = vmul.f32 %v7689_v0, %v4351_v13  ;;  %4887 = vmatmul.bf16.gmra.mxu0 %v11116_v7  ;;  %4936 = vmatmul.bf16.gmra.mxu1 %v11116_v7  ;;  %v4349_v28 = vsel %vm4348_vm11, %v7687_v15, %v4345_v23 }
 0x97f   : > { %v4446_v49 = vmul.f32 %v4349_v28, %v10989_v53  ;;  %4970 = vmatpush.bf16.msra.mxu3 %v6910_v27 }
 0x980   : > { %v4353_v16 = vmul.f32 0.5, %v4352_v61  ;;  %v4235_v48 = vpop.xlane.xlu1 %4234 }
 0x981   : > { %v4257_v46 = vmul.f32 %v4235_v48, %v12926_v29  ;;  %v4465_v43 = vmul.f32 %v11084_v51, %v4446_v49 }
 0x982   : > { %v4354_v5 = vsub.f32 1.5, %v4353_v16 }
 0x983   : > { %v7691_v12 = vpop.eup %7690  ;;  %v4273_v31 = vadd.f32 1e-05, %v4257_v46 }
 0x984   : > { %v4355_v9 = vmul.f32 %v7689_v0, %v4354_v5  ;;  %v4361_v35 = vmul.f32 %v7691_v12, %v11118_v24  ;;  %vm4367_vm15 = vweird.f32 %v7691_v12 }
 0x985   : > { %7692 = vrsqrt.f32 %v4273_v31  ;;  %vm4368_vm1 = vmor %vm4366_vm0, %vm4367_vm15  ;;  %vm4376_vm3 = vweird.f32 %v4273_v31 }
 0x986   : > { %v4359_v25 = vsel %vm4358_vm14, %v7689_v0, %v4355_v9  ;;  %v4362_v57 = vmul.f32 %v7691_v12, %v4361_v35  ;;  %v6914_v0 = vor.u32 %v7187_v56, %v6911_v52 }
 0x987   : > { %v4447_v26 = vmul.f32 %v4359_v25, %v10996_v34 }
 0x988   : > { %v4363_v33 = vmul.f32 0.5, %v4362_v57  ;;  %v4237_v19 = vpop.xlane.xlu2 %4236  ;;  %5019 = vmatpush.bf16.msra.mxu2 %v6914_v0 }
 0x989   : > { %v4466_v32 = vmul.f32 %v11084_v51, %v4447_v26  ;;  %v4258_v15 = vmul.f32 %v4237_v19, %v12926_v29 }
 0x98a   : > { %v4364_v6 = vsub.f32 1.5, %v4363_v33 }
 0x98b   : > { %v7693_v30 = vpop.eup %7692  ;;  %v11132_v50 = vpack.c.bf16 %v4466_v32, %v4465_v43  ;;  %v4274_v37 = vadd.f32 1e-05, %v4258_v15  ;;  %v7181_v43 = vld [vmem:[#allocation11 + $0xa4] sm:$0xf]  ;;  %v6887_v32 = vld [vmem:[#allocation11 + $0xb8] sm:$0xf0] }
 0x98c   : > { %v4371_v36 = vmul.f32 %v7693_v30, %v4273_v31  ;;  %v4365_v44 = vmul.f32 %v7691_v12, %v4364_v6  ;;  %vm4377_vm2 = vweird.f32 %v7693_v30  ;;  %v6890_v19 = vor.u32 %v7181_v43, %v6887_v32  ;;  %v7172_v43 = vld [vmem:[#allocation11 + $0x54] sm:$0xf0] }
 0x98d   : > { %4794 = vmatmul.bf16.gmra.mxu3 %v11132_v50  ;;  %4843 = vmatmul.bf16.gmra.mxu2 %v11132_v50  ;;  %7694 = vrsqrt.f32 %v4274_v37  ;;  %vm4378_vm4 = vmor %vm4376_vm3, %vm4377_vm2  ;;  %vm4386_vm7 = vweird.f32 %v4274_v37 }
 0x98e   : > { %v4372_v18 = vmul.f32 %v7693_v30, %v4371_v36  ;;  %4892 = vmatmul.bf16.gmra.mxu0 %v11132_v50  ;;  %4941 = vmatmul.bf16.gmra.mxu1 %v11132_v50  ;;  %v4369_v59 = vsel %vm4368_vm1, %v7691_v12, %v4365_v44 }
 0x98f   : > { %v4448_v28 = vmul.f32 %v4369_v59, %v11003_v58  ;;  %5020 = vmatpush.bf16.msra.mxu2 %v6890_v19  ;;  %v6863_v59 = vld [vmem:[#allocation11 + $0x88] sm:$0xf0] }
 0x990   : > { %v4373_v21 = vmul.f32 0.5, %v4372_v18  ;;  %v4239_v13 = vpop.xlane.xlu0 %4238  ;;  %v6885_v18 = vld [vmem:[#allocation11 + $0xa0] sm:$0xf] }
 0x991   : > { %v4259_v61 = vmul.f32 %v4239_v13, %v12926_v29  ;;  %v4467_v12 = vmul.f32 %v11084_v51, %v4448_v28  ;;  %v6886_v0 = vor.u32 %v7184_v11, %v6885_v18  ;;  %v7175_v13 = vld [vmem:[#allocation11 + $0x74] sm:$0xf] }
 0x992   : > { %v4374_v23 = vsub.f32 1.5, %v4373_v21 }
 0x993   : > { %v7695_v16 = vpop.eup %7694  ;;  %v4275_v46 = vadd.f32 1e-05, %v4259_v61  ;;  %4971 = vmatpush.bf16.msra.mxu3 %v6886_v0 }
 0x994   : > { %v4375_v48 = vmul.f32 %v7693_v30, %v4374_v23  ;;  %v4381_v5 = vmul.f32 %v7695_v16, %v4274_v37  ;;  %vm4387_vm6 = vweird.f32 %v7695_v16  ;;  %v6866_v23 = vor.u32 %v7175_v13, %v6863_v59 }
 0x995   : > { %7696 = vrsqrt.f32 %v4275_v46  ;;  %vm4388_vm5 = vmor %vm4386_vm7, %vm4387_vm6  ;;  %vm4396_vm9 = vweird.f32 %v4275_v46 }
 0x996   : > { %v4379_v38 = vsel %vm4378_vm4, %v7693_v30, %v4375_v48  ;;  %v4382_v10 = vmul.f32 %v7695_v16, %v4381_v5  ;;  %5021 = vmatpush.bf16.msra.mxu2 %v6866_v23 }
 0x997   : > { %v4449_v24 = vmul.f32 %v4379_v38, %v11010_v63 }
 0x998   : > { %v4383_v9 = vmul.f32 0.5, %v4382_v10 }
 0x999   : > { %v4468_v3 = vmul.f32 %v11084_v51, %v4449_v24 }
 0x99a   : > { %v4384_v49 = vsub.f32 1.5, %v4383_v9  ;;  %v7178_v9 = vld [vmem:[#allocation11 + $0x84] sm:$0xf0] }
 0x99b   : > { %v11144_v35 = vpack.c.bf16 %v4468_v3, %v4467_v12  ;;  %v7697_v25 = vpop.eup %7696  ;;  %v6861_v3 = vld [vmem:[#allocation11 + $0x70] sm:$0xf] }
 0x99c   : > { %v4391_v31 = vmul.f32 %v7697_v25, %v4275_v46  ;;  %v4385_v57 = vmul.f32 %v7695_v16, %v4384_v49  ;;  %vm4397_vm8 = vweird.f32 %v7697_v25 }
 0x99d   : > { %4799 = vmatmul.bf16.gmra.mxu3 %v11144_v35  ;;  %4848 = vmatmul.bf16.gmra.mxu2 %v11144_v35  ;;  %vm4398_vm10 = vmor %vm4396_vm9, %vm4397_vm8 }
 0x99e   : > { %4897 = vmatmul.bf16.gmra.mxu0 %v11144_v35  ;;  %4946 = vmatmul.bf16.gmra.mxu1 %v11144_v35  ;;  %v4392_v26 = vmul.f32 %v7697_v25, %v4391_v31  ;;  %v4389_v6 = vsel %vm4388_vm5, %v7695_v16, %v4385_v57  ;;  %v7169_v31 = vld [vmem:[#allocation11 + $0x44] sm:$0xf]  ;;  %v6839_v57 = vld [vmem:[#allocation11 + $0x58] sm:$0xf0] }
 0x99f   : > { %v4450_v36 = vmul.f32 %v4389_v6, %v11017_v42 }
 0x9a0   : > { %v4393_v33 = vmul.f32 0.5, %v4392_v26  ;;  %v6837_v26 = vld [vmem:[#allocation11 + $0x40] sm:$0xf] }
 0x9a1   : > { %v4469_v56 = vmul.f32 %v11084_v51, %v4450_v36  ;;  %v6838_v6 = vor.u32 %v7172_v43, %v6837_v26  ;;  %v7166_v26 = vld [vmem:[#allocation11 + $0x24] sm:$0xf0] }
 0x9a2   : > { %v4394_v15 = vsub.f32 1.5, %v4393_v33  ;;  %v6842_v33 = vor.u32 %v7169_v31, %v6839_v57  ;;  %v6813_v57 = vld [vmem:[#allocation11 + $0x10] sm:$0xf] }
 0x9a3   : > { %v6814_v43 = vor.u32 %v7166_v26, %v6813_v57 }
 0x9a4   : > { %v4395_v30 = vmul.f32 %v7697_v25, %v4394_v15  ;;  %5022 = vmatpush.bf16.msra.mxu2 %v6842_v33 }
 0x9a6   : > { %v4399_v17 = vsel %vm4398_vm10, %v7697_v25, %v4395_v30  ;;  %v6862_v25 = vor.u32 %v7178_v9, %v6861_v3  ;;  %v7163_v9 = vld [vmem:[#allocation11 + $0x14] sm:$0xf] }
 0x9a7   : > { %v4451_v62 = vmul.f32 %v4399_v17, %v11024_v55  ;;  %v4241_v1 = vpop.xlane.xlu1 %4240 }
 0x9a8   : > { %v4260_v37 = vmul.f32 %v4241_v1, %v12926_v29  ;;  %4972 = vmatpush.bf16.msra.mxu3 %v6862_v25 }
 0x9a9   : > { %v4470_v52 = vmul.f32 %v11084_v51, %v4451_v62 }
 0x9aa   : > { %v4276_v44 = vadd.f32 1e-05, %v4260_v37 }
 0x9ab   : > { %v11155_v40 = vpack.c.bf16 %v4470_v52, %v4469_v56 }
 0x9ac   : > { %7698 = vrsqrt.f32 %v4276_v44  ;;  %vm4406_vm12 = vweird.f32 %v4276_v44  ;;  %4973 = vmatpush.bf16.msra.mxu3 %v6838_v6  ;;  %v7215_v6 = vld [vmem:[#allocation13 + $0x30] sm:$0xff] }
 0x9ad   : > { %4804 = vmatmul.bf16.gmra.mxu3 %v11155_v40  ;;  %4853 = vmatmul.bf16.gmra.mxu2 %v11155_v40 }
 0x9ae   : > { %4902 = vmatmul.bf16.gmra.mxu0 %v11155_v40  ;;  %4951 = vmatmul.bf16.gmra.mxu1 %v11155_v40 }
 0x9af   : > { %v4243_v27 = vpop.xlane.xlu2 %4242 }
 0x9b0   : > { %v4261_v21 = vmul.f32 %v4243_v27, %v12926_v29  ;;  %4974 = vmatpush.bf16.msra.mxu3 %v6814_v43 }
 0x9b2   : > { %v7699_v61 = vpop.eup %7698  ;;  %v4277_v16 = vadd.f32 1e-05, %v4261_v21 }
 0x9b3   : > { %v4401_v48 = vmul.f32 %v7699_v61, %v4276_v44  ;;  %vm4407_vm11 = vweird.f32 %v7699_v61 }
 0x9b4   : > { %7700 = vrsqrt.f32 %v4277_v16  ;;  %vm4408_vm13 = vmor %vm4406_vm12, %vm4407_vm11  ;;  %vm4416_vm15 = vweird.f32 %v4277_v16 }
 0x9b5   : > { %v4402_v46 = vmul.f32 %v7699_v61, %v4401_v48 }
 0x9b7   : > { %v4403_v28 = vmul.f32 0.5, %v4402_v46 }
 0x9b8   : > { %v4245_v5 = vpop.xlane.xlu0 %4244 }
 0x9b9   : > { %v4262_v38 = vmul.f32 %v4245_v5, %v12926_v29  ;;  %v4404_v24 = vsub.f32 1.5, %v4403_v28 }
 0x9ba   : > { %v7701_v10 = vpop.eup %7700 }
 0x9bb   : > { %v4278_v12 = vadd.f32 1e-05, %v4262_v38  ;;  %v4411_v49 = vmul.f32 %v7701_v10, %v4277_v16  ;;  %v4405_v32 = vmul.f32 %v7699_v61, %v4404_v24  ;;  %vm4417_vm14 = vweird.f32 %v7701_v10 }
 0x9bc   : > { %vm4418_vm0 = vmor %vm4416_vm15, %vm4417_vm14 }
 0x9bd   : > { %7702 = vrsqrt.f32 %v4278_v12  ;;  %v4412_v19 = vmul.f32 %v7701_v10, %v4411_v49  ;;  %v4409_v17 = vsel %vm4408_vm13, %v7699_v61, %v4405_v32  ;;  %vm4426_vm2 = vweird.f32 %v4278_v12  ;;  %v6815_v49 = vld [vmem:[#allocation11 + $0x28] sm:$0xf0]  ;;  %v7216_v32 = vld [vmem:[#allocation13 + $0x38] sm:$0xff] }
 0x9be   : > { %v4452_v18 = vmul.f32 %v4409_v17, %v11031_v41  ;;  %6289 = vmatpush.bf16.msra.mxu0 %v7216_v32 }
 0x9bf   : > { %v4413_v15 = vmul.f32 0.5, %v4412_v19 }
 0x9c0   : > { %v4247_v30 = vpop.xlane.xlu1 %4246 }
 0x9c1   : > { %v4263_v36 = vmul.f32 %v4247_v30, %v12926_v29  ;;  %v4414_v62 = vsub.f32 1.5, %v4413_v15  ;;  %v4471_v29 = vmul.f32 %v11084_v51, %v4452_v18  ;;  %v7214_v15 = vld [vmem:[#allocation13 + $0x28] sm:$0xff]  ;;  %v7211_v18 = vld [vmem:[#allocation13 + $0x10] sm:$0xff] }
 0x9c2   : > { %6290 = vmatpush.bf16.msra.mxu0 %v7215_v6 }
 0x9c3   : > { %v7703_v1 = vpop.eup %7702  ;;  %v4279_v37 = vadd.f32 1e-05, %v4263_v36  ;;  %v4415_v56 = vmul.f32 %v7701_v10, %v4414_v62 }
 0x9c4   : > { %v4421_v52 = vmul.f32 %v7703_v1, %v4278_v12  ;;  %vm4427_vm1 = vweird.f32 %v7703_v1  ;;  %v6818_v12 = vor.u32 %v7163_v9, %v6815_v49 }
 0x9c5   : > { %7704 = vrsqrt.f32 %v4279_v37  ;;  %v4419_v11 = vsel %vm4418_vm0, %v7701_v10, %v4415_v56  ;;  %vm4428_vm3 = vmor %vm4426_vm2, %vm4427_vm1  ;;  %vm4436_vm6 = vweird.f32 %v4279_v37  ;;  %v7212_v56 = vld [vmem:[#allocation13 + $0x18] sm:$0xff] }
 0x9c6   : > { %v4422_v44 = vmul.f32 %v7703_v1, %v4421_v52  ;;  %v4453_v0 = vmul.f32 %v4419_v11, %v11038_v47  ;;  %5023 = vmatpush.bf16.msra.mxu2 %v6818_v12  ;;  %6291 = vmatpush.bf16.msra.mxu0 %v7214_v15  ;;  %v7221_v47 = vld [vmem:[#allocation13 + $0x60] sm:$0xff] }
 0x9c8   : > { %v4423_v27 = vmul.f32 0.5, %v4422_v44  ;;  %v4472_v21 = vmul.f32 %v11084_v51, %v4453_v0 }
 0x9ca   : > { %v4424_v13 = vsub.f32 1.5, %v4423_v27  ;;  %v11168_v23 = vpack.c.bf16 %v4472_v21, %v4471_v29 }
 0x9cb   : > { %v7705_v59 = vpop.eup %7704 }
 0x9cc   : > { %v4431_v61 = vmul.f32 %v7705_v59, %v4279_v37  ;;  %4809 = vmatmul.bf16.gmra.mxu3 %v11168_v23  ;;  %4858 = vmatmul.bf16.gmra.mxu2 %v11168_v23  ;;  %v4425_v16 = vmul.f32 %v7703_v1, %v4424_v13  ;;  %vm4437_vm4 = vweird.f32 %v7705_v59  ;;  %v7213_v37 = vld [vmem:[#allocation13 + $0x20] sm:$0xff]  ;;  %v7210_v13 = vld [vmem:[#allocation13 + $0x8] sm:$0xff] }
 0x9cd   : > { %4907 = vmatmul.bf16.gmra.mxu0 %v11168_v23  ;;  %4956 = vmatmul.bf16.gmra.mxu1 %v11168_v23  ;;  %vm4438_vm7 = vmor %vm4436_vm6, %vm4437_vm4 }
 0x9ce   : > { %v4432_v48 = vmul.f32 %v7705_v59, %v4431_v61  ;;  %v4429_v28 = vsel %vm4428_vm3, %v7703_v1, %v4425_v16  ;;  %6292 = vmatpush.bf16.msra.mxu0 %v7213_v37 }
 0x9cf   : > { %v4454_v24 = vmul.f32 %v4429_v28, %v11049_v8  ;;  %v7209_v28 = vld [vmem:[#allocation13] sm:$0xff] }
 0x9d0   : > { %v4433_v46 = vmul.f32 0.5, %v4432_v48 }
 0x9d1   : > { %v4473_v25 = vmul.f32 %v11084_v51, %v4454_v24 }
 0x9d2   : > { %v4434_v5 = vsub.f32 1.5, %v4433_v46  ;;  %6293 = vmatpush.bf16.msra.mxu0 %v7212_v56 }
 0x9d4   : > { %v4435_v38 = vmul.f32 %v7705_v59, %v4434_v5 }
 0x9d6   : > { %v4439_v10 = vsel %vm4438_vm7, %v7705_v59, %v4435_v38  ;;  %6294 = vmatpush.bf16.msra.mxu0 %v7211_v18 }
 0x9d7   : > { %v4455_v3 = vmul.f32 %v4439_v10, %v11065_v54 }
 0x9d9   : > { %v4474_v31 = vmul.f32 %v11084_v51, %v4455_v3 }
 0x9da   : > { %6295 = vmatpush.bf16.msra.mxu0 %v7210_v13 }
 0x9db   : > { %v11178_v33 = vpack.c.bf16 %v4474_v31, %v4473_v25  ;;  %v4927_v5 = vpop.f32.mrf.mxu1 }
 0x9dd   : > { %4814 = vmatmul.bf16.gmra.mxu3 %v11178_v33  ;;  %4863 = vmatmul.bf16.gmra.mxu2 %v11178_v33 }
 0x9de   : > { %4912 = vmatmul.bf16.gmra.mxu0 %v11178_v33  ;;  %4961 = vmatmul.bf16.gmra.mxu1 %v11178_v33 }
 0x9df   : > { %6296 = vmatpush.bf16.msra.mxu0 %v7209_v28 }
 0x9e0   : > { %v11184_v19 = vpop.f32.mrf.mxu3  ;;  %v11187_v30 = vpop.f32.mrf.mxu2 }
 0x9e1   : > { %v6987_v51 = vmul.f32 -1.442695, %v11184_v19 }
 0x9e3   : > { %7706 = vpow2.f32 %v6987_v51  ;;  %v4929_v37 = vpop.f32.mrf.mxu1 }
 0x9e8   : > { %v4782_v36 = vpop.f32.mrf.mxu3  ;;  %v11191_v0 = vpop.f32.mrf.mxu2 }
 0x9e9   : > { %v7707_v17 = vpop.eup %7706  ;;  %v6990_v62 = vmul.f32 -1.442695, %v4782_v36 }
 0x9ea   : > { %v5209_v1 = vadd.f32 1.0, %v7707_v17  ;;  %v7232_v17 = vld [vmem:[#allocation13 + $0xb8] sm:$0xff] }
 0x9eb   : > { %7708 = vpow2.f32 %v6990_v62  ;;  %6387 = vmatpush.bf16.msrb.mxu3 %v7232_v17 }
 0x9ec   : > { %7710 = vrcp.f32 %v5209_v1  ;;  %v5268_v16 = vand.u32 2147483648, %v5209_v1  ;;  %vm5262_vm8 = vweird.f32 %v5209_v1  ;;  %v5266_v48 = vand.u32 2147483647, %v5209_v1 }
 0x9ed   : > { %4975 = vmatmul.bf16.vlgmr.msra.gmra.mxu3 %v11091_v4  ;;  %5024 = vmatmul.bf16.vlgmr.msra.gmra.mxu2 %v11091_v4 }
 0x9ee   : > { %v5269_v25 = vor.u32 1.1754944e-38, %v5268_v16  ;;  %vm5267_vm10 = vcmp.eq.f32.partialorder %v5266_v48, 8.507059e+37 }
 0x9f0   : > { %v11193_v29 = vpop.f32.mrf.mxu3  ;;  %v11200_v10 = vpop.f32.mrf.mxu2 }
 0x9f1   : > { %v7709_v52 = vpop.eup %7708  ;;  %v6993_v24 = vmul.f32 -1.442695, %v11193_v29 }
 0x9f2   : > { %v7711_v11 = vpop.eup %7710  ;;  %v5212_v44 = vadd.f32 1.0, %v7709_v52 }
 0x9f3   : > { %v5258_v27 = vmul.f32 %v7711_v11, %v5209_v1  ;;  %vm5263_vm5 = vweird.f32 %v7711_v11 }
 0x9f4   : > { %7712 = vrcp.f32 %v5212_v44  ;;  %vm11195_vm9 = vmor %vm5262_vm8, %vm5263_vm5  ;;  %v5313_v31 = vand.u32 2147483648, %v5212_v44  ;;  %v5311_v57 = vand.u32 2147483647, %v5212_v44  ;;  %vm5307_vm12 = vweird.f32 %v5212_v44 }
 0x9f5   : > { %v5259_v21 = vsub.f32 1.0, %v5258_v27  ;;  %7714 = vpow2.f32 %v6993_v24 }
 0x9f6   : > { %v5314_v32 = vor.u32 1.1754944e-38, %v5313_v31  ;;  %vm5312_vm14 = vcmp.eq.f32.partialorder %v5311_v57, 8.507059e+37 }
 0x9f7   : > { %v5260_v59 = vmul.f32 %v7711_v11, %v5259_v21 }
 0x9f8   : > { %v11204_v49 = vpop.f32.mrf.mxu3  ;;  %v11210_v56 = vpop.f32.mrf.mxu2 }
 0x9f9   : > { %v5261_v61 = vadd.f32 %v7711_v11, %v5260_v59  ;;  %v6996_v51 = vmul.f32 -1.442695, %v11204_v49 }
 0x9fa   : > { %v7713_v4 = vpop.eup %7712 }
 0x9fb   : > { %v5303_v46 = vmul.f32 %v7713_v4, %v5212_v44  ;;  %v5265_v3 = vsel %vm11195_vm9, %v7711_v11, %v5261_v61  ;;  %vm5308_vm11 = vweird.f32 %v7713_v4  ;;  %v7715_v1 = vpop.eup %7714  ;;  %7716 = vpow2.f32 %v6996_v51 }
 0x9fc   : > { %v5270_v26 = vsel %vm5267_vm10, %v5269_v25, %v5265_v3  ;;  %vm5309_vm13 = vmor %vm5307_vm12, %vm5308_vm11  ;;  %v5215_v27 = vadd.f32 1.0, %v7715_v1 }
 0x9fd   : > { %v5304_v9 = vsub.f32 1.0, %v5303_v46  ;;  %4980 = vmatmul.bf16.gmra.mxu3 %v11104_v2  ;;  %5029 = vmatmul.bf16.gmra.mxu2 %v11104_v2  ;;  %v5977_v6 = vmul.f32 %v5270_v26, %v11184_v19  ;;  %v7224_v19 = vld [vmem:[#allocation13 + $0x78] sm:$0xff] }
 0x9fe   : > { %7718 = vrcp.f32 %v5215_v27  ;;  %6338 = vmatpush.bf16.msrb.mxu1 %v7224_v19  ;;  %vm5352_vm2 = vweird.f32 %v5215_v27 }
 0x9ff   : > { %v5305_v12 = vmul.f32 %v7713_v4, %v5304_v9  ;;  %v6025_v52 = vmul.f32 %v5977_v6, %v4927_v5 }
 0xa00   : > { %v11212_v11 = vpop.f32.mrf.mxu3 }
 0xa01   : > { %v5306_v43 = vadd.f32 %v7713_v4, %v5305_v12  ;;  %v6999_v21 = vmul.f32 -1.442695, %v11212_v11  ;;  %v7717_v13 = vpop.eup %7716  ;;  %v4932_v12 = vpop.f32.mrf.mxu1 }
 0xa02   : > { %v5218_v59 = vadd.f32 1.0, %v7717_v13 }
 0xa03   : > { %v5310_v15 = vsel %vm5309_vm13, %v7713_v4, %v5306_v43  ;;  %7720 = vpow2.f32 %v6999_v21 }
 0xa04   : > { %v5315_v2 = vsel %vm5312_vm14, %v5314_v32, %v5310_v15  ;;  %7722 = vrcp.f32 %v5218_v59  ;;  %v7719_v4 = vpop.eup %7718  ;;  %v5403_v15 = vand.u32 2147483648, %v5218_v59  ;;  %vm5397_vm1 = vweird.f32 %v5218_v59 }
 0xa05   : > { %v5980_v62 = vmul.f32 %v5315_v2, %v4782_v36  ;;  %v11217_v36 = vpop.f32.mrf.mxu2  ;;  %v5348_v28 = vmul.f32 %v7719_v4, %v5215_v27  ;;  %vm5353_vm0 = vweird.f32 %v7719_v4  ;;  %v5358_v2 = vand.u32 2147483648, %v5215_v27 }
 0xa06   : > { %v5401_v17 = vand.u32 2147483647, %v5218_v59  ;;  %vm5354_vm4 = vmor %vm5352_vm2, %vm5353_vm0 }
 0xa07   : > { %v6028_v18 = vmul.f32 %v5980_v62, %v4929_v37  ;;  %v5349_v3 = vsub.f32 1.0, %v5348_v28  ;;  %v5356_v62 = vand.u32 2147483647, %v5215_v27  ;;  %v5359_v19 = vor.u32 1.1754944e-38, %v5358_v2 }
 0xa08   : > { %v11219_v61 = vpop.f32.mrf.mxu3  ;;  %vm5402_vm6 = vcmp.eq.f32.partialorder %v5401_v17, 8.507059e+37 }
 0xa09   : > { %v6073_v44 = vpack.c.bf16 %v6028_v18, %v6025_v52  ;;  %v7721_v16 = vpop.eup %7720  ;;  %v7002_v48 = vmul.f32 -1.442695, %v11219_v61  ;;  %v5350_v57 = vmul.f32 %v7719_v4, %v5349_v3  ;;  %v5404_v18 = vor.u32 1.1754944e-38, %v5403_v15  ;;  %v4934_v13 = vpop.f32.mrf.mxu1 }
 0xa0a   : > { %v7723_v46 = vpop.eup %7722  ;;  %v11222_v38 = vadd.f32 1.0, %v7721_v16  ;;  %vm5357_vm7 = vcmp.eq.f32.partialorder %v5356_v62, 8.507059e+37 }
 0xa0b   : > { %6297 = vmatmul.bf16.vlgmr.msra.gmra.mxu0 %v6073_v44  ;;  %v5393_v5 = vmul.f32 %v7723_v46, %v5218_v59  ;;  %7724 = vpow2.f32 %v7002_v48  ;;  %vm5398_vm15 = vweird.f32 %v7723_v46  ;;  %v5351_v6 = vadd.f32 %v7719_v4, %v5350_v57  ;;  %v7223_v44 = vld [vmem:[#allocation13 + $0x70] sm:$0xff] }
 0xa0c   : > { %7726 = vrcp.f32 %v11222_v38  ;;  %vm5399_vm3 = vmor %vm5397_vm1, %vm5398_vm15  ;;  %6339 = vmatpush.bf16.msrb.mxu1 %v7223_v44  ;;  %v5448_v17 = vand.u32 2147483648, %v11222_v38  ;;  %vm5442_vm11 = vweird.f32 %v11222_v38 }
 0xa0d   : > { %4985 = vmatmul.bf16.gmra.mxu3 %v11116_v7  ;;  %5034 = vmatmul.bf16.gmra.mxu2 %v11116_v7  ;;  %v5394_v24 = vsub.f32 1.0, %v5393_v5  ;;  %v11224_v9 = vpop.f32.mrf.mxu2  ;;  %v7231_v7 = vld [vmem:[#allocation13 + $0xb0] sm:$0xff]  ;;  %v5355_v52 = vsel %vm5354_vm4, %v7719_v4, %v5351_v6 }
 0xa0e   : > { %6388 = vmatpush.bf16.msrb.mxu3 %v7231_v7  ;;  %v5360_v27 = vsel %vm5357_vm7, %v5359_v19, %v5355_v52 }
 0xa0f   : > { %v5395_v25 = vmul.f32 %v7723_v46, %v5394_v24  ;;  %v5983_v24 = vmul.f32 %v5360_v27, %v11193_v29 }
 0xa10   : > { %v11231_v43 = vpop.f32.mrf.mxu3 }
 0xa11   : > { %v7725_v31 = vpop.eup %7724  ;;  %v5396_v32 = vadd.f32 %v7723_v46, %v5395_v25  ;;  %v7005_v5 = vmul.f32 -1.442695, %v11231_v43  ;;  %v6031_v6 = vmul.f32 %v5983_v24, %v4932_v12  ;;  %v4937_v2 = vpop.f32.mrf.mxu1 }
 0xa12   : > { %v11229_v26 = vadd.f32 1.0, %v7725_v31  ;;  %v11234_v51 = vpop.eup %7726 }
 0xa13   : > { %v5400_v1 = vsel %vm5399_vm3, %v7723_v46, %v5396_v32  ;;  %v5438_v37 = vmul.f32 %v11234_v51, %v11222_v38  ;;  %vm5443_vm8 = vweird.f32 %v11234_v51 }
 0xa14   : > { %7728 = vrcp.f32 %v11229_v26  ;;  %v5405_v16 = vsel %vm5402_vm6, %v5404_v18, %v5400_v1  ;;  %vm5487_vm9 = vweird.f32 %v11229_v26  ;;  %v5491_v15 = vand.u32 2147483647, %v11229_v26  ;;  %vm5444_vm12 = vmor %vm5442_vm11, %vm5443_vm8 }
 0xa15   : > { %v5439_v48 = vsub.f32 1.0, %v5438_v37  ;;  %v5986_v4 = vmul.f32 %v5405_v16, %v11204_v49  ;;  %7730 = vpow2.f32 %v7005_v5  ;;  %v5493_v49 = vand.u32 2147483648, %v11229_v26  ;;  %v11263_v16 = vpop.f32.mrf.mxu0 }
 0xa16   : > { %vm5492_vm13 = vcmp.eq.f32.partialorder %v5491_v15, 8.507059e+37 }
 0xa17   : > { %v5440_v25 = vmul.f32 %v11234_v51, %v5439_v48  ;;  %v6034_v57 = vmul.f32 %v5986_v4, %v4934_v13  ;;  %v5494_v37 = vor.u32 1.1754944e-38, %v5493_v49  ;;  %v7230_v13 = vld [vmem:[#allocation13 + $0xa8] sm:$0xff]  ;;  %v6989_v4 = vmul.f32 -1.442695, %v11263_v16 }
 0xa18   : > { %v11241_v28 = vpop.f32.mrf.mxu3  ;;  %6389 = vmatpush.bf16.msrb.mxu3 %v7230_v13 }
 0xa19   : > { %v7008_v7 = vmul.f32 -1.442695, %v11241_v28  ;;  %v5441_v29 = vadd.f32 %v11234_v51, %v5440_v25  ;;  %v6076_v12 = vpack.c.bf16 %v6034_v57, %v6031_v6  ;;  %v4939_v5 = vpop.f32.mrf.mxu1 }
 0xa1a   : > { %v7729_v21 = vpop.eup %7728 }
 0xa1b   : > { %v5483_v59 = vmul.f32 %v7729_v21, %v11229_v26  ;;  %vm5488_vm5 = vweird.f32 %v7729_v21  ;;  %7732 = vpow2.f32 %v7008_v7  ;;  %v7731_v1 = vpop.eup %7730  ;;  %v5445_v18 = vsel %vm5444_vm12, %v11234_v51, %v5441_v29  ;;  %6302 = vmatmul.bf16.gmra.mxu0 %v6076_v12  ;;  %v7222_v7 = vld [vmem:[#allocation13 + $0x68] sm:$0xff] }
 0xa1c   : > { %vm5489_vm10 = vmor %vm5487_vm9, %vm5488_vm5  ;;  %v5449_v26 = vor.u32 1.1754944e-38, %v5448_v17  ;;  %6340 = vmatpush.bf16.msrb.mxu1 %v7222_v7 }
 0xa1d   : > { %4990 = vmatmul.bf16.gmra.mxu3 %v11132_v50  ;;  %5039 = vmatmul.bf16.gmra.mxu2 %v11132_v50  ;;  %v11236_v50 = vpop.f32.mrf.mxu2  ;;  %v5484_v46 = vsub.f32 1.0, %v5483_v59  ;;  %v11265_v59 = vadd.f32 1.0, %v7731_v1 }
 0xa1e   : > { %12933 = vst [vmem:[#allocation55_spill] sm:$0xff] %v11236_v50 }
 0xa1f   : > { %v5485_v3 = vmul.f32 %v7729_v21, %v5484_v46  ;;  %vm5532_vm2 = vweird.f32 %v11265_v59 }
 0xa20   : > { %v11261_v44 = vpop.f32.mrf.mxu3  ;;  %6341 = vmatpush.bf16.msrb.mxu1 %v7221_v47  ;;  %v6997_v47 = vmul.f32 -1.442695, %v11210_v56 }
 0xa21   : > { %v5486_v32 = vadd.f32 %v7729_v21, %v5485_v3  ;;  %v7733_v52 = vpop.eup %7732  ;;  %v7011_v48 = vmul.f32 -1.442695, %v11261_v44  ;;  %v6988_v3 = vmul.f32 -1.442695, %v11187_v30 }
 0xa23   : > { %v5490_v62 = vsel %vm5489_vm10, %v7729_v21, %v5486_v32  ;;  %v11286_v32 = vpop.f32.mrf.mxu0 }
 0xa24   : > { %v5495_v19 = vsel %vm5492_vm13, %v5494_v37, %v5490_v62  ;;  %v7229_v37 = vld [vmem:[#allocation13 + $0xa0] sm:$0xff] }
 0xa25   : > { %v11249_v31 = vpop.f32.mrf.mxu2  ;;  %v5992_v51 = vmul.f32 %v5495_v19, %v11219_v61  ;;  %v11304_v19 = vpop.f32.mrf.mxu1  ;;  %6390 = vmatpush.bf16.msrb.mxu3 %v7229_v37 }
 0xa26   : > { %12934 = vst [vmem:[#allocation33_spill] sm:$0xff] %v11249_v31 }
 0xa27   : > { %v6040_v24 = vmul.f32 %v5992_v51, %v4939_v5  ;;  %v6991_v5 = vmul.f32 -1.442695, %v11191_v0 }
 0xa28   : > { %v11280_v25 = vpop.f32.mrf.mxu3 }
 0xa29   : > { %v7014_v49 = vmul.f32 -1.442695, %v11280_v25 }
 0xa2d   : > { %4995 = vmatmul.bf16.gmra.mxu3 %v11144_v35  ;;  %5044 = vmatmul.bf16.gmra.mxu2 %v11144_v35  ;;  %v5446_v35 = vand.u32 2147483647, %v11222_v38  ;;  %v11267_v38 = vadd.f32 1.0, %v7733_v52  ;;  %v11269_v27 = vpop.f32.mrf.mxu2 }
 0xa2e   : > { %12935 = vst [vmem:[#allocation31_spill] sm:$0xff] %v11269_v27 }
 0xa2f   : > { %vm5447_vm14 = vcmp.eq.f32.partialorder %v5446_v35, 8.507059e+37  ;;  %7734 = vrcp.f32 %v11267_v38  ;;  %v5583_v7 = vand.u32 2147483648, %v11267_v38  ;;  %vm5577_vm1 = vweird.f32 %v11267_v38 }
 0xa30   : > { %v5450_v21 = vsel %vm5447_vm14, %v5449_v26, %v5445_v18  ;;  %7736 = vrcp.f32 %v11265_v59  ;;  %v11302_v26 = vpop.f32.mrf.mxu0 }
 0xa31   : > { %v5989_v46 = vmul.f32 %v5450_v21, %v11212_v11  ;;  %7738 = vpow2.f32 %v7011_v48  ;;  %v11308_v48 = vpop.f32.mrf.mxu3 }
 0xa32   : > { %7740 = vpow2.f32 %v6989_v4 }
 0xa33   : > { %v6037_v61 = vmul.f32 %v5989_v46, %v4937_v2  ;;  %7742 = vpow2.f32 %v6988_v3 }
 0xa34   : > { %7744 = vpow2.f32 %v7014_v49  ;;  %v5536_v49 = vand.u32 2147483647, %v11265_v59 }
 0xa35   : > { %v11282_v57 = vpop.eup %7734  ;;  %v6079_v6 = vpack.c.bf16 %v6040_v24, %v6037_v61  ;;  %v11289_v29 = vpop.f32.mrf.mxu2 }
 0xa36   : > { %v11284_v11 = vpop.eup %7736  ;;  %12936 = vst [vmem:[#allocation29_spill] sm:$0xff] %v11289_v29  ;;  %vm5578_vm15 = vweird.f32 %v11282_v57  ;;  %vm5537_vm7 = vcmp.eq.f32.partialorder %v5536_v49, 8.507059e+37 }
 0xa37   : > { %v7739_v15 = vpop.eup %7738  ;;  %v5528_v2 = vmul.f32 %v11284_v11, %v11265_v59  ;;  %6307 = vmatmul.bf16.gmra.mxu0 %v6079_v6  ;;  %vm5533_vm0 = vweird.f32 %v11284_v11  ;;  %v5538_v6 = vand.u32 2147483648, %v11265_v59  ;;  %vm11331_vm3 = vmor %vm5577_vm1, %vm5578_vm15 }
 0xa38   : > { %v7741_v17 = vpop.eup %7740  ;;  %v11295_v62 = vadd.f32 1.0, %v7739_v15  ;;  %v6995_v15 = vmul.f32 -1.442695, %v11302_v26  ;;  %vm11337_vm4 = vmor %vm5532_vm2, %vm5533_vm0  ;;  %v11353_v37 = vpop.f32.mrf.mxu0 }
 0xa39   : > { %v7743_v12 = vpop.eup %7742  ;;  %v5529_v1 = vsub.f32 1.0, %v5528_v2  ;;  %v11297_v52 = vadd.f32 1.0, %v7741_v17  ;;  %12941 = vst [vmem:[#allocation60_spill] sm:$0xff] %v11353_v37 }
 0xa3a   : > { %7746 = vrcp.f32 %v11295_v62  ;;  %v11300_v18 = vadd.f32 1.0, %v7743_v12  ;;  %v7745_v21 = vpop.eup %7744  ;;  %v5584_v12 = vor.u32 1.1754944e-38, %v5583_v7  ;;  %vm5622_vm10 = vweird.f32 %v11295_v62 }
 0xa3b   : > { %v5530_v51 = vmul.f32 %v11284_v11, %v5529_v1  ;;  %7748 = vrcp.f32 %v11297_v52  ;;  %v11319_v24 = vadd.f32 1.0, %v7745_v21  ;;  %v4944_v21 = vpop.f32.mrf.mxu1  ;;  %v5296_v42 = vand.u32 2147483647, %v11297_v52 }
 0xa3c   : > { %7750 = vrcp.f32 %v11300_v18  ;;  %v5298_v63 = vand.u32 2147483648, %v11297_v52  ;;  %vm5292_vm1 = vweird.f32 %v11297_v52 }
 0xa3d   : > { %5000 = vmatmul.bf16.gmra.mxu3 %v11155_v40  ;;  %5049 = vmatmul.bf16.gmra.mxu2 %v11155_v40  ;;  %v5573_v40 = vmul.f32 %v11282_v57, %v11267_v38  ;;  %v11310_v46 = vpop.f32.mrf.mxu2  ;;  %v5531_v61 = vadd.f32 %v11284_v11, %v5530_v51  ;;  %7752 = vrcp.f32 %v11319_v24  ;;  %vm5667_vm9 = vweird.f32 %v11319_v24 }
 0xa3e   : > { %7754 = vpow2.f32 %v6991_v5 }
 0xa3f   : > { %v5574_v35 = vsub.f32 1.0, %v5573_v40  ;;  %7756 = vpow2.f32 %v6995_v15  ;;  %v7017_v15 = vmul.f32 -1.442695, %v11308_v48 }
 0xa40   : > { %v11321_v3 = vpop.eup %7746 }
 0xa41   : > { %v5575_v13 = vmul.f32 %v11282_v57, %v5574_v35  ;;  %v5618_v59 = vmul.f32 %v11321_v3, %v11295_v62  ;;  %v11346_v17 = vpop.eup %7748  ;;  %v5535_v35 = vsel %vm11337_vm4, %v11284_v11, %v5531_v61  ;;  %vm5623_vm8 = vweird.f32 %v11321_v3 }
 0xa42   : > { %v11351_v1 = vpop.eup %7750  ;;  %v5288_v61 = vmul.f32 %v11346_v17, %v11297_v52  ;;  %vm11417_vm12 = vmor %vm5622_vm10, %vm5623_vm8  ;;  %vm5293_vm14 = vweird.f32 %v11346_v17  ;;  %vm5297_vm4 = vcmp.eq.f32.partialorder %v5296_v42, 8.507059e+37 }
 0xa43   : > { %v5576_v4 = vadd.f32 %v11282_v57, %v5575_v13  ;;  %v5539_v13 = vor.u32 1.1754944e-38, %v5538_v6  ;;  %v5619_v2 = vsub.f32 1.0, %v5618_v59  ;;  %v11360_v11 = vpop.eup %7752  ;;  %v5273_v7 = vmul.f32 %v11351_v1, %v11300_v18  ;;  %vm11450_vm2 = vmor %vm5292_vm1, %vm5293_vm14 }
 0xa44   : > { %v6994_v6 = vmul.f32 -1.442695, %v11200_v10  ;;  %vm5668_vm5 = vweird.f32 %v11360_v11  ;;  %vm5278_vm0 = vweird.f32 %v11351_v1 }
 0xa45   : > { %v11357_v5 = vpop.f32.mrf.mxu2  ;;  %v5540_v40 = vsel %vm5537_vm7, %v5539_v13, %v5535_v35  ;;  %v5620_v35 = vmul.f32 %v11321_v3, %v5619_v2  ;;  %v5289_v13 = vsub.f32 1.0, %v5288_v61  ;;  %v5274_v54 = vsub.f32 1.0, %v5273_v7  ;;  %vm11402_vm11 = vmor %vm5667_vm9, %vm5668_vm5 }
 0xa46   : > { %v5995_v59 = vmul.f32 %v5540_v40, %v11231_v43 }
 0xa47   : > { %v5621_v61 = vadd.f32 %v11321_v3, %v5620_v35 }
 0xa48   : > { %v6043_v43 = vmul.f32 %v5995_v59, %v11304_v19  ;;  %v5671_v19 = vand.u32 2147483647, %v11319_v24 }
 0xa4a   : > { %vm5672_vm13 = vcmp.eq.f32.partialorder %v5671_v19, 8.507059e+37  ;;  %v7000_v19 = vmul.f32 -1.442695, %v11217_v36 }
 0xa4d   : > { %5005 = vmatmul.bf16.gmra.mxu3 %v11168_v23  ;;  %5054 = vmatmul.bf16.gmra.mxu2 %v11168_v23  ;;  %v5581_v23 = vand.u32 2147483647, %v11267_v38  ;;  %v5580_v38 = vsel %vm11331_vm3, %v11282_v57, %v5576_v4  ;;  %v11355_v57 = vpop.f32.mrf.mxu3  ;;  %v6992_v4 = vmul.f32 -1.442695, %v11286_v32  ;;  %vm5277_vm3 = vweird.f32 %v11300_v18 }
 0xa4f   : > { %vm5582_vm6 = vcmp.eq.f32.partialorder %v5581_v23, 8.507059e+37  ;;  %v7755_v23 = vpop.eup %7754  ;;  %7758 = vpow2.f32 %v6992_v4  ;;  %v7020_v4 = vmul.f32 -1.442695, %v11355_v57  ;;  %v11384_v2 = vpop.f32.mrf.mxu2 }
 0xa50   : > { %v5585_v51 = vsel %vm5582_vm6, %v5584_v12, %v5580_v38  ;;  %v5663_v38 = vmul.f32 %v11360_v11, %v11319_v24  ;;  %v11373_v8 = vadd.f32 1.0, %v7755_v23  ;;  %7760 = vpow2.f32 %v6994_v6  ;;  %v7757_v41 = vpop.eup %7756  ;;  %12942 = vst [vmem:[#allocation48_spill] sm:$0xff] %v11384_v2  ;;  %v11396_v23 = vpop.f32.mrf.mxu1  ;;  %vm11467_vm6 = vmor %vm5277_vm3, %vm5278_vm0 }
 0xa51   : > { %v5998_v49 = vmul.f32 %v5585_v51, %v11241_v28  ;;  %7762 = vpow2.f32 %v7017_v15  ;;  %v5673_v51 = vand.u32 2147483648, %v11319_v24  ;;  %v11393_v6 = vadd.f32 1.0, %v7757_v41  ;;  %v7220_v15 = vld [vmem:[#allocation13 + $0x58] sm:$0xff] }
 0xa52   : > { %v5664_v12 = vsub.f32 1.0, %v5663_v38  ;;  %v7228_v38 = vld [vmem:[#allocation13 + $0x98] sm:$0xff]  ;;  %v5626_v41 = vand.u32 2147483647, %v11295_v62  ;;  %7764 = vpow2.f32 %v7020_v4  ;;  %6342 = vmatpush.bf16.msrb.mxu1 %v7220_v15  ;;  %v5283_v15 = vand.u32 2147483648, %v11300_v18 }
 0xa53   : > { %v6046_v55 = vmul.f32 %v5998_v49, %v4944_v21  ;;  %v11387_v21 = vpop.f32.mrf.mxu0  ;;  %6391 = vmatpush.bf16.msrb.mxu3 %v7228_v38  ;;  %7766 = vrcp.f32 %v11373_v8  ;;  %vm5322_vm8 = vweird.f32 %v11373_v8  ;;  %vm5382_vm10 = vweird.f32 %v11393_v6 }
 0xa54   : > { %v5665_v28 = vmul.f32 %v11360_v11, %v5664_v12  ;;  %12943 = vst [vmem:[#allocation61_spill] sm:$0xff] %v11387_v21  ;;  %7768 = vrcp.f32 %v11393_v6  ;;  %vm5627_vm15 = vcmp.eq.f32.partialorder %v5626_v41, 8.507059e+37  ;;  %v5284_v42 = vor.u32 1.1754944e-38, %v5283_v15 }
 0xa55   : > { %v11382_v40 = vpop.f32.mrf.mxu3  ;;  %v11406_v59 = vpop.eup %7758  ;;  %v6082_v35 = vpack.c.bf16 %v6046_v55, %v6043_v43  ;;  %v5625_v55 = vsel %vm11417_vm12, %v11321_v3, %v5621_v61  ;;  %7770 = vpow2.f32 %v6997_v47 }
 0xa56   : > { %v5666_v7 = vadd.f32 %v11360_v11, %v5665_v28  ;;  %v7761_v12 = vpop.eup %7760  ;;  %v5290_v28 = vmul.f32 %v11346_v17, %v5289_v13 }
 0xa57   : > { %v7763_v49 = vpop.eup %7762  ;;  %6312 = vmatmul.bf16.gmra.mxu0 %v6082_v35  ;;  %v11432_v38 = vadd.f32 1.0, %v7761_v12 }
 0xa58   : > { %v5670_v24 = vsel %vm11402_vm11, %v11360_v11, %v5666_v7  ;;  %v5275_v11 = vmul.f32 %v11351_v1, %v5274_v54  ;;  %v11427_v4 = vadd.f32 1.0, %v7763_v49  ;;  %v7001_v54 = vmul.f32 -1.442695, %v11387_v21  ;;  %v7765_v3 = vpop.eup %7764 }
 0xa59   : > { %v5291_v7 = vadd.f32 %v11346_v17, %v5290_v28  ;;  %v11446_v35 = vpop.eup %7766  ;;  %v11458_v28 = vadd.f32 1.0, %v7765_v3 }
 0xa5a   : > { %7772 = vrcp.f32 %v11427_v4  ;;  %v5276_v61 = vadd.f32 %v11351_v1, %v5275_v11  ;;  %v5318_v3 = vmul.f32 %v11446_v35, %v11373_v8  ;;  %vm5712_vm9 = vweird.f32 %v11427_v4 }
 0xa5b   : > { %7774 = vpow2.f32 %v7001_v54  ;;  %v5295_v49 = vsel %vm11450_vm2, %v11346_v17, %v5291_v7  ;;  %v11478_v17 = vadd.f32 1.0, %v11406_v59  ;;  %v5328_v7 = vand.u32 2147483648, %v11373_v8 }
 0xa5c   : > { %7776 = vrcp.f32 %v11432_v38  ;;  %v6998_v59 = vmul.f32 -1.442695, %v11353_v37  ;;  %vm5757_vm14 = vweird.f32 %v11458_v28  ;;  %vm5323_vm0 = vweird.f32 %v11446_v35 }
 0xa5d   : > { %5010 = vmatmul.bf16.gmra.mxu3 %v11178_v33  ;;  %5059 = vmatmul.bf16.gmra.mxu2 %v11178_v33  ;;  %v5628_v33 = vand.u32 2147483648, %v11295_v62  ;;  %v5674_v62 = vor.u32 1.1754944e-38, %v5673_v51  ;;  %v7227_v51 = vld [vmem:[#allocation13 + $0x90] sm:$0xff]  ;;  %v11442_v41 = vpop.f32.mrf.mxu3  ;;  %7778 = vpow2.f32 %v7000_v19 }
 0xa5e   : > { %6392 = vmatpush.bf16.msrb.mxu3 %v7227_v51  ;;  %7780 = vrcp.f32 %v11458_v28 }
 0xa5f   : > { %v5629_v13 = vor.u32 1.1754944e-38, %v5628_v33  ;;  %v5675_v43 = vsel %vm5672_vm13, %v5674_v62, %v5670_v24  ;;  %v5281_v33 = vand.u32 2147483647, %v11300_v18  ;;  %v11444_v24 = vpop.f32.mrf.mxu2  ;;  %v11460_v62 = vpop.eup %7768  ;;  %7782 = vrcp.f32 %v11478_v17 }
 0xa60   : > { %v6004_v47 = vmul.f32 %v5675_v43, %v11280_v25  ;;  %12948 = vst [vmem:[#allocation49_spill] sm:$0xff] %v11444_v24  ;;  %v11455_v25 = vpop.f32.mrf.mxu0  ;;  %v4949_v18 = vpop.f32.mrf.mxu1  ;;  %7784 = vpow2.f32 %v6998_v59  ;;  %vm5383_vm3 = vweird.f32 %v11460_v62 }
 0xa61   : > { %v5630_v58 = vsel %vm5627_vm15, %v5629_v13, %v5625_v55  ;;  %12951 = vst [vmem:[#allocation42_spill] sm:$0xff] %v11455_v25  ;;  %v7771_v55 = vpop.eup %7770  ;;  %v5280_v13 = vsel %vm11467_vm6, %v11351_v1, %v5276_v61  ;;  %vm5282_vm7 = vcmp.eq.f32.partialorder %v5281_v33, 8.507059e+37  ;;  %v5378_v61 = vmul.f32 %v11460_v62, %v11393_v6  ;;  %vm11584_vm6 = vmor %vm5322_vm8, %vm5323_vm0 }
 0xa62   : > { %v6001_v52 = vmul.f32 %v5630_v58, %v11261_v44  ;;  %v5299_v44 = vor.u32 1.1754944e-38, %v5298_v63  ;;  %v6052_v43 = vmul.f32 %v6004_v47, %v4949_v18  ;;  %v11475_v51 = vpop.eup %7772  ;;  %v5285_v1 = vsel %vm5282_vm7, %v5284_v42, %v5280_v13 }
 0xa63   : > { %v5708_v58 = vmul.f32 %v11475_v51, %v11427_v4  ;;  %v7775_v19 = vpop.eup %7774  ;;  %v11490_v47 = vadd.f32 1.0, %v7771_v55  ;;  %v11501_v18 = vmul.f32 %v5285_v1, %v11187_v30  ;;  %v5319_v42 = vsub.f32 1.0, %v5318_v3 }
 0xa64   : > { %v5300_v54 = vsel %vm5297_vm4, %v5299_v44, %v5295_v49  ;;  %v6049_v63 = vmul.f32 %v6001_v52, %v11396_v23  ;;  %v11492_v12 = vpop.eup %7776  ;;  %v5326_v52 = vand.u32 2147483647, %v11373_v8  ;;  %v7003_v49 = vmul.f32 -1.442695, %v11224_v9 }
 0xa65   : > { %v5709_v33 = vsub.f32 1.0, %v5708_v58  ;;  %v11495_v23 = vmul.f32 %v5300_v54, %v11263_v16  ;;  %v7779_v11 = vpop.eup %7778  ;;  %v11503_v44 = vor.u32 1.1754944e-38, %v5328_v7  ;;  %v5379_v16 = vsub.f32 1.0, %v5378_v61 }
 0xa66   : > { %v6085_v15 = vpack.c.bf16 %v6052_v43, %v6049_v63  ;;  %v7781_v43 = vpop.eup %7780  ;;  %v11507_v54 = vadd.f32 1.0, %v7775_v19  ;;  %v11509_v63 = vpop.f32.mrf.mxu3  ;;  %7786 = vrcp.f32 %v11490_v47  ;;  %vm5713_vm5 = vweird.f32 %v11475_v51 }
 0xa67   : > { %v5710_v13 = vmul.f32 %v11475_v51, %v5709_v33  ;;  %v11511_v58 = vpop.f32.mrf.mxu2  ;;  %v5753_v1 = vmul.f32 %v7781_v43, %v11458_v28  ;;  %v5363_v3 = vmul.f32 %v11492_v12, %v11432_v38  ;;  %v11521_v61 = vadd.f32 1.0, %v7779_v11  ;;  %vm11538_vm11 = vmor %vm5712_vm9, %vm5713_vm5 }
 0xa68   : > { %12954 = vst [vmem:[#allocation35_spill] sm:$0xff] %v11511_v58  ;;  %v11514_v30 = vpop.f32.mrf.mxu0  ;;  %6317 = vmatmul.bf16.gmra.mxu0 %v6085_v15  ;;  %7788 = vpow2.f32 %v7003_v49  ;;  %v11523_v59 = vpop.f32.mrf.mxu1  ;;  %v5718_v19 = vand.u32 2147483648, %v11427_v4  ;;  %v5716_v33 = vand.u32 2147483647, %v11427_v4  ;;  %v7023_v55 = vmul.f32 -1.442695, %v11382_v40  ;;  %vm11600_vm5 = vmor %vm5382_vm10, %vm5383_vm3 }
 0xa69   : > { %12955 = vst [vmem:[#allocation59_spill] sm:$0xff] %v11514_v30  ;;  %v5711_v7 = vadd.f32 %v11475_v51, %v5710_v13  ;;  %v5754_v13 = vsub.f32 1.0, %v5753_v1  ;;  %v11530_v15 = vpop.eup %7782  ;;  %v5320_v34 = vmul.f32 %v11446_v35, %v5319_v42  ;;  %7790 = vrcp.f32 %v11507_v54 }
 0xa6a   : > { %v7007_v49 = vmul.f32 -1.442695, %v11514_v30  ;;  %v5763_v4 = vand.u32 2147483648, %v11458_v28  ;;  %vm5758_vm12 = vweird.f32 %v7781_v43  ;;  %v5761_v42 = vand.u32 2147483647, %v11458_v28  ;;  %v7785_v22 = vpop.eup %7784  ;;  %v7219_v28 = vld [vmem:[#allocation13 + $0x50] sm:$0xff] }
 0xa6b   : > { %v5715_v1 = vsel %vm11538_vm11, %v11475_v51, %v5711_v7  ;;  %v5755_v53 = vmul.f32 %v7781_v43, %v5754_v13  ;;  %v5380_v20 = vmul.f32 %v11460_v62, %v5379_v16  ;;  %v5364_v39 = vsub.f32 1.0, %v5363_v3  ;;  %vm5759_vm15 = vmor %vm5757_vm14, %vm5758_vm12  ;;  %6343 = vmatpush.bf16.msrb.mxu1 %v7219_v28 }
 0xa6c   : > { %7792 = vrcp.f32 %v11521_v61  ;;  %v5719_v60 = vor.u32 1.1754944e-38, %v5718_v19  ;;  %v11549_v14 = vpop.eup %7786  ;;  %vm5717_vm13 = vcmp.eq.f32.partialorder %v5716_v33, 8.507059e+37  ;;  %v5388_v51 = vand.u32 2147483648, %v11393_v6 }
 0xa6d   : > { %v5756_v45 = vadd.f32 %v7781_v43, %v5755_v53  ;;  %7794 = vpow2.f32 %v7023_v55  ;;  %v5764_v13 = vor.u32 1.1754944e-38, %v5763_v4  ;;  %v5321_v16 = vadd.f32 %v11446_v35, %v5320_v34 }
 0xa6e   : > { %v7789_v11 = vpop.eup %7788  ;;  %7796 = vpow2.f32 %v7007_v49  ;;  %v5720_v7 = vsel %vm5717_vm13, %v5719_v60, %v5715_v1  ;;  %vm11556_vm1 = vcmp.eq.f32.partialorder %v5326_v52, 8.507059e+37  ;;  %vm5762_vm2 = vcmp.eq.f32.partialorder %v5761_v42, 8.507059e+37  ;;  %v11565_v49 = vpop.f32.mrf.mxu3 }
 0xa6f   : > { %v5760_v53 = vsel %vm5759_vm15, %v7781_v43, %v5756_v45  ;;  %v11560_v55 = vpop.eup %7790  ;;  %v5381_v19 = vadd.f32 %v11460_v62, %v5380_v20  ;;  %v5365_v60 = vmul.f32 %v11492_v12, %v5364_v39  ;;  %v11567_v34 = vpop.f32.mrf.mxu2  ;;  %v12962_v52 = vand.u32 2147483647, %v11393_v6 }
 0xa70   : > { %12960 = vst [vmem:[#allocation27_spill] sm:$0xff] %v11560_v55  ;;  %v5765_v33 = vsel %vm5762_vm2, %v5764_v13, %v5760_v53  ;;  %v7004_v45 = vmul.f32 -1.442695, %v11455_v25  ;;  %v6007_v43 = vmul.f32 %v5720_v7, %v11308_v48  ;;  %v5389_v42 = vor.u32 1.1754944e-38, %v5388_v51 }
 0xa71   : > { %12961 = vst [vmem:[#allocation25_spill] sm:$0xff] %v11567_v34  ;;  %vm11571_vm4 = vcmp.eq.f32.partialorder %v12962_v52, 8.507059e+37  ;;  %v6010_v20 = vmul.f32 %v5765_v33, %v11355_v57  ;;  %vm5367_vm7 = vweird.f32 %v11432_v38  ;;  %v5408_v13 = vmul.f32 %v11549_v14, %v11490_v47  ;;  %v4954_v57 = vpop.f32.mrf.mxu1 }
 0xa72   : > { %v11578_v1 = vpop.eup %7792  ;;  %v11591_v48 = vadd.f32 1.0, %v7789_v11  ;;  %v5325_v53 = vsel %vm11584_vm6, %v11446_v35, %v5321_v16  ;;  %v5371_v51 = vand.u32 2147483647, %v11432_v38  ;;  %v11605_v28 = vadd.f32 1.0, %v7785_v22 }
 0xa73   : > { %v7795_v7 = vpop.eup %7794  ;;  %v6058_v11 = vmul.f32 %v6010_v20, %v4954_v57  ;;  %v5385_v52 = vsel %vm11600_vm5, %v11460_v62, %v5381_v19  ;;  %v5366_v35 = vadd.f32 %v11492_v12, %v5365_v60  ;;  %vm5368_vm8 = vweird.f32 %v11492_v12  ;;  %v7226_v20 = vld [vmem:[#allocation13 + $0x88] sm:$0xff] }
 0xa74   : > { %v7797_v33 = vpop.eup %7796  ;;  %v7006_v6 = vmul.f32 -1.442695, %v11236_v50  ;;  %v5468_v16 = vmul.f32 %v11560_v55, %v11507_v54  ;;  %7798 = vpow2.f32 %v7004_v45  ;;  %v6055_v39 = vmul.f32 %v6007_v43, %v11523_v59  ;;  %6393 = vmatpush.bf16.msrb.mxu3 %v7226_v20  ;;  %vm11632_vm9 = vmor %vm5367_vm7, %vm5368_vm8 }
 0xa75   : > { %v7026_v22 = vmul.f32 -1.442695, %v11442_v41  ;;  %v5409_v57 = vsub.f32 1.0, %v5408_v13  ;;  %v5453_v8 = vmul.f32 %v11578_v1, %v11521_v61  ;;  %7800 = vrcp.f32 %v11591_v48 }
 0xa76   : > { %v11620_v62 = vadd.f32 1.0, %v7795_v7  ;;  %v5373_v19 = vand.u32 2147483648, %v11432_v38  ;;  %v11623_v60 = vadd.f32 1.0, %v7797_v33  ;;  %v6088_v34 = vpack.c.bf16 %v6058_v11, %v6055_v39  ;;  %v11641_v7 = vpop.f32.mrf.mxu3 }
 0xa77   : > { %7802 = vpow2.f32 %v7026_v22  ;;  %v5330_v59 = vsel %vm11556_vm1, %v11503_v44, %v5325_v53  ;;  %vm11636_vm10 = vcmp.eq.f32.partialorder %v5371_v51, 8.507059e+37  ;;  %v7009_v13 = vmul.f32 -1.442695, %v11249_v31  ;;  %v11652_v33 = vpop.f32.mrf.mxu2 }
 0xa78   : > { %7804 = vpow2.f32 %v7006_v6  ;;  %v5390_v44 = vsel %vm11571_vm4, %v5389_v42, %v5385_v52  ;;  %v5370_v38 = vsel %vm11632_vm9, %v11492_v12, %v5366_v35  ;;  %6322 = vmatmul.bf16.gmra.mxu0 %v6088_v34  ;;  %v7029_v3 = vmul.f32 -1.442695, %v11509_v63 }
 0xa79   : > { %7806 = vrcp.f32 %v11605_v28  ;;  %v5410_v53 = vmul.f32 %v11549_v14, %v5409_v57  ;;  %v5469_v51 = vsub.f32 1.0, %v5468_v16  ;;  %v5454_v11 = vsub.f32 1.0, %v5453_v8  ;;  %v7218_v16 = vld [vmem:[#allocation13 + $0x48] sm:$0xff] }
 0xa7a   : > { %7808 = vrcp.f32 %v11620_v62  ;;  %v7799_v6 = vpop.eup %7798  ;;  %v11655_v4 = vmul.f32 %v5330_v59, %v11191_v0  ;;  %v5374_v42 = vor.u32 1.1754944e-38, %v5373_v19  ;;  %v5416_v12 = vand.u32 2147483647, %v11490_v47  ;;  %6344 = vmatpush.bf16.msrb.mxu1 %v7218_v16 }
 0xa7b   : > { %7810 = vrcp.f32 %v11623_v60  ;;  %v11659_v34 = vpop.eup %7800  ;;  %v11662_v52 = vmul.f32 %v5390_v44, %v11302_v26  ;;  %vm5412_vm11 = vweird.f32 %v11490_v47  ;;  %v5418_v35 = vand.u32 2147483648, %v11490_v47 }
 0xa7c   : > { %7812 = vpow2.f32 %v7009_v13  ;;  %v5375_v0 = vsel %vm11636_vm10, %v5374_v42, %v5370_v38  ;;  %vm5472_vm12 = vweird.f32 %v11507_v54  ;;  %v5411_v57 = vadd.f32 %v11549_v14, %v5410_v53  ;;  %v7225_v42 = vld [vmem:[#allocation13 + $0x80] sm:$0xff] }
 0xa7d   : > { %12973 = vst [vmem:[#allocation22_spill] sm:$0xff] %v11662_v52  ;;  %v7803_v39 = vpop.eup %7802  ;;  %7814 = vpow2.f32 %v7029_v3  ;;  %vm5413_vm13 = vweird.f32 %v11549_v14  ;;  %v5470_v26 = vmul.f32 %v11560_v55, %v5469_v51  ;;  %v5455_v8 = vmul.f32 %v11578_v1, %v5454_v11  ;;  %v11694_v11 = vpop.f32.mrf.mxu0  ;;  %6394 = vmatpush.bf16.msrb.mxu3 %v7225_v42 }
 0xa7e   : > { %v7805_v20 = vpop.eup %7804  ;;  %vm11676_vm14 = vcmp.eq.f32.partialorder %v5416_v12, 8.507059e+37  ;;  %v5478_v45 = vand.u32 2147483648, %v11507_v54  ;;  %v5498_v43 = vmul.f32 %v11659_v34, %v11591_v48  ;;  %v11683_v13 = vadd.f32 1.0, %v7803_v39  ;;  %12976 = vst [vmem:[#allocation24_spill] sm:$0xff] %v11694_v11  ;;  %v7217_v12 = vld [vmem:[#allocation13 + $0x40] sm:$0xff]  ;;  %vm11702_vm15 = vmor %vm5412_vm11, %vm5413_vm13 }
 0xa7f   : > { %v11674_v19 = vpop.eup %7806  ;;  %v11688_v38 = vmul.f32 %v5375_v0, %v11200_v10  ;;  %v5461_v3 = vand.u32 2147483647, %v11521_v61  ;;  %v5463_v53 = vand.u32 2147483648, %v11521_v61  ;;  %v11692_v51 = vadd.f32 1.0, %v7799_v6  ;;  %v11710_v6 = vpop.f32.mrf.mxu3  ;;  %6345 = vmatpush.bf16.msrb.mxu1 %v7217_v12 }
 0xa80   : > { %v11685_v44 = vpop.eup %7808  ;;  %v5419_v10 = vor.u32 1.1754944e-38, %v5418_v35  ;;  %vm5473_vm0 = vweird.f32 %v11560_v55  ;;  %v11707_v0 = vadd.f32 1.0, %v7805_v20  ;;  %7816 = vrcp.f32 %v11683_v13 }
 0xa81   : > { %v11696_v16 = vpop.eup %7810  ;;  %v5415_v25 = vsel %vm11702_vm15, %v11549_v14, %v5411_v57  ;;  %v11716_v47 = vadd.f32 %v11560_v55, %v5470_v26  ;;  %v5456_v58 = vadd.f32 %v11578_v1, %v5455_v8  ;;  %vm5458_vm1 = vweird.f32 %v11578_v1  ;;  %vm11729_vm2 = vmor %vm5472_vm12, %vm5473_vm0  ;;  %v11739_v8 = vpop.f32.mrf.mxu2 }
 0xa82   : > { %v7813_v22 = vpop.eup %7812  ;;  %v11720_v20 = vor.u32 1.1754944e-38, %v5478_v45  ;;  %v5499_v30 = vsub.f32 1.0, %v5498_v43  ;;  %v7010_v21 = vmul.f32 -1.442695, %v11694_v11  ;;  %v5798_v52 = vmul.f32 %v11685_v44, %v11620_v62 }
 0xa83   : > { %12979 = vst [vmem:[#allocation21_spill] sm:$0xff] %v11716_v47  ;;  %v7815_v35 = vpop.eup %7814  ;;  %vm5457_vm3 = vweird.f32 %v11521_v61  ;;  %vm11734_vm4 = vcmp.eq.f32.partialorder %v5461_v3, 8.507059e+37  ;;  %v5464_v26 = vor.u32 1.1754944e-38, %v5463_v53  ;;  %7818 = vrcp.f32 %v11692_v51 }
 0xa84   : > { %12980 = vst [vmem:[#allocation23_spill] sm:$0xff] %v11720_v20  ;;  %v5420_v45 = vsel %vm11676_vm14, %v5419_v10, %v5415_v25  ;;  %vm11745_vm6 = vmor %vm5457_vm3, %vm5458_vm1  ;;  %v5558_v61 = vmul.f32 %v11696_v16, %v11623_v60  ;;  %7820 = vrcp.f32 %v11707_v0  ;;  %v7032_v3 = vmul.f32 -1.442695, %v11565_v49 }
 0xa85   : > { %v5460_v25 = vsel %vm11745_vm6, %v11578_v1, %v5456_v58  ;;  %v11760_v59 = vadd.f32 1.0, %v7813_v22  ;;  %v11762_v42 = vadd.f32 1.0, %v7815_v35  ;;  %v5500_v39 = vmul.f32 %v11659_v34, %v5499_v30 }
 0xa86   : > { %v11764_v12 = vpop.eup %7816  ;;  %v5506_v10 = vand.u32 2147483647, %v11591_v48  ;;  %7822 = vpow2.f32 %v7010_v21  ;;  %v5799_v11 = vsub.f32 1.0, %v5798_v52  ;;  %v5508_v24 = vand.u32 2147483648, %v11591_v48  ;;  %v11783_v52 = vpop.f32.mrf.mxu0 }
 0xa87   : > { %v7012_v53 = vmul.f32 -1.442695, %v11269_v27  ;;  %v5843_v43 = vmul.f32 %v11764_v12, %v11683_v13  ;;  %7824 = vrcp.f32 %v11762_v42  ;;  %v5465_v58 = vsel %vm11734_vm4, %v5464_v26, %v5460_v25  ;;  %12987 = vst [vmem:[#allocation39_spill] sm:$0xff] %v11783_v52 }
 0xa88   : > { %v5559_v1 = vsub.f32 1.0, %v5558_v61  ;;  %v7015_v22 = vmul.f32 -1.442695, %v11289_v29  ;;  %7826 = vpow2.f32 %v7032_v3  ;;  %v11779_v21 = vmul.f32 %v5420_v45, %v11210_v56  ;;  %v11793_v61 = vpop.f32.mrf.mxu1  ;;  %v11796_v45 = vpop.f32.mrf.mxu3 }
 0xa89   : > { %v11776_v30 = vpop.eup %7818  ;;  %vm5502_vm7 = vweird.f32 %v11591_v48  ;;  %7828 = vrcp.f32 %v11760_v59  ;;  %v5844_v35 = vsub.f32 1.0, %v5843_v43  ;;  %v5501_v57 = vadd.f32 %v11659_v34, %v5500_v39 }
 0xa8a   : > { %v11785_v27 = vpop.eup %7820  ;;  %vm5503_vm5 = vweird.f32 %v11659_v34  ;;  %vm11789_vm8 = vcmp.eq.f32.partialorder %v5506_v10, 8.507059e+37  ;;  %v5800_v56 = vmul.f32 %v11685_v44, %v5799_v11  ;;  %v11799_v3 = vmul.f32 %v5465_v58, %v11217_v36  ;;  %v11820_v58 = vpop.f32.mrf.mxu2 }
 0xa8b   : > { %v5509_v25 = vor.u32 1.1754944e-38, %v5508_v24  ;;  %7830 = vpow2.f32 %v7012_v53  ;;  %v5845_v43 = vmul.f32 %v11764_v12, %v5844_v35  ;;  %v5560_v29 = vmul.f32 %v11696_v16, %v5559_v1  ;;  %vm11811_vm9 = vmor %vm5502_vm7, %vm5503_vm5  ;;  %12992 = vst [vmem:[#allocation37_spill] sm:$0xff] %v11820_v58 }
 0xa8c   : > { %v7823_v39 = vpop.eup %7822  ;;  %7832 = vpow2.f32 %v7015_v22  ;;  %v5543_v24 = vmul.f32 %v11785_v27, %v11707_v0  ;;  %v7013_v11 = vmul.f32 -1.442695, %v11783_v52  ;;  %vm5848_vm10 = vweird.f32 %v11764_v12 }
 0xa8d   : > { %v11805_v50 = vpop.eup %7824  ;;  %v5846_v53 = vadd.f32 %v11764_v12, %v5845_v43  ;;  %v5505_v48 = vsel %vm11811_vm9, %v11659_v34, %v5501_v57  ;;  %v5801_v22 = vadd.f32 %v11685_v44, %v5800_v56  ;;  %vm5803_vm11 = vweird.f32 %v11685_v44 }
 0xa8e   : > { %v7827_v1 = vpop.eup %7826  ;;  %v5853_v35 = vand.u32 2147483648, %v11683_v13  ;;  %v5808_v10 = vand.u32 2147483648, %v11620_v62  ;;  %vm5847_vm12 = vweird.f32 %v11683_v13  ;;  %v5851_v43 = vand.u32 2147483647, %v11683_v13 }
 0xa8f   : > { %v11828_v31 = vpop.eup %7828  ;;  %v5888_v52 = vmul.f32 %v11805_v50, %v11762_v42  ;;  %v11836_v36 = vadd.f32 %v11696_v16, %v5560_v29  ;;  %v11838_v34 = vadd.f32 1.0, %v7823_v39  ;;  %vm5802_vm13 = vweird.f32 %v11620_v62  ;;  %vm11844_vm14 = vmor %vm5847_vm12, %vm5848_vm10  ;;  %v11875_v29 = vpop.f32.mrf.mxu0 }
 0xa90   : > { %v5806_v57 = vand.u32 2147483647, %v11620_v62  ;;  %v5544_v13 = vsub.f32 1.0, %v5543_v24  ;;  %v5553_v37 = vand.u32 2147483648, %v11707_v0  ;;  %vm11851_vm15 = vmor %vm5802_vm13, %vm5803_vm11  ;;  %v5850_v62 = vsel %vm11844_vm14, %v11764_v12, %v5846_v53  ;;  %v11867_v47 = vpop.f32.mrf.mxu3 }
 0xa91   : > { %12993 = vst [vmem:[#allocation28_spill] sm:$0xff] %v11836_v36  ;;  %v7831_v58 = vpop.eup %7830  ;;  %v11858_v39 = vadd.f32 1.0, %v7827_v1  ;;  %v5588_v24 = vmul.f32 %v11828_v31, %v11760_v59  ;;  %v5805_v36 = vsel %vm11851_vm15, %v11685_v44, %v5801_v22  ;;  %v5854_v20 = vor.u32 1.1754944e-38, %v5853_v35 }
 0xa92   : > { %12994 = vst [vmem:[#allocation26_spill] sm:$0xff] %v11838_v34  ;;  %v7833_v2 = vpop.eup %7832  ;;  %v5510_v34 = vsel %vm11789_vm8, %v5509_v25, %v5505_v48  ;;  %v5809_v55 = vor.u32 1.1754944e-38, %v5808_v10  ;;  %vm5852_vm0 = vcmp.eq.f32.partialorder %v5851_v43, 8.507059e+37  ;;  %v5889_v56 = vsub.f32 1.0, %v5888_v52  ;;  %v4959_v25 = vpop.f32.mrf.mxu1 }
 0xa93   : > { %v5333_v12 = vmul.f32 %v11530_v15, %v11478_v17  ;;  %v11872_v26 = vadd.f32 1.0, %v7831_v58  ;;  %vm5807_vm1 = vcmp.eq.f32.partialorder %v5806_v57, 8.507059e+37  ;;  %v5855_v1 = vsel %vm5852_vm0, %v5854_v20, %v5850_v62 }
 0xa94   : > { %v5545_v48 = vmul.f32 %v11785_v27, %v5544_v13  ;;  %v11877_v44 = vadd.f32 1.0, %v7833_v2  ;;  %v5810_v22 = vsel %vm5807_vm1, %v5809_v55, %v5805_v36  ;;  %7834 = vrcp.f32 %v11858_v39  ;;  %v11888_v13 = vpop.f32.mrf.mxu2 }
 0xa95   : > { %v11881_v52 = vmul.f32 %v5510_v34, %v11224_v9  ;;  %v11883_v10 = vor.u32 1.1754944e-38, %v5553_v37  ;;  %v5589_v35 = vsub.f32 1.0, %v5588_v24  ;;  %v7018_v58 = vmul.f32 -1.442695, %v11310_v46 }
 0xa96   : > { %7836 = vpow2.f32 %v7013_v11  ;;  %v6016_v20 = vmul.f32 %v5855_v1, %v11442_v41  ;;  %v5890_v43 = vmul.f32 %v11805_v50, %v5889_v56  ;;  %v5334_v57 = vsub.f32 1.0, %v5333_v12 }
 0xa97   : > { %7838 = vrcp.f32 %v11872_v26  ;;  %v11893_v9 = vmul.f32 -1.442695, %v11875_v29  ;;  %v6013_v37 = vmul.f32 %v5810_v22, %v11382_v40  ;;  %v11897_v55 = vadd.f32 %v11785_v27, %v5545_v48 }
 0xa98   : > { %7840 = vrcp.f32 %v11877_v44  ;;  %v5896_v41 = vand.u32 2147483647, %v11762_v42  ;;  %v5590_v36 = vmul.f32 %v11828_v31, %v5589_v35  ;;  %vm5893_vm3 = vweird.f32 %v11805_v50  ;;  %v11906_v62 = vpop.f32.mrf.mxu3 }
 0xa99   : > { %7842 = vpow2.f32 %v7018_v58  ;;  %v6026_v34 = vmul.f32 %v11501_v18, %v11641_v7  ;;  %v6064_v24 = vmul.f32 %v6016_v20, %v4959_v25  ;;  %v5891_v56 = vadd.f32 %v11805_v50, %v5890_v43 }
 0xa9a   : > { %v7835_v40 = vpop.eup %7834  ;;  %v6029_v12 = vmul.f32 %v11655_v4, %v11710_v6  ;;  %v5335_v1 = vmul.f32 %v11530_v15, %v5334_v57  ;;  %v7021_v48 = vmul.f32 -1.442695, %v11357_v5  ;;  %v6061_v22 = vmul.f32 %v6013_v37, %v11793_v61  ;;  %v11927_v61 = vpop.f32.mrf.mxu1 }
 0xa9b   : > { %vm5892_vm4 = vweird.f32 %v11762_v42  ;;  %v5933_v35 = vmul.f32 %v7835_v40, %v11858_v39  ;;  %vm5548_vm6 = vweird.f32 %v11785_v27  ;;  %vm11919_vm7 = vcmp.eq.f32.partialorder %v5896_v41, 8.507059e+37 }
 0xa9c   : > { %v11916_v18 = vpop.eup %7836  ;;  %v5898_v4 = vand.u32 2147483648, %v11762_v42  ;;  %v6074_v6 = vpack.c.bf16 %v6029_v12, %v6026_v34  ;;  %v5336_v25 = vadd.f32 %v11530_v15, %v5335_v1  ;;  %vm11931_vm5 = vmor %vm5892_vm4, %vm5893_vm3  ;;  %vm5337_vm8 = vweird.f32 %v11478_v17 }
 0xa9d   : > { %v11925_v58 = vpop.eup %7838  ;;  %v5934_v43 = vsub.f32 1.0, %v5933_v35  ;;  %vm5338_vm9 = vweird.f32 %v11530_v15  ;;  %v5341_v42 = vand.u32 2147483647, %v11478_v17  ;;  %vm5547_vm10 = vweird.f32 %v11707_v0 }
 0xa9e   : > { %v11938_v57 = vpop.eup %7840  ;;  %vm5593_vm11 = vweird.f32 %v11828_v31  ;;  %v5895_v37 = vsel %vm11931_vm5, %v11805_v50, %v5891_v56  ;;  %v5943_v41 = vand.u32 2147483648, %v11858_v39  ;;  %vm11946_vm12 = vmor %vm5337_vm8, %vm5338_vm9  ;;  %v5343_v12 = vand.u32 2147483648, %v11478_v17  ;;  %6346 = vmatmul.bf16.vlgmr.msrb.gmra.mxu1 %v6074_v6 }
 0xa9f   : > { %v6091_v1 = vpack.c.bf16 %v6064_v24, %v6061_v22  ;;  %v11951_v35 = vpop.eup %7842  ;;  %v5935_v11 = vmul.f32 %v7835_v40, %v5934_v43  ;;  %vm5938_vm13 = vweird.f32 %v7835_v40  ;;  %v5941_v2 = vand.u32 2147483647, %v11858_v39  ;;  %v11965_v24 = vpop.f32.mrf.mxu2  ;;  %vm12004_vm8 = vmor %vm5547_vm10, %vm5548_vm6 }
 0xaa0   : > { %v5340_v50 = vsel %vm11946_vm12, %v11530_v15, %v5336_v25  ;;  %v5899_v56 = vor.u32 1.1754944e-38, %v5898_v4  ;;  %v5344_v20 = vor.u32 1.1754944e-38, %v5343_v12  ;;  %v11959_v53 = vmul.f32 %v11688_v38, %v11796_v45  ;;  %v4988_v4 = vpop.f32.mrf.mxu3 }
 0xaa1   : > { %6327 = vmatmul.bf16.gmra.mxu0 %v6091_v1  ;;  %v11963_v17 = vmul.f32 %v11779_v21, %v11867_v47  ;;  %v5936_v22 = vadd.f32 %v7835_v40, %v5935_v11  ;;  %vm5937_vm14 = vweird.f32 %v11858_v39  ;;  %vm5342_vm15 = vcmp.eq.f32.partialorder %v5341_v42, 8.507059e+37 }
 0xaa2   : > { %v5423_v15 = vmul.f32 %v11674_v19, %v11605_v28  ;;  %v5900_v6 = vsel %vm11919_vm7, %v5899_v56, %v5895_v37  ;;  %vm5939_vm0 = vmor %vm5937_vm14, %vm5938_vm13  ;;  %v5944_v38 = vor.u32 1.1754944e-38, %v5943_v41  ;;  %v5345_v45 = vsel %vm5342_vm15, %v5344_v20, %v5340_v50 }
 0xaa3   : > { %v6077_v47 = vpack.c.bf16 %v11963_v17, %v11959_v53  ;;  %vm5563_vm1 = vweird.f32 %v11696_v16  ;;  %v5940_v21 = vsel %vm5939_vm0, %v7835_v40, %v5936_v22  ;;  %vm5942_vm3 = vcmp.eq.f32.partialorder %v5941_v2, 8.507059e+37 }
 0xaa4   : > { %v5982_v39 = vmul.f32 %v5345_v45, %v11286_v32  ;;  %v5424_v11 = vsub.f32 1.0, %v5423_v15  ;;  %v5591_v25 = vadd.f32 %v11828_v31, %v5590_v36  ;;  %7844 = vpow2.f32 %v7021_v48 }
 0xaa5   : > { %v5945_v43 = vsel %vm5942_vm3, %v5944_v38, %v5940_v21  ;;  %v6027_v7 = vmul.f32 %v11495_v23, %v11652_v33  ;;  %v13005_v42 = vand.u32 2147483647, %v11507_v54  ;;  %vm5562_vm7 = vweird.f32 %v11623_v60 }
 0xaa6   : > { %v6022_v53 = vmul.f32 %v5945_v43, %v11565_v49  ;;  %v6030_v32 = vmul.f32 %v5982_v39, %v11739_v8  ;;  %v5425_v2 = vmul.f32 %v11674_v19, %v5424_v11  ;;  %vm5428_vm5 = vweird.f32 %v11674_v19  ;;  %v4964_v8 = vpop.f32.mrf.mxu1  ;;  %v13018_v43 = vld [vmem:[#allocation21_spill] sm:$0xff]  ;;  %vm12072_vm15 = vmor %vm5562_vm7, %vm5563_vm1  ;;  %v13028_v49 = vld [vmem:[#allocation26_spill] sm:$0xff] }
 0xaa7   : > { %vm11982_vm4 = vcmp.eq.f32.partialorder %v13005_v42, 8.507059e+37  ;;  %v6019_v36 = vmul.f32 %v5900_v6, %v11509_v63  ;;  %v5433_v23 = vand.u32 2147483648, %v11605_v28  ;;  %v11995_v54 = vmul.f32 %v11799_v3, %v11906_v62  ;;  %v12042_v17 = vpop.f32.mrf.mxu2  ;;  %v12051_v6 = vpop.f32.mrf.mxu0  ;;  %v13020_v42 = vld [vmem:[#allocation23_spill] sm:$0xff] }
 0xaa8   : > { %v11998_v33 = vmul.f32 %v11881_v52, %v4988_v4  ;;  %v6075_v40 = vpack.c.bf16 %v6030_v32, %v6027_v7  ;;  %v5426_v63 = vadd.f32 %v11674_v19, %v5425_v2  ;;  %vm5427_vm9 = vweird.f32 %v11605_v28  ;;  %v4991_v1 = vpop.f32.mrf.mxu3 }
 0xaa9   : > { %v5431_v3 = vand.u32 2147483647, %v11605_v28  ;;  %vm5592_vm12 = vweird.f32 %v11760_v59  ;;  %7846 = vpow2.f32 %v11893_v9  ;;  %v6070_v52 = vmul.f32 %v6022_v53, %v4964_v8  ;;  %vm12013_vm13 = vmor %vm5427_vm9, %vm5428_vm5  ;;  %v13029_v8 = vld [vmem:[#allocation48_spill] sm:$0xff] }
 0xaaa   : > { %v6080_v48 = vpack.c.bf16 %v11998_v33, %v11995_v54  ;;  %v5550_v41 = vsel %vm12004_vm8, %v11785_v27, %v11897_v55  ;;  %vm12025_vm6 = vmor %vm5592_vm12, %vm5593_vm11  ;;  %v5633_v9 = vmul.f32 %v11925_v58, %v11872_v26  ;;  %6395 = vmatmul.bf16.vlgmr.msrb.gmra.mxu3 %v6075_v40  ;;  %v5430_v34 = vsel %vm12013_vm13, %v11674_v19, %v5426_v63  ;;  %v7845_v50 = vpop.eup %7844  ;;  %v13030_v63 = vld [vmem:[#allocation60_spill] sm:$0xff] }
 0xaab   : > { %v5513_v12 = vmul.f32 %v11776_v30, %v11692_v51  ;;  %v5595_v27 = vsel %vm12025_vm6, %v11828_v31, %v5591_v25  ;;  %v5678_v55 = vmul.f32 %v11938_v57, %v11877_v44  ;;  %v6067_v56 = vmul.f32 %v6019_v36, %v11927_v61  ;;  %v13027_v36 = vld [vmem:[#allocation28_spill] sm:$0xff] }
 0xaac   : > { %v5434_v20 = vor.u32 1.1754944e-38, %v5433_v23  ;;  %v13014_v22 = vand.u32 2147483647, %v11707_v0  ;;  %v13015_v19 = vand.u32 2147483647, %v11760_v59  ;;  %v13016_v15 = vand.u32 2147483648, %v11760_v59 }
 0xaad   : > { %vm5432_vm14 = vcmp.eq.f32.partialorder %v5431_v3, 8.507059e+37  ;;  %v12054_v38 = vadd.f32 1.0, %v11951_v35  ;;  %v6094_v45 = vpack.c.bf16 %v6070_v52, %v6067_v56  ;;  %v5634_v39 = vsub.f32 1.0, %v5633_v9  ;;  %v13017_v59 = vld [vmem:[#allocation27_spill] sm:$0xff] }
 0xaae   : > { %vm5552_vm10 = vcmp.eq.f32.partialorder %v13014_v22, 8.507059e+37  ;;  %vm5597_vm11 = vcmp.eq.f32.partialorder %v13015_v19, 8.507059e+37  ;;  %v5599_v4 = vor.u32 1.1754944e-38, %v13016_v15  ;;  %v5435_v61 = vsel %vm5432_vm14, %v5434_v20, %v5430_v34  ;;  %6351 = vmatmul.bf16.gmra.mxu1 %v6077_v47  ;;  %v13031_v52 = vld [vmem:[#allocation55_spill] sm:$0xff]  ;;  %v13035_v19 = vld [vmem:[#allocation22_spill] sm:$0xff] }
 0xaaf   : > { %v5555_v31 = vsel %vm5552_vm10, %v11883_v10, %v5550_v41  ;;  %v12056_v0 = vadd.f32 1.0, %v7845_v50  ;;  %v5514_v11 = vsub.f32 1.0, %v5513_v12  ;;  %v7847_v25 = vpop.eup %7846  ;;  %v13019_v7 = vsel %vm11729_vm2, %v13017_v59, %v13018_v43  ;;  %v13032_v41 = vld [vmem:[#allocation33_spill] sm:$0xff] }
 0xab0   : > { %v5600_v21 = vsel %vm5597_vm11, %v5599_v4, %v5595_v27  ;;  %v12066_v10 = vsel %vm11982_vm4, %v13020_v42, %v13019_v7  ;;  %v13023_v53 = vand.u32 2147483647, %v11623_v60  ;;  %v13026_v32 = vand.u32 2147483648, %v11623_v60  ;;  %v13033_v60 = vld [vmem:[#allocation49_spill] sm:$0xff]  ;;  %v4993_v12 = vpop.f32.mrf.mxu3  ;;  %v12117_v4 = vpop.f32.mrf.mxu2  ;;  %v13045_v7 = vld [vmem:[#allocation42_spill] sm:$0xff] }
 0xab1   : > { %v5679_v37 = vsub.f32 1.0, %v5678_v55  ;;  %v5565_v23 = vsel %vm12072_vm15, %v11696_v16, %v13027_v36  ;;  %7848 = vrcp.f32 %v13028_v49  ;;  %v7024_v40 = vmul.f32 -1.442695, %v13029_v8  ;;  %6332 = vmatmul.bf16.gmra.mxu0 %v6094_v45 }
 0xab2   : > { %vm12078_vm0 = vcmp.eq.f32.partialorder %v13023_v53, 8.507059e+37  ;;  %v5569_v2 = vor.u32 1.1754944e-38, %v13026_v32  ;;  %v5988_v3 = vmul.f32 %v5435_v61, %v13030_v63  ;;  %v5996_v62 = vmul.f32 %v5555_v31, %v13031_v52 }
 0xab3   : > { %v5999_v28 = vmul.f32 %v5600_v21, %v13032_v41  ;;  %7850 = vrcp.f32 %v12054_v38  ;;  %v7027_v9 = vmul.f32 -1.442695, %v13033_v60  ;;  %v5635_v47 = vmul.f32 %v11925_v58, %v5634_v39 }
 0xab4   : > { %7852 = vrcp.f32 %v12056_v0  ;;  %v6036_v16 = vmul.f32 %v5988_v3, %v11888_v13  ;;  %v5515_v34 = vmul.f32 %v11776_v30, %v5514_v11  ;;  %v12101_v50 = vsel %vm12078_vm0, %v5569_v2, %v5565_v23  ;;  %v13034_v13 = vld [vmem:[#allocation37_spill] sm:$0xff] }
 0xab5   : > { %v5680_v27 = vmul.f32 %v11938_v57, %v5679_v37  ;;  %v12104_v55 = vmul.f32 %v5996_v62, %v4991_v1  ;;  %v12106_v56 = vmul.f32 %v5999_v28, %v4993_v12  ;;  %v12109_v20 = vadd.f32 1.0, %v11916_v18  ;;  %v13048_v2 = vld [vmem:[#allocation25_spill] sm:$0xff] }
 0xab6   : > { %v12111_v22 = vadd.f32 1.0, %v7847_v25  ;;  %7854 = vpow2.f32 %v7024_v40  ;;  %v6033_v15 = vmul.f32 %v13035_v19, %v13034_v13  ;;  %vm5637_vm2 = vweird.f32 %v11872_v26  ;;  %v12131_v25 = vpop.f32.mrf.mxu0 }
 0xab7   : > { %vm5638_vm1 = vweird.f32 %v11925_v58  ;;  %7856 = vpow2.f32 %v7027_v9  ;;  %v6083_v1 = vpack.c.bf16 %v12106_v56, %v12104_v55  ;;  %v12121_v31 = vpop.eup %7848  ;;  %v5636_v18 = vadd.f32 %v11925_v58, %v5635_v47 }
 0xab8   : > { %v6078_v61 = vpack.c.bf16 %v6036_v16, %v6033_v15  ;;  %v5516_v45 = vadd.f32 %v11776_v30, %v5515_v34  ;;  %vm5518_vm3 = vweird.f32 %v11776_v30  ;;  %v5643_v39 = vand.u32 2147483648, %v11872_v26  ;;  %vm12140_vm7 = vmor %vm5637_vm2, %vm5638_vm1  ;;  %v4996_v40 = vpop.f32.mrf.mxu3 }
 0xab9   : > { %v12126_v21 = vpop.eup %7850  ;;  %v5681_v11 = vadd.f32 %v11938_v57, %v5680_v27  ;;  %vm5683_vm4 = vweird.f32 %v11938_v57  ;;  %v5523_v59 = vand.u32 2147483648, %v11692_v51  ;;  %v5641_v42 = vand.u32 2147483647, %v11872_v26  ;;  %v13042_v27 = vld [vmem:[#allocation61_spill] sm:$0xff] }
 0xaba   : > { %v12134_v43 = vpop.eup %7852  ;;  %v5688_v35 = vand.u32 2147483648, %v11877_v44  ;;  %vm5517_vm5 = vweird.f32 %v11692_v51  ;;  %v5521_v53 = vand.u32 2147483647, %v11692_v51  ;;  %7858 = vrcp.f32 %v12109_v20  ;;  %6400 = vmatmul.bf16.gmra.mxu3 %v6078_v61  ;;  %v12194_v61 = vpop.f32.mrf.mxu2 }
 0xabb   : > { %vm5682_vm8 = vweird.f32 %v11877_v44  ;;  %v5686_v14 = vand.u32 2147483647, %v11877_v44  ;;  %v7019_v32 = vmul.f32 -1.442695, %v12051_v6  ;;  %vm12154_vm9 = vmor %vm5517_vm5, %vm5518_vm3  ;;  %v5640_v37 = vsel %vm12140_vm7, %v11925_v58, %v5636_v18 }
 0xabc   : > { %v7855_v26 = vpop.eup %7854  ;;  %vm12163_vm12 = vmor %vm5682_vm8, %vm5683_vm4  ;;  %v5723_v44 = vmul.f32 %v12126_v21, %v12054_v38  ;;  %v5520_v36 = vsel %vm12154_vm9, %v11776_v30, %v5516_v45  ;;  %v5603_v23 = vmul.f32 %v12121_v31, %v13028_v49  ;;  %v5644_v58 = vor.u32 1.1754944e-38, %v5643_v39  ;;  %v13043_v45 = vld [vmem:[#allocation59_spill] sm:$0xff] }
 0xabd   : > { %v7857_v63 = vpop.eup %7856  ;;  %v5685_v3 = vsel %vm12163_vm12, %v11938_v57, %v5681_v11  ;;  %v5768_v52 = vmul.f32 %v12134_v43, %v12056_v0  ;;  %v5524_v62 = vor.u32 1.1754944e-38, %v5523_v59  ;;  %vm5642_vm13 = vcmp.eq.f32.partialorder %v5641_v42, 8.507059e+37  ;;  %v13044_v11 = vld [vmem:[#allocation35_spill] sm:$0xff] }
 0xabe   : > { %7860 = vrcp.f32 %v12111_v22  ;;  %v5689_v41 = vor.u32 1.1754944e-38, %v5688_v35  ;;  %vm5522_vm6 = vcmp.eq.f32.partialorder %v5521_v53, 8.507059e+37  ;;  %v5645_v30 = vsel %vm5642_vm13, %v5644_v58, %v5640_v37  ;;  %v12189_v18 = vpop.f32.mrf.mxu0  ;;  %6356 = vmatmul.bf16.gmra.mxu1 %v6080_v48  ;;  %v13046_v42 = vld [vmem:[#allocation31_spill] sm:$0xff]  ;;  %v13047_v53 = vld [vmem:[#allocation29_spill] sm:$0xff] }
 0xabf   : > { %vm5687_vm10 = vcmp.eq.f32.partialorder %v5686_v14, 8.507059e+37  ;;  %v12180_v28 = vadd.f32 1.0, %v7855_v26  ;;  %v5525_v9 = vsel %vm5522_vm6, %v5524_v62, %v5520_v36  ;;  %v5724_v16 = vsub.f32 1.0, %v5723_v44 }
 0xac0   : > { %v5690_v47 = vsel %vm5687_vm10, %v5689_v41, %v5685_v3  ;;  %v12182_v34 = vadd.f32 1.0, %v7857_v63  ;;  %v5604_v12 = vsub.f32 1.0, %v5603_v23  ;;  %v12184_v57 = vpop.eup %7858  ;;  %v5991_v13 = vmul.f32 %v12066_v10, %v13042_v27  ;;  %v4998_v26 = vpop.f32.mrf.mxu3 }
 0xac1   : > { %v7022_v19 = vmul.f32 -1.442695, %v12131_v25  ;;  %v5769_v15 = vsub.f32 1.0, %v5768_v52  ;;  %v12198_v39 = vmul.f32 %v12101_v50, %v13043_v45  ;;  %7862 = vpow2.f32 %v7019_v32 }
 0xac2   : > { %v7030_v59 = vmul.f32 -1.442695, %v13044_v11  ;;  %v5994_v10 = vmul.f32 %v5525_v9, %v13045_v7  ;;  %v6002_v35 = vmul.f32 %v5645_v30, %v13046_v42  ;;  %v6005_v14 = vmul.f32 %v5690_v47, %v13047_v53 }
 0xac3   : > { %7864 = vrcp.f32 %v12180_v28  ;;  %v7033_v54 = vmul.f32 -1.442695, %v13048_v2  ;;  %v5725_v48 = vmul.f32 %v12126_v21, %v5724_v16  ;;  %v5605_v32 = vmul.f32 %v12121_v31, %v5604_v12 }
 0xac4   : > { %v12206_v33 = vpop.eup %7860  ;;  %7866 = vrcp.f32 %v12182_v34  ;;  %v6042_v50 = vmul.f32 %v5994_v10, %v12042_v17  ;;  %v5770_v37 = vmul.f32 %v12134_v43, %v5769_v15  ;;  %v12213_v51 = vmul.f32 %v6002_v35, %v4996_v40  ;;  %v12256_v10 = vpop.f32.mrf.mxu2 }
 0xac5   : > { %7868 = vpow2.f32 %v7022_v19  ;;  %v12215_v44 = vmul.f32 %v6005_v14, %v4998_v26  ;;  %v5648_v36 = vmul.f32 %v12184_v57, %v12109_v20  ;;  %v5656_v23 = vand.u32 2147483647, %v12109_v20 }
 0xac6   : > { %7870 = vpow2.f32 %v7030_v59  ;;  %v6039_v63 = vmul.f32 %v5991_v13, %v11965_v24  ;;  %v5693_v17 = vmul.f32 %v12206_v33, %v12111_v22  ;;  %vm5728_vm11 = vweird.f32 %v12126_v21  ;;  %v12248_v59 = vpop.f32.mrf.mxu0 }
 0xac7   : > { %7872 = vpow2.f32 %v7033_v54  ;;  %v6086_v40 = vpack.c.bf16 %v12215_v44, %v12213_v51  ;;  %v7863_v58 = vpop.eup %7862  ;;  %v5726_v3 = vadd.f32 %v12126_v21, %v5725_v48  ;;  %v5606_v62 = vadd.f32 %v12121_v31, %v5605_v32 }
 0xac8   : > { %v6081_v52 = vpack.c.bf16 %v6042_v50, %v6039_v63  ;;  %vm5608_vm14 = vweird.f32 %v12121_v31  ;;  %vm5727_vm15 = vweird.f32 %v12054_v38  ;;  %v5771_v24 = vadd.f32 %v12134_v43, %v5770_v37  ;;  %v5001_v14 = vpop.f32.mrf.mxu3 }
 0xac9   : > { %v12229_v41 = vpop.eup %7864  ;;  %vm5773_vm0 = vweird.f32 %v12134_v43  ;;  %v5613_v30 = vand.u32 2147483648, %v13028_v49  ;;  %vm12237_vm2 = vmor %vm5727_vm15, %vm5728_vm11  ;;  %v5733_v16 = vand.u32 2147483648, %v12054_v38  ;;  %v5778_v12 = vand.u32 2147483648, %v12056_v0 }
 0xaca   : > { %v12235_v9 = vpop.eup %7866  ;;  %vm5607_vm1 = vweird.f32 %v13028_v49  ;;  %v5611_v27 = vand.u32 2147483647, %v13028_v49  ;;  %v5649_v19 = vsub.f32 1.0, %v5648_v36  ;;  %v5731_v15 = vand.u32 2147483647, %v12054_v38  ;;  %6405 = vmatmul.bf16.gmra.mxu3 %v6081_v52 }
 0xacb   : > { %v7869_v13 = vpop.eup %7868  ;;  %vm5772_vm3 = vweird.f32 %v12056_v0  ;;  %v5776_v45 = vand.u32 2147483647, %v12056_v0  ;;  %vm12252_vm4 = vmor %vm5607_vm1, %vm5608_vm14  ;;  %v5694_v49 = vsub.f32 1.0, %v5693_v17  ;;  %v12258_v35 = vadd.f32 1.0, %v7863_v58 }
 0xacc   : > { %v7871_v42 = vpop.eup %7870  ;;  %v5730_v38 = vsel %vm12237_vm2, %v12126_v21, %v5726_v3  ;;  %vm12265_vm7 = vmor %vm5772_vm3, %vm5773_vm0  ;;  %v5610_v53 = vsel %vm12252_vm4, %v12121_v31, %v5606_v62  ;;  %v5813_v21 = vmul.f32 %v12229_v41, %v12180_v28  ;;  %v5858_v50 = vmul.f32 %v12235_v9, %v12182_v34 }
 0xacd   : > { %v7873_v54 = vpop.eup %7872  ;;  %v5775_v48 = vsel %vm12265_vm7, %v12134_v43, %v5771_v24  ;;  %v5614_v32 = vor.u32 1.1754944e-38, %v5613_v30  ;;  %v5734_v26 = vor.u32 1.1754944e-38, %v5733_v16  ;;  %v12279_v37 = vadd.f32 1.0, %v7869_v13  ;;  %v13055_v16 = vld [vmem:[#allocation24_spill] sm:$0xff] }
 0xace   : > { %v5779_v36 = vor.u32 1.1754944e-38, %v5778_v12  ;;  %vm5612_vm5 = vcmp.eq.f32.partialorder %v5611_v27, 8.507059e+37  ;;  %vm5652_vm8 = vweird.f32 %v12109_v20  ;;  %vm5732_vm9 = vcmp.eq.f32.partialorder %v5731_v15, 8.507059e+37  ;;  %6361 = vmatmul.bf16.gmra.mxu1 %v6083_v1 }
 0xacf   : > { %vm5777_vm12 = vcmp.eq.f32.partialorder %v5776_v45, 8.507059e+37  ;;  %v12282_v31 = vadd.f32 1.0, %v7871_v42  ;;  %v5615_v63 = vsel %vm5612_vm5, %v5614_v32, %v5610_v53  ;;  %v5650_v43 = vmul.f32 %v12184_v57, %v5649_v19 }
 0xad0   : > { %v5735_v17 = vsel %vm5732_vm9, %v5734_v26, %v5730_v38  ;;  %v5780_v58 = vsel %vm5777_vm12, %v5779_v36, %v5775_v48  ;;  %v12285_v3 = vadd.f32 1.0, %v7873_v54  ;;  %v5658_v52 = vand.u32 2147483648, %v12109_v20  ;;  %v5003_v56 = vpop.f32.mrf.mxu3 }
 0xad1   : > { %7874 = vrcp.f32 %v12258_v35  ;;  %v5814_v62 = vsub.f32 1.0, %v5813_v21  ;;  %v5859_v24 = vsub.f32 1.0, %v5858_v50  ;;  %v5695_v30 = vmul.f32 %v12206_v33, %v5694_v49 }
 0xad2   : > { %7876 = vrcp.f32 %v12279_v37  ;;  %v7028_v47 = vmul.f32 -1.442695, %v12248_v59  ;;  %v6000_v12 = vmul.f32 %v5615_v63, %v13055_v16  ;;  %v6008_v27 = vmul.f32 %v5735_v17, %v11310_v46  ;;  %v12306_v46 = vpop.f32.mrf.mxu0 }
 0xad3   : > { %v6011_v13 = vmul.f32 %v5780_v58, %v11357_v5  ;;  %v7025_v19 = vmul.f32 -1.442695, %v12189_v18  ;;  %7878 = vrcp.f32 %v12282_v31  ;;  %v5651_v15 = vadd.f32 %v12184_v57, %v5650_v43  ;;  %v12308_v5 = vpop.f32.mrf.mxu2 }
 0xad4   : > { %vm5653_vm13 = vweird.f32 %v12184_v57  ;;  %7880 = vrcp.f32 %v12285_v3  ;;  %v6048_v55 = vmul.f32 %v6000_v12, %v12194_v61  ;;  %v5815_v1 = vmul.f32 %v12229_v41, %v5814_v62 }
 0xad5   : > { %v5860_v45 = vmul.f32 %v12235_v9, %v5859_v24  ;;  %v12310_v7 = vmul.f32 %v6008_v27, %v5001_v14  ;;  %v12312_v42 = vmul.f32 %v6011_v13, %v5003_v56  ;;  %v5696_v49 = vadd.f32 %v12206_v33, %v5695_v30  ;;  %vm12335_vm14 = vmor %vm5652_vm8, %vm5653_vm13 }
 0xad6   : > { %vm5698_vm6 = vweird.f32 %v12206_v33  ;;  %7882 = vpow2.f32 %v7028_v47  ;;  %v6045_v61 = vmul.f32 %v12198_v39, %v12117_v4  ;;  %vm12322_vm10 = vcmp.eq.f32.partialorder %v5656_v23, 8.507059e+37 }
 0xad7   : > { %v12318_v38 = vpop.eup %7874  ;;  %vm5697_vm11 = vweird.f32 %v12111_v22  ;;  %7884 = vpow2.f32 %v7025_v19  ;;  %v6089_v53 = vpack.c.bf16 %v12312_v42, %v12310_v7  ;;  %v5701_v39 = vand.u32 2147483647, %v12111_v22 }
 0xad8   : > { %v12329_v14 = vpop.eup %7876  ;;  %v5703_v23 = vand.u32 2147483648, %v12111_v22  ;;  %vm5818_vm15 = vweird.f32 %v12229_v41  ;;  %v6084_v54 = vpack.c.bf16 %v6048_v55, %v6045_v61  ;;  %v5655_v21 = vsel %vm12335_vm14, %v12184_v57, %v5651_v15  ;;  %vm12349_vm0 = vmor %vm5697_vm11, %vm5698_vm6  ;;  %v5006_v16 = vpop.f32.mrf.mxu3 }
 0xad9   : > { %v12342_v48 = vpop.eup %7878  ;;  %v5816_v50 = vadd.f32 %v12229_v41, %v5815_v1  ;;  %v5861_v32 = vadd.f32 %v12235_v9, %v5860_v45  ;;  %vm5863_vm2 = vweird.f32 %v12235_v9  ;;  %v5700_v26 = vsel %vm12349_vm0, %v12206_v33, %v5696_v49 }
 0xada   : > { %v12356_v22 = vpop.eup %7880  ;;  %vm5817_vm1 = vweird.f32 %v12180_v28  ;;  %v5823_v57 = vand.u32 2147483648, %v12180_v28  ;;  %v5868_v36 = vand.u32 2147483648, %v12182_v34  ;;  %v5738_v63 = vmul.f32 %v12318_v38, %v12258_v35  ;;  %6410 = vmatmul.bf16.gmra.mxu3 %v6084_v54 }
 0xadb   : > { %vm12366_vm3 = vmor %vm5817_vm1, %vm5818_vm15  ;;  %v5821_v17 = vand.u32 2147483647, %v12180_v28  ;;  %vm5862_vm4 = vweird.f32 %v12182_v34  ;;  %v5866_v58 = vand.u32 2147483647, %v12182_v34  ;;  %v5659_v62 = vor.u32 1.1754944e-38, %v5658_v52 }
 0xadc   : > { %v7883_v33 = vpop.eup %7882  ;;  %vm5702_vm7 = vcmp.eq.f32.partialorder %v5701_v39, 8.507059e+37  ;;  %v5704_v24 = vor.u32 1.1754944e-38, %v5703_v23  ;;  %v5783_v30 = vmul.f32 %v12329_v14, %v12279_v37  ;;  %vm12377_vm5 = vmor %vm5862_vm4, %vm5863_vm2  ;;  %v5820_v34 = vsel %vm12366_vm3, %v12229_v41, %v5816_v50  ;;  %v12395_v41 = vpop.f32.mrf.mxu0  ;;  %v13066_v23 = vld [vmem:[#allocation39_spill] sm:$0xff] }
 0xadd   : > { %v7885_v28 = vpop.eup %7884  ;;  %v5865_v52 = vsel %vm12377_vm5, %v12235_v9, %v5861_v32  ;;  %v5903_v12 = vmul.f32 %v12342_v48, %v12282_v31  ;;  %v5948_v27 = vmul.f32 %v12356_v22, %v12285_v3  ;;  %v5660_v13 = vsel %vm12322_vm10, %v5659_v62, %v5655_v21  ;;  %v12397_v9 = vpop.f32.mrf.mxu2 }
 0xade   : > { %v5705_v19 = vsel %vm5702_vm7, %v5704_v24, %v5700_v26  ;;  %v5824_v15 = vor.u32 1.1754944e-38, %v5823_v57  ;;  %v5869_v55 = vor.u32 1.1754944e-38, %v5868_v36  ;;  %v5739_v56 = vsub.f32 1.0, %v5738_v63  ;;  %6366 = vmatmul.bf16.gmra.mxu1 %v6086_v40 }
 0xadf   : > { %vm5822_vm8 = vcmp.eq.f32.partialorder %v5821_v17, 8.507059e+37  ;;  %v12393_v1 = vadd.f32 1.0, %v7883_v33  ;;  %vm5867_vm9 = vcmp.eq.f32.partialorder %v5866_v58, 8.507059e+37  ;;  %v5784_v45 = vsub.f32 1.0, %v5783_v30 }
 0xae0   : > { %v12399_v49 = vadd.f32 1.0, %v7885_v28  ;;  %v5825_v61 = vsel %vm5822_vm8, %v5824_v15, %v5820_v34  ;;  %v5870_v4 = vsel %vm5867_vm9, %v5869_v55, %v5865_v52  ;;  %v5904_v39 = vsub.f32 1.0, %v5903_v12  ;;  %v5008_v44 = vpop.f32.mrf.mxu3 }
 0xae1   : > { %v5949_v0 = vsub.f32 1.0, %v5948_v27  ;;  %v6003_v54 = vmul.f32 %v5660_v13, %v13066_v23  ;;  %v6006_v21 = vmul.f32 %v5705_v19, %v11875_v29  ;;  %vm5742_vm12 = vweird.f32 %v12258_v35 }
 0xae2   : > { %v7034_v20 = vmul.f32 -1.442695, %v12395_v41  ;;  %v5740_v50 = vmul.f32 %v12318_v38, %v5739_v56  ;;  %v6014_v32 = vmul.f32 %v5825_v61, %v13029_v8  ;;  %7886 = vrcp.f32 %v12393_v1 }
 0xae3   : > { %v6017_v26 = vmul.f32 %v5870_v4, %v13033_v60  ;;  %v5785_v57 = vmul.f32 %v12329_v14, %v5784_v45  ;;  %7888 = vrcp.f32 %v12399_v49  ;;  %v7031_v51 = vmul.f32 -1.442695, %v12306_v46 }
 0xae4   : > { %v6054_v29 = vmul.f32 %v6006_v21, %v12308_v5  ;;  %v5905_v40 = vmul.f32 %v12342_v48, %v5904_v39  ;;  %v5950_v36 = vmul.f32 %v12356_v22, %v5949_v0  ;;  %v12418_v63 = vmul.f32 %v6014_v32, %v5006_v16 }
 0xae5   : > { %v12420_v8 = vmul.f32 %v6017_v26, %v5008_v44  ;;  %vm5743_vm13 = vweird.f32 %v12318_v38  ;;  %v5748_v60 = vand.u32 2147483648, %v12258_v35  ;;  %7890 = vpow2.f32 %v7034_v20  ;;  %v5052_v16 = vpop.f32.mrf.mxu2 }
 0xae6   : > { %v6051_v43 = vmul.f32 %v6003_v54, %v12256_v10  ;;  %v5741_v17 = vadd.f32 %v12318_v38, %v5740_v50  ;;  %vm5787_vm6 = vweird.f32 %v12279_v37  ;;  %vm5788_vm10 = vweird.f32 %v12329_v14  ;;  %vm12436_vm14 = vmor %vm5742_vm12, %vm5743_vm13 }
 0xae7   : > { %v6092_v5 = vpack.c.bf16 %v12420_v8, %v12418_v63  ;;  %v5786_v58 = vadd.f32 %v12329_v14, %v5785_v57  ;;  %7892 = vpow2.f32 %v7031_v51  ;;  %vm5908_vm11 = vweird.f32 %v12342_v48  ;;  %vm12448_vm0 = vmor %vm5787_vm6, %vm5788_vm10 }
 0xae8   : > { %v6087_v33 = vpack.c.bf16 %v6054_v29, %v6051_v43  ;;  %v12432_v62 = vpop.eup %7886  ;;  %v5793_v24 = vand.u32 2147483648, %v12279_v37  ;;  %v5906_v30 = vadd.f32 %v12342_v48, %v5905_v40  ;;  %v5951_v47 = vadd.f32 %v12356_v22, %v5950_v36 }
 0xae9   : > { %vm5953_vm15 = vweird.f32 %v12356_v22  ;;  %v12444_v28 = vpop.eup %7888  ;;  %v5791_v52 = vand.u32 2147483647, %v12279_v37  ;;  %vm5907_vm2 = vweird.f32 %v12282_v31  ;;  %v5913_v12 = vand.u32 2147483648, %v12282_v31 }
 0xaea   : > { %v5958_v27 = vand.u32 2147483648, %v12285_v3  ;;  %vm12458_vm1 = vmor %vm5907_vm2, %vm5908_vm11  ;;  %v5911_v19 = vand.u32 2147483647, %v12282_v31  ;;  %vm5952_vm3 = vweird.f32 %v12285_v3  ;;  %v5956_v15 = vand.u32 2147483647, %v12285_v3  ;;  %6415 = vmatmul.bf16.gmra.mxu3 %v6087_v33  ;;  %v5011_v31 = vpop.f32.mrf.mxu3 }
 0xaeb   : > { %v7891_v55 = vpop.eup %7890  ;;  %v5746_v37 = vand.u32 2147483647, %v12258_v35  ;;  %v5749_v56 = vor.u32 1.1754944e-38, %v5748_v60  ;;  %v5790_v45 = vsel %vm12448_vm0, %v12329_v14, %v5786_v58  ;;  %v5873_v61 = vmul.f32 %v12432_v62, %v12393_v1  ;;  %vm12473_vm4 = vmor %vm5952_vm3, %vm5953_vm15 }
 0xaec   : > { %v5745_v35 = vsel %vm12436_vm14, %v12318_v38, %v5741_v17  ;;  %v5794_v3 = vor.u32 1.1754944e-38, %v5793_v24  ;;  %v5910_v14 = vsel %vm12458_vm1, %v12342_v48, %v5906_v30  ;;  %v5955_v39 = vsel %vm12473_vm4, %v12356_v22, %v5951_v47 }
 0xaed   : > { %v7893_v0 = vpop.eup %7892  ;;  %vm5792_vm7 = vcmp.eq.f32.partialorder %v5791_v52, 8.507059e+37  ;;  %v5828_v23 = vmul.f32 %v12444_v28, %v12399_v49  ;;  %v5914_v54 = vor.u32 1.1754944e-38, %v5913_v12  ;;  %v5959_v21 = vor.u32 1.1754944e-38, %v5958_v27  ;;  %v5055_v40 = vpop.f32.mrf.mxu2 }
 0xaee   : > { %v5795_v20 = vsel %vm5792_vm7, %v5794_v3, %v5790_v45  ;;  %vm5912_vm5 = vcmp.eq.f32.partialorder %v5911_v19, 8.507059e+37  ;;  %v12488_v50 = vadd.f32 1.0, %v7891_v55  ;;  %vm5957_vm8 = vcmp.eq.f32.partialorder %v5956_v15, 8.507059e+37  ;;  %6371 = vmatmul.bf16.gmra.mxu1 %v6089_v53 }
 0xaef   : > { %vm5747_vm9 = vcmp.eq.f32.partialorder %v5746_v37, 8.507059e+37  ;;  %v5874_v38 = vsub.f32 1.0, %v5873_v61  ;;  %v5915_v32 = vsel %vm5912_vm5, %v5914_v54, %v5910_v14  ;;  %v5960_v48 = vsel %vm5957_vm8, %v5959_v21, %v5955_v39  ;;  %v6298_v21 = vpop.f32.mrf.mxu0 }
 0xaf0   : > { %v5750_v26 = vsel %vm5747_vm9, %v5749_v56, %v5745_v35  ;;  %v12490_v57 = vadd.f32 1.0, %v7893_v0  ;;  %v6012_v22 = vmul.f32 %v5795_v20, %v12131_v25  ;;  %v5829_v51 = vsub.f32 1.0, %v5828_v23 }
 0xaf1   : > { %v6020_v29 = vmul.f32 %v5915_v32, %v13044_v11  ;;  %7894 = vrcp.f32 %v12488_v50  ;;  %v6023_v44 = vmul.f32 %v5960_v48, %v13048_v2  ;;  %v6009_v36 = vmul.f32 %v5750_v26, %v12051_v6 }
 0xaf2   : > { %v5875_v60 = vmul.f32 %v12432_v62, %v5874_v38  ;;  %v6060_v43 = vmul.f32 %v6012_v22, %v5052_v16  ;;  %v5013_v17 = vpop.f32.mrf.mxu3  ;;  %7896 = vrcp.f32 %v12490_v57  ;;  %v5830_v25 = vmul.f32 %v12444_v28, %v5829_v51 }
 0xaf3   : > { %v12502_v7 = vmul.f32 %v6020_v29, %v5011_v31  ;;  %v12504_v42 = vmul.f32 %v6023_v44, %v5013_v17  ;;  %v6057_v11 = vmul.f32 %v6009_v36, %v12397_v9  ;;  %vm5878_vm12 = vweird.f32 %v12432_v62  ;;  %v13075_v17 = vld [vmem:[#allocation47_spill] sm:$0xff] }
 0xaf4   : > { %v5876_v53 = vadd.f32 %v12432_v62, %v5875_v60  ;;  %v5883_v33 = vand.u32 2147483648, %v12393_v1  ;;  %v5831_v10 = vadd.f32 %v12444_v28, %v5830_v25  ;;  %vm5833_vm13 = vweird.f32 %v12444_v28 }
 0xaf5   : > { %v6095_v2 = vpack.c.bf16 %v12504_v42, %v12502_v7  ;;  %v6090_v6 = vpack.c.bf16 %v6060_v43, %v6057_v11  ;;  %vm5877_vm6 = vweird.f32 %v12393_v1  ;;  %v5881_v24 = vand.u32 2147483647, %v12393_v1  ;;  %v5057_v12 = vpop.f32.mrf.mxu2 }
 0xaf6   : > { %v5838_v30 = vand.u32 2147483648, %v12399_v49  ;;  %vm5879_vm10 = vmor %vm5877_vm6, %vm5878_vm12  ;;  %vm5832_vm11 = vweird.f32 %v12399_v49  ;;  %v5836_v47 = vand.u32 2147483647, %v12399_v49  ;;  %v5884_v52 = vor.u32 1.1754944e-38, %v5883_v33 }
 0xaf7   : > { %v7895_v58 = vpop.eup %7894  ;;  %v5880_v16 = vsel %vm5879_vm10, %v12432_v62, %v5876_v53  ;;  %vm5834_vm14 = vmor %vm5832_vm11, %vm5833_vm13  ;;  %vm5882_vm15 = vcmp.eq.f32.partialorder %v5881_v24, 8.507059e+37  ;;  %v5973_v3 = vand.u32 2147483648, %v12488_v50  ;;  %vm5967_vm3 = vweird.f32 %v12488_v50  ;;  %v13077_v24 = vld [vmem:[#allocation41_spill] sm:$0xff] }
 0xaf8   : > { %v7897_v9 = vpop.eup %7896  ;;  %v5963_v34 = vmul.f32 %v7895_v58, %v12488_v50  ;;  %v5835_v27 = vsel %vm5834_vm14, %v12444_v28, %v5831_v10  ;;  %v5839_v13 = vor.u32 1.1754944e-38, %v5838_v30  ;;  %v5885_v19 = vsel %vm5882_vm15, %v5884_v52, %v5880_v16 }
 0xaf9   : > { %v5918_v1 = vmul.f32 %v7897_v9, %v12490_v57  ;;  %vm5837_vm0 = vcmp.eq.f32.partialorder %v5836_v47, 8.507059e+37  ;;  %v6018_v49 = vmul.f32 %v5885_v19, %v12248_v59  ;;  %vm5968_vm2 = vweird.f32 %v7895_v58 }
 0xafa   : > { %6420 = vmatmul.bf16.gmra.mxu3 %v6090_v6  ;;  %v5964_v15 = vsub.f32 1.0, %v5963_v34  ;;  %v5840_v55 = vsel %vm5837_vm0, %v5839_v13, %v5835_v27  ;;  %vm5923_vm1 = vweird.f32 %v7897_v9  ;;  %v5971_v63 = vand.u32 2147483647, %v12488_v50  ;;  %vm5969_vm4 = vmor %vm5967_vm3, %vm5968_vm2 }
 0xafb   : > { %v5919_v62 = vsub.f32 1.0, %v5918_v1  ;;  %v6015_v37 = vmul.f32 %v5840_v55, %v12189_v18  ;;  %v6066_v45 = vmul.f32 %v6018_v49, %v5057_v12  ;;  %v5928_v59 = vand.u32 2147483648, %v12490_v57  ;;  %v13078_v12 = vld [vmem:[#allocation56_spill] sm:$0xff]  ;;  %v13079_v49 = vld [vmem:[#allocation50_spill] sm:$0xff] }
 0xafc   : > { %v5965_v56 = vmul.f32 %v7895_v58, %v5964_v15  ;;  %vm5922_vm7 = vweird.f32 %v12490_v57  ;;  %v5926_v18 = vand.u32 2147483647, %v12490_v57  ;;  %vm5972_vm8 = vcmp.eq.f32.partialorder %v5971_v63, 8.507059e+37  ;;  %v6300_v57 = vpop.f32.mrf.mxu0 }
 0xafd   : > { %v5920_v28 = vmul.f32 %v7897_v9, %v5919_v62  ;;  %v6063_v61 = vmul.f32 %v6015_v37, %v5055_v40  ;;  %v5060_v4 = vpop.f32.mrf.mxu2  ;;  %vm5924_vm5 = vmor %vm5922_vm7, %vm5923_vm1  ;;  %v5929_v0 = vor.u32 1.1754944e-38, %v5928_v59 }
 0xafe   : > { %6376 = vmatmul.bf16.gmra.mxu1 %v6092_v5  ;;  %v5966_v31 = vadd.f32 %v7895_v58, %v5965_v56  ;;  %v5974_v5 = vor.u32 1.1754944e-38, %v5973_v3  ;;  %vm5927_vm9 = vcmp.eq.f32.partialorder %v5926_v18, 8.507059e+37  ;;  %v13081_v18 = vld [vmem:[#allocation36_spill] sm:$0xff] }
 0xaff   : > { %v6093_v35 = vpack.c.bf16 %v6066_v45, %v6063_v61  ;;  %v5921_v14 = vadd.f32 %v7897_v9, %v5920_v28 }
 0xb00   : > { %v5970_v8 = vsel %vm5969_vm4, %v7895_v58, %v5966_v31 }
 0xb01   : > { %v5925_v39 = vsel %vm5924_vm5, %v7897_v9, %v5921_v14  ;;  %v5975_v23 = vsel %vm5972_vm8, %v5974_v5, %v5970_v8 }
 0xb02   : > { %v5930_v54 = vsel %vm5927_vm9, %v5929_v0, %v5925_v39  ;;  %v6024_v50 = vmul.f32 %v5975_v23, %v12395_v41 }
 0xb03   : > { %v6021_v38 = vmul.f32 %v5930_v54, %v12306_v46  ;;  %v13082_v54 = vld [vmem:[#allocation34_spill] sm:$0xff] }
 0xb04   : > { %v6303_v51 = vpop.f32.mrf.mxu0 }
 0xb05   : > { %v5062_v20 = vpop.f32.mrf.mxu2  ;;  %v6069_v48 = vmul.f32 %v6021_v38, %v5060_v4  ;;  %v13080_v4 = vld [vmem:[#allocation44_spill] sm:$0xff] }
 0xb06   : > { %v6072_v32 = vmul.f32 %v6024_v50, %v5062_v20 }
 0xb08   : > { %v6096_v26 = vpack.c.bf16 %v6072_v32, %v6069_v48 }
 0xb0a   : > { %6425 = vmatmul.bf16.gmra.mxu3 %v6093_v35 }
 0xb0c   : > { %v6305_v36 = vpop.f32.mrf.mxu0 }
 0xb0e   : > { %6381 = vmatmul.bf16.gmra.mxu1 %v6095_v2  ;;  %v13076_v2 = vld [vmem:[#allocation52_spill] sm:$0xff] }
 0xb14   : > { %v6308_v11 = vpop.f32.mrf.mxu0 }
 0xb1a   : > { %6430 = vmatmul.bf16.gmra.mxu3 %v6096_v26  ;;  %v13083_v26 = vld [vmem:[#allocation54_spill] sm:$0xff] }
 0xb1b   : > { %v6347_v22 = vpop.f32.mrf.mxu1 }
 0xb1c   : > { %v6348_v44 = vadd.f32 %v6347_v22, %v6298_v21  ;;  %v6310_v30 = vpop.f32.mrf.mxu0 }
 0xb23   : > { %v6349_v29 = vpop.f32.mrf.mxu1 }
 0xb24   : > { %v6350_v46 = vadd.f32 %v6349_v29, %v6300_v57  ;;  %v6313_v1 = vpop.f32.mrf.mxu0 }
 0xb2b   : > { %v6352_v40 = vpop.f32.mrf.mxu1 }
 0xb2c   : > { %v6353_v6 = vadd.f32 %v6352_v40, %v6303_v51  ;;  %v6315_v45 = vpop.f32.mrf.mxu0  ;;  %v13084_v40 = vld [vmem:[#allocation51_spill] sm:$0xff] }
 0xb2d   : > { %v6396_v60 = vpop.f32.mrf.mxu3 }
 0xb2e   : > { %v6397_v43 = vadd.f32 %v6396_v60, %v6348_v44 }
 0xb30   : > { %v6436_v7 = vadd.f32 %v6397_v43, %v13075_v17 }
 0xb32   : > { %6452 = vst [vmem:[%s12540_s14] sm:$0xff] %v6436_v7 }
 0xb33   : > { %v6354_v41 = vpop.f32.mrf.mxu1 }
 0xb34   : > { %v6355_v47 = vadd.f32 %v6354_v41, %v6305_v36  ;;  %v6318_v59 = vpop.f32.mrf.mxu0  ;;  %v13085_v41 = vld [vmem:[#allocation45_spill] sm:$0xff] }
 0xb35   : > { %v6398_v42 = vpop.f32.mrf.mxu3 }
 0xb36   : > { %v6399_v25 = vadd.f32 %v6398_v42, %v6350_v46 }
 0xb38   : > { %v6437_v53 = vadd.f32 %v6399_v25, %v13076_v2 }
 0xb3a   : > { %6453 = vst [vmem:[%s12540_s14 + $0x8] sm:$0xff] %v6437_v53 }
 0xb3b   : > { %v6357_v58 = vpop.f32.mrf.mxu1 }
 0xb3c   : > { %v6358_v13 = vadd.f32 %v6357_v58, %v6308_v11  ;;  %v6320_v20 = vpop.f32.mrf.mxu0  ;;  %v13086_v58 = vld [vmem:[#allocation57_spill] sm:$0xff] }
 0xb3d   : > { %v6401_v33 = vpop.f32.mrf.mxu3 }
 0xb3e   : > { %v6402_v10 = vadd.f32 %v6401_v33, %v6353_v6 }
 0xb40   : > { %v6438_v9 = vadd.f32 %v6402_v10, %v13077_v24 }
 0xb42   : > { %6454 = vst [vmem:[%s12540_s14 + $0x10] sm:$0xff] %v6438_v9 }
 0xb43   : > { %v6359_v16 = vpop.f32.mrf.mxu1 }
 0xb44   : > { %v6360_v37 = vadd.f32 %v6359_v16, %v6310_v30  ;;  %v6323_v22 = vpop.f32.mrf.mxu0  ;;  %v13087_v16 = vld [vmem:[#allocation53_spill] sm:$0xff] }
 0xb45   : > { %v6403_v34 = vpop.f32.mrf.mxu3 }
 0xb46   : > { %v6404_v52 = vadd.f32 %v6403_v34, %v6355_v47 }
 0xb48   : > { %v6439_v27 = vadd.f32 %v6404_v52, %v13078_v12 }
 0xb4a   : > { %6455 = vst [vmem:[%s12540_s14 + $0x18] sm:$0xff] %v6439_v27 }
 0xb4b   : > { %v6362_v19 = vpop.f32.mrf.mxu1 }
 0xb4c   : > { %v6363_v35 = vadd.f32 %v6362_v19, %v6313_v1  ;;  %v6325_v17 = vpop.f32.mrf.mxu0 }
 0xb4d   : > { %v6406_v15 = vpop.f32.mrf.mxu3 }
 0xb4e   : > { %v6407_v55 = vadd.f32 %v6406_v15, %v6358_v13  ;;  %v13088_v13 = vld [vmem:[#allocation46_spill] sm:$0xff] }
 0xb50   : > { %v6440_v62 = vadd.f32 %v6407_v55, %v13079_v49 }
 0xb52   : > { %6456 = vst [vmem:[%s12540_s14 + $0x20] sm:$0xff] %v6440_v62 }
 0xb53   : > { %v6364_v56 = vpop.f32.mrf.mxu1 }
 0xb54   : > { %v6365_v5 = vadd.f32 %v6364_v56, %v6315_v45  ;;  %v6328_v2 = vpop.f32.mrf.mxu0 }
 0xb55   : > { %v6408_v28 = vpop.f32.mrf.mxu3 }
 0xb56   : > { %v6409_v61 = vadd.f32 %v6408_v28, %v6360_v37  ;;  %v13089_v37 = vld [vmem:[#allocation40_spill] sm:$0xff] }
 0xb58   : > { %v6441_v31 = vadd.f32 %v6409_v61, %v13080_v4 }
 0xb5a   : > { %6457 = vst [vmem:[%s12540_s14 + $0x28] sm:$0xff] %v6441_v31 }
 0xb5b   : > { %v6367_v3 = vpop.f32.mrf.mxu1 }
 0xb5c   : > { %v6368_v50 = vadd.f32 %v6367_v3, %v6318_v59  ;;  %v6330_v47 = vpop.f32.mrf.mxu0 }
 0xb5d   : > { %v6411_v14 = vpop.f32.mrf.mxu3 }
 0xb5e   : > { %v6412_v63 = vadd.f32 %v6411_v14, %v6363_v35  ;;  %v13090_v35 = vld [vmem:[#allocation38_spill] sm:$0xff] }
 0xb60   : > { %v6442_v8 = vadd.f32 %v6412_v63, %v13081_v18 }
 0xb62   : > { %6458 = vst [vmem:[%s12540_s14 + $0x30] sm:$0xff] %v6442_v8 }
 0xb63   : > { %v6369_v0 = vpop.f32.mrf.mxu1 }
 0xb64   : > { %v6370_v51 = vadd.f32 %v6369_v0, %v6320_v20  ;;  %v6333_v15 = vpop.f32.mrf.mxu0 }
 0xb65   : > { %v6413_v39 = vpop.f32.mrf.mxu3 }
 0xb66   : > { %v6414_v23 = vadd.f32 %v6413_v39, %v6365_v5 }
 0xb68   : > { %v6443_v21 = vadd.f32 %v6414_v23, %v13082_v54 }
 0xb6a   : > { %6459 = vst [vmem:[%s12540_s14 + $0x38] sm:$0xff] %v6443_v21 }
 0xb6b   : > { %v6372_v48 = vpop.f32.mrf.mxu1 }
 0xb6c   : > { %v6373_v43 = vadd.f32 %v6372_v48, %v6323_v22  ;;  %v6335_v28 = vpop.f32.mrf.mxu0 }
 0xb6d   : > { %v6416_v38 = vpop.f32.mrf.mxu3 }
 0xb6e   : > { %v6417_v32 = vadd.f32 %v6416_v38, %v6368_v50 }
 0xb70   : > { %v6444_v57 = vadd.f32 %v6417_v32, %v13083_v26 }
 0xb72   : > { %6460 = vst [vmem:[%s12540_s14 + $0x40] sm:$0xff] %v6444_v57 }
 0xb73   : > { %v6374_v60 = vpop.f32.mrf.mxu1 }
 0xb74   : > { %v6375_v11 = vadd.f32 %v6374_v60, %v6325_v17 }
 0xb75   : > { %v6418_v29 = vpop.f32.mrf.mxu3 }
 0xb76   : > { %v6419_v44 = vadd.f32 %v6418_v29, %v6370_v51 }
 0xb78   : > { %v6445_v36 = vadd.f32 %v6419_v44, %v13084_v40 }
 0xb7a   : > { %6461 = vst [vmem:[%s12540_s14 + $0x48] sm:$0xff] %v6445_v36 }
 0xb7b   : > { %v6377_v25 = vpop.f32.mrf.mxu1 }
 0xb7c   : > { %v6378_v10 = vadd.f32 %v6377_v25, %v6328_v2 }
 0xb7d   : > { %v6421_v7 = vpop.f32.mrf.mxu3 }
 0xb7e   : > { %v6422_v46 = vadd.f32 %v6421_v7, %v6373_v43 }
 0xb80   : > { %v6446_v42 = vadd.f32 %v6422_v46, %v13085_v41 }
 0xb82   : > { %6462 = vst [vmem:[%s12540_s14 + $0x50] sm:$0xff] %v6446_v42 }
 0xb83   : > { %v6379_v9 = vpop.f32.mrf.mxu1 }
 0xb84   : > { %v6380_v52 = vadd.f32 %v6379_v9, %v6330_v47 }
 0xb85   : > { %v6423_v53 = vpop.f32.mrf.mxu3 }
 0xb86   : > { %v6424_v6 = vadd.f32 %v6423_v53, %v6375_v11 }
 0xb88   : > { %v6447_v33 = vadd.f32 %v6424_v6, %v13086_v58 }
 0xb8a   : > { %6463 = vst [vmem:[%s12540_s14 + $0x58] sm:$0xff] %v6447_v33 }
 0xb8b   : > { %v6382_v1 = vpop.f32.mrf.mxu1 }
 0xb8c   : > { %v6383_v55 = vadd.f32 %v6382_v1, %v6333_v15 }
 0xb8d   : > { %v6426_v24 = vpop.f32.mrf.mxu3 }
 0xb8e   : > { %v6427_v30 = vadd.f32 %v6426_v24, %v6378_v10 }
 0xb90   : > { %v6448_v34 = vadd.f32 %v6427_v30, %v13087_v16 }
 0xb92   : > { %6464 = vst [vmem:[%s12540_s14 + $0x60] sm:$0xff] %v6448_v34 }
 0xb93   : > { %v6384_v45 = vpop.f32.mrf.mxu1 }
 0xb94   : > { %v6385_v61 = vadd.f32 %v6384_v45, %v6335_v28 }
 0xb95   : > { %v6428_v12 = vpop.f32.mrf.mxu3 }
 0xb96   : > { %v6429_v27 = vadd.f32 %v6428_v12, %v6380_v52 }
 0xb98   : > { %v6449_v19 = vadd.f32 %v6429_v27, %v13088_v13 }
 0xb9a   : > { %6465 = vst [vmem:[%s12540_s14 + $0x68] sm:$0xff] %v6449_v19 }
 0xb9d   : > { %v6431_v49 = vpop.f32.mrf.mxu3 }
 0xb9e   : > { %v6432_v62 = vadd.f32 %v6431_v49, %v6383_v55 }
 0xba0   : > { %v6450_v56 = vadd.f32 %v6432_v62, %v13089_v37 }
 0xba2   : > { %6466 = vst [vmem:[%s12540_s14 + $0x70] sm:$0xff] %v6450_v56 }
 0xba5   : > { %v6433_v4 = vpop.f32.mrf.mxu3 }
 0xba6   : > { %v6434_v31 = vadd.f32 %v6433_v4, %v6385_v61 }
 0xba8   : > { %v6451_v3 = vadd.f32 %v6434_v31, %v13090_v35 }
 0xbaa   : > { %6467 = vst [vmem:[%s12540_s14 + $0x78] sm:$0xff] %v6451_v3 }
 0xbab   : > { %8151 = shalt.err (!%p8148_p9)
}
 0xbac   : > { %s8225_s27 = smov 128   ;;  %s8226_s24 = smov 8  }
 0xbad   : > { %7284 = dma.vmem_to_hbm [thread:$0]  (%p8377_p4), %s6482_s18, 2048, %s6484_s17, %s6469_s16, %s8225_s27, %s8225_s27, %s8226_s24  }
 0xbae PF: > { %s6498_s14 = sand.u32 1, %s8190_s30   ;;  %p13091_p10 = scmp.ge.s32.totalorder %s8202_s12, 2 }
 0xbaf   : > { %s6499_s1 = scalar_lea.sflag [#allocation4], %s6498_s14 }
 0xbb0   : > { %p7310_p13 = pnand %p13091_p10, %p8381_p6 }
 0xbb2   : > { %p7311_p11 = pneg %p7310_p13 }
 0xbb4   : > { %8185 = dma.done.wait (%p7311_p11), %s6499_s1, 2048  }
 0xbb5   : > { %8187 = vsyncadd (%p7311_p11), %s6499_s1, 4294965248  ;;  %p25_p0 = scmp.ge.s32.totalorder %s8351_s19, 4   ;;  %s13092_s30 = smov %s8194_s10 }
 0xbb6   : > { %s13093_s10 = smov %s8198_s11  ;;  %s13094_s11 = smov %s8362_s13 }
 0xbb7   : > { %s13095_s12 = smov %s8351_s19  ;;  %27 = sbr.rel (!%p25_p0) target bundleno = 13 (0xd), region = 125 }
 0xbbc   :  { %6505 = vsyncpa [#allocation3], 1 }
 0xbbd   :  { %6507 = vsyncpa [#allocation3 + $0x1], 1 }
 0xbbe   :  { %6508 = vsyncpa [#allocation6], 1 }
 0xbbf   :  { %6509 = vsyncpa [#allocation9], 1 }
 0xbc0   :  { %6510 = vsyncpa [#allocation12], 1 }
 0xbc1   :  { %6511 = vsyncpa [#allocation4], 1 }
 0xbc2   :  { %6513 = vsyncpa [#allocation4 + $0x1], 1 }

</bundles_post_ra>
